<compile_context>
chip_gen: v5e
topology: v5e:2x2
jax: 0.10.0
libtpu: 0.0.40
codegen_flags: <defaults>
</compile_context>

<pallas_src>
import math

import numpy as np
import jax
import jax.numpy as jnp
from jax import lax
from jax.experimental import pallas as pl
from jax.experimental.pallas import tpu as pltpu

NEG_SLOPE = 0.2          # ModelArch default neg_slop
PLANE_NUM = 3
CONV_DIMS = [(1, 4), (4, 8), (8, 16), (16, 32), (32, 64)]


def _leaky(x):
    return jnp.where(x >= 0, x, NEG_SLOPE * x)


# ----------------------------- Pallas kernels -----------------------------

def make_stage_kernel(H, Hp, Do, WoCout):
    """Fused Conv3d(3,1,1) + bias + MaxPool(depth,width) + LeakyReLU for one stage.

    a_ref : [1, Dp*Hp, Wp*Cin]    zero-padded activation of one batch element
    bw_ref: [9, Wp*Cin, 2*WoCout] banded conv weight, tap index t = kd*3 + kh
    bt_ref: [1, WoCout]           bias tiled over pooled width
    o_ref : [1, Do*H, WoCout]     depth+width pooled, LeakyReLU'd conv output
                                  (height pool is finished by the cheap XLA glue)
    """
    WC2 = 2 * WoCout

    def kernel(a_ref, bw_ref, bt_ref, o_ref):

        def conv_plane(d):
            # conv output plane at depth d: [H, W*Cout], columns ordered (w%2, w//2, cout)
            acc = jnp.zeros((H, WC2), jnp.float32)
            for kd in range(3):
                for kh in range(3):
                    lhs = a_ref[0, pl.ds((d + kd) * Hp + kh, H), :]
                    acc = acc + jnp.dot(lhs, bw_ref[kd * 3 + kh],
                                        preferred_element_type=jnp.float32)
            return acc

        def body(do, carry):
            yd = jnp.maximum(conv_plane(2 * do), conv_plane(2 * do + 1))  # depth pool
            yw = jnp.maximum(yd[:, :WoCout], yd[:, WoCout:])              # width pool
            z = _leaky(yw + bt_ref[...])                                  # bias + LeakyReLU
            o_ref[0, pl.ds(pl.multiple_of(do * H, H), H), :] = z
            return carry

        lax.fori_loop(0, Do, body, 0)

    return kernel


def make_final_kernel(Hp, WoCout):
    """Last conv stage (spatial 2 -> 1) fully fused with the three plane-MLP heads.

    a_ref : [1, Dp*Hp, Wp*Cin]   (= [1, 16, 128] for 32^3 inputs)
    bw_ref: [9, Wp*Cin, 2*WoCout]
    bt_ref: [1, WoCout]
    w*/b* : stacked per-plane Linear params ([3, in, out] / [3, 1, out])
    o_ref : [1, PLANE_NUM, 4]    L2-normalized plane parameters for this batch element
    """
    H = 2
    WC2 = 2 * WoCout

    def kernel(a_ref, bw_ref, bt_ref, w1_ref, b1_ref, w2_ref, b2_ref,
               w3_ref, b3_ref, o_ref):

        def conv_plane(d):
            acc = jnp.zeros((H, WC2), jnp.float32)
            for kd in range(3):
                for kh in range(3):
                    lhs = a_ref[0, pl.ds((d + kd) * Hp + kh, H), :]
                    acc = acc + jnp.dot(lhs, bw_ref[kd * 3 + kh],
                                        preferred_element_type=jnp.float32)
            return acc

        yd = jnp.maximum(conv_plane(0), conv_plane(1))     # depth pool
        yw = jnp.maximum(yd[:, :WoCout], yd[:, WoCout:])   # width pool
        yh = jnp.max(yw, axis=0, keepdims=True)            # height pool -> [1, 64]
        emb = _leaky(yh + bt_ref[...])                     # embedding (64 channels)

        for p in range(PLANE_NUM):
            t = _leaky(jnp.dot(emb, w1_ref[p], preferred_element_type=jnp.float32)
                       + b1_ref[p])
            t = _leaky(jnp.dot(t, w2_ref[p], preferred_element_type=jnp.float32)
                       + b2_ref[p])
            y = jnp.dot(t, w3_ref[p], preferred_element_type=jnp.float32) + b3_ref[p]
            nrm = jnp.sqrt(jnp.sum(y * y, axis=1, keepdims=True))
            o_ref[:, p, :] = y / jnp.maximum(nrm, 1e-12)   # F.normalize(p=2, dim=1)

    return kernel


# ----------------------------- pallas_call wrappers -----------------------------

def conv_pool_stage(a_pad, bw, bt, *, H, Hp, Do, WoCout):
    B, DpHp, WpCin = a_pad.shape
    kernel = make_stage_kernel(H, Hp, Do, WoCout)
    return pl.pallas_call(
        kernel,
        out_shape=jax.ShapeDtypeStruct((B, Do * H, WoCout), jnp.float32),
        grid=(B,),
        in_specs=[
            pl.BlockSpec((1, DpHp, WpCin), lambda b: (b, 0, 0)),
            pl.BlockSpec((9, WpCin, 2 * WoCout), lambda b: (0, 0, 0)),
            pl.BlockSpec((1, WoCout), lambda b: (0, 0)),
        ],
        out_specs=pl.BlockSpec((1, Do * H, WoCout), lambda b: (b, 0, 0)),
        compiler_params=pltpu.CompilerParams(dimension_semantics=("parallel",)),
    )(a_pad, bw, bt)


def final_stage_and_heads(a_pad, bw, bt, fnn, *, Hp, WoCout):
    B, DpHp, WpCin = a_pad.shape
    kernel = make_final_kernel(Hp, WoCout)
    w1, b1 = fnn["w1"], fnn["b1"]
    w2, b2 = fnn["w2"], fnn["b2"]
    w3, b3 = fnn["w3"], fnn["b3"]

    def full(arr):
        n = arr.ndim
        return pl.BlockSpec(arr.shape, lambda b: (0,) * n)

    return pl.pallas_call(
        kernel,
        out_shape=jax.ShapeDtypeStruct((B, PLANE_NUM, w3.shape[2]), jnp.float32),
        grid=(B,),
        in_specs=[
            pl.BlockSpec((1, DpHp, WpCin), lambda b: (b, 0, 0)),
            full(bw), full(bt),
            full(w1), full(b1), full(w2), full(b2), full(w3), full(b3),
        ],
        out_specs=pl.BlockSpec((1, PLANE_NUM, w3.shape[2]), lambda b: (b, 0, 0)),
        compiler_params=pltpu.CompilerParams(dimension_semantics=("parallel",)),
    )(a_pad, bw, bt, w1, b1, w2, b2, w3, b3)


# ----------------------------- tiny XLA glue -----------------------------

def _pool_h_and_pad(y, Do, H, Cout):
    """Finish the height half of MaxPool3d(2), then zero-pad (conv padding=1) and flatten
    to the next stage's [B, Dp*Hp, Wp*Cin] layout.  y: [B, Do*H, Wo*Cout], Wo == H//2."""
    B = y.shape[0]
    Ho = Wo = H // 2
    t = y.reshape(B, Do, Ho, 2, Wo * Cout).max(axis=3)        # height pool
    t = t.reshape(B, Do, Ho, Wo, Cout)
    t = jnp.pad(t, ((0, 0), (1, 1), (1, 1), (1, 1), (0, 0)))  # pad d/h/w by 1
    return t.reshape(B, (Do + 2) * (Ho + 2), (Wo + 2) * Cout)


# ----------------------------- parameters -----------------------------

def _banded_conv_params(w, b, D):
    """Fold the 3 width taps of a Conv3d(3,1,1) weight into a banded matrix so the conv
    becomes 9 row-shifted matmuls.  Output columns ordered (w%2, w//2, cout) so the width
    max-pool is a lane-half max inside the kernel."""
    w = np.asarray(w, np.float32)             # [Cout, Cin, 3, 3, 3] (PyTorch layout)
    b = np.asarray(b, np.float32)
    cout, cin = w.shape[0], w.shape[1]
    wp, wo = D + 2, D // 2
    bw = np.zeros((9, wp * cin, D * cout), np.float32)
    for kd in range(3):
        for kh in range(3):
            t = kd * 3 + kh
            for kw in range(3):
                blk = w[:, :, kd, kh, kw].T   # [Cin, Cout]
                for wi in range(D):
                    col = (wi % 2) * wo * cout + (wi // 2) * cout
                    row = (wi + kw) * cin
                    bw[t, row:row + cin, col:col + cout] = blk
    bt = np.tile(b, wo).reshape(1, wo * cout)
    return jnp.asarray(bw), jnp.asarray(bt)


def init_params(key, spatial=32):
    assert spatial == 32   # five MaxPool3d(2) stages must reduce the volume to 1^3
    params = {"stages": [], "conv_dense": [], "fnn": {}}
    D = spatial
    for cin, cout in CONV_DIMS:
        key, kw_, kb_ = jax.random.split(key, 3)
        bound = 1.0 / math.sqrt(cin * 27)
        w = jax.random.uniform(kw_, (cout, cin, 3, 3, 3), jnp.float32, -bound, bound)
        b = jax.random.uniform(kb_, (cout,), jnp.float32, -bound, bound)
        bw, bt = _banded_conv_params(w, b, D)
        params["stages"].append({"bw": bw, "bt": bt})
        params["conv_dense"].append((w, b))    # kept only for the pure-XLA self-check
        D //= 2
    dims = [(64, 32), (32, 16), (16, 4)]
    for li, (fin, fout) in enumerate(dims, start=1):
        ws, bs = [], []
        for _ in range(PLANE_NUM):
            key, kw_, kb_ = jax.random.split(key, 3)
            bound = 1.0 / math.sqrt(fin)
            wt = jax.random.uniform(kw_, (fout, fin), jnp.float32, -bound, bound)
            bt_ = jax.random.uniform(kb_, (fout,), jnp.float32, -bound, bound)
            ws.append(wt.T)                    # [fin, fout] for x @ W
            bs.append(bt_.reshape(1, fout))
        params["fnn"][f"w{li}"] = jnp.stack(ws, axis=0)   # [3, fin, fout]
        params["fnn"][f"b{li}"] = jnp.stack(bs, axis=0)   # [3, 1, fout]
    return params


# ----------------------------- forward -----------------------------

@jax.jit
def model_forward(x, params):
    """x: [batch, X, Y, Z] with X = Y = Z = 32 (in_channels = 1)."""
    B, D, Hd, Wd = x.shape
    assert D == Hd == Wd == 32, "five MaxPool3d(2) stages require a 32^3 input volume"

    a = jnp.pad(x.astype(jnp.float32).reshape(B, D, Hd, Wd, 1),
                ((0, 0), (1, 1), (1, 1), (1, 1), (0, 0)))
    a = a.reshape(B, (D + 2) * (Hd + 2), (Wd + 2) * 1)

    S = D
    for s in range(4):                         # conv stages 1..4 (stage 5 fused below)
        cout = CONV_DIMS[s][1]
        st = params["stages"][s]
        out = conv_pool_stage(a, st["bw"], st["bt"],
                              H=S, Hp=S + 2, Do=S // 2, WoCout=(S // 2) * cout)
        a = _pool_h_and_pad(out, Do=S // 2, H=S, Cout=cout)
        S //= 2

    st = params["stages"][4]
    planes = final_stage_and_heads(a, st["bw"], st["bt"], params["fnn"],
                                   Hp=S + 2, WoCout=(S // 2) * CONV_DIMS[4][1])
    return [planes[:, p, :] for p in range(PLANE_NUM)]


@jax.jit
def reference_forward(x, params):
    """Pure-XLA reference (dense Conv3d + reduce_window) for correctness checking."""
    B = x.shape[0]
    h = x.astype(jnp.float32)[:, None]         # [B, 1, D, H, W]
    for w, b in params["conv_dense"]:
        h = lax.conv_general_dilated(
            h, w, window_strides=(1, 1, 1), padding=((1, 1), (1, 1), (1, 1)),
            dimension_numbers=("NCDHW", "OIDHW", "NCDHW"),
            precision=lax.Precision.HIGHEST) + b.reshape(1, -1, 1, 1, 1)
        h = lax.reduce_window(h, -jnp.inf, lax.max,
                              (1, 1, 2, 2, 2), (1, 1, 2, 2, 2), "VALID")
        h = _leaky(h)
    emb = h.reshape(B, -1)                     # [B, 64]
    outs = []
    for p in range(PLANE_NUM):
        t = _leaky(emb @ params["fnn"]["w1"][p] + params["fnn"]["b1"][p])
        t = _leaky(t @ params["fnn"]["w2"][p] + params["fnn"]["b2"][p])
        y = t @ params["fnn"]["w3"][p] + params["fnn"]["b3"][p]
        n = jnp.sqrt(jnp.sum(y * y, axis=1, keepdims=True))
        outs.append(y / jnp.maximum(n, 1e-12))
    return outs


if __name__ == "__main__":
    key = jax.random.PRNGKey(0)
    kx, kp = jax.random.split(key)
    # 5 MaxPool3d(2) stages => spatial 32 reduces to 1 (as the module requires).
    x = jax.random.normal(kx, (2, 32, 32, 32), jnp.float32)
    params = init_params(kp)

    planes = model_forward(x, params)
    planes = jax.block_until_ready(planes)

    ref = reference_forward(x, params)
    assert len(planes) == PLANE_NUM
    for p, r in zip(planes, ref):
        assert p.shape == (2, 4)
        assert bool(jnp.all(jnp.isfinite(p)))
        assert bool(jnp.allclose(p, r, atol=2e-2, rtol=0.0))
    print("KERNEL_OK")
</pallas_src>

<mosaic_0001>
module attributes {stable_mosaic.version = 11 : i64} {
  func.func @kernel(%arg0: i32, %arg1: memref<1x1156x34xf32, #tpu.memory_space<vmem>>, %arg2: memref<9x34x128xf32, #tpu.memory_space<vmem>>, %arg3: memref<1x64xf32, #tpu.memory_space<vmem>>, %arg4: memref<1x512x64xf32, #tpu.memory_space<vmem>>) attributes {dimension_semantics = [#tpu.dimension_semantics<parallel>], iteration_bounds = array<i64: 2>, scalar_prefetch = 0 : i64, scratch_operands = 0 : i64, tpu.core_type = #tpu.core_type<tc>, window_params = [{transform_indices = @transform_0, window_bounds = array<i64: 1, 1156, 34>}, {pipeline_mode = #tpu.pipeline_mode<synchronous>, transform_indices = @transform_1, window_bounds = array<i64: 9, 34, 128>}, {pipeline_mode = #tpu.pipeline_mode<synchronous>, transform_indices = @transform_2, window_bounds = array<i64: 1, 64>}, {transform_indices = @transform_3, window_bounds = array<i64: 1, 512, 64>}]} {
    %c0_i32 = arith.constant 0 : i32
    %c16_i32 = arith.constant 16 : i32
    %0 = arith.addi %c0_i32, %c16_i32 : i32
    %c1_i32 = arith.constant 1 : i32
    scf.for %arg5 = %c0_i32 to %0 step %c1_i32  : i32 {
      %c2_i32 = arith.constant 2 : i32
      %1 = arith.muli %c2_i32, %arg5 : i32
      %cst = arith.constant 0.000000e+00 : f32
      %2 = vector.broadcast %cst : f32 to vector<32x128xf32>
      %c0_i32_1 = arith.constant 0 : i32
      %3 = arith.addi %1, %c0_i32_1 : i32
      %c34_i32 = arith.constant 34 : i32
      %4 = arith.muli %3, %c34_i32 : i32
      %c0_i32_2 = arith.constant 0 : i32
      %5 = arith.addi %4, %c0_i32_2 : i32
      %c0 = arith.constant 0 : index
      %6 = arith.index_cast %5 : i32 to index
      %c0_3 = arith.constant 0 : index
      %7 = vector.load %arg1[%c0, %6, %c0_3] : memref<1x1156x34xf32, #tpu.memory_space<vmem>>, vector<1x32x34xf32>
      %8 = vector.shape_cast %7 : vector<1x32x34xf32> to vector<32x34xf32>
      %c0_4 = arith.constant 0 : index
      %c0_5 = arith.constant 0 : index
      %c0_6 = arith.constant 0 : index
      %9 = vector.load %arg2[%c0_4, %c0_5, %c0_6] : memref<9x34x128xf32, #tpu.memory_space<vmem>>, vector<1x34x128xf32>
      %10 = vector.shape_cast %9 : vector<1x34x128xf32> to vector<34x128xf32>
      %cst_7 = arith.constant dense<0.000000e+00> : vector<32x128xf32>
      %11 = tpu.matmul %8, %10, %cst_7 {dimension_numbers = #tpu.dot_dimension_numbers<[1], [0], [0], [1], [0, 0, 1, 1], [], []>} : vector<32x34xf32>, vector<34x128xf32>, vector<32x128xf32> -> vector<32x128xf32>
      %12 = arith.addf %2, %11 : vector<32x128xf32>
      %c0_i32_8 = arith.constant 0 : i32
      %13 = arith.addi %1, %c0_i32_8 : i32
      %c34_i32_9 = arith.constant 34 : i32
      %14 = arith.muli %13, %c34_i32_9 : i32
      %c1_i32_10 = arith.constant 1 : i32
      %15 = arith.addi %14, %c1_i32_10 : i32
      %c0_11 = arith.constant 0 : index
      %16 = arith.index_cast %15 : i32 to index
      %c0_12 = arith.constant 0 : index
      %17 = vector.load %arg1[%c0_11, %16, %c0_12] : memref<1x1156x34xf32, #tpu.memory_space<vmem>>, vector<1x32x34xf32>
      %18 = vector.shape_cast %17 : vector<1x32x34xf32> to vector<32x34xf32>
      %c1 = arith.constant 1 : index
      %c0_13 = arith.constant 0 : index
      %c0_14 = arith.constant 0 : index
      %19 = vector.load %arg2[%c1, %c0_13, %c0_14] : memref<9x34x128xf32, #tpu.memory_space<vmem>>, vector<1x34x128xf32>
      %20 = vector.shape_cast %19 : vector<1x34x128xf32> to vector<34x128xf32>
      %cst_15 = arith.constant dense<0.000000e+00> : vector<32x128xf32>
      %21 = tpu.matmul %18, %20, %cst_15 {dimension_numbers = #tpu.dot_dimension_numbers<[1], [0], [0], [1], [0, 0, 1, 1], [], []>} : vector<32x34xf32>, vector<34x128xf32>, vector<32x128xf32> -> vector<32x128xf32>
      %22 = arith.addf %12, %21 : vector<32x128xf32>
      %c0_i32_16 = arith.constant 0 : i32
      %23 = arith.addi %1, %c0_i32_16 : i32
      %c34_i32_17 = arith.constant 34 : i32
      %24 = arith.muli %23, %c34_i32_17 : i32
      %c2_i32_18 = arith.constant 2 : i32
      %25 = arith.addi %24, %c2_i32_18 : i32
      %c0_19 = arith.constant 0 : index
      %26 = arith.index_cast %25 : i32 to index
      %c0_20 = arith.constant 0 : index
      %27 = vector.load %arg1[%c0_19, %26, %c0_20] : memref<1x1156x34xf32, #tpu.memory_space<vmem>>, vector<1x32x34xf32>
      %28 = vector.shape_cast %27 : vector<1x32x34xf32> to vector<32x34xf32>
      %c2 = arith.constant 2 : index
      %c0_21 = arith.constant 0 : index
      %c0_22 = arith.constant 0 : index
      %29 = vector.load %arg2[%c2, %c0_21, %c0_22] : memref<9x34x128xf32, #tpu.memory_space<vmem>>, vector<1x34x128xf32>
      %30 = vector.shape_cast %29 : vector<1x34x128xf32> to vector<34x128xf32>
      %cst_23 = arith.constant dense<0.000000e+00> : vector<32x128xf32>
      %31 = tpu.matmul %28, %30, %cst_23 {dimension_numbers = #tpu.dot_dimension_numbers<[1], [0], [0], [1], [0, 0, 1, 1], [], []>} : vector<32x34xf32>, vector<34x128xf32>, vector<32x128xf32> -> vector<32x128xf32>
      %32 = arith.addf %22, %31 : vector<32x128xf32>
      %c1_i32_24 = arith.constant 1 : i32
      %33 = arith.addi %1, %c1_i32_24 : i32
      %c34_i32_25 = arith.constant 34 : i32
      %34 = arith.muli %33, %c34_i32_25 : i32
      %c0_i32_26 = arith.constant 0 : i32
      %35 = arith.addi %34, %c0_i32_26 : i32
      %c0_27 = arith.constant 0 : index
      %36 = arith.index_cast %35 : i32 to index
      %c0_28 = arith.constant 0 : index
      %37 = vector.load %arg1[%c0_27, %36, %c0_28] : memref<1x1156x34xf32, #tpu.memory_space<vmem>>, vector<1x32x34xf32>
      %38 = vector.shape_cast %37 : vector<1x32x34xf32> to vector<32x34xf32>
      %c3 = arith.constant 3 : index
      %c0_29 = arith.constant 0 : index
      %c0_30 = arith.constant 0 : index
      %39 = vector.load %arg2[%c3, %c0_29, %c0_30] : memref<9x34x128xf32, #tpu.memory_space<vmem>>, vector<1x34x128xf32>
      %40 = vector.shape_cast %39 : vector<1x34x128xf32> to vector<34x128xf32>
      %cst_31 = arith.constant dense<0.000000e+00> : vector<32x128xf32>
      %41 = tpu.matmul %38, %40, %cst_31 {dimension_numbers = #tpu.dot_dimension_numbers<[1], [0], [0], [1], [0, 0, 1, 1], [], []>} : vector<32x34xf32>, vector<34x128xf32>, vector<32x128xf32> -> vector<32x128xf32>
      %42 = arith.addf %32, %41 : vector<32x128xf32>
      %c1_i32_32 = arith.constant 1 : i32
      %43 = arith.addi %1, %c1_i32_32 : i32
      %c34_i32_33 = arith.constant 34 : i32
      %44 = arith.muli %43, %c34_i32_33 : i32
      %c1_i32_34 = arith.constant 1 : i32
      %45 = arith.addi %44, %c1_i32_34 : i32
      %c0_35 = arith.constant 0 : index
      %46 = arith.index_cast %45 : i32 to index
      %c0_36 = arith.constant 0 : index
      %47 = vector.load %arg1[%c0_35, %46, %c0_36] : memref<1x1156x34xf32, #tpu.memory_space<vmem>>, vector<1x32x34xf32>
      %48 = vector.shape_cast %47 : vector<1x32x34xf32> to vector<32x34xf32>
      %c4 = arith.constant 4 : index
      %c0_37 = arith.constant 0 : index
      %c0_38 = arith.constant 0 : index
      %49 = vector.load %arg2[%c4, %c0_37, %c0_38] : memref<9x34x128xf32, #tpu.memory_space<vmem>>, vector<1x34x128xf32>
      %50 = vector.shape_cast %49 : vector<1x34x128xf32> to vector<34x128xf32>
      %cst_39 = arith.constant dense<0.000000e+00> : vector<32x128xf32>
      %51 = tpu.matmul %48, %50, %cst_39 {dimension_numbers = #tpu.dot_dimension_numbers<[1], [0], [0], [1], [0, 0, 1, 1], [], []>} : vector<32x34xf32>, vector<34x128xf32>, vector<32x128xf32> -> vector<32x128xf32>
      %52 = arith.addf %42, %51 : vector<32x128xf32>
      %c1_i32_40 = arith.constant 1 : i32
      %53 = arith.addi %1, %c1_i32_40 : i32
      %c34_i32_41 = arith.constant 34 : i32
      %54 = arith.muli %53, %c34_i32_41 : i32
      %c2_i32_42 = arith.constant 2 : i32
      %55 = arith.addi %54, %c2_i32_42 : i32
      %c0_43 = arith.constant 0 : index
      %56 = arith.index_cast %55 : i32 to index
      %c0_44 = arith.constant 0 : index
      %57 = vector.load %arg1[%c0_43, %56, %c0_44] : memref<1x1156x34xf32, #tpu.memory_space<vmem>>, vector<1x32x34xf32>
      %58 = vector.shape_cast %57 : vector<1x32x34xf32> to vector<32x34xf32>
      %c5 = arith.constant 5 : index
      %c0_45 = arith.constant 0 : index
      %c0_46 = arith.constant 0 : index
      %59 = vector.load %arg2[%c5, %c0_45, %c0_46] : memref<9x34x128xf32, #tpu.memory_space<vmem>>, vector<1x34x128xf32>
      %60 = vector.shape_cast %59 : vector<1x34x128xf32> to vector<34x128xf32>
      %cst_47 = arith.constant dense<0.000000e+00> : vector<32x128xf32>
      %61 = tpu.matmul %58, %60, %cst_47 {dimension_numbers = #tpu.dot_dimension_numbers<[1], [0], [0], [1], [0, 0, 1, 1], [], []>} : vector<32x34xf32>, vector<34x128xf32>, vector<32x128xf32> -> vector<32x128xf32>
      %62 = arith.addf %52, %61 : vector<32x128xf32>
      %c2_i32_48 = arith.constant 2 : i32
      %63 = arith.addi %1, %c2_i32_48 : i32
      %c34_i32_49 = arith.constant 34 : i32
      %64 = arith.muli %63, %c34_i32_49 : i32
      %c0_i32_50 = arith.constant 0 : i32
      %65 = arith.addi %64, %c0_i32_50 : i32
      %c0_51 = arith.constant 0 : index
      %66 = arith.index_cast %65 : i32 to index
      %c0_52 = arith.constant 0 : index
      %67 = vector.load %arg1[%c0_51, %66, %c0_52] : memref<1x1156x34xf32, #tpu.memory_space<vmem>>, vector<1x32x34xf32>
      %68 = vector.shape_cast %67 : vector<1x32x34xf32> to vector<32x34xf32>
      %c6 = arith.constant 6 : index
      %c0_53 = arith.constant 0 : index
      %c0_54 = arith.constant 0 : index
      %69 = vector.load %arg2[%c6, %c0_53, %c0_54] : memref<9x34x128xf32, #tpu.memory_space<vmem>>, vector<1x34x128xf32>
      %70 = vector.shape_cast %69 : vector<1x34x128xf32> to vector<34x128xf32>
      %cst_55 = arith.constant dense<0.000000e+00> : vector<32x128xf32>
      %71 = tpu.matmul %68, %70, %cst_55 {dimension_numbers = #tpu.dot_dimension_numbers<[1], [0], [0], [1], [0, 0, 1, 1], [], []>} : vector<32x34xf32>, vector<34x128xf32>, vector<32x128xf32> -> vector<32x128xf32>
      %72 = arith.addf %62, %71 : vector<32x128xf32>
      %c2_i32_56 = arith.constant 2 : i32
      %73 = arith.addi %1, %c2_i32_56 : i32
      %c34_i32_57 = arith.constant 34 : i32
      %74 = arith.muli %73, %c34_i32_57 : i32
      %c1_i32_58 = arith.constant 1 : i32
      %75 = arith.addi %74, %c1_i32_58 : i32
      %c0_59 = arith.constant 0 : index
      %76 = arith.index_cast %75 : i32 to index
      %c0_60 = arith.constant 0 : index
      %77 = vector.load %arg1[%c0_59, %76, %c0_60] : memref<1x1156x34xf32, #tpu.memory_space<vmem>>, vector<1x32x34xf32>
      %78 = vector.shape_cast %77 : vector<1x32x34xf32> to vector<32x34xf32>
      %c7 = arith.constant 7 : index
      %c0_61 = arith.constant 0 : index
      %c0_62 = arith.constant 0 : index
      %79 = vector.load %arg2[%c7, %c0_61, %c0_62] : memref<9x34x128xf32, #tpu.memory_space<vmem>>, vector<1x34x128xf32>
      %80 = vector.shape_cast %79 : vector<1x34x128xf32> to vector<34x128xf32>
      %cst_63 = arith.constant dense<0.000000e+00> : vector<32x128xf32>
      %81 = tpu.matmul %78, %80, %cst_63 {dimension_numbers = #tpu.dot_dimension_numbers<[1], [0], [0], [1], [0, 0, 1, 1], [], []>} : vector<32x34xf32>, vector<34x128xf32>, vector<32x128xf32> -> vector<32x128xf32>
      %82 = arith.addf %72, %81 : vector<32x128xf32>
      %c2_i32_64 = arith.constant 2 : i32
      %83 = arith.addi %1, %c2_i32_64 : i32
      %c34_i32_65 = arith.constant 34 : i32
      %84 = arith.muli %83, %c34_i32_65 : i32
      %c2_i32_66 = arith.constant 2 : i32
      %85 = arith.addi %84, %c2_i32_66 : i32
      %c0_67 = arith.constant 0 : index
      %86 = arith.index_cast %85 : i32 to index
      %c0_68 = arith.constant 0 : index
      %87 = vector.load %arg1[%c0_67, %86, %c0_68] : memref<1x1156x34xf32, #tpu.memory_space<vmem>>, vector<1x32x34xf32>
      %88 = vector.shape_cast %87 : vector<1x32x34xf32> to vector<32x34xf32>
      %c8 = arith.constant 8 : index
      %c0_69 = arith.constant 0 : index
      %c0_70 = arith.constant 0 : index
      %89 = vector.load %arg2[%c8, %c0_69, %c0_70] : memref<9x34x128xf32, #tpu.memory_space<vmem>>, vector<1x34x128xf32>
      %90 = vector.shape_cast %89 : vector<1x34x128xf32> to vector<34x128xf32>
      %cst_71 = arith.constant dense<0.000000e+00> : vector<32x128xf32>
      %91 = tpu.matmul %88, %90, %cst_71 {dimension_numbers = #tpu.dot_dimension_numbers<[1], [0], [0], [1], [0, 0, 1, 1], [], []>} : vector<32x34xf32>, vector<34x128xf32>, vector<32x128xf32> -> vector<32x128xf32>
      %92 = arith.addf %82, %91 : vector<32x128xf32>
      %c2_i32_72 = arith.constant 2 : i32
      %93 = arith.muli %c2_i32_72, %arg5 : i32
      %c1_i32_73 = arith.constant 1 : i32
      %94 = arith.addi %93, %c1_i32_73 : i32
      %cst_74 = arith.constant 0.000000e+00 : f32
      %95 = vector.broadcast %cst_74 : f32 to vector<32x128xf32>
      %c0_i32_75 = arith.constant 0 : i32
      %96 = arith.addi %94, %c0_i32_75 : i32
      %c34_i32_76 = arith.constant 34 : i32
      %97 = arith.muli %96, %c34_i32_76 : i32
      %c0_i32_77 = arith.constant 0 : i32
      %98 = arith.addi %97, %c0_i32_77 : i32
      %c0_78 = arith.constant 0 : index
      %99 = arith.index_cast %98 : i32 to index
      %c0_79 = arith.constant 0 : index
      %100 = vector.load %arg1[%c0_78, %99, %c0_79] : memref<1x1156x34xf32, #tpu.memory_space<vmem>>, vector<1x32x34xf32>
      %101 = vector.shape_cast %100 : vector<1x32x34xf32> to vector<32x34xf32>
      %c0_80 = arith.constant 0 : index
      %c0_81 = arith.constant 0 : index
      %c0_82 = arith.constant 0 : index
      %102 = vector.load %arg2[%c0_80, %c0_81, %c0_82] : memref<9x34x128xf32, #tpu.memory_space<vmem>>, vector<1x34x128xf32>
      %103 = vector.shape_cast %102 : vector<1x34x128xf32> to vector<34x128xf32>
      %cst_83 = arith.constant dense<0.000000e+00> : vector<32x128xf32>
      %104 = tpu.matmul %101, %103, %cst_83 {dimension_numbers = #tpu.dot_dimension_numbers<[1], [0], [0], [1], [0, 0, 1, 1], [], []>} : vector<32x34xf32>, vector<34x128xf32>, vector<32x128xf32> -> vector<32x128xf32>
      %105 = arith.addf %95, %104 : vector<32x128xf32>
      %c0_i32_84 = arith.constant 0 : i32
      %106 = arith.addi %94, %c0_i32_84 : i32
      %c34_i32_85 = arith.constant 34 : i32
      %107 = arith.muli %106, %c34_i32_85 : i32
      %c1_i32_86 = arith.constant 1 : i32
      %108 = arith.addi %107, %c1_i32_86 : i32
      %c0_87 = arith.constant 0 : index
      %109 = arith.index_cast %108 : i32 to index
      %c0_88 = arith.constant 0 : index
      %110 = vector.load %arg1[%c0_87, %109, %c0_88] : memref<1x1156x34xf32, #tpu.memory_space<vmem>>, vector<1x32x34xf32>
      %111 = vector.shape_cast %110 : vector<1x32x34xf32> to vector<32x34xf32>
      %c1_89 = arith.constant 1 : index
      %c0_90 = arith.constant 0 : index
      %c0_91 = arith.constant 0 : index
      %112 = vector.load %arg2[%c1_89, %c0_90, %c0_91] : memref<9x34x128xf32, #tpu.memory_space<vmem>>, vector<1x34x128xf32>
      %113 = vector.shape_cast %112 : vector<1x34x128xf32> to vector<34x128xf32>
      %cst_92 = arith.constant dense<0.000000e+00> : vector<32x128xf32>
      %114 = tpu.matmul %111, %113, %cst_92 {dimension_numbers = #tpu.dot_dimension_numbers<[1], [0], [0], [1], [0, 0, 1, 1], [], []>} : vector<32x34xf32>, vector<34x128xf32>, vector<32x128xf32> -> vector<32x128xf32>
      %115 = arith.addf %105, %114 : vector<32x128xf32>
      %c0_i32_93 = arith.constant 0 : i32
      %116 = arith.addi %94, %c0_i32_93 : i32
      %c34_i32_94 = arith.constant 34 : i32
      %117 = arith.muli %116, %c34_i32_94 : i32
      %c2_i32_95 = arith.constant 2 : i32
      %118 = arith.addi %117, %c2_i32_95 : i32
      %c0_96 = arith.constant 0 : index
      %119 = arith.index_cast %118 : i32 to index
      %c0_97 = arith.constant 0 : index
      %120 = vector.load %arg1[%c0_96, %119, %c0_97] : memref<1x1156x34xf32, #tpu.memory_space<vmem>>, vector<1x32x34xf32>
      %121 = vector.shape_cast %120 : vector<1x32x34xf32> to vector<32x34xf32>
      %c2_98 = arith.constant 2 : index
      %c0_99 = arith.constant 0 : index
      %c0_100 = arith.constant 0 : index
      %122 = vector.load %arg2[%c2_98, %c0_99, %c0_100] : memref<9x34x128xf32, #tpu.memory_space<vmem>>, vector<1x34x128xf32>
      %123 = vector.shape_cast %122 : vector<1x34x128xf32> to vector<34x128xf32>
      %cst_101 = arith.constant dense<0.000000e+00> : vector<32x128xf32>
      %124 = tpu.matmul %121, %123, %cst_101 {dimension_numbers = #tpu.dot_dimension_numbers<[1], [0], [0], [1], [0, 0, 1, 1], [], []>} : vector<32x34xf32>, vector<34x128xf32>, vector<32x128xf32> -> vector<32x128xf32>
      %125 = arith.addf %115, %124 : vector<32x128xf32>
      %c1_i32_102 = arith.constant 1 : i32
      %126 = arith.addi %94, %c1_i32_102 : i32
      %c34_i32_103 = arith.constant 34 : i32
      %127 = arith.muli %126, %c34_i32_103 : i32
      %c0_i32_104 = arith.constant 0 : i32
      %128 = arith.addi %127, %c0_i32_104 : i32
      %c0_105 = arith.constant 0 : index
      %129 = arith.index_cast %128 : i32 to index
      %c0_106 = arith.constant 0 : index
      %130 = vector.load %arg1[%c0_105, %129, %c0_106] : memref<1x1156x34xf32, #tpu.memory_space<vmem>>, vector<1x32x34xf32>
      %131 = vector.shape_cast %130 : vector<1x32x34xf32> to vector<32x34xf32>
      %c3_107 = arith.constant 3 : index
      %c0_108 = arith.constant 0 : index
      %c0_109 = arith.constant 0 : index
      %132 = vector.load %arg2[%c3_107, %c0_108, %c0_109] : memref<9x34x128xf32, #tpu.memory_space<vmem>>, vector<1x34x128xf32>
      %133 = vector.shape_cast %132 : vector<1x34x128xf32> to vector<34x128xf32>
      %cst_110 = arith.constant dense<0.000000e+00> : vector<32x128xf32>
      %134 = tpu.matmul %131, %133, %cst_110 {dimension_numbers = #tpu.dot_dimension_numbers<[1], [0], [0], [1], [0, 0, 1, 1], [], []>} : vector<32x34xf32>, vector<34x128xf32>, vector<32x128xf32> -> vector<32x128xf32>
      %135 = arith.addf %125, %134 : vector<32x128xf32>
      %c1_i32_111 = arith.constant 1 : i32
      %136 = arith.addi %94, %c1_i32_111 : i32
      %c34_i32_112 = arith.constant 34 : i32
      %137 = arith.muli %136, %c34_i32_112 : i32
      %c1_i32_113 = arith.constant 1 : i32
      %138 = arith.addi %137, %c1_i32_113 : i32
      %c0_114 = arith.constant 0 : index
      %139 = arith.index_cast %138 : i32 to index
      %c0_115 = arith.constant 0 : index
      %140 = vector.load %arg1[%c0_114, %139, %c0_115] : memref<1x1156x34xf32, #tpu.memory_space<vmem>>, vector<1x32x34xf32>
      %141 = vector.shape_cast %140 : vector<1x32x34xf32> to vector<32x34xf32>
      %c4_116 = arith.constant 4 : index
      %c0_117 = arith.constant 0 : index
      %c0_118 = arith.constant 0 : index
      %142 = vector.load %arg2[%c4_116, %c0_117, %c0_118] : memref<9x34x128xf32, #tpu.memory_space<vmem>>, vector<1x34x128xf32>
      %143 = vector.shape_cast %142 : vector<1x34x128xf32> to vector<34x128xf32>
      %cst_119 = arith.constant dense<0.000000e+00> : vector<32x128xf32>
      %144 = tpu.matmul %141, %143, %cst_119 {dimension_numbers = #tpu.dot_dimension_numbers<[1], [0], [0], [1], [0, 0, 1, 1], [], []>} : vector<32x34xf32>, vector<34x128xf32>, vector<32x128xf32> -> vector<32x128xf32>
      %145 = arith.addf %135, %144 : vector<32x128xf32>
      %c1_i32_120 = arith.constant 1 : i32
      %146 = arith.addi %94, %c1_i32_120 : i32
      %c34_i32_121 = arith.constant 34 : i32
      %147 = arith.muli %146, %c34_i32_121 : i32
      %c2_i32_122 = arith.constant 2 : i32
      %148 = arith.addi %147, %c2_i32_122 : i32
      %c0_123 = arith.constant 0 : index
      %149 = arith.index_cast %148 : i32 to index
      %c0_124 = arith.constant 0 : index
      %150 = vector.load %arg1[%c0_123, %149, %c0_124] : memref<1x1156x34xf32, #tpu.memory_space<vmem>>, vector<1x32x34xf32>
      %151 = vector.shape_cast %150 : vector<1x32x34xf32> to vector<32x34xf32>
      %c5_125 = arith.constant 5 : index
      %c0_126 = arith.constant 0 : index
      %c0_127 = arith.constant 0 : index
      %152 = vector.load %arg2[%c5_125, %c0_126, %c0_127] : memref<9x34x128xf32, #tpu.memory_space<vmem>>, vector<1x34x128xf32>
      %153 = vector.shape_cast %152 : vector<1x34x128xf32> to vector<34x128xf32>
      %cst_128 = arith.constant dense<0.000000e+00> : vector<32x128xf32>
      %154 = tpu.matmul %151, %153, %cst_128 {dimension_numbers = #tpu.dot_dimension_numbers<[1], [0], [0], [1], [0, 0, 1, 1], [], []>} : vector<32x34xf32>, vector<34x128xf32>, vector<32x128xf32> -> vector<32x128xf32>
      %155 = arith.addf %145, %154 : vector<32x128xf32>
      %c2_i32_129 = arith.constant 2 : i32
      %156 = arith.addi %94, %c2_i32_129 : i32
      %c34_i32_130 = arith.constant 34 : i32
      %157 = arith.muli %156, %c34_i32_130 : i32
      %c0_i32_131 = arith.constant 0 : i32
      %158 = arith.addi %157, %c0_i32_131 : i32
      %c0_132 = arith.constant 0 : index
      %159 = arith.index_cast %158 : i32 to index
      %c0_133 = arith.constant 0 : index
      %160 = vector.load %arg1[%c0_132, %159, %c0_133] : memref<1x1156x34xf32, #tpu.memory_space<vmem>>, vector<1x32x34xf32>
      %161 = vector.shape_cast %160 : vector<1x32x34xf32> to vector<32x34xf32>
      %c6_134 = arith.constant 6 : index
      %c0_135 = arith.constant 0 : index
      %c0_136 = arith.constant 0 : index
      %162 = vector.load %arg2[%c6_134, %c0_135, %c0_136] : memref<9x34x128xf32, #tpu.memory_space<vmem>>, vector<1x34x128xf32>
      %163 = vector.shape_cast %162 : vector<1x34x128xf32> to vector<34x128xf32>
      %cst_137 = arith.constant dense<0.000000e+00> : vector<32x128xf32>
      %164 = tpu.matmul %161, %163, %cst_137 {dimension_numbers = #tpu.dot_dimension_numbers<[1], [0], [0], [1], [0, 0, 1, 1], [], []>} : vector<32x34xf32>, vector<34x128xf32>, vector<32x128xf32> -> vector<32x128xf32>
      %165 = arith.addf %155, %164 : vector<32x128xf32>
      %c2_i32_138 = arith.constant 2 : i32
      %166 = arith.addi %94, %c2_i32_138 : i32
      %c34_i32_139 = arith.constant 34 : i32
      %167 = arith.muli %166, %c34_i32_139 : i32
      %c1_i32_140 = arith.constant 1 : i32
      %168 = arith.addi %167, %c1_i32_140 : i32
      %c0_141 = arith.constant 0 : index
      %169 = arith.index_cast %168 : i32 to index
      %c0_142 = arith.constant 0 : index
      %170 = vector.load %arg1[%c0_141, %169, %c0_142] : memref<1x1156x34xf32, #tpu.memory_space<vmem>>, vector<1x32x34xf32>
      %171 = vector.shape_cast %170 : vector<1x32x34xf32> to vector<32x34xf32>
      %c7_143 = arith.constant 7 : index
      %c0_144 = arith.constant 0 : index
      %c0_145 = arith.constant 0 : index
      %172 = vector.load %arg2[%c7_143, %c0_144, %c0_145] : memref<9x34x128xf32, #tpu.memory_space<vmem>>, vector<1x34x128xf32>
      %173 = vector.shape_cast %172 : vector<1x34x128xf32> to vector<34x128xf32>
      %cst_146 = arith.constant dense<0.000000e+00> : vector<32x128xf32>
      %174 = tpu.matmul %171, %173, %cst_146 {dimension_numbers = #tpu.dot_dimension_numbers<[1], [0], [0], [1], [0, 0, 1, 1], [], []>} : vector<32x34xf32>, vector<34x128xf32>, vector<32x128xf32> -> vector<32x128xf32>
      %175 = arith.addf %165, %174 : vector<32x128xf32>
      %c2_i32_147 = arith.constant 2 : i32
      %176 = arith.addi %94, %c2_i32_147 : i32
      %c34_i32_148 = arith.constant 34 : i32
      %177 = arith.muli %176, %c34_i32_148 : i32
      %c2_i32_149 = arith.constant 2 : i32
      %178 = arith.addi %177, %c2_i32_149 : i32
      %c0_150 = arith.constant 0 : index
      %179 = arith.index_cast %178 : i32 to index
      %c0_151 = arith.constant 0 : index
      %180 = vector.load %arg1[%c0_150, %179, %c0_151] : memref<1x1156x34xf32, #tpu.memory_space<vmem>>, vector<1x32x34xf32>
      %181 = vector.shape_cast %180 : vector<1x32x34xf32> to vector<32x34xf32>
      %c8_152 = arith.constant 8 : index
      %c0_153 = arith.constant 0 : index
      %c0_154 = arith.constant 0 : index
      %182 = vector.load %arg2[%c8_152, %c0_153, %c0_154] : memref<9x34x128xf32, #tpu.memory_space<vmem>>, vector<1x34x128xf32>
      %183 = vector.shape_cast %182 : vector<1x34x128xf32> to vector<34x128xf32>
      %cst_155 = arith.constant dense<0.000000e+00> : vector<32x128xf32>
      %184 = tpu.matmul %181, %183, %cst_155 {dimension_numbers = #tpu.dot_dimension_numbers<[1], [0], [0], [1], [0, 0, 1, 1], [], []>} : vector<32x34xf32>, vector<34x128xf32>, vector<32x128xf32> -> vector<32x128xf32>
      %185 = arith.addf %175, %184 : vector<32x128xf32>
      %186 = arith.maximumf %92, %185 : vector<32x128xf32>
      %187 = vector.extract_strided_slice %186 {offsets = [0, 0], sizes = [32, 64], strides = [1, 1]} : vector<32x128xf32> to vector<32x64xf32>
      %188 = vector.extract_strided_slice %186 {offsets = [0, 64], sizes = [32, 64], strides = [1, 1]} : vector<32x128xf32> to vector<32x64xf32>
      %189 = arith.maximumf %187, %188 : vector<32x64xf32>
      %c0_156 = arith.constant 0 : index
      %c0_157 = arith.constant 0 : index
      %190 = vector.load %arg3[%c0_156, %c0_157] : memref<1x64xf32, #tpu.memory_space<vmem>>, vector<1x64xf32>
      %191 = vector.broadcast %190 : vector<1x64xf32> to vector<32x64xf32>
      %192 = arith.addf %189, %191 : vector<32x64xf32>
      %cst_158 = arith.constant 0.000000e+00 : f32
      %193 = vector.broadcast %cst_158 : f32 to vector<32x64xf32>
      %194 = arith.cmpf oge, %192, %193 : vector<32x64xf32>
      %cst_159 = arith.constant 2.000000e-01 : f32
      %195 = vector.broadcast %cst_159 : f32 to vector<32x64xf32>
      %196 = arith.mulf %195, %192 : vector<32x64xf32>
      %197 = arith.select %194, %192, %196 : vector<32x64xi1>, vector<32x64xf32>
      %c32_i32 = arith.constant 32 : i32
      %198 = arith.muli %arg5, %c32_i32 : i32
      %199 = tpu.assume_multiple %198, 32 : i32
      %c0_160 = arith.constant 0 : index
      %200 = arith.index_cast %199 : i32 to index
      %c0_161 = arith.constant 0 : index
      %201 = vector.load %arg4[%c0_160, %200, %c0_161] : memref<1x512x64xf32, #tpu.memory_space<vmem>>, vector<1x32x64xf32>
      %202 = vector.shape_cast %201 : vector<1x32x64xf32> to vector<32x64xf32>
      %203 = vector.shape_cast %197 : vector<32x64xf32> to vector<1x32x64xf32>
      tpu.vector_store %arg4[%c0_160, %200, %c0_161], %203 {strides = array<i32>} : memref<1x512x64xf32, #tpu.memory_space<vmem>>, vector<1x32x64xf32>,
    }
    %c16_i32_0 = arith.constant 16 : i32
    return
  }
  func.func @transform_0(%arg0: i32) -> (i32, i32, i32) {
    %c0_i32 = arith.constant 0 : i32
    %c0_i32_0 = arith.constant 0 : i32
    %c0_i32_1 = arith.constant 0 : i32
    return %arg0, %c0_i32, %c0_i32_0 : i32, i32, i32
  }
  func.func @transform_1(%arg0: i32) -> (i32, i32, i32) {
    %c0_i32 = arith.constant 0 : i32
    %c0_i32_0 = arith.constant 0 : i32
    %c0_i32_1 = arith.constant 0 : i32
    %c0_i32_2 = arith.constant 0 : i32
    return %c0_i32, %c0_i32_0, %c0_i32_1 : i32, i32, i32
  }
  func.func @transform_2(%arg0: i32) -> (i32, i32) {
    %c0_i32 = arith.constant 0 : i32
    %c0_i32_0 = arith.constant 0 : i32
    %c0_i32_1 = arith.constant 0 : i32
    return %c0_i32, %c0_i32_0 : i32, i32
  }
  func.func @transform_3(%arg0: i32) -> (i32, i32, i32) {
    %c0_i32 = arith.constant 0 : i32
    %c0_i32_0 = arith.constant 0 : i32
    %c0_i32_1 = arith.constant 0 : i32
    return %arg0, %c0_i32, %c0_i32_0 : i32, i32, i32
  }
}

module attributes {stable_mosaic.version = 11 : i64} {
  func.func @kernel(%arg0: i32, %arg1: memref<1x324x72xf32, #tpu.memory_space<vmem>>, %arg2: memref<9x72x128xf32, #tpu.memory_space<vmem>>, %arg3: memref<1x64xf32, #tpu.memory_space<vmem>>, %arg4: memref<1x128x64xf32, #tpu.memory_space<vmem>>) attributes {dimension_semantics = [#tpu.dimension_semantics<parallel>], iteration_bounds = array<i64: 2>, scalar_prefetch = 0 : i64, scratch_operands = 0 : i64, tpu.core_type = #tpu.core_type<tc>, window_params = [{transform_indices = @transform_0, window_bounds = array<i64: 1, 324, 72>}, {pipeline_mode = #tpu.pipeline_mode<synchronous>, transform_indices = @transform_1, window_bounds = array<i64: 9, 72, 128>}, {pipeline_mode = #tpu.pipeline_mode<synchronous>, transform_indices = @transform_2, window_bounds = array<i64: 1, 64>}, {transform_indices = @transform_3, window_bounds = array<i64: 1, 128, 64>}]} {
    %c0_i32 = arith.constant 0 : i32
    %c8_i32 = arith.constant 8 : i32
    %0 = arith.addi %c0_i32, %c8_i32 : i32
    %c1_i32 = arith.constant 1 : i32
    scf.for %arg5 = %c0_i32 to %0 step %c1_i32  : i32 {
      %c2_i32 = arith.constant 2 : i32
      %1 = arith.muli %c2_i32, %arg5 : i32
      %cst = arith.constant 0.000000e+00 : f32
      %2 = vector.broadcast %cst : f32 to vector<16x128xf32>
      %c0_i32_1 = arith.constant 0 : i32
      %3 = arith.addi %1, %c0_i32_1 : i32
      %c18_i32 = arith.constant 18 : i32
      %4 = arith.muli %3, %c18_i32 : i32
      %c0_i32_2 = arith.constant 0 : i32
      %5 = arith.addi %4, %c0_i32_2 : i32
      %c0 = arith.constant 0 : index
      %6 = arith.index_cast %5 : i32 to index
      %c0_3 = arith.constant 0 : index
      %7 = vector.load %arg1[%c0, %6, %c0_3] : memref<1x324x72xf32, #tpu.memory_space<vmem>>, vector<1x16x72xf32>
      %8 = vector.shape_cast %7 : vector<1x16x72xf32> to vector<16x72xf32>
      %c0_4 = arith.constant 0 : index
      %c0_5 = arith.constant 0 : index
      %c0_6 = arith.constant 0 : index
      %9 = vector.load %arg2[%c0_4, %c0_5, %c0_6] : memref<9x72x128xf32, #tpu.memory_space<vmem>>, vector<1x72x128xf32>
      %10 = vector.shape_cast %9 : vector<1x72x128xf32> to vector<72x128xf32>
      %cst_7 = arith.constant dense<0.000000e+00> : vector<16x128xf32>
      %11 = tpu.matmul %8, %10, %cst_7 {dimension_numbers = #tpu.dot_dimension_numbers<[1], [0], [0], [1], [0, 0, 1, 1], [], []>} : vector<16x72xf32>, vector<72x128xf32>, vector<16x128xf32> -> vector<16x128xf32>
      %12 = arith.addf %2, %11 : vector<16x128xf32>
      %c0_i32_8 = arith.constant 0 : i32
      %13 = arith.addi %1, %c0_i32_8 : i32
      %c18_i32_9 = arith.constant 18 : i32
      %14 = arith.muli %13, %c18_i32_9 : i32
      %c1_i32_10 = arith.constant 1 : i32
      %15 = arith.addi %14, %c1_i32_10 : i32
      %c0_11 = arith.constant 0 : index
      %16 = arith.index_cast %15 : i32 to index
      %c0_12 = arith.constant 0 : index
      %17 = vector.load %arg1[%c0_11, %16, %c0_12] : memref<1x324x72xf32, #tpu.memory_space<vmem>>, vector<1x16x72xf32>
      %18 = vector.shape_cast %17 : vector<1x16x72xf32> to vector<16x72xf32>
      %c1 = arith.constant 1 : index
      %c0_13 = arith.constant 0 : index
      %c0_14 = arith.constant 0 : index
      %19 = vector.load %arg2[%c1, %c0_13, %c0_14] : memref<9x72x128xf32, #tpu.memory_space<vmem>>, vector<1x72x128xf32>
      %20 = vector.shape_cast %19 : vector<1x72x128xf32> to vector<72x128xf32>
      %cst_15 = arith.constant dense<0.000000e+00> : vector<16x128xf32>
      %21 = tpu.matmul %18, %20, %cst_15 {dimension_numbers = #tpu.dot_dimension_numbers<[1], [0], [0], [1], [0, 0, 1, 1], [], []>} : vector<16x72xf32>, vector<72x128xf32>, vector<16x128xf32> -> vector<16x128xf32>
      %22 = arith.addf %12, %21 : vector<16x128xf32>
      %c0_i32_16 = arith.constant 0 : i32
      %23 = arith.addi %1, %c0_i32_16 : i32
      %c18_i32_17 = arith.constant 18 : i32
      %24 = arith.muli %23, %c18_i32_17 : i32
      %c2_i32_18 = arith.constant 2 : i32
      %25 = arith.addi %24, %c2_i32_18 : i32
      %c0_19 = arith.constant 0 : index
      %26 = arith.index_cast %25 : i32 to index
      %c0_20 = arith.constant 0 : index
      %27 = vector.load %arg1[%c0_19, %26, %c0_20] : memref<1x324x72xf32, #tpu.memory_space<vmem>>, vector<1x16x72xf32>
      %28 = vector.shape_cast %27 : vector<1x16x72xf32> to vector<16x72xf32>
      %c2 = arith.constant 2 : index
      %c0_21 = arith.constant 0 : index
      %c0_22 = arith.constant 0 : index
      %29 = vector.load %arg2[%c2, %c0_21, %c0_22] : memref<9x72x128xf32, #tpu.memory_space<vmem>>, vector<1x72x128xf32>
      %30 = vector.shape_cast %29 : vector<1x72x128xf32> to vector<72x128xf32>
      %cst_23 = arith.constant dense<0.000000e+00> : vector<16x128xf32>
      %31 = tpu.matmul %28, %30, %cst_23 {dimension_numbers = #tpu.dot_dimension_numbers<[1], [0], [0], [1], [0, 0, 1, 1], [], []>} : vector<16x72xf32>, vector<72x128xf32>, vector<16x128xf32> -> vector<16x128xf32>
      %32 = arith.addf %22, %31 : vector<16x128xf32>
      %c1_i32_24 = arith.constant 1 : i32
      %33 = arith.addi %1, %c1_i32_24 : i32
      %c18_i32_25 = arith.constant 18 : i32
      %34 = arith.muli %33, %c18_i32_25 : i32
      %c0_i32_26 = arith.constant 0 : i32
      %35 = arith.addi %34, %c0_i32_26 : i32
      %c0_27 = arith.constant 0 : index
      %36 = arith.index_cast %35 : i32 to index
      %c0_28 = arith.constant 0 : index
      %37 = vector.load %arg1[%c0_27, %36, %c0_28] : memref<1x324x72xf32, #tpu.memory_space<vmem>>, vector<1x16x72xf32>
      %38 = vector.shape_cast %37 : vector<1x16x72xf32> to vector<16x72xf32>
      %c3 = arith.constant 3 : index
      %c0_29 = arith.constant 0 : index
      %c0_30 = arith.constant 0 : index
      %39 = vector.load %arg2[%c3, %c0_29, %c0_30] : memref<9x72x128xf32, #tpu.memory_space<vmem>>, vector<1x72x128xf32>
      %40 = vector.shape_cast %39 : vector<1x72x128xf32> to vector<72x128xf32>
      %cst_31 = arith.constant dense<0.000000e+00> : vector<16x128xf32>
      %41 = tpu.matmul %38, %40, %cst_31 {dimension_numbers = #tpu.dot_dimension_numbers<[1], [0], [0], [1], [0, 0, 1, 1], [], []>} : vector<16x72xf32>, vector<72x128xf32>, vector<16x128xf32> -> vector<16x128xf32>
      %42 = arith.addf %32, %41 : vector<16x128xf32>
      %c1_i32_32 = arith.constant 1 : i32
      %43 = arith.addi %1, %c1_i32_32 : i32
      %c18_i32_33 = arith.constant 18 : i32
      %44 = arith.muli %43, %c18_i32_33 : i32
      %c1_i32_34 = arith.constant 1 : i32
      %45 = arith.addi %44, %c1_i32_34 : i32
      %c0_35 = arith.constant 0 : index
      %46 = arith.index_cast %45 : i32 to index
      %c0_36 = arith.constant 0 : index
      %47 = vector.load %arg1[%c0_35, %46, %c0_36] : memref<1x324x72xf32, #tpu.memory_space<vmem>>, vector<1x16x72xf32>
      %48 = vector.shape_cast %47 : vector<1x16x72xf32> to vector<16x72xf32>
      %c4 = arith.constant 4 : index
      %c0_37 = arith.constant 0 : index
      %c0_38 = arith.constant 0 : index
      %49 = vector.load %arg2[%c4, %c0_37, %c0_38] : memref<9x72x128xf32, #tpu.memory_space<vmem>>, vector<1x72x128xf32>
      %50 = vector.shape_cast %49 : vector<1x72x128xf32> to vector<72x128xf32>
      %cst_39 = arith.constant dense<0.000000e+00> : vector<16x128xf32>
      %51 = tpu.matmul %48, %50, %cst_39 {dimension_numbers = #tpu.dot_dimension_numbers<[1], [0], [0], [1], [0, 0, 1, 1], [], []>} : vector<16x72xf32>, vector<72x128xf32>, vector<16x128xf32> -> vector<16x128xf32>
      %52 = arith.addf %42, %51 : vector<16x128xf32>
      %c1_i32_40 = arith.constant 1 : i32
      %53 = arith.addi %1, %c1_i32_40 : i32
      %c18_i32_41 = arith.constant 18 : i32
      %54 = arith.muli %53, %c18_i32_41 : i32
      %c2_i32_42 = arith.constant 2 : i32
      %55 = arith.addi %54, %c2_i32_42 : i32
      %c0_43 = arith.constant 0 : index
      %56 = arith.index_cast %55 : i32 to index
      %c0_44 = arith.constant 0 : index
      %57 = vector.load %arg1[%c0_43, %56, %c0_44] : memref<1x324x72xf32, #tpu.memory_space<vmem>>, vector<1x16x72xf32>
      %58 = vector.shape_cast %57 : vector<1x16x72xf32> to vector<16x72xf32>
      %c5 = arith.constant 5 : index
      %c0_45 = arith.constant 0 : index
      %c0_46 = arith.constant 0 : index
      %59 = vector.load %arg2[%c5, %c0_45, %c0_46] : memref<9x72x128xf32, #tpu.memory_space<vmem>>, vector<1x72x128xf32>
      %60 = vector.shape_cast %59 : vector<1x72x128xf32> to vector<72x128xf32>
      %cst_47 = arith.constant dense<0.000000e+00> : vector<16x128xf32>
      %61 = tpu.matmul %58, %60, %cst_47 {dimension_numbers = #tpu.dot_dimension_numbers<[1], [0], [0], [1], [0, 0, 1, 1], [], []>} : vector<16x72xf32>, vector<72x128xf32>, vector<16x128xf32> -> vector<16x128xf32>
      %62 = arith.addf %52, %61 : vector<16x128xf32>
      %c2_i32_48 = arith.constant 2 : i32
      %63 = arith.addi %1, %c2_i32_48 : i32
      %c18_i32_49 = arith.constant 18 : i32
      %64 = arith.muli %63, %c18_i32_49 : i32
      %c0_i32_50 = arith.constant 0 : i32
      %65 = arith.addi %64, %c0_i32_50 : i32
      %c0_51 = arith.constant 0 : index
      %66 = arith.index_cast %65 : i32 to index
      %c0_52 = arith.constant 0 : index
      %67 = vector.load %arg1[%c0_51, %66, %c0_52] : memref<1x324x72xf32, #tpu.memory_space<vmem>>, vector<1x16x72xf32>
      %68 = vector.shape_cast %67 : vector<1x16x72xf32> to vector<16x72xf32>
      %c6 = arith.constant 6 : index
      %c0_53 = arith.constant 0 : index
      %c0_54 = arith.constant 0 : index
      %69 = vector.load %arg2[%c6, %c0_53, %c0_54] : memref<9x72x128xf32, #tpu.memory_space<vmem>>, vector<1x72x128xf32>
      %70 = vector.shape_cast %69 : vector<1x72x128xf32> to vector<72x128xf32>
      %cst_55 = arith.constant dense<0.000000e+00> : vector<16x128xf32>
      %71 = tpu.matmul %68, %70, %cst_55 {dimension_numbers = #tpu.dot_dimension_numbers<[1], [0], [0], [1], [0, 0, 1, 1], [], []>} : vector<16x72xf32>, vector<72x128xf32>, vector<16x128xf32> -> vector<16x128xf32>
      %72 = arith.addf %62, %71 : vector<16x128xf32>
      %c2_i32_56 = arith.constant 2 : i32
      %73 = arith.addi %1, %c2_i32_56 : i32
      %c18_i32_57 = arith.constant 18 : i32
      %74 = arith.muli %73, %c18_i32_57 : i32
      %c1_i32_58 = arith.constant 1 : i32
      %75 = arith.addi %74, %c1_i32_58 : i32
      %c0_59 = arith.constant 0 : index
      %76 = arith.index_cast %75 : i32 to index
      %c0_60 = arith.constant 0 : index
      %77 = vector.load %arg1[%c0_59, %76, %c0_60] : memref<1x324x72xf32, #tpu.memory_space<vmem>>, vector<1x16x72xf32>
      %78 = vector.shape_cast %77 : vector<1x16x72xf32> to vector<16x72xf32>
      %c7 = arith.constant 7 : index
      %c0_61 = arith.constant 0 : index
      %c0_62 = arith.constant 0 : index
      %79 = vector.load %arg2[%c7, %c0_61, %c0_62] : memref<9x72x128xf32, #tpu.memory_space<vmem>>, vector<1x72x128xf32>
      %80 = vector.shape_cast %79 : vector<1x72x128xf32> to vector<72x128xf32>
      %cst_63 = arith.constant dense<0.000000e+00> : vector<16x128xf32>
      %81 = tpu.matmul %78, %80, %cst_63 {dimension_numbers = #tpu.dot_dimension_numbers<[1], [0], [0], [1], [0, 0, 1, 1], [], []>} : vector<16x72xf32>, vector<72x128xf32>, vector<16x128xf32> -> vector<16x128xf32>
      %82 = arith.addf %72, %81 : vector<16x128xf32>
      %c2_i32_64 = arith.constant 2 : i32
      %83 = arith.addi %1, %c2_i32_64 : i32
      %c18_i32_65 = arith.constant 18 : i32
      %84 = arith.muli %83, %c18_i32_65 : i32
      %c2_i32_66 = arith.constant 2 : i32
      %85 = arith.addi %84, %c2_i32_66 : i32
      %c0_67 = arith.constant 0 : index
      %86 = arith.index_cast %85 : i32 to index
      %c0_68 = arith.constant 0 : index
      %87 = vector.load %arg1[%c0_67, %86, %c0_68] : memref<1x324x72xf32, #tpu.memory_space<vmem>>, vector<1x16x72xf32>
      %88 = vector.shape_cast %87 : vector<1x16x72xf32> to vector<16x72xf32>
      %c8 = arith.constant 8 : index
      %c0_69 = arith.constant 0 : index
      %c0_70 = arith.constant 0 : index
      %89 = vector.load %arg2[%c8, %c0_69, %c0_70] : memref<9x72x128xf32, #tpu.memory_space<vmem>>, vector<1x72x128xf32>
      %90 = vector.shape_cast %89 : vector<1x72x128xf32> to vector<72x128xf32>
      %cst_71 = arith.constant dense<0.000000e+00> : vector<16x128xf32>
      %91 = tpu.matmul %88, %90, %cst_71 {dimension_numbers = #tpu.dot_dimension_numbers<[1], [0], [0], [1], [0, 0, 1, 1], [], []>} : vector<16x72xf32>, vector<72x128xf32>, vector<16x128xf32> -> vector<16x128xf32>
      %92 = arith.addf %82, %91 : vector<16x128xf32>
      %c2_i32_72 = arith.constant 2 : i32
      %93 = arith.muli %c2_i32_72, %arg5 : i32
      %c1_i32_73 = arith.constant 1 : i32
      %94 = arith.addi %93, %c1_i32_73 : i32
      %cst_74 = arith.constant 0.000000e+00 : f32
      %95 = vector.broadcast %cst_74 : f32 to vector<16x128xf32>
      %c0_i32_75 = arith.constant 0 : i32
      %96 = arith.addi %94, %c0_i32_75 : i32
      %c18_i32_76 = arith.constant 18 : i32
      %97 = arith.muli %96, %c18_i32_76 : i32
      %c0_i32_77 = arith.constant 0 : i32
      %98 = arith.addi %97, %c0_i32_77 : i32
      %c0_78 = arith.constant 0 : index
      %99 = arith.index_cast %98 : i32 to index
      %c0_79 = arith.constant 0 : index
      %100 = vector.load %arg1[%c0_78, %99, %c0_79] : memref<1x324x72xf32, #tpu.memory_space<vmem>>, vector<1x16x72xf32>
      %101 = vector.shape_cast %100 : vector<1x16x72xf32> to vector<16x72xf32>
      %c0_80 = arith.constant 0 : index
      %c0_81 = arith.constant 0 : index
      %c0_82 = arith.constant 0 : index
      %102 = vector.load %arg2[%c0_80, %c0_81, %c0_82] : memref<9x72x128xf32, #tpu.memory_space<vmem>>, vector<1x72x128xf32>
      %103 = vector.shape_cast %102 : vector<1x72x128xf32> to vector<72x128xf32>
      %cst_83 = arith.constant dense<0.000000e+00> : vector<16x128xf32>
      %104 = tpu.matmul %101, %103, %cst_83 {dimension_numbers = #tpu.dot_dimension_numbers<[1], [0], [0], [1], [0, 0, 1, 1], [], []>} : vector<16x72xf32>, vector<72x128xf32>, vector<16x128xf32> -> vector<16x128xf32>
      %105 = arith.addf %95, %104 : vector<16x128xf32>
      %c0_i32_84 = arith.constant 0 : i32
      %106 = arith.addi %94, %c0_i32_84 : i32
      %c18_i32_85 = arith.constant 18 : i32
      %107 = arith.muli %106, %c18_i32_85 : i32
      %c1_i32_86 = arith.constant 1 : i32
      %108 = arith.addi %107, %c1_i32_86 : i32
      %c0_87 = arith.constant 0 : index
      %109 = arith.index_cast %108 : i32 to index
      %c0_88 = arith.constant 0 : index
      %110 = vector.load %arg1[%c0_87, %109, %c0_88] : memref<1x324x72xf32, #tpu.memory_space<vmem>>, vector<1x16x72xf32>
      %111 = vector.shape_cast %110 : vector<1x16x72xf32> to vector<16x72xf32>
      %c1_89 = arith.constant 1 : index
      %c0_90 = arith.constant 0 : index
      %c0_91 = arith.constant 0 : index
      %112 = vector.load %arg2[%c1_89, %c0_90, %c0_91] : memref<9x72x128xf32, #tpu.memory_space<vmem>>, vector<1x72x128xf32>
      %113 = vector.shape_cast %112 : vector<1x72x128xf32> to vector<72x128xf32>
      %cst_92 = arith.constant dense<0.000000e+00> : vector<16x128xf32>
      %114 = tpu.matmul %111, %113, %cst_92 {dimension_numbers = #tpu.dot_dimension_numbers<[1], [0], [0], [1], [0, 0, 1, 1], [], []>} : vector<16x72xf32>, vector<72x128xf32>, vector<16x128xf32> -> vector<16x128xf32>
      %115 = arith.addf %105, %114 : vector<16x128xf32>
      %c0_i32_93 = arith.constant 0 : i32
      %116 = arith.addi %94, %c0_i32_93 : i32
      %c18_i32_94 = arith.constant 18 : i32
      %117 = arith.muli %116, %c18_i32_94 : i32
      %c2_i32_95 = arith.constant 2 : i32
      %118 = arith.addi %117, %c2_i32_95 : i32
      %c0_96 = arith.constant 0 : index
      %119 = arith.index_cast %118 : i32 to index
      %c0_97 = arith.constant 0 : index
      %120 = vector.load %arg1[%c0_96, %119, %c0_97] : memref<1x324x72xf32, #tpu.memory_space<vmem>>, vector<1x16x72xf32>
      %121 = vector.shape_cast %120 : vector<1x16x72xf32> to vector<16x72xf32>
      %c2_98 = arith.constant 2 : index
      %c0_99 = arith.constant 0 : index
      %c0_100 = arith.constant 0 : index
      %122 = vector.load %arg2[%c2_98, %c0_99, %c0_100] : memref<9x72x128xf32, #tpu.memory_space<vmem>>, vector<1x72x128xf32>
      %123 = vector.shape_cast %122 : vector<1x72x128xf32> to vector<72x128xf32>
      %cst_101 = arith.constant dense<0.000000e+00> : vector<16x128xf32>
      %124 = tpu.matmul %121, %123, %cst_101 {dimension_numbers = #tpu.dot_dimension_numbers<[1], [0], [0], [1], [0, 0, 1, 1], [], []>} : vector<16x72xf32>, vector<72x128xf32>, vector<16x128xf32> -> vector<16x128xf32>
      %125 = arith.addf %115, %124 : vector<16x128xf32>
      %c1_i32_102 = arith.constant 1 : i32
      %126 = arith.addi %94, %c1_i32_102 : i32
      %c18_i32_103 = arith.constant 18 : i32
      %127 = arith.muli %126, %c18_i32_103 : i32
      %c0_i32_104 = arith.constant 0 : i32
      %128 = arith.addi %127, %c0_i32_104 : i32
      %c0_105 = arith.constant 0 : index
      %129 = arith.index_cast %128 : i32 to index
      %c0_106 = arith.constant 0 : index
      %130 = vector.load %arg1[%c0_105, %129, %c0_106] : memref<1x324x72xf32, #tpu.memory_space<vmem>>, vector<1x16x72xf32>
      %131 = vector.shape_cast %130 : vector<1x16x72xf32> to vector<16x72xf32>
      %c3_107 = arith.constant 3 : index
      %c0_108 = arith.constant 0 : index
      %c0_109 = arith.constant 0 : index
      %132 = vector.load %arg2[%c3_107, %c0_108, %c0_109] : memref<9x72x128xf32, #tpu.memory_space<vmem>>, vector<1x72x128xf32>
      %133 = vector.shape_cast %132 : vector<1x72x128xf32> to vector<72x128xf32>
      %cst_110 = arith.constant dense<0.000000e+00> : vector<16x128xf32>
      %134 = tpu.matmul %131, %133, %cst_110 {dimension_numbers = #tpu.dot_dimension_numbers<[1], [0], [0], [1], [0, 0, 1, 1], [], []>} : vector<16x72xf32>, vector<72x128xf32>, vector<16x128xf32> -> vector<16x128xf32>
      %135 = arith.addf %125, %134 : vector<16x128xf32>
      %c1_i32_111 = arith.constant 1 : i32
      %136 = arith.addi %94, %c1_i32_111 : i32
      %c18_i32_112 = arith.constant 18 : i32
      %137 = arith.muli %136, %c18_i32_112 : i32
      %c1_i32_113 = arith.constant 1 : i32
      %138 = arith.addi %137, %c1_i32_113 : i32
      %c0_114 = arith.constant 0 : index
      %139 = arith.index_cast %138 : i32 to index
      %c0_115 = arith.constant 0 : index
      %140 = vector.load %arg1[%c0_114, %139, %c0_115] : memref<1x324x72xf32, #tpu.memory_space<vmem>>, vector<1x16x72xf32>
      %141 = vector.shape_cast %140 : vector<1x16x72xf32> to vector<16x72xf32>
      %c4_116 = arith.constant 4 : index
      %c0_117 = arith.constant 0 : index
      %c0_118 = arith.constant 0 : index
      %142 = vector.load %arg2[%c4_116, %c0_117, %c0_118] : memref<9x72x128xf32, #tpu.memory_space<vmem>>, vector<1x72x128xf32>
      %143 = vector.shape_cast %142 : vector<1x72x128xf32> to vector<72x128xf32>
      %cst_119 = arith.constant dense<0.000000e+00> : vector<16x128xf32>
      %144 = tpu.matmul %141, %143, %cst_119 {dimension_numbers = #tpu.dot_dimension_numbers<[1], [0], [0], [1], [0, 0, 1, 1], [], []>} : vector<16x72xf32>, vector<72x128xf32>, vector<16x128xf32> -> vector<16x128xf32>
      %145 = arith.addf %135, %144 : vector<16x128xf32>
      %c1_i32_120 = arith.constant 1 : i32
      %146 = arith.addi %94, %c1_i32_120 : i32
      %c18_i32_121 = arith.constant 18 : i32
      %147 = arith.muli %146, %c18_i32_121 : i32
      %c2_i32_122 = arith.constant 2 : i32
      %148 = arith.addi %147, %c2_i32_122 : i32
      %c0_123 = arith.constant 0 : index
      %149 = arith.index_cast %148 : i32 to index
      %c0_124 = arith.constant 0 : index
      %150 = vector.load %arg1[%c0_123, %149, %c0_124] : memref<1x324x72xf32, #tpu.memory_space<vmem>>, vector<1x16x72xf32>
      %151 = vector.shape_cast %150 : vector<1x16x72xf32> to vector<16x72xf32>
      %c5_125 = arith.constant 5 : index
      %c0_126 = arith.constant 0 : index
      %c0_127 = arith.constant 0 : index
      %152 = vector.load %arg2[%c5_125, %c0_126, %c0_127] : memref<9x72x128xf32, #tpu.memory_space<vmem>>, vector<1x72x128xf32>
      %153 = vector.shape_cast %152 : vector<1x72x128xf32> to vector<72x128xf32>
      %cst_128 = arith.constant dense<0.000000e+00> : vector<16x128xf32>
      %154 = tpu.matmul %151, %153, %cst_128 {dimension_numbers = #tpu.dot_dimension_numbers<[1], [0], [0], [1], [0, 0, 1, 1], [], []>} : vector<16x72xf32>, vector<72x128xf32>, vector<16x128xf32> -> vector<16x128xf32>
      %155 = arith.addf %145, %154 : vector<16x128xf32>
      %c2_i32_129 = arith.constant 2 : i32
      %156 = arith.addi %94, %c2_i32_129 : i32
      %c18_i32_130 = arith.constant 18 : i32
      %157 = arith.muli %156, %c18_i32_130 : i32
      %c0_i32_131 = arith.constant 0 : i32
      %158 = arith.addi %157, %c0_i32_131 : i32
      %c0_132 = arith.constant 0 : index
      %159 = arith.index_cast %158 : i32 to index
      %c0_133 = arith.constant 0 : index
      %160 = vector.load %arg1[%c0_132, %159, %c0_133] : memref<1x324x72xf32, #tpu.memory_space<vmem>>, vector<1x16x72xf32>
      %161 = vector.shape_cast %160 : vector<1x16x72xf32> to vector<16x72xf32>
      %c6_134 = arith.constant 6 : index
      %c0_135 = arith.constant 0 : index
      %c0_136 = arith.constant 0 : index
      %162 = vector.load %arg2[%c6_134, %c0_135, %c0_136] : memref<9x72x128xf32, #tpu.memory_space<vmem>>, vector<1x72x128xf32>
      %163 = vector.shape_cast %162 : vector<1x72x128xf32> to vector<72x128xf32>
      %cst_137 = arith.constant dense<0.000000e+00> : vector<16x128xf32>
      %164 = tpu.matmul %161, %163, %cst_137 {dimension_numbers = #tpu.dot_dimension_numbers<[1], [0], [0], [1], [0, 0, 1, 1], [], []>} : vector<16x72xf32>, vector<72x128xf32>, vector<16x128xf32> -> vector<16x128xf32>
      %165 = arith.addf %155, %164 : vector<16x128xf32>
      %c2_i32_138 = arith.constant 2 : i32
      %166 = arith.addi %94, %c2_i32_138 : i32
      %c18_i32_139 = arith.constant 18 : i32
      %167 = arith.muli %166, %c18_i32_139 : i32
      %c1_i32_140 = arith.constant 1 : i32
      %168 = arith.addi %167, %c1_i32_140 : i32
      %c0_141 = arith.constant 0 : index
      %169 = arith.index_cast %168 : i32 to index
      %c0_142 = arith.constant 0 : index
      %170 = vector.load %arg1[%c0_141, %169, %c0_142] : memref<1x324x72xf32, #tpu.memory_space<vmem>>, vector<1x16x72xf32>
      %171 = vector.shape_cast %170 : vector<1x16x72xf32> to vector<16x72xf32>
      %c7_143 = arith.constant 7 : index
      %c0_144 = arith.constant 0 : index
      %c0_145 = arith.constant 0 : index
      %172 = vector.load %arg2[%c7_143, %c0_144, %c0_145] : memref<9x72x128xf32, #tpu.memory_space<vmem>>, vector<1x72x128xf32>
      %173 = vector.shape_cast %172 : vector<1x72x128xf32> to vector<72x128xf32>
      %cst_146 = arith.constant dense<0.000000e+00> : vector<16x128xf32>
      %174 = tpu.matmul %171, %173, %cst_146 {dimension_numbers = #tpu.dot_dimension_numbers<[1], [0], [0], [1], [0, 0, 1, 1], [], []>} : vector<16x72xf32>, vector<72x128xf32>, vector<16x128xf32> -> vector<16x128xf32>
      %175 = arith.addf %165, %174 : vector<16x128xf32>
      %c2_i32_147 = arith.constant 2 : i32
      %176 = arith.addi %94, %c2_i32_147 : i32
      %c18_i32_148 = arith.constant 18 : i32
      %177 = arith.muli %176, %c18_i32_148 : i32
      %c2_i32_149 = arith.constant 2 : i32
      %178 = arith.addi %177, %c2_i32_149 : i32
      %c0_150 = arith.constant 0 : index
      %179 = arith.index_cast %178 : i32 to index
      %c0_151 = arith.constant 0 : index
      %180 = vector.load %arg1[%c0_150, %179, %c0_151] : memref<1x324x72xf32, #tpu.memory_space<vmem>>, vector<1x16x72xf32>
      %181 = vector.shape_cast %180 : vector<1x16x72xf32> to vector<16x72xf32>
      %c8_152 = arith.constant 8 : index
      %c0_153 = arith.constant 0 : index
      %c0_154 = arith.constant 0 : index
      %182 = vector.load %arg2[%c8_152, %c0_153, %c0_154] : memref<9x72x128xf32, #tpu.memory_space<vmem>>, vector<1x72x128xf32>
      %183 = vector.shape_cast %182 : vector<1x72x128xf32> to vector<72x128xf32>
      %cst_155 = arith.constant dense<0.000000e+00> : vector<16x128xf32>
      %184 = tpu.matmul %181, %183, %cst_155 {dimension_numbers = #tpu.dot_dimension_numbers<[1], [0], [0], [1], [0, 0, 1, 1], [], []>} : vector<16x72xf32>, vector<72x128xf32>, vector<16x128xf32> -> vector<16x128xf32>
      %185 = arith.addf %175, %184 : vector<16x128xf32>
      %186 = arith.maximumf %92, %185 : vector<16x128xf32>
      %187 = vector.extract_strided_slice %186 {offsets = [0, 0], sizes = [16, 64], strides = [1, 1]} : vector<16x128xf32> to vector<16x64xf32>
      %188 = vector.extract_strided_slice %186 {offsets = [0, 64], sizes = [16, 64], strides = [1, 1]} : vector<16x128xf32> to vector<16x64xf32>
      %189 = arith.maximumf %187, %188 : vector<16x64xf32>
      %c0_156 = arith.constant 0 : index
      %c0_157 = arith.constant 0 : index
      %190 = vector.load %arg3[%c0_156, %c0_157] : memref<1x64xf32, #tpu.memory_space<vmem>>, vector<1x64xf32>
      %191 = vector.broadcast %190 : vector<1x64xf32> to vector<16x64xf32>
      %192 = arith.addf %189, %191 : vector<16x64xf32>
      %cst_158 = arith.constant 0.000000e+00 : f32
      %193 = vector.broadcast %cst_158 : f32 to vector<16x64xf32>
      %194 = arith.cmpf oge, %192, %193 : vector<16x64xf32>
      %cst_159 = arith.constant 2.000000e-01 : f32
      %195 = vector.broadcast %cst_159 : f32 to vector<16x64xf32>
      %196 = arith.mulf %195, %192 : vector<16x64xf32>
      %197 = arith.select %194, %192, %196 : vector<16x64xi1>, vector<16x64xf32>
      %c16_i32 = arith.constant 16 : i32
      %198 = arith.muli %arg5, %c16_i32 : i32
      %199 = tpu.assume_multiple %198, 16 : i32
      %c0_160 = arith.constant 0 : index
      %200 = arith.index_cast %199 : i32 to index
      %c0_161 = arith.constant 0 : index
      %201 = vector.load %arg4[%c0_160, %200, %c0_161] : memref<1x128x64xf32, #tpu.memory_space<vmem>>, vector<1x16x64xf32>
      %202 = vector.shape_cast %201 : vector<1x16x64xf32> to vector<16x64xf32>
      %203 = vector.shape_cast %197 : vector<16x64xf32> to vector<1x16x64xf32>
      tpu.vector_store %arg4[%c0_160, %200, %c0_161], %203 {strides = array<i32>} : memref<1x128x64xf32, #tpu.memory_space<vmem>>, vector<1x16x64xf32>,
    }
    %c8_i32_0 = arith.constant 8 : i32
    return
  }
  func.func @transform_0(%arg0: i32) -> (i32, i32, i32) {
    %c0_i32 = arith.constant 0 : i32
    %c0_i32_0 = arith.constant 0 : i32
    %c0_i32_1 = arith.constant 0 : i32
    return %arg0, %c0_i32, %c0_i32_0 : i32, i32, i32
  }
  func.func @transform_1(%arg0: i32) -> (i32, i32, i32) {
    %c0_i32 = arith.constant 0 : i32
    %c0_i32_0 = arith.constant 0 : i32
    %c0_i32_1 = arith.constant 0 : i32
    %c0_i32_2 = arith.constant 0 : i32
    return %c0_i32, %c0_i32_0, %c0_i32_1 : i32, i32, i32
  }
  func.func @transform_2(%arg0: i32) -> (i32, i32) {
    %c0_i32 = arith.constant 0 : i32
    %c0_i32_0 = arith.constant 0 : i32
    %c0_i32_1 = arith.constant 0 : i32
    return %c0_i32, %c0_i32_0 : i32, i32
  }
  func.func @transform_3(%arg0: i32) -> (i32, i32, i32) {
    %c0_i32 = arith.constant 0 : i32
    %c0_i32_0 = arith.constant 0 : i32
    %c0_i32_1 = arith.constant 0 : i32
    return %arg0, %c0_i32, %c0_i32_0 : i32, i32, i32
  }
}

module attributes {stable_mosaic.version = 11 : i64} {
  func.func @kernel(%arg0: i32, %arg1: memref<1x100x80xf32, #tpu.memory_space<vmem>>, %arg2: memref<9x80x128xf32, #tpu.memory_space<vmem>>, %arg3: memref<1x64xf32, #tpu.memory_space<vmem>>, %arg4: memref<1x32x64xf32, #tpu.memory_space<vmem>>) attributes {dimension_semantics = [#tpu.dimension_semantics<parallel>], iteration_bounds = array<i64: 2>, scalar_prefetch = 0 : i64, scratch_operands = 0 : i64, tpu.core_type = #tpu.core_type<tc>, window_params = [{transform_indices = @transform_0, window_bounds = array<i64: 1, 100, 80>}, {pipeline_mode = #tpu.pipeline_mode<synchronous>, transform_indices = @transform_1, window_bounds = array<i64: 9, 80, 128>}, {pipeline_mode = #tpu.pipeline_mode<synchronous>, transform_indices = @transform_2, window_bounds = array<i64: 1, 64>}, {transform_indices = @transform_3, window_bounds = array<i64: 1, 32, 64>}]} {
    %c0_i32 = arith.constant 0 : i32
    %c4_i32 = arith.constant 4 : i32
    %0 = arith.addi %c0_i32, %c4_i32 : i32
    %c1_i32 = arith.constant 1 : i32
    scf.for %arg5 = %c0_i32 to %0 step %c1_i32  : i32 {
      %c2_i32 = arith.constant 2 : i32
      %1 = arith.muli %c2_i32, %arg5 : i32
      %cst = arith.constant 0.000000e+00 : f32
      %2 = vector.broadcast %cst : f32 to vector<8x128xf32>
      %c0_i32_1 = arith.constant 0 : i32
      %3 = arith.addi %1, %c0_i32_1 : i32
      %c10_i32 = arith.constant 10 : i32
      %4 = arith.muli %3, %c10_i32 : i32
      %c0_i32_2 = arith.constant 0 : i32
      %5 = arith.addi %4, %c0_i32_2 : i32
      %c0 = arith.constant 0 : index
      %6 = arith.index_cast %5 : i32 to index
      %c0_3 = arith.constant 0 : index
      %7 = vector.load %arg1[%c0, %6, %c0_3] : memref<1x100x80xf32, #tpu.memory_space<vmem>>, vector<1x8x80xf32>
      %8 = vector.shape_cast %7 : vector<1x8x80xf32> to vector<8x80xf32>
      %c0_4 = arith.constant 0 : index
      %c0_5 = arith.constant 0 : index
      %c0_6 = arith.constant 0 : index
      %9 = vector.load %arg2[%c0_4, %c0_5, %c0_6] : memref<9x80x128xf32, #tpu.memory_space<vmem>>, vector<1x80x128xf32>
      %10 = vector.shape_cast %9 : vector<1x80x128xf32> to vector<80x128xf32>
      %cst_7 = arith.constant dense<0.000000e+00> : vector<8x128xf32>
      %11 = tpu.matmul %8, %10, %cst_7 {dimension_numbers = #tpu.dot_dimension_numbers<[1], [0], [0], [1], [0, 0, 1, 1], [], []>} : vector<8x80xf32>, vector<80x128xf32>, vector<8x128xf32> -> vector<8x128xf32>
      %12 = arith.addf %2, %11 : vector<8x128xf32>
      %c0_i32_8 = arith.constant 0 : i32
      %13 = arith.addi %1, %c0_i32_8 : i32
      %c10_i32_9 = arith.constant 10 : i32
      %14 = arith.muli %13, %c10_i32_9 : i32
      %c1_i32_10 = arith.constant 1 : i32
      %15 = arith.addi %14, %c1_i32_10 : i32
      %c0_11 = arith.constant 0 : index
      %16 = arith.index_cast %15 : i32 to index
      %c0_12 = arith.constant 0 : index
      %17 = vector.load %arg1[%c0_11, %16, %c0_12] : memref<1x100x80xf32, #tpu.memory_space<vmem>>, vector<1x8x80xf32>
      %18 = vector.shape_cast %17 : vector<1x8x80xf32> to vector<8x80xf32>
      %c1 = arith.constant 1 : index
      %c0_13 = arith.constant 0 : index
      %c0_14 = arith.constant 0 : index
      %19 = vector.load %arg2[%c1, %c0_13, %c0_14] : memref<9x80x128xf32, #tpu.memory_space<vmem>>, vector<1x80x128xf32>
      %20 = vector.shape_cast %19 : vector<1x80x128xf32> to vector<80x128xf32>
      %cst_15 = arith.constant dense<0.000000e+00> : vector<8x128xf32>
      %21 = tpu.matmul %18, %20, %cst_15 {dimension_numbers = #tpu.dot_dimension_numbers<[1], [0], [0], [1], [0, 0, 1, 1], [], []>} : vector<8x80xf32>, vector<80x128xf32>, vector<8x128xf32> -> vector<8x128xf32>
      %22 = arith.addf %12, %21 : vector<8x128xf32>
      %c0_i32_16 = arith.constant 0 : i32
      %23 = arith.addi %1, %c0_i32_16 : i32
      %c10_i32_17 = arith.constant 10 : i32
      %24 = arith.muli %23, %c10_i32_17 : i32
      %c2_i32_18 = arith.constant 2 : i32
      %25 = arith.addi %24, %c2_i32_18 : i32
      %c0_19 = arith.constant 0 : index
      %26 = arith.index_cast %25 : i32 to index
      %c0_20 = arith.constant 0 : index
      %27 = vector.load %arg1[%c0_19, %26, %c0_20] : memref<1x100x80xf32, #tpu.memory_space<vmem>>, vector<1x8x80xf32>
      %28 = vector.shape_cast %27 : vector<1x8x80xf32> to vector<8x80xf32>
      %c2 = arith.constant 2 : index
      %c0_21 = arith.constant 0 : index
      %c0_22 = arith.constant 0 : index
      %29 = vector.load %arg2[%c2, %c0_21, %c0_22] : memref<9x80x128xf32, #tpu.memory_space<vmem>>, vector<1x80x128xf32>
      %30 = vector.shape_cast %29 : vector<1x80x128xf32> to vector<80x128xf32>
      %cst_23 = arith.constant dense<0.000000e+00> : vector<8x128xf32>
      %31 = tpu.matmul %28, %30, %cst_23 {dimension_numbers = #tpu.dot_dimension_numbers<[1], [0], [0], [1], [0, 0, 1, 1], [], []>} : vector<8x80xf32>, vector<80x128xf32>, vector<8x128xf32> -> vector<8x128xf32>
      %32 = arith.addf %22, %31 : vector<8x128xf32>
      %c1_i32_24 = arith.constant 1 : i32
      %33 = arith.addi %1, %c1_i32_24 : i32
      %c10_i32_25 = arith.constant 10 : i32
      %34 = arith.muli %33, %c10_i32_25 : i32
      %c0_i32_26 = arith.constant 0 : i32
      %35 = arith.addi %34, %c0_i32_26 : i32
      %c0_27 = arith.constant 0 : index
      %36 = arith.index_cast %35 : i32 to index
      %c0_28 = arith.constant 0 : index
      %37 = vector.load %arg1[%c0_27, %36, %c0_28] : memref<1x100x80xf32, #tpu.memory_space<vmem>>, vector<1x8x80xf32>
      %38 = vector.shape_cast %37 : vector<1x8x80xf32> to vector<8x80xf32>
      %c3 = arith.constant 3 : index
      %c0_29 = arith.constant 0 : index
      %c0_30 = arith.constant 0 : index
      %39 = vector.load %arg2[%c3, %c0_29, %c0_30] : memref<9x80x128xf32, #tpu.memory_space<vmem>>, vector<1x80x128xf32>
      %40 = vector.shape_cast %39 : vector<1x80x128xf32> to vector<80x128xf32>
      %cst_31 = arith.constant dense<0.000000e+00> : vector<8x128xf32>
      %41 = tpu.matmul %38, %40, %cst_31 {dimension_numbers = #tpu.dot_dimension_numbers<[1], [0], [0], [1], [0, 0, 1, 1], [], []>} : vector<8x80xf32>, vector<80x128xf32>, vector<8x128xf32> -> vector<8x128xf32>
      %42 = arith.addf %32, %41 : vector<8x128xf32>
      %c1_i32_32 = arith.constant 1 : i32
      %43 = arith.addi %1, %c1_i32_32 : i32
      %c10_i32_33 = arith.constant 10 : i32
      %44 = arith.muli %43, %c10_i32_33 : i32
      %c1_i32_34 = arith.constant 1 : i32
      %45 = arith.addi %44, %c1_i32_34 : i32
      %c0_35 = arith.constant 0 : index
      %46 = arith.index_cast %45 : i32 to index
      %c0_36 = arith.constant 0 : index
      %47 = vector.load %arg1[%c0_35, %46, %c0_36] : memref<1x100x80xf32, #tpu.memory_space<vmem>>, vector<1x8x80xf32>
      %48 = vector.shape_cast %47 : vector<1x8x80xf32> to vector<8x80xf32>
      %c4 = arith.constant 4 : index
      %c0_37 = arith.constant 0 : index
      %c0_38 = arith.constant 0 : index
      %49 = vector.load %arg2[%c4, %c0_37, %c0_38] : memref<9x80x128xf32, #tpu.memory_space<vmem>>, vector<1x80x128xf32>
      %50 = vector.shape_cast %49 : vector<1x80x128xf32> to vector<80x128xf32>
      %cst_39 = arith.constant dense<0.000000e+00> : vector<8x128xf32>
      %51 = tpu.matmul %48, %50, %cst_39 {dimension_numbers = #tpu.dot_dimension_numbers<[1], [0], [0], [1], [0, 0, 1, 1], [], []>} : vector<8x80xf32>, vector<80x128xf32>, vector<8x128xf32> -> vector<8x128xf32>
      %52 = arith.addf %42, %51 : vector<8x128xf32>
      %c1_i32_40 = arith.constant 1 : i32
      %53 = arith.addi %1, %c1_i32_40 : i32
      %c10_i32_41 = arith.constant 10 : i32
      %54 = arith.muli %53, %c10_i32_41 : i32
      %c2_i32_42 = arith.constant 2 : i32
      %55 = arith.addi %54, %c2_i32_42 : i32
      %c0_43 = arith.constant 0 : index
      %56 = arith.index_cast %55 : i32 to index
      %c0_44 = arith.constant 0 : index
      %57 = vector.load %arg1[%c0_43, %56, %c0_44] : memref<1x100x80xf32, #tpu.memory_space<vmem>>, vector<1x8x80xf32>
      %58 = vector.shape_cast %57 : vector<1x8x80xf32> to vector<8x80xf32>
      %c5 = arith.constant 5 : index
      %c0_45 = arith.constant 0 : index
      %c0_46 = arith.constant 0 : index
      %59 = vector.load %arg2[%c5, %c0_45, %c0_46] : memref<9x80x128xf32, #tpu.memory_space<vmem>>, vector<1x80x128xf32>
      %60 = vector.shape_cast %59 : vector<1x80x128xf32> to vector<80x128xf32>
      %cst_47 = arith.constant dense<0.000000e+00> : vector<8x128xf32>
      %61 = tpu.matmul %58, %60, %cst_47 {dimension_numbers = #tpu.dot_dimension_numbers<[1], [0], [0], [1], [0, 0, 1, 1], [], []>} : vector<8x80xf32>, vector<80x128xf32>, vector<8x128xf32> -> vector<8x128xf32>
      %62 = arith.addf %52, %61 : vector<8x128xf32>
      %c2_i32_48 = arith.constant 2 : i32
      %63 = arith.addi %1, %c2_i32_48 : i32
      %c10_i32_49 = arith.constant 10 : i32
      %64 = arith.muli %63, %c10_i32_49 : i32
      %c0_i32_50 = arith.constant 0 : i32
      %65 = arith.addi %64, %c0_i32_50 : i32
      %c0_51 = arith.constant 0 : index
      %66 = arith.index_cast %65 : i32 to index
      %c0_52 = arith.constant 0 : index
      %67 = vector.load %arg1[%c0_51, %66, %c0_52] : memref<1x100x80xf32, #tpu.memory_space<vmem>>, vector<1x8x80xf32>
      %68 = vector.shape_cast %67 : vector<1x8x80xf32> to vector<8x80xf32>
      %c6 = arith.constant 6 : index
      %c0_53 = arith.constant 0 : index
      %c0_54 = arith.constant 0 : index
      %69 = vector.load %arg2[%c6, %c0_53, %c0_54] : memref<9x80x128xf32, #tpu.memory_space<vmem>>, vector<1x80x128xf32>
      %70 = vector.shape_cast %69 : vector<1x80x128xf32> to vector<80x128xf32>
      %cst_55 = arith.constant dense<0.000000e+00> : vector<8x128xf32>
      %71 = tpu.matmul %68, %70, %cst_55 {dimension_numbers = #tpu.dot_dimension_numbers<[1], [0], [0], [1], [0, 0, 1, 1], [], []>} : vector<8x80xf32>, vector<80x128xf32>, vector<8x128xf32> -> vector<8x128xf32>
      %72 = arith.addf %62, %71 : vector<8x128xf32>
      %c2_i32_56 = arith.constant 2 : i32
      %73 = arith.addi %1, %c2_i32_56 : i32
      %c10_i32_57 = arith.constant 10 : i32
      %74 = arith.muli %73, %c10_i32_57 : i32
      %c1_i32_58 = arith.constant 1 : i32
      %75 = arith.addi %74, %c1_i32_58 : i32
      %c0_59 = arith.constant 0 : index
      %76 = arith.index_cast %75 : i32 to index
      %c0_60 = arith.constant 0 : index
      %77 = vector.load %arg1[%c0_59, %76, %c0_60] : memref<1x100x80xf32, #tpu.memory_space<vmem>>, vector<1x8x80xf32>
      %78 = vector.shape_cast %77 : vector<1x8x80xf32> to vector<8x80xf32>
      %c7 = arith.constant 7 : index
      %c0_61 = arith.constant 0 : index
      %c0_62 = arith.constant 0 : index
      %79 = vector.load %arg2[%c7, %c0_61, %c0_62] : memref<9x80x128xf32, #tpu.memory_space<vmem>>, vector<1x80x128xf32>
      %80 = vector.shape_cast %79 : vector<1x80x128xf32> to vector<80x128xf32>
      %cst_63 = arith.constant dense<0.000000e+00> : vector<8x128xf32>
      %81 = tpu.matmul %78, %80, %cst_63 {dimension_numbers = #tpu.dot_dimension_numbers<[1], [0], [0], [1], [0, 0, 1, 1], [], []>} : vector<8x80xf32>, vector<80x128xf32>, vector<8x128xf32> -> vector<8x128xf32>
      %82 = arith.addf %72, %81 : vector<8x128xf32>
      %c2_i32_64 = arith.constant 2 : i32
      %83 = arith.addi %1, %c2_i32_64 : i32
      %c10_i32_65 = arith.constant 10 : i32
      %84 = arith.muli %83, %c10_i32_65 : i32
      %c2_i32_66 = arith.constant 2 : i32
      %85 = arith.addi %84, %c2_i32_66 : i32
      %c0_67 = arith.constant 0 : index
      %86 = arith.index_cast %85 : i32 to index
      %c0_68 = arith.constant 0 : index
      %87 = vector.load %arg1[%c0_67, %86, %c0_68] : memref<1x100x80xf32, #tpu.memory_space<vmem>>, vector<1x8x80xf32>
      %88 = vector.shape_cast %87 : vector<1x8x80xf32> to vector<8x80xf32>
      %c8 = arith.constant 8 : index
      %c0_69 = arith.constant 0 : index
      %c0_70 = arith.constant 0 : index
      %89 = vector.load %arg2[%c8, %c0_69, %c0_70] : memref<9x80x128xf32, #tpu.memory_space<vmem>>, vector<1x80x128xf32>
      %90 = vector.shape_cast %89 : vector<1x80x128xf32> to vector<80x128xf32>
      %cst_71 = arith.constant dense<0.000000e+00> : vector<8x128xf32>
      %91 = tpu.matmul %88, %90, %cst_71 {dimension_numbers = #tpu.dot_dimension_numbers<[1], [0], [0], [1], [0, 0, 1, 1], [], []>} : vector<8x80xf32>, vector<80x128xf32>, vector<8x128xf32> -> vector<8x128xf32>
      %92 = arith.addf %82, %91 : vector<8x128xf32>
      %c2_i32_72 = arith.constant 2 : i32
      %93 = arith.muli %c2_i32_72, %arg5 : i32
      %c1_i32_73 = arith.constant 1 : i32
      %94 = arith.addi %93, %c1_i32_73 : i32
      %cst_74 = arith.constant 0.000000e+00 : f32
      %95 = vector.broadcast %cst_74 : f32 to vector<8x128xf32>
      %c0_i32_75 = arith.constant 0 : i32
      %96 = arith.addi %94, %c0_i32_75 : i32
      %c10_i32_76 = arith.constant 10 : i32
      %97 = arith.muli %96, %c10_i32_76 : i32
      %c0_i32_77 = arith.constant 0 : i32
      %98 = arith.addi %97, %c0_i32_77 : i32
      %c0_78 = arith.constant 0 : index
      %99 = arith.index_cast %98 : i32 to index
      %c0_79 = arith.constant 0 : index
      %100 = vector.load %arg1[%c0_78, %99, %c0_79] : memref<1x100x80xf32, #tpu.memory_space<vmem>>, vector<1x8x80xf32>
      %101 = vector.shape_cast %100 : vector<1x8x80xf32> to vector<8x80xf32>
      %c0_80 = arith.constant 0 : index
      %c0_81 = arith.constant 0 : index
      %c0_82 = arith.constant 0 : index
      %102 = vector.load %arg2[%c0_80, %c0_81, %c0_82] : memref<9x80x128xf32, #tpu.memory_space<vmem>>, vector<1x80x128xf32>
      %103 = vector.shape_cast %102 : vector<1x80x128xf32> to vector<80x128xf32>
      %cst_83 = arith.constant dense<0.000000e+00> : vector<8x128xf32>
      %104 = tpu.matmul %101, %103, %cst_83 {dimension_numbers = #tpu.dot_dimension_numbers<[1], [0], [0], [1], [0, 0, 1, 1], [], []>} : vector<8x80xf32>, vector<80x128xf32>, vector<8x128xf32> -> vector<8x128xf32>
      %105 = arith.addf %95, %104 : vector<8x128xf32>
      %c0_i32_84 = arith.constant 0 : i32
      %106 = arith.addi %94, %c0_i32_84 : i32
      %c10_i32_85 = arith.constant 10 : i32
      %107 = arith.muli %106, %c10_i32_85 : i32
      %c1_i32_86 = arith.constant 1 : i32
      %108 = arith.addi %107, %c1_i32_86 : i32
      %c0_87 = arith.constant 0 : index
      %109 = arith.index_cast %108 : i32 to index
      %c0_88 = arith.constant 0 : index
      %110 = vector.load %arg1[%c0_87, %109, %c0_88] : memref<1x100x80xf32, #tpu.memory_space<vmem>>, vector<1x8x80xf32>
      %111 = vector.shape_cast %110 : vector<1x8x80xf32> to vector<8x80xf32>
      %c1_89 = arith.constant 1 : index
      %c0_90 = arith.constant 0 : index
      %c0_91 = arith.constant 0 : index
      %112 = vector.load %arg2[%c1_89, %c0_90, %c0_91] : memref<9x80x128xf32, #tpu.memory_space<vmem>>, vector<1x80x128xf32>
      %113 = vector.shape_cast %112 : vector<1x80x128xf32> to vector<80x128xf32>
      %cst_92 = arith.constant dense<0.000000e+00> : vector<8x128xf32>
      %114 = tpu.matmul %111, %113, %cst_92 {dimension_numbers = #tpu.dot_dimension_numbers<[1], [0], [0], [1], [0, 0, 1, 1], [], []>} : vector<8x80xf32>, vector<80x128xf32>, vector<8x128xf32> -> vector<8x128xf32>
      %115 = arith.addf %105, %114 : vector<8x128xf32>
      %c0_i32_93 = arith.constant 0 : i32
      %116 = arith.addi %94, %c0_i32_93 : i32
      %c10_i32_94 = arith.constant 10 : i32
      %117 = arith.muli %116, %c10_i32_94 : i32
      %c2_i32_95 = arith.constant 2 : i32
      %118 = arith.addi %117, %c2_i32_95 : i32
      %c0_96 = arith.constant 0 : index
      %119 = arith.index_cast %118 : i32 to index
      %c0_97 = arith.constant 0 : index
      %120 = vector.load %arg1[%c0_96, %119, %c0_97] : memref<1x100x80xf32, #tpu.memory_space<vmem>>, vector<1x8x80xf32>
      %121 = vector.shape_cast %120 : vector<1x8x80xf32> to vector<8x80xf32>
      %c2_98 = arith.constant 2 : index
      %c0_99 = arith.constant 0 : index
      %c0_100 = arith.constant 0 : index
      %122 = vector.load %arg2[%c2_98, %c0_99, %c0_100] : memref<9x80x128xf32, #tpu.memory_space<vmem>>, vector<1x80x128xf32>
      %123 = vector.shape_cast %122 : vector<1x80x128xf32> to vector<80x128xf32>
      %cst_101 = arith.constant dense<0.000000e+00> : vector<8x128xf32>
      %124 = tpu.matmul %121, %123, %cst_101 {dimension_numbers = #tpu.dot_dimension_numbers<[1], [0], [0], [1], [0, 0, 1, 1], [], []>} : vector<8x80xf32>, vector<80x128xf32>, vector<8x128xf32> -> vector<8x128xf32>
      %125 = arith.addf %115, %124 : vector<8x128xf32>
      %c1_i32_102 = arith.constant 1 : i32
      %126 = arith.addi %94, %c1_i32_102 : i32
      %c10_i32_103 = arith.constant 10 : i32
      %127 = arith.muli %126, %c10_i32_103 : i32
      %c0_i32_104 = arith.constant 0 : i32
      %128 = arith.addi %127, %c0_i32_104 : i32
      %c0_105 = arith.constant 0 : index
      %129 = arith.index_cast %128 : i32 to index
      %c0_106 = arith.constant 0 : index
      %130 = vector.load %arg1[%c0_105, %129, %c0_106] : memref<1x100x80xf32, #tpu.memory_space<vmem>>, vector<1x8x80xf32>
      %131 = vector.shape_cast %130 : vector<1x8x80xf32> to vector<8x80xf32>
      %c3_107 = arith.constant 3 : index
      %c0_108 = arith.constant 0 : index
      %c0_109 = arith.constant 0 : index
      %132 = vector.load %arg2[%c3_107, %c0_108, %c0_109] : memref<9x80x128xf32, #tpu.memory_space<vmem>>, vector<1x80x128xf32>
      %133 = vector.shape_cast %132 : vector<1x80x128xf32> to vector<80x128xf32>
      %cst_110 = arith.constant dense<0.000000e+00> : vector<8x128xf32>
      %134 = tpu.matmul %131, %133, %cst_110 {dimension_numbers = #tpu.dot_dimension_numbers<[1], [0], [0], [1], [0, 0, 1, 1], [], []>} : vector<8x80xf32>, vector<80x128xf32>, vector<8x128xf32> -> vector<8x128xf32>
      %135 = arith.addf %125, %134 : vector<8x128xf32>
      %c1_i32_111 = arith.constant 1 : i32
      %136 = arith.addi %94, %c1_i32_111 : i32
      %c10_i32_112 = arith.constant 10 : i32
      %137 = arith.muli %136, %c10_i32_112 : i32
      %c1_i32_113 = arith.constant 1 : i32
      %138 = arith.addi %137, %c1_i32_113 : i32
      %c0_114 = arith.constant 0 : index
      %139 = arith.index_cast %138 : i32 to index
      %c0_115 = arith.constant 0 : index
      %140 = vector.load %arg1[%c0_114, %139, %c0_115] : memref<1x100x80xf32, #tpu.memory_space<vmem>>, vector<1x8x80xf32>
      %141 = vector.shape_cast %140 : vector<1x8x80xf32> to vector<8x80xf32>
      %c4_116 = arith.constant 4 : index
      %c0_117 = arith.constant 0 : index
      %c0_118 = arith.constant 0 : index
      %142 = vector.load %arg2[%c4_116, %c0_117, %c0_118] : memref<9x80x128xf32, #tpu.memory_space<vmem>>, vector<1x80x128xf32>
      %143 = vector.shape_cast %142 : vector<1x80x128xf32> to vector<80x128xf32>
      %cst_119 = arith.constant dense<0.000000e+00> : vector<8x128xf32>
      %144 = tpu.matmul %141, %143, %cst_119 {dimension_numbers = #tpu.dot_dimension_numbers<[1], [0], [0], [1], [0, 0, 1, 1], [], []>} : vector<8x80xf32>, vector<80x128xf32>, vector<8x128xf32> -> vector<8x128xf32>
      %145 = arith.addf %135, %144 : vector<8x128xf32>
      %c1_i32_120 = arith.constant 1 : i32
      %146 = arith.addi %94, %c1_i32_120 : i32
      %c10_i32_121 = arith.constant 10 : i32
      %147 = arith.muli %146, %c10_i32_121 : i32
      %c2_i32_122 = arith.constant 2 : i32
      %148 = arith.addi %147, %c2_i32_122 : i32
      %c0_123 = arith.constant 0 : index
      %149 = arith.index_cast %148 : i32 to index
      %c0_124 = arith.constant 0 : index
      %150 = vector.load %arg1[%c0_123, %149, %c0_124] : memref<1x100x80xf32, #tpu.memory_space<vmem>>, vector<1x8x80xf32>
      %151 = vector.shape_cast %150 : vector<1x8x80xf32> to vector<8x80xf32>
      %c5_125 = arith.constant 5 : index
      %c0_126 = arith.constant 0 : index
      %c0_127 = arith.constant 0 : index
      %152 = vector.load %arg2[%c5_125, %c0_126, %c0_127] : memref<9x80x128xf32, #tpu.memory_space<vmem>>, vector<1x80x128xf32>
      %153 = vector.shape_cast %152 : vector<1x80x128xf32> to vector<80x128xf32>
      %cst_128 = arith.constant dense<0.000000e+00> : vector<8x128xf32>
      %154 = tpu.matmul %151, %153, %cst_128 {dimension_numbers = #tpu.dot_dimension_numbers<[1], [0], [0], [1], [0, 0, 1, 1], [], []>} : vector<8x80xf32>, vector<80x128xf32>, vector<8x128xf32> -> vector<8x128xf32>
      %155 = arith.addf %145, %154 : vector<8x128xf32>
      %c2_i32_129 = arith.constant 2 : i32
      %156 = arith.addi %94, %c2_i32_129 : i32
      %c10_i32_130 = arith.constant 10 : i32
      %157 = arith.muli %156, %c10_i32_130 : i32
      %c0_i32_131 = arith.constant 0 : i32
      %158 = arith.addi %157, %c0_i32_131 : i32
      %c0_132 = arith.constant 0 : index
      %159 = arith.index_cast %158 : i32 to index
      %c0_133 = arith.constant 0 : index
      %160 = vector.load %arg1[%c0_132, %159, %c0_133] : memref<1x100x80xf32, #tpu.memory_space<vmem>>, vector<1x8x80xf32>
      %161 = vector.shape_cast %160 : vector<1x8x80xf32> to vector<8x80xf32>
      %c6_134 = arith.constant 6 : index
      %c0_135 = arith.constant 0 : index
      %c0_136 = arith.constant 0 : index
      %162 = vector.load %arg2[%c6_134, %c0_135, %c0_136] : memref<9x80x128xf32, #tpu.memory_space<vmem>>, vector<1x80x128xf32>
      %163 = vector.shape_cast %162 : vector<1x80x128xf32> to vector<80x128xf32>
      %cst_137 = arith.constant dense<0.000000e+00> : vector<8x128xf32>
      %164 = tpu.matmul %161, %163, %cst_137 {dimension_numbers = #tpu.dot_dimension_numbers<[1], [0], [0], [1], [0, 0, 1, 1], [], []>} : vector<8x80xf32>, vector<80x128xf32>, vector<8x128xf32> -> vector<8x128xf32>
      %165 = arith.addf %155, %164 : vector<8x128xf32>
      %c2_i32_138 = arith.constant 2 : i32
      %166 = arith.addi %94, %c2_i32_138 : i32
      %c10_i32_139 = arith.constant 10 : i32
      %167 = arith.muli %166, %c10_i32_139 : i32
      %c1_i32_140 = arith.constant 1 : i32
      %168 = arith.addi %167, %c1_i32_140 : i32
      %c0_141 = arith.constant 0 : index
      %169 = arith.index_cast %168 : i32 to index
      %c0_142 = arith.constant 0 : index
      %170 = vector.load %arg1[%c0_141, %169, %c0_142] : memref<1x100x80xf32, #tpu.memory_space<vmem>>, vector<1x8x80xf32>
      %171 = vector.shape_cast %170 : vector<1x8x80xf32> to vector<8x80xf32>
      %c7_143 = arith.constant 7 : index
      %c0_144 = arith.constant 0 : index
      %c0_145 = arith.constant 0 : index
      %172 = vector.load %arg2[%c7_143, %c0_144, %c0_145] : memref<9x80x128xf32, #tpu.memory_space<vmem>>, vector<1x80x128xf32>
      %173 = vector.shape_cast %172 : vector<1x80x128xf32> to vector<80x128xf32>
      %cst_146 = arith.constant dense<0.000000e+00> : vector<8x128xf32>
      %174 = tpu.matmul %171, %173, %cst_146 {dimension_numbers = #tpu.dot_dimension_numbers<[1], [0], [0], [1], [0, 0, 1, 1], [], []>} : vector<8x80xf32>, vector<80x128xf32>, vector<8x128xf32> -> vector<8x128xf32>
      %175 = arith.addf %165, %174 : vector<8x128xf32>
      %c2_i32_147 = arith.constant 2 : i32
      %176 = arith.addi %94, %c2_i32_147 : i32
      %c10_i32_148 = arith.constant 10 : i32
      %177 = arith.muli %176, %c10_i32_148 : i32
      %c2_i32_149 = arith.constant 2 : i32
      %178 = arith.addi %177, %c2_i32_149 : i32
      %c0_150 = arith.constant 0 : index
      %179 = arith.index_cast %178 : i32 to index
      %c0_151 = arith.constant 0 : index
      %180 = vector.load %arg1[%c0_150, %179, %c0_151] : memref<1x100x80xf32, #tpu.memory_space<vmem>>, vector<1x8x80xf32>
      %181 = vector.shape_cast %180 : vector<1x8x80xf32> to vector<8x80xf32>
      %c8_152 = arith.constant 8 : index
      %c0_153 = arith.constant 0 : index
      %c0_154 = arith.constant 0 : index
      %182 = vector.load %arg2[%c8_152, %c0_153, %c0_154] : memref<9x80x128xf32, #tpu.memory_space<vmem>>, vector<1x80x128xf32>
      %183 = vector.shape_cast %182 : vector<1x80x128xf32> to vector<80x128xf32>
      %cst_155 = arith.constant dense<0.000000e+00> : vector<8x128xf32>
      %184 = tpu.matmul %181, %183, %cst_155 {dimension_numbers = #tpu.dot_dimension_numbers<[1], [0], [0], [1], [0, 0, 1, 1], [], []>} : vector<8x80xf32>, vector<80x128xf32>, vector<8x128xf32> -> vector<8x128xf32>
      %185 = arith.addf %175, %184 : vector<8x128xf32>
      %186 = arith.maximumf %92, %185 : vector<8x128xf32>
      %187 = vector.extract_strided_slice %186 {offsets = [0, 0], sizes = [8, 64], strides = [1, 1]} : vector<8x128xf32> to vector<8x64xf32>
      %188 = vector.extract_strided_slice %186 {offsets = [0, 64], sizes = [8, 64], strides = [1, 1]} : vector<8x128xf32> to vector<8x64xf32>
      %189 = arith.maximumf %187, %188 : vector<8x64xf32>
      %c0_156 = arith.constant 0 : index
      %c0_157 = arith.constant 0 : index
      %190 = vector.load %arg3[%c0_156, %c0_157] : memref<1x64xf32, #tpu.memory_space<vmem>>, vector<1x64xf32>
      %191 = vector.broadcast %190 : vector<1x64xf32> to vector<8x64xf32>
      %192 = arith.addf %189, %191 : vector<8x64xf32>
      %cst_158 = arith.constant 0.000000e+00 : f32
      %193 = vector.broadcast %cst_158 : f32 to vector<8x64xf32>
      %194 = arith.cmpf oge, %192, %193 : vector<8x64xf32>
      %cst_159 = arith.constant 2.000000e-01 : f32
      %195 = vector.broadcast %cst_159 : f32 to vector<8x64xf32>
      %196 = arith.mulf %195, %192 : vector<8x64xf32>
      %197 = arith.select %194, %192, %196 : vector<8x64xi1>, vector<8x64xf32>
      %c8_i32 = arith.constant 8 : i32
      %198 = arith.muli %arg5, %c8_i32 : i32
      %199 = tpu.assume_multiple %198, 8 : i32
      %c0_160 = arith.constant 0 : index
      %200 = arith.index_cast %199 : i32 to index
      %c0_161 = arith.constant 0 : index
      %201 = vector.load %arg4[%c0_160, %200, %c0_161] : memref<1x32x64xf32, #tpu.memory_space<vmem>>, vector<1x8x64xf32>
      %202 = vector.shape_cast %201 : vector<1x8x64xf32> to vector<8x64xf32>
      %203 = vector.shape_cast %197 : vector<8x64xf32> to vector<1x8x64xf32>
      tpu.vector_store %arg4[%c0_160, %200, %c0_161], %203 {strides = array<i32>} : memref<1x32x64xf32, #tpu.memory_space<vmem>>, vector<1x8x64xf32>,
    }
    %c4_i32_0 = arith.constant 4 : i32
    return
  }
  func.func @transform_0(%arg0: i32) -> (i32, i32, i32) {
    %c0_i32 = arith.constant 0 : i32
    %c0_i32_0 = arith.constant 0 : i32
    %c0_i32_1 = arith.constant 0 : i32
    return %arg0, %c0_i32, %c0_i32_0 : i32, i32, i32
  }
  func.func @transform_1(%arg0: i32) -> (i32, i32, i32) {
    %c0_i32 = arith.constant 0 : i32
    %c0_i32_0 = arith.constant 0 : i32
    %c0_i32_1 = arith.constant 0 : i32
    %c0_i32_2 = arith.constant 0 : i32
    return %c0_i32, %c0_i32_0, %c0_i32_1 : i32, i32, i32
  }
  func.func @transform_2(%arg0: i32) -> (i32, i32) {
    %c0_i32 = arith.constant 0 : i32
    %c0_i32_0 = arith.constant 0 : i32
    %c0_i32_1 = arith.constant 0 : i32
    return %c0_i32, %c0_i32_0 : i32, i32
  }
  func.func @transform_3(%arg0: i32) -> (i32, i32, i32) {
    %c0_i32 = arith.constant 0 : i32
    %c0_i32_0 = arith.constant 0 : i32
    %c0_i32_1 = arith.constant 0 : i32
    return %arg0, %c0_i32, %c0_i32_0 : i32, i32, i32
  }
}

module attributes {stable_mosaic.version = 11 : i64} {
  func.func @kernel(%arg0: i32, %arg1: memref<1x36x96xf32, #tpu.memory_space<vmem>>, %arg2: memref<9x96x128xf32, #tpu.memory_space<vmem>>, %arg3: memref<1x64xf32, #tpu.memory_space<vmem>>, %arg4: memref<1x8x64xf32, #tpu.memory_space<vmem>>) attributes {dimension_semantics = [#tpu.dimension_semantics<parallel>], iteration_bounds = array<i64: 2>, scalar_prefetch = 0 : i64, scratch_operands = 0 : i64, tpu.core_type = #tpu.core_type<tc>, window_params = [{transform_indices = @transform_0, window_bounds = array<i64: 1, 36, 96>}, {pipeline_mode = #tpu.pipeline_mode<synchronous>, transform_indices = @transform_1, window_bounds = array<i64: 9, 96, 128>}, {pipeline_mode = #tpu.pipeline_mode<synchronous>, transform_indices = @transform_2, window_bounds = array<i64: 1, 64>}, {transform_indices = @transform_3, window_bounds = array<i64: 1, 8, 64>}]} {
    %c0_i32 = arith.constant 0 : i32
    %c2_i32 = arith.constant 2 : i32
    %0 = arith.addi %c0_i32, %c2_i32 : i32
    %c1_i32 = arith.constant 1 : i32
    scf.for %arg5 = %c0_i32 to %0 step %c1_i32  : i32 {
      %c2_i32_1 = arith.constant 2 : i32
      %1 = arith.muli %c2_i32_1, %arg5 : i32
      %cst = arith.constant 0.000000e+00 : f32
      %2 = vector.broadcast %cst : f32 to vector<4x128xf32>
      %c0_i32_2 = arith.constant 0 : i32
      %3 = arith.addi %1, %c0_i32_2 : i32
      %c6_i32 = arith.constant 6 : i32
      %4 = arith.muli %3, %c6_i32 : i32
      %c0_i32_3 = arith.constant 0 : i32
      %5 = arith.addi %4, %c0_i32_3 : i32
      %c0 = arith.constant 0 : index
      %6 = arith.index_cast %5 : i32 to index
      %c0_4 = arith.constant 0 : index
      %7 = vector.load %arg1[%c0, %6, %c0_4] : memref<1x36x96xf32, #tpu.memory_space<vmem>>, vector<1x4x96xf32>
      %8 = vector.shape_cast %7 : vector<1x4x96xf32> to vector<4x96xf32>
      %c0_5 = arith.constant 0 : index
      %c0_6 = arith.constant 0 : index
      %c0_7 = arith.constant 0 : index
      %9 = vector.load %arg2[%c0_5, %c0_6, %c0_7] : memref<9x96x128xf32, #tpu.memory_space<vmem>>, vector<1x96x128xf32>
      %10 = vector.shape_cast %9 : vector<1x96x128xf32> to vector<96x128xf32>
      %cst_8 = arith.constant dense<0.000000e+00> : vector<4x128xf32>
      %11 = tpu.matmul %8, %10, %cst_8 {dimension_numbers = #tpu.dot_dimension_numbers<[1], [0], [0], [1], [0, 0, 1, 1], [], []>} : vector<4x96xf32>, vector<96x128xf32>, vector<4x128xf32> -> vector<4x128xf32>
      %12 = arith.addf %2, %11 : vector<4x128xf32>
      %c0_i32_9 = arith.constant 0 : i32
      %13 = arith.addi %1, %c0_i32_9 : i32
      %c6_i32_10 = arith.constant 6 : i32
      %14 = arith.muli %13, %c6_i32_10 : i32
      %c1_i32_11 = arith.constant 1 : i32
      %15 = arith.addi %14, %c1_i32_11 : i32
      %c0_12 = arith.constant 0 : index
      %16 = arith.index_cast %15 : i32 to index
      %c0_13 = arith.constant 0 : index
      %17 = vector.load %arg1[%c0_12, %16, %c0_13] : memref<1x36x96xf32, #tpu.memory_space<vmem>>, vector<1x4x96xf32>
      %18 = vector.shape_cast %17 : vector<1x4x96xf32> to vector<4x96xf32>
      %c1 = arith.constant 1 : index
      %c0_14 = arith.constant 0 : index
      %c0_15 = arith.constant 0 : index
      %19 = vector.load %arg2[%c1, %c0_14, %c0_15] : memref<9x96x128xf32, #tpu.memory_space<vmem>>, vector<1x96x128xf32>
      %20 = vector.shape_cast %19 : vector<1x96x128xf32> to vector<96x128xf32>
      %cst_16 = arith.constant dense<0.000000e+00> : vector<4x128xf32>
      %21 = tpu.matmul %18, %20, %cst_16 {dimension_numbers = #tpu.dot_dimension_numbers<[1], [0], [0], [1], [0, 0, 1, 1], [], []>} : vector<4x96xf32>, vector<96x128xf32>, vector<4x128xf32> -> vector<4x128xf32>
      %22 = arith.addf %12, %21 : vector<4x128xf32>
      %c0_i32_17 = arith.constant 0 : i32
      %23 = arith.addi %1, %c0_i32_17 : i32
      %c6_i32_18 = arith.constant 6 : i32
      %24 = arith.muli %23, %c6_i32_18 : i32
      %c2_i32_19 = arith.constant 2 : i32
      %25 = arith.addi %24, %c2_i32_19 : i32
      %c0_20 = arith.constant 0 : index
      %26 = arith.index_cast %25 : i32 to index
      %c0_21 = arith.constant 0 : index
      %27 = vector.load %arg1[%c0_20, %26, %c0_21] : memref<1x36x96xf32, #tpu.memory_space<vmem>>, vector<1x4x96xf32>
      %28 = vector.shape_cast %27 : vector<1x4x96xf32> to vector<4x96xf32>
      %c2 = arith.constant 2 : index
      %c0_22 = arith.constant 0 : index
      %c0_23 = arith.constant 0 : index
      %29 = vector.load %arg2[%c2, %c0_22, %c0_23] : memref<9x96x128xf32, #tpu.memory_space<vmem>>, vector<1x96x128xf32>
      %30 = vector.shape_cast %29 : vector<1x96x128xf32> to vector<96x128xf32>
      %cst_24 = arith.constant dense<0.000000e+00> : vector<4x128xf32>
      %31 = tpu.matmul %28, %30, %cst_24 {dimension_numbers = #tpu.dot_dimension_numbers<[1], [0], [0], [1], [0, 0, 1, 1], [], []>} : vector<4x96xf32>, vector<96x128xf32>, vector<4x128xf32> -> vector<4x128xf32>
      %32 = arith.addf %22, %31 : vector<4x128xf32>
      %c1_i32_25 = arith.constant 1 : i32
      %33 = arith.addi %1, %c1_i32_25 : i32
      %c6_i32_26 = arith.constant 6 : i32
      %34 = arith.muli %33, %c6_i32_26 : i32
      %c0_i32_27 = arith.constant 0 : i32
      %35 = arith.addi %34, %c0_i32_27 : i32
      %c0_28 = arith.constant 0 : index
      %36 = arith.index_cast %35 : i32 to index
      %c0_29 = arith.constant 0 : index
      %37 = vector.load %arg1[%c0_28, %36, %c0_29] : memref<1x36x96xf32, #tpu.memory_space<vmem>>, vector<1x4x96xf32>
      %38 = vector.shape_cast %37 : vector<1x4x96xf32> to vector<4x96xf32>
      %c3 = arith.constant 3 : index
      %c0_30 = arith.constant 0 : index
      %c0_31 = arith.constant 0 : index
      %39 = vector.load %arg2[%c3, %c0_30, %c0_31] : memref<9x96x128xf32, #tpu.memory_space<vmem>>, vector<1x96x128xf32>
      %40 = vector.shape_cast %39 : vector<1x96x128xf32> to vector<96x128xf32>
      %cst_32 = arith.constant dense<0.000000e+00> : vector<4x128xf32>
      %41 = tpu.matmul %38, %40, %cst_32 {dimension_numbers = #tpu.dot_dimension_numbers<[1], [0], [0], [1], [0, 0, 1, 1], [], []>} : vector<4x96xf32>, vector<96x128xf32>, vector<4x128xf32> -> vector<4x128xf32>
      %42 = arith.addf %32, %41 : vector<4x128xf32>
      %c1_i32_33 = arith.constant 1 : i32
      %43 = arith.addi %1, %c1_i32_33 : i32
      %c6_i32_34 = arith.constant 6 : i32
      %44 = arith.muli %43, %c6_i32_34 : i32
      %c1_i32_35 = arith.constant 1 : i32
      %45 = arith.addi %44, %c1_i32_35 : i32
      %c0_36 = arith.constant 0 : index
      %46 = arith.index_cast %45 : i32 to index
      %c0_37 = arith.constant 0 : index
      %47 = vector.load %arg1[%c0_36, %46, %c0_37] : memref<1x36x96xf32, #tpu.memory_space<vmem>>, vector<1x4x96xf32>
      %48 = vector.shape_cast %47 : vector<1x4x96xf32> to vector<4x96xf32>
      %c4 = arith.constant 4 : index
      %c0_38 = arith.constant 0 : index
      %c0_39 = arith.constant 0 : index
      %49 = vector.load %arg2[%c4, %c0_38, %c0_39] : memref<9x96x128xf32, #tpu.memory_space<vmem>>, vector<1x96x128xf32>
      %50 = vector.shape_cast %49 : vector<1x96x128xf32> to vector<96x128xf32>
      %cst_40 = arith.constant dense<0.000000e+00> : vector<4x128xf32>
      %51 = tpu.matmul %48, %50, %cst_40 {dimension_numbers = #tpu.dot_dimension_numbers<[1], [0], [0], [1], [0, 0, 1, 1], [], []>} : vector<4x96xf32>, vector<96x128xf32>, vector<4x128xf32> -> vector<4x128xf32>
      %52 = arith.addf %42, %51 : vector<4x128xf32>
      %c1_i32_41 = arith.constant 1 : i32
      %53 = arith.addi %1, %c1_i32_41 : i32
      %c6_i32_42 = arith.constant 6 : i32
      %54 = arith.muli %53, %c6_i32_42 : i32
      %c2_i32_43 = arith.constant 2 : i32
      %55 = arith.addi %54, %c2_i32_43 : i32
      %c0_44 = arith.constant 0 : index
      %56 = arith.index_cast %55 : i32 to index
      %c0_45 = arith.constant 0 : index
      %57 = vector.load %arg1[%c0_44, %56, %c0_45] : memref<1x36x96xf32, #tpu.memory_space<vmem>>, vector<1x4x96xf32>
      %58 = vector.shape_cast %57 : vector<1x4x96xf32> to vector<4x96xf32>
      %c5 = arith.constant 5 : index
      %c0_46 = arith.constant 0 : index
      %c0_47 = arith.constant 0 : index
      %59 = vector.load %arg2[%c5, %c0_46, %c0_47] : memref<9x96x128xf32, #tpu.memory_space<vmem>>, vector<1x96x128xf32>
      %60 = vector.shape_cast %59 : vector<1x96x128xf32> to vector<96x128xf32>
      %cst_48 = arith.constant dense<0.000000e+00> : vector<4x128xf32>
      %61 = tpu.matmul %58, %60, %cst_48 {dimension_numbers = #tpu.dot_dimension_numbers<[1], [0], [0], [1], [0, 0, 1, 1], [], []>} : vector<4x96xf32>, vector<96x128xf32>, vector<4x128xf32> -> vector<4x128xf32>
      %62 = arith.addf %52, %61 : vector<4x128xf32>
      %c2_i32_49 = arith.constant 2 : i32
      %63 = arith.addi %1, %c2_i32_49 : i32
      %c6_i32_50 = arith.constant 6 : i32
      %64 = arith.muli %63, %c6_i32_50 : i32
      %c0_i32_51 = arith.constant 0 : i32
      %65 = arith.addi %64, %c0_i32_51 : i32
      %c0_52 = arith.constant 0 : index
      %66 = arith.index_cast %65 : i32 to index
      %c0_53 = arith.constant 0 : index
      %67 = vector.load %arg1[%c0_52, %66, %c0_53] : memref<1x36x96xf32, #tpu.memory_space<vmem>>, vector<1x4x96xf32>
      %68 = vector.shape_cast %67 : vector<1x4x96xf32> to vector<4x96xf32>
      %c6 = arith.constant 6 : index
      %c0_54 = arith.constant 0 : index
      %c0_55 = arith.constant 0 : index
      %69 = vector.load %arg2[%c6, %c0_54, %c0_55] : memref<9x96x128xf32, #tpu.memory_space<vmem>>, vector<1x96x128xf32>
      %70 = vector.shape_cast %69 : vector<1x96x128xf32> to vector<96x128xf32>
      %cst_56 = arith.constant dense<0.000000e+00> : vector<4x128xf32>
      %71 = tpu.matmul %68, %70, %cst_56 {dimension_numbers = #tpu.dot_dimension_numbers<[1], [0], [0], [1], [0, 0, 1, 1], [], []>} : vector<4x96xf32>, vector<96x128xf32>, vector<4x128xf32> -> vector<4x128xf32>
      %72 = arith.addf %62, %71 : vector<4x128xf32>
      %c2_i32_57 = arith.constant 2 : i32
      %73 = arith.addi %1, %c2_i32_57 : i32
      %c6_i32_58 = arith.constant 6 : i32
      %74 = arith.muli %73, %c6_i32_58 : i32
      %c1_i32_59 = arith.constant 1 : i32
      %75 = arith.addi %74, %c1_i32_59 : i32
      %c0_60 = arith.constant 0 : index
      %76 = arith.index_cast %75 : i32 to index
      %c0_61 = arith.constant 0 : index
      %77 = vector.load %arg1[%c0_60, %76, %c0_61] : memref<1x36x96xf32, #tpu.memory_space<vmem>>, vector<1x4x96xf32>
      %78 = vector.shape_cast %77 : vector<1x4x96xf32> to vector<4x96xf32>
      %c7 = arith.constant 7 : index
      %c0_62 = arith.constant 0 : index
      %c0_63 = arith.constant 0 : index
      %79 = vector.load %arg2[%c7, %c0_62, %c0_63] : memref<9x96x128xf32, #tpu.memory_space<vmem>>, vector<1x96x128xf32>
      %80 = vector.shape_cast %79 : vector<1x96x128xf32> to vector<96x128xf32>
      %cst_64 = arith.constant dense<0.000000e+00> : vector<4x128xf32>
      %81 = tpu.matmul %78, %80, %cst_64 {dimension_numbers = #tpu.dot_dimension_numbers<[1], [0], [0], [1], [0, 0, 1, 1], [], []>} : vector<4x96xf32>, vector<96x128xf32>, vector<4x128xf32> -> vector<4x128xf32>
      %82 = arith.addf %72, %81 : vector<4x128xf32>
      %c2_i32_65 = arith.constant 2 : i32
      %83 = arith.addi %1, %c2_i32_65 : i32
      %c6_i32_66 = arith.constant 6 : i32
      %84 = arith.muli %83, %c6_i32_66 : i32
      %c2_i32_67 = arith.constant 2 : i32
      %85 = arith.addi %84, %c2_i32_67 : i32
      %c0_68 = arith.constant 0 : index
      %86 = arith.index_cast %85 : i32 to index
      %c0_69 = arith.constant 0 : index
      %87 = vector.load %arg1[%c0_68, %86, %c0_69] : memref<1x36x96xf32, #tpu.memory_space<vmem>>, vector<1x4x96xf32>
      %88 = vector.shape_cast %87 : vector<1x4x96xf32> to vector<4x96xf32>
      %c8 = arith.constant 8 : index
      %c0_70 = arith.constant 0 : index
      %c0_71 = arith.constant 0 : index
      %89 = vector.load %arg2[%c8, %c0_70, %c0_71] : memref<9x96x128xf32, #tpu.memory_space<vmem>>, vector<1x96x128xf32>
      %90 = vector.shape_cast %89 : vector<1x96x128xf32> to vector<96x128xf32>
      %cst_72 = arith.constant dense<0.000000e+00> : vector<4x128xf32>
      %91 = tpu.matmul %88, %90, %cst_72 {dimension_numbers = #tpu.dot_dimension_numbers<[1], [0], [0], [1], [0, 0, 1, 1], [], []>} : vector<4x96xf32>, vector<96x128xf32>, vector<4x128xf32> -> vector<4x128xf32>
      %92 = arith.addf %82, %91 : vector<4x128xf32>
      %c2_i32_73 = arith.constant 2 : i32
      %93 = arith.muli %c2_i32_73, %arg5 : i32
      %c1_i32_74 = arith.constant 1 : i32
      %94 = arith.addi %93, %c1_i32_74 : i32
      %cst_75 = arith.constant 0.000000e+00 : f32
      %95 = vector.broadcast %cst_75 : f32 to vector<4x128xf32>
      %c0_i32_76 = arith.constant 0 : i32
      %96 = arith.addi %94, %c0_i32_76 : i32
      %c6_i32_77 = arith.constant 6 : i32
      %97 = arith.muli %96, %c6_i32_77 : i32
      %c0_i32_78 = arith.constant 0 : i32
      %98 = arith.addi %97, %c0_i32_78 : i32
      %c0_79 = arith.constant 0 : index
      %99 = arith.index_cast %98 : i32 to index
      %c0_80 = arith.constant 0 : index
      %100 = vector.load %arg1[%c0_79, %99, %c0_80] : memref<1x36x96xf32, #tpu.memory_space<vmem>>, vector<1x4x96xf32>
      %101 = vector.shape_cast %100 : vector<1x4x96xf32> to vector<4x96xf32>
      %c0_81 = arith.constant 0 : index
      %c0_82 = arith.constant 0 : index
      %c0_83 = arith.constant 0 : index
      %102 = vector.load %arg2[%c0_81, %c0_82, %c0_83] : memref<9x96x128xf32, #tpu.memory_space<vmem>>, vector<1x96x128xf32>
      %103 = vector.shape_cast %102 : vector<1x96x128xf32> to vector<96x128xf32>
      %cst_84 = arith.constant dense<0.000000e+00> : vector<4x128xf32>
      %104 = tpu.matmul %101, %103, %cst_84 {dimension_numbers = #tpu.dot_dimension_numbers<[1], [0], [0], [1], [0, 0, 1, 1], [], []>} : vector<4x96xf32>, vector<96x128xf32>, vector<4x128xf32> -> vector<4x128xf32>
      %105 = arith.addf %95, %104 : vector<4x128xf32>
      %c0_i32_85 = arith.constant 0 : i32
      %106 = arith.addi %94, %c0_i32_85 : i32
      %c6_i32_86 = arith.constant 6 : i32
      %107 = arith.muli %106, %c6_i32_86 : i32
      %c1_i32_87 = arith.constant 1 : i32
      %108 = arith.addi %107, %c1_i32_87 : i32
      %c0_88 = arith.constant 0 : index
      %109 = arith.index_cast %108 : i32 to index
      %c0_89 = arith.constant 0 : index
      %110 = vector.load %arg1[%c0_88, %109, %c0_89] : memref<1x36x96xf32, #tpu.memory_space<vmem>>, vector<1x4x96xf32>
      %111 = vector.shape_cast %110 : vector<1x4x96xf32> to vector<4x96xf32>
      %c1_90 = arith.constant 1 : index
      %c0_91 = arith.constant 0 : index
      %c0_92 = arith.constant 0 : index
      %112 = vector.load %arg2[%c1_90, %c0_91, %c0_92] : memref<9x96x128xf32, #tpu.memory_space<vmem>>, vector<1x96x128xf32>
      %113 = vector.shape_cast %112 : vector<1x96x128xf32> to vector<96x128xf32>
      %cst_93 = arith.constant dense<0.000000e+00> : vector<4x128xf32>
      %114 = tpu.matmul %111, %113, %cst_93 {dimension_numbers = #tpu.dot_dimension_numbers<[1], [0], [0], [1], [0, 0, 1, 1], [], []>} : vector<4x96xf32>, vector<96x128xf32>, vector<4x128xf32> -> vector<4x128xf32>
      %115 = arith.addf %105, %114 : vector<4x128xf32>
      %c0_i32_94 = arith.constant 0 : i32
      %116 = arith.addi %94, %c0_i32_94 : i32
      %c6_i32_95 = arith.constant 6 : i32
      %117 = arith.muli %116, %c6_i32_95 : i32
      %c2_i32_96 = arith.constant 2 : i32
      %118 = arith.addi %117, %c2_i32_96 : i32
      %c0_97 = arith.constant 0 : index
      %119 = arith.index_cast %118 : i32 to index
      %c0_98 = arith.constant 0 : index
      %120 = vector.load %arg1[%c0_97, %119, %c0_98] : memref<1x36x96xf32, #tpu.memory_space<vmem>>, vector<1x4x96xf32>
      %121 = vector.shape_cast %120 : vector<1x4x96xf32> to vector<4x96xf32>
      %c2_99 = arith.constant 2 : index
      %c0_100 = arith.constant 0 : index
      %c0_101 = arith.constant 0 : index
      %122 = vector.load %arg2[%c2_99, %c0_100, %c0_101] : memref<9x96x128xf32, #tpu.memory_space<vmem>>, vector<1x96x128xf32>
      %123 = vector.shape_cast %122 : vector<1x96x128xf32> to vector<96x128xf32>
      %cst_102 = arith.constant dense<0.000000e+00> : vector<4x128xf32>
      %124 = tpu.matmul %121, %123, %cst_102 {dimension_numbers = #tpu.dot_dimension_numbers<[1], [0], [0], [1], [0, 0, 1, 1], [], []>} : vector<4x96xf32>, vector<96x128xf32>, vector<4x128xf32> -> vector<4x128xf32>
      %125 = arith.addf %115, %124 : vector<4x128xf32>
      %c1_i32_103 = arith.constant 1 : i32
      %126 = arith.addi %94, %c1_i32_103 : i32
      %c6_i32_104 = arith.constant 6 : i32
      %127 = arith.muli %126, %c6_i32_104 : i32
      %c0_i32_105 = arith.constant 0 : i32
      %128 = arith.addi %127, %c0_i32_105 : i32
      %c0_106 = arith.constant 0 : index
      %129 = arith.index_cast %128 : i32 to index
      %c0_107 = arith.constant 0 : index
      %130 = vector.load %arg1[%c0_106, %129, %c0_107] : memref<1x36x96xf32, #tpu.memory_space<vmem>>, vector<1x4x96xf32>
      %131 = vector.shape_cast %130 : vector<1x4x96xf32> to vector<4x96xf32>
      %c3_108 = arith.constant 3 : index
      %c0_109 = arith.constant 0 : index
      %c0_110 = arith.constant 0 : index
      %132 = vector.load %arg2[%c3_108, %c0_109, %c0_110] : memref<9x96x128xf32, #tpu.memory_space<vmem>>, vector<1x96x128xf32>
      %133 = vector.shape_cast %132 : vector<1x96x128xf32> to vector<96x128xf32>
      %cst_111 = arith.constant dense<0.000000e+00> : vector<4x128xf32>
      %134 = tpu.matmul %131, %133, %cst_111 {dimension_numbers = #tpu.dot_dimension_numbers<[1], [0], [0], [1], [0, 0, 1, 1], [], []>} : vector<4x96xf32>, vector<96x128xf32>, vector<4x128xf32> -> vector<4x128xf32>
      %135 = arith.addf %125, %134 : vector<4x128xf32>
      %c1_i32_112 = arith.constant 1 : i32
      %136 = arith.addi %94, %c1_i32_112 : i32
      %c6_i32_113 = arith.constant 6 : i32
      %137 = arith.muli %136, %c6_i32_113 : i32
      %c1_i32_114 = arith.constant 1 : i32
      %138 = arith.addi %137, %c1_i32_114 : i32
      %c0_115 = arith.constant 0 : index
      %139 = arith.index_cast %138 : i32 to index
      %c0_116 = arith.constant 0 : index
      %140 = vector.load %arg1[%c0_115, %139, %c0_116] : memref<1x36x96xf32, #tpu.memory_space<vmem>>, vector<1x4x96xf32>
      %141 = vector.shape_cast %140 : vector<1x4x96xf32> to vector<4x96xf32>
      %c4_117 = arith.constant 4 : index
      %c0_118 = arith.constant 0 : index
      %c0_119 = arith.constant 0 : index
      %142 = vector.load %arg2[%c4_117, %c0_118, %c0_119] : memref<9x96x128xf32, #tpu.memory_space<vmem>>, vector<1x96x128xf32>
      %143 = vector.shape_cast %142 : vector<1x96x128xf32> to vector<96x128xf32>
      %cst_120 = arith.constant dense<0.000000e+00> : vector<4x128xf32>
      %144 = tpu.matmul %141, %143, %cst_120 {dimension_numbers = #tpu.dot_dimension_numbers<[1], [0], [0], [1], [0, 0, 1, 1], [], []>} : vector<4x96xf32>, vector<96x128xf32>, vector<4x128xf32> -> vector<4x128xf32>
      %145 = arith.addf %135, %144 : vector<4x128xf32>
      %c1_i32_121 = arith.constant 1 : i32
      %146 = arith.addi %94, %c1_i32_121 : i32
      %c6_i32_122 = arith.constant 6 : i32
      %147 = arith.muli %146, %c6_i32_122 : i32
      %c2_i32_123 = arith.constant 2 : i32
      %148 = arith.addi %147, %c2_i32_123 : i32
      %c0_124 = arith.constant 0 : index
      %149 = arith.index_cast %148 : i32 to index
      %c0_125 = arith.constant 0 : index
      %150 = vector.load %arg1[%c0_124, %149, %c0_125] : memref<1x36x96xf32, #tpu.memory_space<vmem>>, vector<1x4x96xf32>
      %151 = vector.shape_cast %150 : vector<1x4x96xf32> to vector<4x96xf32>
      %c5_126 = arith.constant 5 : index
      %c0_127 = arith.constant 0 : index
      %c0_128 = arith.constant 0 : index
      %152 = vector.load %arg2[%c5_126, %c0_127, %c0_128] : memref<9x96x128xf32, #tpu.memory_space<vmem>>, vector<1x96x128xf32>
      %153 = vector.shape_cast %152 : vector<1x96x128xf32> to vector<96x128xf32>
      %cst_129 = arith.constant dense<0.000000e+00> : vector<4x128xf32>
      %154 = tpu.matmul %151, %153, %cst_129 {dimension_numbers = #tpu.dot_dimension_numbers<[1], [0], [0], [1], [0, 0, 1, 1], [], []>} : vector<4x96xf32>, vector<96x128xf32>, vector<4x128xf32> -> vector<4x128xf32>
      %155 = arith.addf %145, %154 : vector<4x128xf32>
      %c2_i32_130 = arith.constant 2 : i32
      %156 = arith.addi %94, %c2_i32_130 : i32
      %c6_i32_131 = arith.constant 6 : i32
      %157 = arith.muli %156, %c6_i32_131 : i32
      %c0_i32_132 = arith.constant 0 : i32
      %158 = arith.addi %157, %c0_i32_132 : i32
      %c0_133 = arith.constant 0 : index
      %159 = arith.index_cast %158 : i32 to index
      %c0_134 = arith.constant 0 : index
      %160 = vector.load %arg1[%c0_133, %159, %c0_134] : memref<1x36x96xf32, #tpu.memory_space<vmem>>, vector<1x4x96xf32>
      %161 = vector.shape_cast %160 : vector<1x4x96xf32> to vector<4x96xf32>
      %c6_135 = arith.constant 6 : index
      %c0_136 = arith.constant 0 : index
      %c0_137 = arith.constant 0 : index
      %162 = vector.load %arg2[%c6_135, %c0_136, %c0_137] : memref<9x96x128xf32, #tpu.memory_space<vmem>>, vector<1x96x128xf32>
      %163 = vector.shape_cast %162 : vector<1x96x128xf32> to vector<96x128xf32>
      %cst_138 = arith.constant dense<0.000000e+00> : vector<4x128xf32>
      %164 = tpu.matmul %161, %163, %cst_138 {dimension_numbers = #tpu.dot_dimension_numbers<[1], [0], [0], [1], [0, 0, 1, 1], [], []>} : vector<4x96xf32>, vector<96x128xf32>, vector<4x128xf32> -> vector<4x128xf32>
      %165 = arith.addf %155, %164 : vector<4x128xf32>
      %c2_i32_139 = arith.constant 2 : i32
      %166 = arith.addi %94, %c2_i32_139 : i32
      %c6_i32_140 = arith.constant 6 : i32
      %167 = arith.muli %166, %c6_i32_140 : i32
      %c1_i32_141 = arith.constant 1 : i32
      %168 = arith.addi %167, %c1_i32_141 : i32
      %c0_142 = arith.constant 0 : index
      %169 = arith.index_cast %168 : i32 to index
      %c0_143 = arith.constant 0 : index
      %170 = vector.load %arg1[%c0_142, %169, %c0_143] : memref<1x36x96xf32, #tpu.memory_space<vmem>>, vector<1x4x96xf32>
      %171 = vector.shape_cast %170 : vector<1x4x96xf32> to vector<4x96xf32>
      %c7_144 = arith.constant 7 : index
      %c0_145 = arith.constant 0 : index
      %c0_146 = arith.constant 0 : index
      %172 = vector.load %arg2[%c7_144, %c0_145, %c0_146] : memref<9x96x128xf32, #tpu.memory_space<vmem>>, vector<1x96x128xf32>
      %173 = vector.shape_cast %172 : vector<1x96x128xf32> to vector<96x128xf32>
      %cst_147 = arith.constant dense<0.000000e+00> : vector<4x128xf32>
      %174 = tpu.matmul %171, %173, %cst_147 {dimension_numbers = #tpu.dot_dimension_numbers<[1], [0], [0], [1], [0, 0, 1, 1], [], []>} : vector<4x96xf32>, vector<96x128xf32>, vector<4x128xf32> -> vector<4x128xf32>
      %175 = arith.addf %165, %174 : vector<4x128xf32>
      %c2_i32_148 = arith.constant 2 : i32
      %176 = arith.addi %94, %c2_i32_148 : i32
      %c6_i32_149 = arith.constant 6 : i32
      %177 = arith.muli %176, %c6_i32_149 : i32
      %c2_i32_150 = arith.constant 2 : i32
      %178 = arith.addi %177, %c2_i32_150 : i32
      %c0_151 = arith.constant 0 : index
      %179 = arith.index_cast %178 : i32 to index
      %c0_152 = arith.constant 0 : index
      %180 = vector.load %arg1[%c0_151, %179, %c0_152] : memref<1x36x96xf32, #tpu.memory_space<vmem>>, vector<1x4x96xf32>
      %181 = vector.shape_cast %180 : vector<1x4x96xf32> to vector<4x96xf32>
      %c8_153 = arith.constant 8 : index
      %c0_154 = arith.constant 0 : index
      %c0_155 = arith.constant 0 : index
      %182 = vector.load %arg2[%c8_153, %c0_154, %c0_155] : memref<9x96x128xf32, #tpu.memory_space<vmem>>, vector<1x96x128xf32>
      %183 = vector.shape_cast %182 : vector<1x96x128xf32> to vector<96x128xf32>
      %cst_156 = arith.constant dense<0.000000e+00> : vector<4x128xf32>
      %184 = tpu.matmul %181, %183, %cst_156 {dimension_numbers = #tpu.dot_dimension_numbers<[1], [0], [0], [1], [0, 0, 1, 1], [], []>} : vector<4x96xf32>, vector<96x128xf32>, vector<4x128xf32> -> vector<4x128xf32>
      %185 = arith.addf %175, %184 : vector<4x128xf32>
      %186 = arith.maximumf %92, %185 : vector<4x128xf32>
      %187 = vector.extract_strided_slice %186 {offsets = [0, 0], sizes = [4, 64], strides = [1, 1]} : vector<4x128xf32> to vector<4x64xf32>
      %188 = vector.extract_strided_slice %186 {offsets = [0, 64], sizes = [4, 64], strides = [1, 1]} : vector<4x128xf32> to vector<4x64xf32>
      %189 = arith.maximumf %187, %188 : vector<4x64xf32>
      %c0_157 = arith.constant 0 : index
      %c0_158 = arith.constant 0 : index
      %190 = vector.load %arg3[%c0_157, %c0_158] : memref<1x64xf32, #tpu.memory_space<vmem>>, vector<1x64xf32>
      %191 = vector.broadcast %190 : vector<1x64xf32> to vector<4x64xf32>
      %192 = arith.addf %189, %191 : vector<4x64xf32>
      %cst_159 = arith.constant 0.000000e+00 : f32
      %193 = vector.broadcast %cst_159 : f32 to vector<4x64xf32>
      %194 = arith.cmpf oge, %192, %193 : vector<4x64xf32>
      %cst_160 = arith.constant 2.000000e-01 : f32
      %195 = vector.broadcast %cst_160 : f32 to vector<4x64xf32>
      %196 = arith.mulf %195, %192 : vector<4x64xf32>
      %197 = arith.select %194, %192, %196 : vector<4x64xi1>, vector<4x64xf32>
      %c4_i32 = arith.constant 4 : i32
      %198 = arith.muli %arg5, %c4_i32 : i32
      %199 = tpu.assume_multiple %198, 4 : i32
      %c0_161 = arith.constant 0 : index
      %200 = arith.index_cast %199 : i32 to index
      %c0_162 = arith.constant 0 : index
      %201 = vector.load %arg4[%c0_161, %200, %c0_162] : memref<1x8x64xf32, #tpu.memory_space<vmem>>, vector<1x4x64xf32>
      %202 = vector.shape_cast %201 : vector<1x4x64xf32> to vector<4x64xf32>
      %203 = vector.shape_cast %197 : vector<4x64xf32> to vector<1x4x64xf32>
      tpu.vector_store %arg4[%c0_161, %200, %c0_162], %203 {strides = array<i32>} : memref<1x8x64xf32, #tpu.memory_space<vmem>>, vector<1x4x64xf32>,
    }
    %c2_i32_0 = arith.constant 2 : i32
    return
  }
  func.func @transform_0(%arg0: i32) -> (i32, i32, i32) {
    %c0_i32 = arith.constant 0 : i32
    %c0_i32_0 = arith.constant 0 : i32
    %c0_i32_1 = arith.constant 0 : i32
    return %arg0, %c0_i32, %c0_i32_0 : i32, i32, i32
  }
  func.func @transform_1(%arg0: i32) -> (i32, i32, i32) {
    %c0_i32 = arith.constant 0 : i32
    %c0_i32_0 = arith.constant 0 : i32
    %c0_i32_1 = arith.constant 0 : i32
    %c0_i32_2 = arith.constant 0 : i32
    return %c0_i32, %c0_i32_0, %c0_i32_1 : i32, i32, i32
  }
  func.func @transform_2(%arg0: i32) -> (i32, i32) {
    %c0_i32 = arith.constant 0 : i32
    %c0_i32_0 = arith.constant 0 : i32
    %c0_i32_1 = arith.constant 0 : i32
    return %c0_i32, %c0_i32_0 : i32, i32
  }
  func.func @transform_3(%arg0: i32) -> (i32, i32, i32) {
    %c0_i32 = arith.constant 0 : i32
    %c0_i32_0 = arith.constant 0 : i32
    %c0_i32_1 = arith.constant 0 : i32
    return %arg0, %c0_i32, %c0_i32_0 : i32, i32, i32
  }
}

module attributes {stable_mosaic.version = 11 : i64} {
  func.func @kernel(%arg0: i32, %arg1: memref<1x16x128xf32, #tpu.memory_space<vmem>>, %arg2: memref<9x128x128xf32, #tpu.memory_space<vmem>>, %arg3: memref<1x64xf32, #tpu.memory_space<vmem>>, %arg4: memref<3x64x32xf32, #tpu.memory_space<vmem>>, %arg5: memref<3x1x32xf32, #tpu.memory_space<vmem>>, %arg6: memref<3x32x16xf32, #tpu.memory_space<vmem>>, %arg7: memref<3x1x16xf32, #tpu.memory_space<vmem>>, %arg8: memref<3x16x4xf32, #tpu.memory_space<vmem>>, %arg9: memref<3x1x4xf32, #tpu.memory_space<vmem>>, %arg10: memref<1x3x4xf32, #tpu.memory_space<vmem>>) attributes {dimension_semantics = [#tpu.dimension_semantics<parallel>], iteration_bounds = array<i64: 2>, scalar_prefetch = 0 : i64, scratch_operands = 0 : i64, tpu.core_type = #tpu.core_type<tc>, window_params = [{transform_indices = @transform_0, window_bounds = array<i64: 1, 16, 128>}, {pipeline_mode = #tpu.pipeline_mode<synchronous>, transform_indices = @transform_1, window_bounds = array<i64: 9, 128, 128>}, {pipeline_mode = #tpu.pipeline_mode<synchronous>, transform_indices = @transform_2, window_bounds = array<i64: 1, 64>}, {pipeline_mode = #tpu.pipeline_mode<synchronous>, transform_indices = @transform_3, window_bounds = array<i64: 3, 64, 32>}, {pipeline_mode = #tpu.pipeline_mode<synchronous>, transform_indices = @transform_4, window_bounds = array<i64: 3, 1, 32>}, {pipeline_mode = #tpu.pipeline_mode<synchronous>, transform_indices = @transform_5, window_bounds = array<i64: 3, 32, 16>}, {pipeline_mode = #tpu.pipeline_mode<synchronous>, transform_indices = @transform_6, window_bounds = array<i64: 3, 1, 16>}, {pipeline_mode = #tpu.pipeline_mode<synchronous>, transform_indices = @transform_7, window_bounds = array<i64: 3, 16, 4>}, {pipeline_mode = #tpu.pipeline_mode<synchronous>, transform_indices = @transform_8, window_bounds = array<i64: 3, 1, 4>}, {transform_indices = @transform_9, window_bounds = array<i64: 1, 3, 4>}]} {
    %cst = arith.constant 0.000000e+00 : f32
    %0 = vector.broadcast %cst : f32 to vector<2x128xf32>
    %c0 = arith.constant 0 : index
    %c0_0 = arith.constant 0 : index
    %c0_1 = arith.constant 0 : index
    %1 = vector.load %arg1[%c0, %c0_0, %c0_1] : memref<1x16x128xf32, #tpu.memory_space<vmem>>, vector<1x2x128xf32>
    %2 = vector.shape_cast %1 : vector<1x2x128xf32> to vector<2x128xf32>
    %c0_2 = arith.constant 0 : index
    %c0_3 = arith.constant 0 : index
    %c0_4 = arith.constant 0 : index
    %3 = vector.load %arg2[%c0_2, %c0_3, %c0_4] : memref<9x128x128xf32, #tpu.memory_space<vmem>>, vector<1x128x128xf32>
    %4 = vector.shape_cast %3 : vector<1x128x128xf32> to vector<128x128xf32>
    %cst_5 = arith.constant dense<0.000000e+00> : vector<2x128xf32>
    %5 = tpu.matmul %2, %4, %cst_5 {dimension_numbers = #tpu.dot_dimension_numbers<[1], [0], [0], [1], [0, 0, 1, 1], [], []>} : vector<2x128xf32>, vector<128x128xf32>, vector<2x128xf32> -> vector<2x128xf32>
    %6 = arith.addf %0, %5 : vector<2x128xf32>
    %c0_6 = arith.constant 0 : index
    %c1 = arith.constant 1 : index
    %c0_7 = arith.constant 0 : index
    %7 = vector.load %arg1[%c0_6, %c1, %c0_7] : memref<1x16x128xf32, #tpu.memory_space<vmem>>, vector<1x2x128xf32>
    %8 = vector.shape_cast %7 : vector<1x2x128xf32> to vector<2x128xf32>
    %c1_8 = arith.constant 1 : index
    %c0_9 = arith.constant 0 : index
    %c0_10 = arith.constant 0 : index
    %9 = vector.load %arg2[%c1_8, %c0_9, %c0_10] : memref<9x128x128xf32, #tpu.memory_space<vmem>>, vector<1x128x128xf32>
    %10 = vector.shape_cast %9 : vector<1x128x128xf32> to vector<128x128xf32>
    %cst_11 = arith.constant dense<0.000000e+00> : vector<2x128xf32>
    %11 = tpu.matmul %8, %10, %cst_11 {dimension_numbers = #tpu.dot_dimension_numbers<[1], [0], [0], [1], [0, 0, 1, 1], [], []>} : vector<2x128xf32>, vector<128x128xf32>, vector<2x128xf32> -> vector<2x128xf32>
    %12 = arith.addf %6, %11 : vector<2x128xf32>
    %c0_12 = arith.constant 0 : index
    %c2 = arith.constant 2 : index
    %c0_13 = arith.constant 0 : index
    %13 = vector.load %arg1[%c0_12, %c2, %c0_13] : memref<1x16x128xf32, #tpu.memory_space<vmem>>, vector<1x2x128xf32>
    %14 = vector.shape_cast %13 : vector<1x2x128xf32> to vector<2x128xf32>
    %c2_14 = arith.constant 2 : index
    %c0_15 = arith.constant 0 : index
    %c0_16 = arith.constant 0 : index
    %15 = vector.load %arg2[%c2_14, %c0_15, %c0_16] : memref<9x128x128xf32, #tpu.memory_space<vmem>>, vector<1x128x128xf32>
    %16 = vector.shape_cast %15 : vector<1x128x128xf32> to vector<128x128xf32>
    %cst_17 = arith.constant dense<0.000000e+00> : vector<2x128xf32>
    %17 = tpu.matmul %14, %16, %cst_17 {dimension_numbers = #tpu.dot_dimension_numbers<[1], [0], [0], [1], [0, 0, 1, 1], [], []>} : vector<2x128xf32>, vector<128x128xf32>, vector<2x128xf32> -> vector<2x128xf32>
    %18 = arith.addf %12, %17 : vector<2x128xf32>
    %c0_18 = arith.constant 0 : index
    %c4 = arith.constant 4 : index
    %c0_19 = arith.constant 0 : index
    %19 = vector.load %arg1[%c0_18, %c4, %c0_19] : memref<1x16x128xf32, #tpu.memory_space<vmem>>, vector<1x2x128xf32>
    %20 = vector.shape_cast %19 : vector<1x2x128xf32> to vector<2x128xf32>
    %c3 = arith.constant 3 : index
    %c0_20 = arith.constant 0 : index
    %c0_21 = arith.constant 0 : index
    %21 = vector.load %arg2[%c3, %c0_20, %c0_21] : memref<9x128x128xf32, #tpu.memory_space<vmem>>, vector<1x128x128xf32>
    %22 = vector.shape_cast %21 : vector<1x128x128xf32> to vector<128x128xf32>
    %cst_22 = arith.constant dense<0.000000e+00> : vector<2x128xf32>
    %23 = tpu.matmul %20, %22, %cst_22 {dimension_numbers = #tpu.dot_dimension_numbers<[1], [0], [0], [1], [0, 0, 1, 1], [], []>} : vector<2x128xf32>, vector<128x128xf32>, vector<2x128xf32> -> vector<2x128xf32>
    %24 = arith.addf %18, %23 : vector<2x128xf32>
    %c0_23 = arith.constant 0 : index
    %c5 = arith.constant 5 : index
    %c0_24 = arith.constant 0 : index
    %25 = vector.load %arg1[%c0_23, %c5, %c0_24] : memref<1x16x128xf32, #tpu.memory_space<vmem>>, vector<1x2x128xf32>
    %26 = vector.shape_cast %25 : vector<1x2x128xf32> to vector<2x128xf32>
    %c4_25 = arith.constant 4 : index
    %c0_26 = arith.constant 0 : index
    %c0_27 = arith.constant 0 : index
    %27 = vector.load %arg2[%c4_25, %c0_26, %c0_27] : memref<9x128x128xf32, #tpu.memory_space<vmem>>, vector<1x128x128xf32>
    %28 = vector.shape_cast %27 : vector<1x128x128xf32> to vector<128x128xf32>
    %cst_28 = arith.constant dense<0.000000e+00> : vector<2x128xf32>
    %29 = tpu.matmul %26, %28, %cst_28 {dimension_numbers = #tpu.dot_dimension_numbers<[1], [0], [0], [1], [0, 0, 1, 1], [], []>} : vector<2x128xf32>, vector<128x128xf32>, vector<2x128xf32> -> vector<2x128xf32>
    %30 = arith.addf %24, %29 : vector<2x128xf32>
    %c0_29 = arith.constant 0 : index
    %c6 = arith.constant 6 : index
    %c0_30 = arith.constant 0 : index
    %31 = vector.load %arg1[%c0_29, %c6, %c0_30] : memref<1x16x128xf32, #tpu.memory_space<vmem>>, vector<1x2x128xf32>
    %32 = vector.shape_cast %31 : vector<1x2x128xf32> to vector<2x128xf32>
    %c5_31 = arith.constant 5 : index
    %c0_32 = arith.constant 0 : index
    %c0_33 = arith.constant 0 : index
    %33 = vector.load %arg2[%c5_31, %c0_32, %c0_33] : memref<9x128x128xf32, #tpu.memory_space<vmem>>, vector<1x128x128xf32>
    %34 = vector.shape_cast %33 : vector<1x128x128xf32> to vector<128x128xf32>
    %cst_34 = arith.constant dense<0.000000e+00> : vector<2x128xf32>
    %35 = tpu.matmul %32, %34, %cst_34 {dimension_numbers = #tpu.dot_dimension_numbers<[1], [0], [0], [1], [0, 0, 1, 1], [], []>} : vector<2x128xf32>, vector<128x128xf32>, vector<2x128xf32> -> vector<2x128xf32>
    %36 = arith.addf %30, %35 : vector<2x128xf32>
    %c0_35 = arith.constant 0 : index
    %c8 = arith.constant 8 : index
    %c0_36 = arith.constant 0 : index
    %37 = vector.load %arg1[%c0_35, %c8, %c0_36] : memref<1x16x128xf32, #tpu.memory_space<vmem>>, vector<1x2x128xf32>
    %38 = vector.shape_cast %37 : vector<1x2x128xf32> to vector<2x128xf32>
    %c6_37 = arith.constant 6 : index
    %c0_38 = arith.constant 0 : index
    %c0_39 = arith.constant 0 : index
    %39 = vector.load %arg2[%c6_37, %c0_38, %c0_39] : memref<9x128x128xf32, #tpu.memory_space<vmem>>, vector<1x128x128xf32>
    %40 = vector.shape_cast %39 : vector<1x128x128xf32> to vector<128x128xf32>
    %cst_40 = arith.constant dense<0.000000e+00> : vector<2x128xf32>
    %41 = tpu.matmul %38, %40, %cst_40 {dimension_numbers = #tpu.dot_dimension_numbers<[1], [0], [0], [1], [0, 0, 1, 1], [], []>} : vector<2x128xf32>, vector<128x128xf32>, vector<2x128xf32> -> vector<2x128xf32>
    %42 = arith.addf %36, %41 : vector<2x128xf32>
    %c0_41 = arith.constant 0 : index
    %c9 = arith.constant 9 : index
    %c0_42 = arith.constant 0 : index
    %43 = vector.load %arg1[%c0_41, %c9, %c0_42] : memref<1x16x128xf32, #tpu.memory_space<vmem>>, vector<1x2x128xf32>
    %44 = vector.shape_cast %43 : vector<1x2x128xf32> to vector<2x128xf32>
    %c7 = arith.constant 7 : index
    %c0_43 = arith.constant 0 : index
    %c0_44 = arith.constant 0 : index
    %45 = vector.load %arg2[%c7, %c0_43, %c0_44] : memref<9x128x128xf32, #tpu.memory_space<vmem>>, vector<1x128x128xf32>
    %46 = vector.shape_cast %45 : vector<1x128x128xf32> to vector<128x128xf32>
    %cst_45 = arith.constant dense<0.000000e+00> : vector<2x128xf32>
    %47 = tpu.matmul %44, %46, %cst_45 {dimension_numbers = #tpu.dot_dimension_numbers<[1], [0], [0], [1], [0, 0, 1, 1], [], []>} : vector<2x128xf32>, vector<128x128xf32>, vector<2x128xf32> -> vector<2x128xf32>
    %48 = arith.addf %42, %47 : vector<2x128xf32>
    %c0_46 = arith.constant 0 : index
    %c10 = arith.constant 10 : index
    %c0_47 = arith.constant 0 : index
    %49 = vector.load %arg1[%c0_46, %c10, %c0_47] : memref<1x16x128xf32, #tpu.memory_space<vmem>>, vector<1x2x128xf32>
    %50 = vector.shape_cast %49 : vector<1x2x128xf32> to vector<2x128xf32>
    %c8_48 = arith.constant 8 : index
    %c0_49 = arith.constant 0 : index
    %c0_50 = arith.constant 0 : index
    %51 = vector.load %arg2[%c8_48, %c0_49, %c0_50] : memref<9x128x128xf32, #tpu.memory_space<vmem>>, vector<1x128x128xf32>
    %52 = vector.shape_cast %51 : vector<1x128x128xf32> to vector<128x128xf32>
    %cst_51 = arith.constant dense<0.000000e+00> : vector<2x128xf32>
    %53 = tpu.matmul %50, %52, %cst_51 {dimension_numbers = #tpu.dot_dimension_numbers<[1], [0], [0], [1], [0, 0, 1, 1], [], []>} : vector<2x128xf32>, vector<128x128xf32>, vector<2x128xf32> -> vector<2x128xf32>
    %54 = arith.addf %48, %53 : vector<2x128xf32>
    %cst_52 = arith.constant 0.000000e+00 : f32
    %55 = vector.broadcast %cst_52 : f32 to vector<2x128xf32>
    %c0_53 = arith.constant 0 : index
    %c4_54 = arith.constant 4 : index
    %c0_55 = arith.constant 0 : index
    %56 = vector.load %arg1[%c0_53, %c4_54, %c0_55] : memref<1x16x128xf32, #tpu.memory_space<vmem>>, vector<1x2x128xf32>
    %57 = vector.shape_cast %56 : vector<1x2x128xf32> to vector<2x128xf32>
    %c0_56 = arith.constant 0 : index
    %c0_57 = arith.constant 0 : index
    %c0_58 = arith.constant 0 : index
    %58 = vector.load %arg2[%c0_56, %c0_57, %c0_58] : memref<9x128x128xf32, #tpu.memory_space<vmem>>, vector<1x128x128xf32>
    %59 = vector.shape_cast %58 : vector<1x128x128xf32> to vector<128x128xf32>
    %cst_59 = arith.constant dense<0.000000e+00> : vector<2x128xf32>
    %60 = tpu.matmul %57, %59, %cst_59 {dimension_numbers = #tpu.dot_dimension_numbers<[1], [0], [0], [1], [0, 0, 1, 1], [], []>} : vector<2x128xf32>, vector<128x128xf32>, vector<2x128xf32> -> vector<2x128xf32>
    %61 = arith.addf %55, %60 : vector<2x128xf32>
    %c0_60 = arith.constant 0 : index
    %c5_61 = arith.constant 5 : index
    %c0_62 = arith.constant 0 : index
    %62 = vector.load %arg1[%c0_60, %c5_61, %c0_62] : memref<1x16x128xf32, #tpu.memory_space<vmem>>, vector<1x2x128xf32>
    %63 = vector.shape_cast %62 : vector<1x2x128xf32> to vector<2x128xf32>
    %c1_63 = arith.constant 1 : index
    %c0_64 = arith.constant 0 : index
    %c0_65 = arith.constant 0 : index
    %64 = vector.load %arg2[%c1_63, %c0_64, %c0_65] : memref<9x128x128xf32, #tpu.memory_space<vmem>>, vector<1x128x128xf32>
    %65 = vector.shape_cast %64 : vector<1x128x128xf32> to vector<128x128xf32>
    %cst_66 = arith.constant dense<0.000000e+00> : vector<2x128xf32>
    %66 = tpu.matmul %63, %65, %cst_66 {dimension_numbers = #tpu.dot_dimension_numbers<[1], [0], [0], [1], [0, 0, 1, 1], [], []>} : vector<2x128xf32>, vector<128x128xf32>, vector<2x128xf32> -> vector<2x128xf32>
    %67 = arith.addf %61, %66 : vector<2x128xf32>
    %c0_67 = arith.constant 0 : index
    %c6_68 = arith.constant 6 : index
    %c0_69 = arith.constant 0 : index
    %68 = vector.load %arg1[%c0_67, %c6_68, %c0_69] : memref<1x16x128xf32, #tpu.memory_space<vmem>>, vector<1x2x128xf32>
    %69 = vector.shape_cast %68 : vector<1x2x128xf32> to vector<2x128xf32>
    %c2_70 = arith.constant 2 : index
    %c0_71 = arith.constant 0 : index
    %c0_72 = arith.constant 0 : index
    %70 = vector.load %arg2[%c2_70, %c0_71, %c0_72] : memref<9x128x128xf32, #tpu.memory_space<vmem>>, vector<1x128x128xf32>
    %71 = vector.shape_cast %70 : vector<1x128x128xf32> to vector<128x128xf32>
    %cst_73 = arith.constant dense<0.000000e+00> : vector<2x128xf32>
    %72 = tpu.matmul %69, %71, %cst_73 {dimension_numbers = #tpu.dot_dimension_numbers<[1], [0], [0], [1], [0, 0, 1, 1], [], []>} : vector<2x128xf32>, vector<128x128xf32>, vector<2x128xf32> -> vector<2x128xf32>
    %73 = arith.addf %67, %72 : vector<2x128xf32>
    %c0_74 = arith.constant 0 : index
    %c8_75 = arith.constant 8 : index
    %c0_76 = arith.constant 0 : index
    %74 = vector.load %arg1[%c0_74, %c8_75, %c0_76] : memref<1x16x128xf32, #tpu.memory_space<vmem>>, vector<1x2x128xf32>
    %75 = vector.shape_cast %74 : vector<1x2x128xf32> to vector<2x128xf32>
    %c3_77 = arith.constant 3 : index
    %c0_78 = arith.constant 0 : index
    %c0_79 = arith.constant 0 : index
    %76 = vector.load %arg2[%c3_77, %c0_78, %c0_79] : memref<9x128x128xf32, #tpu.memory_space<vmem>>, vector<1x128x128xf32>
    %77 = vector.shape_cast %76 : vector<1x128x128xf32> to vector<128x128xf32>
    %cst_80 = arith.constant dense<0.000000e+00> : vector<2x128xf32>
    %78 = tpu.matmul %75, %77, %cst_80 {dimension_numbers = #tpu.dot_dimension_numbers<[1], [0], [0], [1], [0, 0, 1, 1], [], []>} : vector<2x128xf32>, vector<128x128xf32>, vector<2x128xf32> -> vector<2x128xf32>
    %79 = arith.addf %73, %78 : vector<2x128xf32>
    %c0_81 = arith.constant 0 : index
    %c9_82 = arith.constant 9 : index
    %c0_83 = arith.constant 0 : index
    %80 = vector.load %arg1[%c0_81, %c9_82, %c0_83] : memref<1x16x128xf32, #tpu.memory_space<vmem>>, vector<1x2x128xf32>
    %81 = vector.shape_cast %80 : vector<1x2x128xf32> to vector<2x128xf32>
    %c4_84 = arith.constant 4 : index
    %c0_85 = arith.constant 0 : index
    %c0_86 = arith.constant 0 : index
    %82 = vector.load %arg2[%c4_84, %c0_85, %c0_86] : memref<9x128x128xf32, #tpu.memory_space<vmem>>, vector<1x128x128xf32>
    %83 = vector.shape_cast %82 : vector<1x128x128xf32> to vector<128x128xf32>
    %cst_87 = arith.constant dense<0.000000e+00> : vector<2x128xf32>
    %84 = tpu.matmul %81, %83, %cst_87 {dimension_numbers = #tpu.dot_dimension_numbers<[1], [0], [0], [1], [0, 0, 1, 1], [], []>} : vector<2x128xf32>, vector<128x128xf32>, vector<2x128xf32> -> vector<2x128xf32>
    %85 = arith.addf %79, %84 : vector<2x128xf32>
    %c0_88 = arith.constant 0 : index
    %c10_89 = arith.constant 10 : index
    %c0_90 = arith.constant 0 : index
    %86 = vector.load %arg1[%c0_88, %c10_89, %c0_90] : memref<1x16x128xf32, #tpu.memory_space<vmem>>, vector<1x2x128xf32>
    %87 = vector.shape_cast %86 : vector<1x2x128xf32> to vector<2x128xf32>
    %c5_91 = arith.constant 5 : index
    %c0_92 = arith.constant 0 : index
    %c0_93 = arith.constant 0 : index
    %88 = vector.load %arg2[%c5_91, %c0_92, %c0_93] : memref<9x128x128xf32, #tpu.memory_space<vmem>>, vector<1x128x128xf32>
    %89 = vector.shape_cast %88 : vector<1x128x128xf32> to vector<128x128xf32>
    %cst_94 = arith.constant dense<0.000000e+00> : vector<2x128xf32>
    %90 = tpu.matmul %87, %89, %cst_94 {dimension_numbers = #tpu.dot_dimension_numbers<[1], [0], [0], [1], [0, 0, 1, 1], [], []>} : vector<2x128xf32>, vector<128x128xf32>, vector<2x128xf32> -> vector<2x128xf32>
    %91 = arith.addf %85, %90 : vector<2x128xf32>
    %c0_95 = arith.constant 0 : index
    %c12 = arith.constant 12 : index
    %c0_96 = arith.constant 0 : index
    %92 = vector.load %arg1[%c0_95, %c12, %c0_96] : memref<1x16x128xf32, #tpu.memory_space<vmem>>, vector<1x2x128xf32>
    %93 = vector.shape_cast %92 : vector<1x2x128xf32> to vector<2x128xf32>
    %c6_97 = arith.constant 6 : index
    %c0_98 = arith.constant 0 : index
    %c0_99 = arith.constant 0 : index
    %94 = vector.load %arg2[%c6_97, %c0_98, %c0_99] : memref<9x128x128xf32, #tpu.memory_space<vmem>>, vector<1x128x128xf32>
    %95 = vector.shape_cast %94 : vector<1x128x128xf32> to vector<128x128xf32>
    %cst_100 = arith.constant dense<0.000000e+00> : vector<2x128xf32>
    %96 = tpu.matmul %93, %95, %cst_100 {dimension_numbers = #tpu.dot_dimension_numbers<[1], [0], [0], [1], [0, 0, 1, 1], [], []>} : vector<2x128xf32>, vector<128x128xf32>, vector<2x128xf32> -> vector<2x128xf32>
    %97 = arith.addf %91, %96 : vector<2x128xf32>
    %c0_101 = arith.constant 0 : index
    %c13 = arith.constant 13 : index
    %c0_102 = arith.constant 0 : index
    %98 = vector.load %arg1[%c0_101, %c13, %c0_102] : memref<1x16x128xf32, #tpu.memory_space<vmem>>, vector<1x2x128xf32>
    %99 = vector.shape_cast %98 : vector<1x2x128xf32> to vector<2x128xf32>
    %c7_103 = arith.constant 7 : index
    %c0_104 = arith.constant 0 : index
    %c0_105 = arith.constant 0 : index
    %100 = vector.load %arg2[%c7_103, %c0_104, %c0_105] : memref<9x128x128xf32, #tpu.memory_space<vmem>>, vector<1x128x128xf32>
    %101 = vector.shape_cast %100 : vector<1x128x128xf32> to vector<128x128xf32>
    %cst_106 = arith.constant dense<0.000000e+00> : vector<2x128xf32>
    %102 = tpu.matmul %99, %101, %cst_106 {dimension_numbers = #tpu.dot_dimension_numbers<[1], [0], [0], [1], [0, 0, 1, 1], [], []>} : vector<2x128xf32>, vector<128x128xf32>, vector<2x128xf32> -> vector<2x128xf32>
    %103 = arith.addf %97, %102 : vector<2x128xf32>
    %c0_107 = arith.constant 0 : index
    %c14 = arith.constant 14 : index
    %c0_108 = arith.constant 0 : index
    %104 = vector.load %arg1[%c0_107, %c14, %c0_108] : memref<1x16x128xf32, #tpu.memory_space<vmem>>, vector<1x2x128xf32>
    %105 = vector.shape_cast %104 : vector<1x2x128xf32> to vector<2x128xf32>
    %c8_109 = arith.constant 8 : index
    %c0_110 = arith.constant 0 : index
    %c0_111 = arith.constant 0 : index
    %106 = vector.load %arg2[%c8_109, %c0_110, %c0_111] : memref<9x128x128xf32, #tpu.memory_space<vmem>>, vector<1x128x128xf32>
    %107 = vector.shape_cast %106 : vector<1x128x128xf32> to vector<128x128xf32>
    %cst_112 = arith.constant dense<0.000000e+00> : vector<2x128xf32>
    %108 = tpu.matmul %105, %107, %cst_112 {dimension_numbers = #tpu.dot_dimension_numbers<[1], [0], [0], [1], [0, 0, 1, 1], [], []>} : vector<2x128xf32>, vector<128x128xf32>, vector<2x128xf32> -> vector<2x128xf32>
    %109 = arith.addf %103, %108 : vector<2x128xf32>
    %110 = arith.maximumf %54, %109 : vector<2x128xf32>
    %111 = vector.extract_strided_slice %110 {offsets = [0, 0], sizes = [2, 64], strides = [1, 1]} : vector<2x128xf32> to vector<2x64xf32>
    %112 = vector.extract_strided_slice %110 {offsets = [0, 64], sizes = [2, 64], strides = [1, 1]} : vector<2x128xf32> to vector<2x64xf32>
    %113 = arith.maximumf %111, %112 : vector<2x64xf32>
    %cst_113 = arith.constant dense<0xFF800000> : vector<64xf32>
    %114 = vector.multi_reduction <maximumf>, %113, %cst_113 [0] : vector<2x64xf32> to vector<64xf32>
    %115 = vector.shape_cast %114 : vector<64xf32> to vector<1x64xf32>
    %c0_114 = arith.constant 0 : index
    %c0_115 = arith.constant 0 : index
    %116 = vector.load %arg3[%c0_114, %c0_115] : memref<1x64xf32, #tpu.memory_space<vmem>>, vector<1x64xf32>
    %117 = arith.addf %115, %116 : vector<1x64xf32>
    %cst_116 = arith.constant 0.000000e+00 : f32
    %118 = vector.broadcast %cst_116 : f32 to vector<1x64xf32>
    %119 = arith.cmpf oge, %117, %118 : vector<1x64xf32>
    %cst_117 = arith.constant 2.000000e-01 : f32
    %120 = vector.broadcast %cst_117 : f32 to vector<1x64xf32>
    %121 = arith.mulf %120, %117 : vector<1x64xf32>
    %122 = arith.select %119, %117, %121 : vector<1x64xi1>, vector<1x64xf32>
    %c0_118 = arith.constant 0 : index
    %c0_119 = arith.constant 0 : index
    %c0_120 = arith.constant 0 : index
    %123 = vector.load %arg4[%c0_118, %c0_119, %c0_120] : memref<3x64x32xf32, #tpu.memory_space<vmem>>, vector<1x64x32xf32>
    %124 = vector.shape_cast %123 : vector<1x64x32xf32> to vector<64x32xf32>
    %cst_121 = arith.constant dense<0.000000e+00> : vector<1x32xf32>
    %125 = tpu.matmul %122, %124, %cst_121 {dimension_numbers = #tpu.dot_dimension_numbers<[1], [0], [0], [1], [0, 0, 1, 1], [], []>} : vector<1x64xf32>, vector<64x32xf32>, vector<1x32xf32> -> vector<1x32xf32>
    %c0_122 = arith.constant 0 : index
    %c0_123 = arith.constant 0 : index
    %c0_124 = arith.constant 0 : index
    %126 = vector.load %arg5[%c0_122, %c0_123, %c0_124] : memref<3x1x32xf32, #tpu.memory_space<vmem>>, vector<1x1x32xf32>
    %127 = vector.shape_cast %126 : vector<1x1x32xf32> to vector<1x32xf32>
    %128 = arith.addf %125, %127 : vector<1x32xf32>
    %cst_125 = arith.constant 0.000000e+00 : f32
    %129 = vector.broadcast %cst_125 : f32 to vector<1x32xf32>
    %130 = arith.cmpf oge, %128, %129 : vector<1x32xf32>
    %cst_126 = arith.constant 2.000000e-01 : f32
    %131 = vector.broadcast %cst_126 : f32 to vector<1x32xf32>
    %132 = arith.mulf %131, %128 : vector<1x32xf32>
    %133 = arith.select %130, %128, %132 : vector<1x32xi1>, vector<1x32xf32>
    %c0_127 = arith.constant 0 : index
    %c0_128 = arith.constant 0 : index
    %c0_129 = arith.constant 0 : index
    %134 = vector.load %arg6[%c0_127, %c0_128, %c0_129] : memref<3x32x16xf32, #tpu.memory_space<vmem>>, vector<1x32x16xf32>
    %135 = vector.shape_cast %134 : vector<1x32x16xf32> to vector<32x16xf32>
    %cst_130 = arith.constant dense<0.000000e+00> : vector<1x16xf32>
    %136 = tpu.matmul %133, %135, %cst_130 {dimension_numbers = #tpu.dot_dimension_numbers<[1], [0], [0], [1], [0, 0, 1, 1], [], []>} : vector<1x32xf32>, vector<32x16xf32>, vector<1x16xf32> -> vector<1x16xf32>
    %c0_131 = arith.constant 0 : index
    %c0_132 = arith.constant 0 : index
    %c0_133 = arith.constant 0 : index
    %137 = vector.load %arg7[%c0_131, %c0_132, %c0_133] : memref<3x1x16xf32, #tpu.memory_space<vmem>>, vector<1x1x16xf32>
    %138 = vector.shape_cast %137 : vector<1x1x16xf32> to vector<1x16xf32>
    %139 = arith.addf %136, %138 : vector<1x16xf32>
    %cst_134 = arith.constant 0.000000e+00 : f32
    %140 = vector.broadcast %cst_134 : f32 to vector<1x16xf32>
    %141 = arith.cmpf oge, %139, %140 : vector<1x16xf32>
    %cst_135 = arith.constant 2.000000e-01 : f32
    %142 = vector.broadcast %cst_135 : f32 to vector<1x16xf32>
    %143 = arith.mulf %142, %139 : vector<1x16xf32>
    %144 = arith.select %141, %139, %143 : vector<1x16xi1>, vector<1x16xf32>
    %c0_136 = arith.constant 0 : index
    %c0_137 = arith.constant 0 : index
    %c0_138 = arith.constant 0 : index
    %145 = vector.load %arg8[%c0_136, %c0_137, %c0_138] : memref<3x16x4xf32, #tpu.memory_space<vmem>>, vector<1x16x4xf32>
    %146 = vector.shape_cast %145 : vector<1x16x4xf32> to vector<16x4xf32>
    %cst_139 = arith.constant dense<0.000000e+00> : vector<1x4xf32>
    %147 = tpu.matmul %144, %146, %cst_139 {dimension_numbers = #tpu.dot_dimension_numbers<[1], [0], [0], [1], [0, 0, 1, 1], [], []>} : vector<1x16xf32>, vector<16x4xf32>, vector<1x4xf32> -> vector<1x4xf32>
    %c0_140 = arith.constant 0 : index
    %c0_141 = arith.constant 0 : index
    %c0_142 = arith.constant 0 : index
    %148 = vector.load %arg9[%c0_140, %c0_141, %c0_142] : memref<3x1x4xf32, #tpu.memory_space<vmem>>, vector<1x1x4xf32>
    %149 = vector.shape_cast %148 : vector<1x1x4xf32> to vector<1x4xf32>
    %150 = arith.addf %147, %149 : vector<1x4xf32>
    %151 = arith.mulf %150, %150 : vector<1x4xf32>
    %cst_143 = arith.constant dense<0.000000e+00> : vector<1xf32>
    %152 = vector.multi_reduction <add>, %151, %cst_143 [1] : vector<1x4xf32> to vector<1xf32>
    %153 = vector.shape_cast %152 : vector<1xf32> to vector<1x1xf32>
    %154 = math.sqrt %153 : vector<1x1xf32>
    %cst_144 = arith.constant 9.99999996E-13 : f32
    %155 = vector.broadcast %cst_144 : f32 to vector<1x1xf32>
    %156 = arith.maximumf %154, %155 : vector<1x1xf32>
    %157 = vector.broadcast %156 : vector<1x1xf32> to vector<1x4xf32>
    %158 = arith.divf %150, %157 : vector<1x4xf32>
    %c0_145 = arith.constant 0 : index
    %c0_146 = arith.constant 0 : index
    %c0_147 = arith.constant 0 : index
    %159 = vector.load %arg10[%c0_145, %c0_146, %c0_147] : memref<1x3x4xf32, #tpu.memory_space<vmem>>, vector<1x1x4xf32>
    %160 = vector.shape_cast %159 : vector<1x1x4xf32> to vector<1x4xf32>
    %161 = vector.shape_cast %158 : vector<1x4xf32> to vector<1x1x4xf32>
    tpu.vector_store %arg10[%c0_145, %c0_146, %c0_147], %161 {strides = array<i32>} : memref<1x3x4xf32, #tpu.memory_space<vmem>>, vector<1x1x4xf32>,
    %c1_148 = arith.constant 1 : index
    %c0_149 = arith.constant 0 : index
    %c0_150 = arith.constant 0 : index
    %162 = vector.load %arg4[%c1_148, %c0_149, %c0_150] : memref<3x64x32xf32, #tpu.memory_space<vmem>>, vector<1x64x32xf32>
    %163 = vector.shape_cast %162 : vector<1x64x32xf32> to vector<64x32xf32>
    %cst_151 = arith.constant dense<0.000000e+00> : vector<1x32xf32>
    %164 = tpu.matmul %122, %163, %cst_151 {dimension_numbers = #tpu.dot_dimension_numbers<[1], [0], [0], [1], [0, 0, 1, 1], [], []>} : vector<1x64xf32>, vector<64x32xf32>, vector<1x32xf32> -> vector<1x32xf32>
    %c1_152 = arith.constant 1 : index
    %c0_153 = arith.constant 0 : index
    %c0_154 = arith.constant 0 : index
    %165 = vector.load %arg5[%c1_152, %c0_153, %c0_154] : memref<3x1x32xf32, #tpu.memory_space<vmem>>, vector<1x1x32xf32>
    %166 = vector.shape_cast %165 : vector<1x1x32xf32> to vector<1x32xf32>
    %167 = arith.addf %164, %166 : vector<1x32xf32>
    %cst_155 = arith.constant 0.000000e+00 : f32
    %168 = vector.broadcast %cst_155 : f32 to vector<1x32xf32>
    %169 = arith.cmpf oge, %167, %168 : vector<1x32xf32>
    %cst_156 = arith.constant 2.000000e-01 : f32
    %170 = vector.broadcast %cst_156 : f32 to vector<1x32xf32>
    %171 = arith.mulf %170, %167 : vector<1x32xf32>
    %172 = arith.select %169, %167, %171 : vector<1x32xi1>, vector<1x32xf32>
    %c1_157 = arith.constant 1 : index
    %c0_158 = arith.constant 0 : index
    %c0_159 = arith.constant 0 : index
    %173 = vector.load %arg6[%c1_157, %c0_158, %c0_159] : memref<3x32x16xf32, #tpu.memory_space<vmem>>, vector<1x32x16xf32>
    %174 = vector.shape_cast %173 : vector<1x32x16xf32> to vector<32x16xf32>
    %cst_160 = arith.constant dense<0.000000e+00> : vector<1x16xf32>
    %175 = tpu.matmul %172, %174, %cst_160 {dimension_numbers = #tpu.dot_dimension_numbers<[1], [0], [0], [1], [0, 0, 1, 1], [], []>} : vector<1x32xf32>, vector<32x16xf32>, vector<1x16xf32> -> vector<1x16xf32>
    %c1_161 = arith.constant 1 : index
    %c0_162 = arith.constant 0 : index
    %c0_163 = arith.constant 0 : index
    %176 = vector.load %arg7[%c1_161, %c0_162, %c0_163] : memref<3x1x16xf32, #tpu.memory_space<vmem>>, vector<1x1x16xf32>
    %177 = vector.shape_cast %176 : vector<1x1x16xf32> to vector<1x16xf32>
    %178 = arith.addf %175, %177 : vector<1x16xf32>
    %cst_164 = arith.constant 0.000000e+00 : f32
    %179 = vector.broadcast %cst_164 : f32 to vector<1x16xf32>
    %180 = arith.cmpf oge, %178, %179 : vector<1x16xf32>
    %cst_165 = arith.constant 2.000000e-01 : f32
    %181 = vector.broadcast %cst_165 : f32 to vector<1x16xf32>
    %182 = arith.mulf %181, %178 : vector<1x16xf32>
    %183 = arith.select %180, %178, %182 : vector<1x16xi1>, vector<1x16xf32>
    %c1_166 = arith.constant 1 : index
    %c0_167 = arith.constant 0 : index
    %c0_168 = arith.constant 0 : index
    %184 = vector.load %arg8[%c1_166, %c0_167, %c0_168] : memref<3x16x4xf32, #tpu.memory_space<vmem>>, vector<1x16x4xf32>
    %185 = vector.shape_cast %184 : vector<1x16x4xf32> to vector<16x4xf32>
    %cst_169 = arith.constant dense<0.000000e+00> : vector<1x4xf32>
    %186 = tpu.matmul %183, %185, %cst_169 {dimension_numbers = #tpu.dot_dimension_numbers<[1], [0], [0], [1], [0, 0, 1, 1], [], []>} : vector<1x16xf32>, vector<16x4xf32>, vector<1x4xf32> -> vector<1x4xf32>
    %c1_170 = arith.constant 1 : index
    %c0_171 = arith.constant 0 : index
    %c0_172 = arith.constant 0 : index
    %187 = vector.load %arg9[%c1_170, %c0_171, %c0_172] : memref<3x1x4xf32, #tpu.memory_space<vmem>>, vector<1x1x4xf32>
    %188 = vector.shape_cast %187 : vector<1x1x4xf32> to vector<1x4xf32>
    %189 = arith.addf %186, %188 : vector<1x4xf32>
    %190 = arith.mulf %189, %189 : vector<1x4xf32>
    %cst_173 = arith.constant dense<0.000000e+00> : vector<1xf32>
    %191 = vector.multi_reduction <add>, %190, %cst_173 [1] : vector<1x4xf32> to vector<1xf32>
    %192 = vector.shape_cast %191 : vector<1xf32> to vector<1x1xf32>
    %193 = math.sqrt %192 : vector<1x1xf32>
    %cst_174 = arith.constant 9.99999996E-13 : f32
    %194 = vector.broadcast %cst_174 : f32 to vector<1x1xf32>
    %195 = arith.maximumf %193, %194 : vector<1x1xf32>
    %196 = vector.broadcast %195 : vector<1x1xf32> to vector<1x4xf32>
    %197 = arith.divf %189, %196 : vector<1x4xf32>
    %c0_175 = arith.constant 0 : index
    %c1_176 = arith.constant 1 : index
    %c0_177 = arith.constant 0 : index
    %198 = vector.load %arg10[%c0_175, %c1_176, %c0_177] : memref<1x3x4xf32, #tpu.memory_space<vmem>>, vector<1x1x4xf32>
    %199 = vector.shape_cast %198 : vector<1x1x4xf32> to vector<1x4xf32>
    %200 = vector.shape_cast %197 : vector<1x4xf32> to vector<1x1x4xf32>
    tpu.vector_store %arg10[%c0_175, %c1_176, %c0_177], %200 {strides = array<i32>} : memref<1x3x4xf32, #tpu.memory_space<vmem>>, vector<1x1x4xf32>,
    %c2_178 = arith.constant 2 : index
    %c0_179 = arith.constant 0 : index
    %c0_180 = arith.constant 0 : index
    %201 = vector.load %arg4[%c2_178, %c0_179, %c0_180] : memref<3x64x32xf32, #tpu.memory_space<vmem>>, vector<1x64x32xf32>
    %202 = vector.shape_cast %201 : vector<1x64x32xf32> to vector<64x32xf32>
    %cst_181 = arith.constant dense<0.000000e+00> : vector<1x32xf32>
    %203 = tpu.matmul %122, %202, %cst_181 {dimension_numbers = #tpu.dot_dimension_numbers<[1], [0], [0], [1], [0, 0, 1, 1], [], []>} : vector<1x64xf32>, vector<64x32xf32>, vector<1x32xf32> -> vector<1x32xf32>
    %c2_182 = arith.constant 2 : index
    %c0_183 = arith.constant 0 : index
    %c0_184 = arith.constant 0 : index
    %204 = vector.load %arg5[%c2_182, %c0_183, %c0_184] : memref<3x1x32xf32, #tpu.memory_space<vmem>>, vector<1x1x32xf32>
    %205 = vector.shape_cast %204 : vector<1x1x32xf32> to vector<1x32xf32>
    %206 = arith.addf %203, %205 : vector<1x32xf32>
    %cst_185 = arith.constant 0.000000e+00 : f32
    %207 = vector.broadcast %cst_185 : f32 to vector<1x32xf32>
    %208 = arith.cmpf oge, %206, %207 : vector<1x32xf32>
    %cst_186 = arith.constant 2.000000e-01 : f32
    %209 = vector.broadcast %cst_186 : f32 to vector<1x32xf32>
    %210 = arith.mulf %209, %206 : vector<1x32xf32>
    %211 = arith.select %208, %206, %210 : vector<1x32xi1>, vector<1x32xf32>
    %c2_187 = arith.constant 2 : index
    %c0_188 = arith.constant 0 : index
    %c0_189 = arith.constant 0 : index
    %212 = vector.load %arg6[%c2_187, %c0_188, %c0_189] : memref<3x32x16xf32, #tpu.memory_space<vmem>>, vector<1x32x16xf32>
    %213 = vector.shape_cast %212 : vector<1x32x16xf32> to vector<32x16xf32>
    %cst_190 = arith.constant dense<0.000000e+00> : vector<1x16xf32>
    %214 = tpu.matmul %211, %213, %cst_190 {dimension_numbers = #tpu.dot_dimension_numbers<[1], [0], [0], [1], [0, 0, 1, 1], [], []>} : vector<1x32xf32>, vector<32x16xf32>, vector<1x16xf32> -> vector<1x16xf32>
    %c2_191 = arith.constant 2 : index
    %c0_192 = arith.constant 0 : index
    %c0_193 = arith.constant 0 : index
    %215 = vector.load %arg7[%c2_191, %c0_192, %c0_193] : memref<3x1x16xf32, #tpu.memory_space<vmem>>, vector<1x1x16xf32>
    %216 = vector.shape_cast %215 : vector<1x1x16xf32> to vector<1x16xf32>
    %217 = arith.addf %214, %216 : vector<1x16xf32>
    %cst_194 = arith.constant 0.000000e+00 : f32
    %218 = vector.broadcast %cst_194 : f32 to vector<1x16xf32>
    %219 = arith.cmpf oge, %217, %218 : vector<1x16xf32>
    %cst_195 = arith.constant 2.000000e-01 : f32
    %220 = vector.broadcast %cst_195 : f32 to vector<1x16xf32>
    %221 = arith.mulf %220, %217 : vector<1x16xf32>
    %222 = arith.select %219, %217, %221 : vector<1x16xi1>, vector<1x16xf32>
    %c2_196 = arith.constant 2 : index
    %c0_197 = arith.constant 0 : index
    %c0_198 = arith.constant 0 : index
    %223 = vector.load %arg8[%c2_196, %c0_197, %c0_198] : memref<3x16x4xf32, #tpu.memory_space<vmem>>, vector<1x16x4xf32>
    %224 = vector.shape_cast %223 : vector<1x16x4xf32> to vector<16x4xf32>
    %cst_199 = arith.constant dense<0.000000e+00> : vector<1x4xf32>
    %225 = tpu.matmul %222, %224, %cst_199 {dimension_numbers = #tpu.dot_dimension_numbers<[1], [0], [0], [1], [0, 0, 1, 1], [], []>} : vector<1x16xf32>, vector<16x4xf32>, vector<1x4xf32> -> vector<1x4xf32>
    %c2_200 = arith.constant 2 : index
    %c0_201 = arith.constant 0 : index
    %c0_202 = arith.constant 0 : index
    %226 = vector.load %arg9[%c2_200, %c0_201, %c0_202] : memref<3x1x4xf32, #tpu.memory_space<vmem>>, vector<1x1x4xf32>
    %227 = vector.shape_cast %226 : vector<1x1x4xf32> to vector<1x4xf32>
    %228 = arith.addf %225, %227 : vector<1x4xf32>
    %229 = arith.mulf %228, %228 : vector<1x4xf32>
    %cst_203 = arith.constant dense<0.000000e+00> : vector<1xf32>
    %230 = vector.multi_reduction <add>, %229, %cst_203 [1] : vector<1x4xf32> to vector<1xf32>
    %231 = vector.shape_cast %230 : vector<1xf32> to vector<1x1xf32>
    %232 = math.sqrt %231 : vector<1x1xf32>
    %cst_204 = arith.constant 9.99999996E-13 : f32
    %233 = vector.broadcast %cst_204 : f32 to vector<1x1xf32>
    %234 = arith.maximumf %232, %233 : vector<1x1xf32>
    %235 = vector.broadcast %234 : vector<1x1xf32> to vector<1x4xf32>
    %236 = arith.divf %228, %235 : vector<1x4xf32>
    %c0_205 = arith.constant 0 : index
    %c2_206 = arith.constant 2 : index
    %c0_207 = arith.constant 0 : index
    %237 = vector.load %arg10[%c0_205, %c2_206, %c0_207] : memref<1x3x4xf32, #tpu.memory_space<vmem>>, vector<1x1x4xf32>
    %238 = vector.shape_cast %237 : vector<1x1x4xf32> to vector<1x4xf32>
    %239 = vector.shape_cast %236 : vector<1x4xf32> to vector<1x1x4xf32>
    tpu.vector_store %arg10[%c0_205, %c2_206, %c0_207], %239 {strides = array<i32>} : memref<1x3x4xf32, #tpu.memory_space<vmem>>, vector<1x1x4xf32>,
    return
  }
  func.func @transform_0(%arg0: i32) -> (i32, i32, i32) {
    %c0_i32 = arith.constant 0 : i32
    %c0_i32_0 = arith.constant 0 : i32
    %c0_i32_1 = arith.constant 0 : i32
    return %arg0, %c0_i32, %c0_i32_0 : i32, i32, i32
  }
  func.func @transform_1(%arg0: i32) -> (i32, i32, i32) {
    %c0_i32 = arith.constant 0 : i32
    %c0_i32_0 = arith.constant 0 : i32
    %c0_i32_1 = arith.constant 0 : i32
    %c0_i32_2 = arith.constant 0 : i32
    return %c0_i32, %c0_i32_0, %c0_i32_1 : i32, i32, i32
  }
  func.func @transform_2(%arg0: i32) -> (i32, i32) {
    %c0_i32 = arith.constant 0 : i32
    %c0_i32_0 = arith.constant 0 : i32
    %c0_i32_1 = arith.constant 0 : i32
    return %c0_i32, %c0_i32_0 : i32, i32
  }
  func.func @transform_3(%arg0: i32) -> (i32, i32, i32) {
    %c0_i32 = arith.constant 0 : i32
    %c0_i32_0 = arith.constant 0 : i32
    %c0_i32_1 = arith.constant 0 : i32
    %c0_i32_2 = arith.constant 0 : i32
    return %c0_i32, %c0_i32_0, %c0_i32_1 : i32, i32, i32
  }
  func.func @transform_4(%arg0: i32) -> (i32, i32, i32) {
    %c0_i32 = arith.constant 0 : i32
    %c0_i32_0 = arith.constant 0 : i32
    %c0_i32_1 = arith.constant 0 : i32
    %c0_i32_2 = arith.constant 0 : i32
    return %c0_i32, %c0_i32_0, %c0_i32_1 : i32, i32, i32
  }
  func.func @transform_5(%arg0: i32) -> (i32, i32, i32) {
    %c0_i32 = arith.constant 0 : i32
    %c0_i32_0 = arith.constant 0 : i32
    %c0_i32_1 = arith.constant 0 : i32
    %c0_i32_2 = arith.constant 0 : i32
    return %c0_i32, %c0_i32_0, %c0_i32_1 : i32, i32, i32
  }
  func.func @transform_6(%arg0: i32) -> (i32, i32, i32) {
    %c0_i32 = arith.constant 0 : i32
    %c0_i32_0 = arith.constant 0 : i32
    %c0_i32_1 = arith.constant 0 : i32
    %c0_i32_2 = arith.constant 0 : i32
    return %c0_i32, %c0_i32_0, %c0_i32_1 : i32, i32, i32
  }
  func.func @transform_7(%arg0: i32) -> (i32, i32, i32) {
    %c0_i32 = arith.constant 0 : i32
    %c0_i32_0 = arith.constant 0 : i32
    %c0_i32_1 = arith.constant 0 : i32
    %c0_i32_2 = arith.constant 0 : i32
    return %c0_i32, %c0_i32_0, %c0_i32_1 : i32, i32, i32
  }
  func.func @transform_8(%arg0: i32) -> (i32, i32, i32) {
    %c0_i32 = arith.constant 0 : i32
    %c0_i32_0 = arith.constant 0 : i32
    %c0_i32_1 = arith.constant 0 : i32
    %c0_i32_2 = arith.constant 0 : i32
    return %c0_i32, %c0_i32_0, %c0_i32_1 : i32, i32, i32
  }
  func.func @transform_9(%arg0: i32) -> (i32, i32, i32) {
    %c0_i32 = arith.constant 0 : i32
    %c0_i32_0 = arith.constant 0 : i32
    %c0_i32_1 = arith.constant 0 : i32
    return %arg0, %c0_i32, %c0_i32_0 : i32, i32, i32
  }
}

</mosaic_0001>

<bundles_post_ra>
// kernel: model_forward.5
= control target key start
LH: loop header
LB: loop body
LE: loop exit
PB: predicated region body
PF: predicated region fallthrough
CT: control target
= control target key end

     0   :  { %s1484_s12 = smov 0   ;;  %s2044_s0 = inlined_call_operand.vmem [shape: f32[2,1156,34], index: 0, kind: input, shape index: {}]   ;;  %s2045_s1 = inlined_call_operand.vmem [shape: f32[9,34,128], index: 1, kind: input, shape index: {}]   ;;  %s2046_s2 = inlined_call_operand.vmem [shape: f32[1,64], index: 2, kind: input, shape index: {}]   ;;  %s2047_s3 = inlined_call_operand.vmem [shape: f32[2,512,64], index: 3, kind: output, shape index: {}]  }
   0x1 LB: > { %s1214_s13 = sadd.s32 4294967295, %s1457_s12   ;;  %p1218_p0 = scmp.ge.s32.totalorder %s1457_s12, 1  ;;  %s1457_s12 = sphi %s1484_s12, %s13_s12  }
   0x2   : > { %p137_p1 = scmp.lt.s32.totalorder %s1457_s12, 3 }
   0x4   : > { %p138_p2 = pnand %p1218_p0, %p137_p1 }
   0x5   : > { %p161_p3 = scmp.lt.s32.totalorder (!%p138_p2), %s1214_s13, 1  ;;  %s1502_s22 = smov (!%p138_p2), 0  }
   0x6   : > { %141 = sbr.rel (%p138_p2) target bundleno = 426 (0x1aa), region = 32 }
   0xb   : > { %s2049_s13 = smov (!%p161_p3, %s1214_s13), 1 }
   0xc   : > { %s1428_s14 = smul.u32 1160, %s2049_s13  ;;  %s1417_s15 = sshll.u32 %s2049_s13, 9 }
   0xd   : > { %s1495_s18 = scalar_lea.vmem %s2047_s3, %s1417_s15 }
   0xe   : > { %s1500_s21 = scalar_lea.vmem %s2044_s0, %s1428_s14 }
   0xf LB: >> { %v1510_v0 = vld [vmem:[%s2045_s1 + $0x48] sm:$0x3]  ;;  %vm214_vm0 = vcmask 1041408   ;;  %v1515_v1 = vld [vmem:[%s2045_s1 + $0x20] sm:$0x3]  ;;  %v1529_v3 = vld [vmem:[%s2045_s1 + $0x18] sm:$0xff]  ;;  %s1461_s22 = sphi %s1502_s22, %s176_s22  }
  0x10   : >> { %v1520_v2 = vld [vmem:[%s2045_s1 + $0x40] sm:$0xff]  ;;  %1418 = vmatpush.msk.msra.mxu2 %vm214_vm0, %v1510_v0  ;;  %1423 = vmatpush.msk.msra.mxu3 %vm214_vm0, %v1515_v1  ;;  %v1534_v4 = vld [vmem:[%s2045_s1 + $0x38] sm:$0xff]  ;;  %v1539_v5 = vld [vmem:[%s2045_s1 + $0x10] sm:$0xff]  ;;  %s178_s8 = smul.u32 68, %s1461_s22  ;;  %vm201_vm1 = vcmask 277504   ;;  %s1414_s28 = sshll.u32 %s1461_s22, 5 }
  0x11   : >> { %1231 = vmatpush.msk.msra.mxu0 %vm214_vm0, %v1510_v0  ;;  %1236 = vmatpush.msk.msra.mxu1 %vm214_vm0, %v1515_v1  ;;  %v1551_v6 = vld [vmem:[%s2045_s1 + $0x30] sm:$0xff]  ;;  %v1556_v7 = vld [vmem:[%s2045_s1 + $0x8] sm:$0xff]  ;;  %v1573_v9 = vld [vmem:[%s2045_s1] sm:$0xff]  ;;  %s1102_s29 = scalar_lea.vmem %s1495_s18, %s1414_s28  ;;  %vm1103_vm2 = vcmask 523264   ;;  %s176_s22 = sadd.s32 1, %s1461_s22  }
  0x12   : >> { %1419 = vmatpush.msra.mxu2 %v1520_v2  ;;  %1424 = vmatpush.msra.mxu3 %v1529_v3  ;;  %s1559_s14 = scalar_lea.vmem %s1500_s21, %s178_s8  ;;  %v1568_v8 = vld [vmem:[%s2045_s1 + $0x28] sm:$0xff]  ;;  %v1584_v12 = vld [vmem:[%s2045_s1 + $0x70] sm:$0x3]  ;;  %v1589_v13 = vld [vmem:[%s2045_s1 + $0x98] sm:$0x3]  ;;  %p173_p4 = scmp.ge.s32.totalorder %s176_s22, 16  }
  0x13   : >> { %230 = vmatpush.msra.mxu0 %v1520_v2  ;;  %274 = vmatpush.msra.mxu1 %v1529_v3  ;;  %v1224_v10 = vld [vmem:[%s1559_s14 + $0x11] sm:$0xff]  ;;  %v1600_v14 = vld [vmem:[%s2045_s1 + $0x68] sm:$0xff]  ;;  %v180_v17 = vld [vmem:[%s1559_s14] sm:$0xff] }
  0x14   : >> { %1420 = vmatpush.msra.mxu2 %v1534_v4  ;;  %1425 = vmatpush.msra.mxu3 %v1539_v5  ;;  %v182_v11 = vld [vmem:[%s1559_s14 + $0x10] sm:$0xff]  ;;  %v1222_v16 = vld [vmem:[%s1559_s14 + $0x1] sm:$0xff]  ;;  %v1642_v22 = vld [vmem:[%s2045_s1 + $0x58] sm:$0xff] }
  0x15   : >> { %231 = vmatpush.msra.mxu0 %v1534_v4  ;;  %275 = vmatpush.msra.mxu1 %v1539_v5  ;;  %v1605_v15 = vld [vmem:[%s2045_s1 + $0x90] sm:$0xff]  ;;  %v1616_v18 = vld [vmem:[%s2045_s1 + $0x60] sm:$0xff]  ;;  %v1623_v19 = vld [vmem:[%s2045_s1 + $0x88] sm:$0xff] }
  0x16   : >> { %1421 = vmatpush.msra.mxu2 %v1551_v6  ;;  %1426 = vmatpush.msra.mxu3 %v1556_v7  ;;  %v1630_v20 = vld [vmem:[%s2045_s1 + $0xc0] sm:$0x3]  ;;  %v1635_v21 = vld [vmem:[%s2045_s1 + $0xe8] sm:$0x3]  ;;  %v183_v25 = vld [vmem:[%s1559_s14 + $0x18] sm:$0xff] }
  0x17   : >> { %232 = vmatpush.msra.mxu0 %v1551_v6  ;;  %276 = vmatpush.msra.mxu1 %v1556_v7  ;;  %v1647_v23 = vld [vmem:[%s2045_s1 + $0x80] sm:$0xff]  ;;  %v1660_v26 = vld [vmem:[%s2045_s1 + $0x50] sm:$0xff]  ;;  %v1665_v27 = vld [vmem:[%s2045_s1 + $0xb8] sm:$0xff] }
  0x18   : >> { %1422 = vmatpush.msra.mxu2 %v1568_v8  ;;  %1427 = vmatpush.msra.mxu3 %v1573_v9  ;;  %v1225_v24 = vld [vmem:[%s1559_s14 + $0x19] sm:$0xff]  ;;  %v1684_v30 = vld [vmem:[%s2045_s1 + $0x110] sm:$0x3]  ;;  %v181_v33 = vld [vmem:[%s1559_s14 + $0x8] sm:$0xff] }
  0x19   : >> { %1234 = vmatmul.msk.f32.vlgmr.msra.gmra.mxu2 %vm201_vm1, %v1224_v10  ;;  %1239 = vmatmul.msk.f32.vlgmr.msra.gmra.mxu3 %vm201_vm1, %v182_v11  ;;  %v1672_v28 = vld [vmem:[%s2045_s1 + $0x78] sm:$0xff]  ;;  %v1677_v29 = vld [vmem:[%s2045_s1 + $0xe0] sm:$0xff]  ;;  %v1689_v31 = vld [vmem:[%s2045_s1 + $0xb0] sm:$0xff] }
  0x1a   : >> { %1250 = vmatpush.msk.msrb.mxu2 %vm214_vm0, %v1584_v12  ;;  %1266 = vmatpush.msk.msrb.mxu3 %vm214_vm0, %v1589_v13  ;;  %v1223_v32 = vld [vmem:[%s1559_s14 + $0x9] sm:$0xff]  ;;  %v1700_v34 = vld [vmem:[%s2045_s1 + $0x138] sm:$0x3]  ;;  %v1743_v42 = vld [vmem:[%s2045_s1 + $0xa0] sm:$0xff] }
  0x1b   : >> { %233 = vmatpush.msra.mxu0 %v1568_v8  ;;  %277 = vmatpush.msra.mxu1 %v1573_v9  ;;  %v1705_v35 = vld [vmem:[%s2045_s1 + $0xd8] sm:$0xff]  ;;  %v1713_v36 = vld [vmem:[%s2045_s1 + $0xa8] sm:$0xff]  ;;  %v1725_v38 = vld [vmem:[%s2045_s1 + $0xd0] sm:$0xff] }
  0x1c   : >> { %330 = vmatpush.msrb.mxu2 %v1600_v14  ;;  %391 = vmatpush.msrb.mxu3 %v1605_v15  ;;  %v1718_v37 = vld [vmem:[%s2045_s1 + $0x108] sm:$0xff]  ;;  %v1730_v39 = vld [vmem:[%s2045_s1 + $0x130] sm:$0xff]  ;;  %v1756_v44 = vld [vmem:[%s2045_s1 + $0x160] sm:$0x3] }
  0x1d   : >> { %1232 = vmatmul.msk.f32.vlgmr.msra.gmra.mxu0 %vm201_vm1, %v1222_v16  ;;  %1237 = vmatmul.msk.f32.vlgmr.msra.gmra.mxu1 %vm201_vm1, %v180_v17  ;;  %v1241_v40 = vld [vmem:[%s1559_s14 + $0x2] sm:$0xff]  ;;  %v1786_v49 = vld [vmem:[%s2045_s1 + $0x158] sm:$0xff]  ;;  %v1807_v52 = vld [vmem:[%s2045_s1 + $0x150] sm:$0xff] }
  0x1e   : >> { %331 = vmatpush.msrb.mxu2 %v1616_v18  ;;  %392 = vmatpush.msrb.mxu3 %v1623_v19  ;;  %v1734_v41 = vld [vmem:[%s1559_s14 + $0x22] sm:$0xff]  ;;  %v1793_v50 = vld [vmem:[%s2045_s1 + $0xf8] sm:$0xff]  ;;  %v1242_v53 = vld [vmem:[%s1559_s14 + $0xa] sm:$0xff] }
  0x1f   : >> { %1282 = vmatpush.msk.msrb.mxu0 %vm214_vm0, %v1630_v20  ;;  %1298 = vmatpush.msk.msrb.mxu1 %vm214_vm0, %v1635_v21  ;;  %v1749_v43 = vld [vmem:[%s2045_s1 + $0xc8] sm:$0xff]  ;;  %v1764_v45 = vld [vmem:[%s2045_s1 + $0x100] sm:$0xff]  ;;  %v1820_v55 = vld [vmem:[%s2045_s1 + $0xf0] sm:$0xff] }
  0x20   : >> { %332 = vmatpush.msrb.mxu2 %v1642_v22  ;;  %393 = vmatpush.msrb.mxu3 %v1647_v23  ;;  %v1769_v46 = vld [vmem:[%s2045_s1 + $0x128] sm:$0xff]  ;;  %v1798_v51 = vld [vmem:[%s2045_s1 + $0x120] sm:$0xff]  ;;  %v1825_v56 = vld [vmem:[%s2045_s1 + $0x118] sm:$0xff] }
  0x21   : >> { %1235 = vmatmul.msk.f32.gmra.mxu2 %vm201_vm1, %v1225_v24  ;;  %1240 = vmatmul.msk.f32.gmra.mxu3 %vm201_vm1, %v183_v25  ;;  %v1774_v47 = vld [vmem:[%s1559_s14 + $0x23] sm:$0xff]  ;;  %v1838_v58 = vld [vmem:[%s1559_s14 + $0x2b] sm:$0xff]  ;;  %v1876_v63 = vld [vmem:[%s1559_s14 + $0x33] sm:$0xff] }
  0x22   : >> { %333 = vmatpush.msrb.mxu2 %v1660_v26  ;;  %451 = vmatpush.msrb.mxu0 %v1665_v27  ;;  %v1777_v48 = vld [vmem:[%s1559_s14 + $0x24] sm:$0xff]  ;;  %v1841_v59 = vld [vmem:[%s1559_s14 + $0x2c] sm:$0xff]  ;;  %v1307_v11 = vld [vmem:[%s1559_s14 + $0x54] sm:$0xff] }
  0x23   : >> { %394 = vmatpush.msrb.mxu3 %v1672_v28  ;;  %511 = vmatpush.msrb.mxu1 %v1677_v29  ;;  %v1811_v54 = vld [vmem:[%s1559_s14 + $0x2a] sm:$0xff]  ;;  %v1850_v60 = vld [vmem:[%s2045_s1 + $0x140] sm:$0xff]  ;;  %v1243_v61 = vld [vmem:[%s1559_s14 + $0x12] sm:$0xff] }
  0x24   : >> { %1314 = vmatpush.msk.msra.mxu2 %vm214_vm0, %v1684_v30  ;;  %452 = vmatpush.msrb.mxu0 %v1689_v31  ;;  %v1832_v57 = vld [vmem:[%s2045_s1 + $0x148] sm:$0xff]  ;;  %v1862_v62 = vld [vmem:[%s1559_s14 + $0x32] sm:$0xff]  ;;  %v1340_v16 = vld [vmem:[%s1559_s14 + $0x5e] sm:$0xff] }
  0x25   : >> { %1233 = vmatmul.msk.f32.gmra.mxu0 %vm201_vm1, %v1223_v32  ;;  %1238 = vmatmul.msk.f32.gmra.mxu1 %vm201_vm1, %v181_v33  ;;  %v1338_v10 = vld [vmem:[%s1559_s14 + $0x4e] sm:$0xff]  ;;  %v1383_v17 = vld [vmem:[%s1559_s14 + $0x66] sm:$0xff]  ;;  %v1386_v32 = vld [vmem:[%s1559_s14 + $0x7e] sm:$0xff] }
  0x26   : >> { %1330 = vmatpush.msk.msra.mxu3 %vm214_vm0, %v1700_v34  ;;  %512 = vmatpush.msrb.mxu1 %v1705_v35 }
  0x27   : >> { %453 = vmatpush.msrb.mxu0 %v1713_v36  ;;  %572 = vmatpush.msra.mxu2 %v1718_v37 }
  0x28   : >> { %513 = vmatpush.msrb.mxu1 %v1725_v38  ;;  %632 = vmatpush.msra.mxu3 %v1730_v39 }
  0x29   : >> { %1251 = vmatmul.msk.f32.vlgmr.msrb.gmra.mxu2 %vm201_vm1, %v1241_v40  ;;  %1267 = vmatmul.msk.f32.vlgmr.msrb.gmra.mxu3 %vm201_vm1, %v1734_v41 }
  0x2a   : >> { %454 = vmatpush.msrb.mxu0 %v1743_v42  ;;  %514 = vmatpush.msrb.mxu1 %v1749_v43 }
  0x2b   : >> { %573 = vmatpush.msra.mxu2 %v1764_v45  ;;  %633 = vmatpush.msra.mxu3 %v1769_v46 }
  0x2c   : >> { %1346 = vmatpush.msk.msra.mxu0 %vm214_vm0, %v1756_v44  ;;  %1351 = vmatpush.msk.msra.mxu1 %vm214_vm0, %v1510_v0  ;;  %v1879_v0 = vld [vmem:[%s1559_s14 + $0x34] sm:$0xff] }
  0x2d   : >> { %1283 = vmatmul.msk.f32.vlgmr.msrb.gmra.mxu0 %vm201_vm1, %v1774_v47  ;;  %1299 = vmatmul.msk.f32.vlgmr.msrb.gmra.mxu1 %vm201_vm1, %v1777_v48 }
  0x2e   : >> { %692 = vmatpush.msra.mxu0 %v1786_v49  ;;  %725 = vmatpush.msra.mxu1 %v1520_v2  ;;  %v1893_v2 = vld [vmem:[%s1559_s14 + $0x3a] sm:$0xff] }
  0x2f   : >> { %574 = vmatpush.msra.mxu2 %v1793_v50  ;;  %634 = vmatpush.msra.mxu3 %v1798_v51 }
  0x30   : >> { %693 = vmatpush.msra.mxu0 %v1807_v52  ;;  %726 = vmatpush.msra.mxu1 %v1534_v4  ;;  %v1906_v4 = vld [vmem:[%s1559_s14 + $0x3c] sm:$0xff] }
  0x31   : >> { %1252 = vmatmul.msk.f32.gmra.mxu2 %vm201_vm1, %v1242_v53  ;;  %1268 = vmatmul.msk.f32.gmra.mxu3 %vm201_vm1, %v1811_v54 }
  0x32   : >> { %575 = vmatpush.msra.mxu2 %v1820_v55  ;;  %635 = vmatpush.msra.mxu3 %v1825_v56 }
  0x33   : >> { %694 = vmatpush.msra.mxu0 %v1832_v57  ;;  %727 = vmatpush.msra.mxu1 %v1551_v6  ;;  %v1321_v6 = vld [vmem:[%s1559_s14 + $0x45] sm:$0xff] }
  0x34   : >> { %1356 = vmatpush.msk.msrb.mxu2 %vm214_vm0, %v1515_v1  ;;  %1361 = vmatpush.msk.msrb.mxu3 %vm214_vm0, %v1584_v12  ;;  %v1244_v1 = vld [vmem:[%s1559_s14 + $0x1a] sm:$0xff] }
  0x35   : >> { %1284 = vmatmul.msk.f32.gmra.mxu0 %vm201_vm1, %v1838_v58  ;;  %1300 = vmatmul.msk.f32.gmra.mxu1 %vm201_vm1, %v1841_v59  ;;  %v1323_v12 = vld [vmem:[%s1559_s14 + $0x55] sm:$0xff] }
  0x36   : >> { %695 = vmatpush.msra.mxu0 %v1850_v60  ;;  %728 = vmatpush.msra.mxu1 %v1568_v8  ;;  %v1306_v8 = vld [vmem:[%s1559_s14 + $0x4c] sm:$0xff] }
  0x37   : >> { %754 = vmatpush.msrb.mxu2 %v1529_v3  ;;  %783 = vmatpush.msrb.mxu3 %v1600_v14  ;;  %v1276_v3 = vld [vmem:[%s1559_s14 + $0x3b] sm:$0xff] }
  0x38   : >> { %1366 = vmatpush.msk.msrb.mxu0 %vm214_vm0, %v1589_v13  ;;  %1371 = vmatpush.msk.msrb.mxu1 %vm214_vm0, %v1630_v20  ;;  %v1339_v13 = vld [vmem:[%s1559_s14 + $0x56] sm:$0xff]  ;;  %v1384_v20 = vld [vmem:[%s1559_s14 + $0x6e] sm:$0xff] }
  0x39   : >> { %1253 = vmatmul.msk.f32.gmra.mxu2 %vm201_vm1, %v1243_v61  ;;  %1269 = vmatmul.msk.f32.gmra.mxu3 %vm201_vm1, %v1862_v62  ;;  %v1308_v14 = vld [vmem:[%s1559_s14 + $0x5c] sm:$0xff] }
  0x3a   : >> { %755 = vmatpush.msrb.mxu2 %v1539_v5  ;;  %784 = vmatpush.msrb.mxu3 %v1616_v18  ;;  %v1305_v5 = vld [vmem:[%s1559_s14 + $0x44] sm:$0xff] }
  0x3b   : >> { %816 = vmatpush.msrb.mxu0 %v1605_v15  ;;  %849 = vmatpush.msrb.mxu1 %v1665_v27  ;;  %v1324_v15 = vld [vmem:[%s1559_s14 + $0x5d] sm:$0xff]  ;;  %v1394_v18 = vld [vmem:[%s1559_s14 + $0x67] sm:$0xff] }
  0x3c   : >> { %756 = vmatpush.msrb.mxu2 %v1556_v7  ;;  %785 = vmatpush.msrb.mxu3 %v1642_v22  ;;  %v1337_v7 = vld [vmem:[%s1559_s14 + $0x46] sm:$0xff]  ;;  %v1406_v22 = vld [vmem:[%s1559_s14 + $0x70] sm:$0xff]  ;;  %v1407_v27 = vld [vmem:[%s1559_s14 + $0x78] sm:$0xff] }
  0x3d   : >> { %1285 = vmatmul.msk.f32.gmra.mxu0 %vm201_vm1, %v1876_v63  ;;  %1301 = vmatmul.msk.f32.gmra.mxu1 %vm201_vm1, %v1879_v0 }
  0x3e   : >> { %817 = vmatpush.msrb.mxu0 %v1623_v19  ;;  %850 = vmatpush.msrb.mxu1 %v1689_v31  ;;  %v1405_v19 = vld [vmem:[%s1559_s14 + $0x68] sm:$0xff] }
  0x3f   : >> { %757 = vmatpush.msrb.mxu2 %v1573_v9  ;;  %786 = vmatpush.msrb.mxu3 %v1660_v26  ;;  %v1322_v9 = vld [vmem:[%s1559_s14 + $0x4d] sm:$0xff]  ;;  %v1396_v26 = vld [vmem:[%s1559_s14 + $0x77] sm:$0xff] }
  0x40   : >> { %818 = vmatpush.msrb.mxu0 %v1647_v23  ;;  %851 = vmatpush.msrb.mxu1 %v1713_v36  ;;  %v1385_v23 = vld [vmem:[%s1559_s14 + $0x76] sm:$0xff]  ;;  %v1408_v36 = vld [vmem:[%s1559_s14 + $0x80] sm:$0xff] }
  0x41   : >> { %1254 = vmatmul.msk.f32.gmra.mxu2 %vm201_vm1, %v1244_v1  ;;  %1270 = vmatmul.msk.f32.gmra.mxu3 %vm201_vm1, %v1893_v2 }
  0x42   : >> { %819 = vmatpush.msrb.mxu0 %v1672_v28  ;;  %852 = vmatpush.msrb.mxu1 %v1743_v42 }
  0x45   : >> { %1286 = vmatmul.msk.f32.gmra.mxu0 %vm201_vm1, %v1276_v3  ;;  %1302 = vmatmul.msk.f32.gmra.mxu1 %vm201_vm1, %v1906_v4 }
  0x49   : >> { %1315 = vmatmul.msk.f32.vlgmr.msra.gmra.mxu2 %vm201_vm1, %v1305_v5  ;;  %1331 = vmatmul.msk.f32.vlgmr.msra.gmra.mxu3 %vm201_vm1, %v1321_v6 }
  0x4a   : >> { %1376 = vmatpush.msk.msra.mxu2 %vm214_vm0, %v1635_v21  ;;  %1387 = vmatpush.msk.msra.mxu3 %vm214_vm0, %v1684_v30  ;;  %v1395_v21 = vld [vmem:[%s1559_s14 + $0x6f] sm:$0xff] }
  0x4c   : >> { %882 = vmatpush.msra.mxu2 %v1677_v29  ;;  %934 = vmatpush.msra.mxu3 %v1718_v37 }
  0x4d   : >> { %1347 = vmatmul.msk.f32.vlgmr.msra.gmra.mxu0 %vm201_vm1, %v1337_v7  ;;  %1352 = vmatmul.msk.f32.vlgmr.msra.gmra.mxu1 %vm201_vm1, %v1774_v47 }
  0x4e   : >> { %1398 = vmatpush.msk.msra.mxu0 %vm214_vm0, %v1700_v34  ;;  %1409 = vmatpush.msk.msra.mxu1 %vm214_vm0, %v1756_v44 }
  0x4f   : >> { %883 = vmatpush.msra.mxu2 %v1705_v35  ;;  %935 = vmatpush.msra.mxu3 %v1764_v45  ;;  %v1397_v35 = vld [vmem:[%s1559_s14 + $0x7f] sm:$0xff]  ;;  %s1463_s14 = smov 64  }
  0x50   : >> { %985 = vmatpush.msra.mxu0 %v1730_v39  ;;  %1036 = vmatpush.msra.mxu1 %v1786_v49 }
  0x51   : >> { %1316 = vmatmul.msk.f32.gmra.mxu2 %vm201_vm1, %v1306_v8  ;;  %1332 = vmatmul.msk.f32.gmra.mxu3 %vm201_vm1, %v1322_v9 }
  0x52   : >> { %884 = vmatpush.msra.mxu2 %v1725_v38  ;;  %936 = vmatpush.msra.mxu3 %v1793_v50 }
  0x53   : >> { %986 = vmatpush.msra.mxu0 %v1769_v46  ;;  %1037 = vmatpush.msra.mxu1 %v1807_v52 }
  0x54   : >> { %885 = vmatpush.msra.mxu2 %v1749_v43  ;;  %937 = vmatpush.msra.mxu3 %v1820_v55 }
  0x55   : >> { %1348 = vmatmul.msk.f32.gmra.mxu0 %vm201_vm1, %v1338_v10  ;;  %1353 = vmatmul.msk.f32.gmra.mxu1 %vm201_vm1, %v1838_v58 }
  0x56   : >> { %987 = vmatpush.msra.mxu0 %v1798_v51  ;;  %1038 = vmatpush.msra.mxu1 %v1832_v57 }
  0x58   : >> { %988 = vmatpush.msra.mxu0 %v1825_v56  ;;  %1039 = vmatpush.msra.mxu1 %v1850_v60 }
  0x59   : >> { %1317 = vmatmul.msk.f32.gmra.mxu2 %vm201_vm1, %v1307_v11  ;;  %1333 = vmatmul.msk.f32.gmra.mxu3 %vm201_vm1, %v1323_v12 }
  0x5d   : >> { %1349 = vmatmul.msk.f32.gmra.mxu0 %vm201_vm1, %v1339_v13  ;;  %1354 = vmatmul.msk.f32.gmra.mxu1 %vm201_vm1, %v1876_v63 }
  0x61   : >> { %1318 = vmatmul.msk.f32.gmra.mxu2 %vm201_vm1, %v1308_v14  ;;  %1334 = vmatmul.msk.f32.gmra.mxu3 %vm201_vm1, %v1324_v15 }
  0x65   : >> { %1350 = vmatmul.msk.f32.gmra.mxu0 %vm201_vm1, %v1340_v16  ;;  %1355 = vmatmul.msk.f32.gmra.mxu1 %vm201_vm1, %v1276_v3 }
  0x69   : >> { %1357 = vmatmul.msk.f32.vlgmr.msrb.gmra.mxu2 %vm201_vm1, %v1734_v41  ;;  %1362 = vmatmul.msk.f32.vlgmr.msrb.gmra.mxu3 %vm201_vm1, %v1777_v48 }
  0x6d   : >> { %1367 = vmatmul.msk.f32.vlgmr.msrb.gmra.mxu0 %vm201_vm1, %v1305_v5  ;;  %1372 = vmatmul.msk.f32.vlgmr.msrb.gmra.mxu1 %vm201_vm1, %v1321_v6 }
  0x71   : >> { %1358 = vmatmul.msk.f32.gmra.mxu2 %vm201_vm1, %v1811_v54  ;;  %1363 = vmatmul.msk.f32.gmra.mxu3 %vm201_vm1, %v1841_v59 }
  0x75   : >> { %1368 = vmatmul.msk.f32.gmra.mxu0 %vm201_vm1, %v1306_v8  ;;  %1373 = vmatmul.msk.f32.gmra.mxu1 %vm201_vm1, %v1322_v9 }
  0x79   : >> { %1359 = vmatmul.msk.f32.gmra.mxu2 %vm201_vm1, %v1862_v62  ;;  %1364 = vmatmul.msk.f32.gmra.mxu3 %vm201_vm1, %v1879_v0 }
  0x7d   : >> { %1369 = vmatmul.msk.f32.gmra.mxu0 %vm201_vm1, %v1307_v11  ;;  %1374 = vmatmul.msk.f32.gmra.mxu1 %vm201_vm1, %v1323_v12 }
  0x81   : >> { %1360 = vmatmul.msk.f32.gmra.mxu2 %vm201_vm1, %v1893_v2  ;;  %1365 = vmatmul.msk.f32.gmra.mxu3 %vm201_vm1, %v1906_v4 }
  0x85   : >> { %1370 = vmatmul.msk.f32.gmra.mxu0 %vm201_vm1, %v1308_v14  ;;  %1375 = vmatmul.msk.f32.gmra.mxu1 %vm201_vm1, %v1324_v15 }
  0x89   : >> { %1377 = vmatmul.msk.f32.vlgmr.msra.gmra.mxu2 %vm201_vm1, %v1337_v7  ;;  %1388 = vmatmul.msk.f32.vlgmr.msra.gmra.mxu3 %vm201_vm1, %v1383_v17 }
  0x8d   : >> { %1399 = vmatmul.msk.f32.vlgmr.msra.gmra.mxu0 %vm201_vm1, %v1394_v18  ;;  %1410 = vmatmul.msk.f32.vlgmr.msra.gmra.mxu1 %vm201_vm1, %v1405_v19 }
  0x91   : >> { %1378 = vmatmul.msk.f32.gmra.mxu2 %vm201_vm1, %v1338_v10  ;;  %1389 = vmatmul.msk.f32.gmra.mxu3 %vm201_vm1, %v1384_v20 }
  0x95   : >> { %1400 = vmatmul.msk.f32.gmra.mxu0 %vm201_vm1, %v1395_v21  ;;  %1411 = vmatmul.msk.f32.gmra.mxu1 %vm201_vm1, %v1406_v22 }
  0x99   : >> { %1379 = vmatmul.msk.f32.gmra.mxu2 %vm201_vm1, %v1339_v13  ;;  %1390 = vmatmul.msk.f32.gmra.mxu3 %vm201_vm1, %v1385_v23 }
  0x9a   : >> { %v235_v24 = vpop.f32.mrf.mxu0  ;;  %v279_v25 = vpop.f32.mrf.mxu1 }
  0x9b   : >> { %v280_v28 = vadd.f32 %v279_v25, %v235_v24 }
  0x9c   : >> { %v241_v29 = vpop.f32.mrf.mxu2  ;;  %v285_v30 = vpop.f32.mrf.mxu3 }
  0x9d   : >> { %v286_v31 = vadd.f32 %v285_v30, %v241_v29  ;;  %1401 = vmatmul.msk.f32.gmra.mxu0 %vm201_vm1, %v1396_v26  ;;  %1412 = vmatmul.msk.f32.gmra.mxu1 %vm201_vm1, %v1407_v27 }
  0xa1   : >> { %1380 = vmatmul.msk.f32.gmra.mxu2 %vm201_vm1, %v1340_v16  ;;  %1391 = vmatmul.msk.f32.gmra.mxu3 %vm201_vm1, %v1386_v32 }
  0xa2   : >> { %v238_v33 = vpop.f32.mrf.mxu0  ;;  %v282_v34 = vpop.f32.mrf.mxu1 }
  0xa3   : >> { %v283_v37 = vadd.f32 %v282_v34, %v238_v33 }
  0xa4   : >> { %v244_v38 = vpop.f32.mrf.mxu2  ;;  %v288_v39 = vpop.f32.mrf.mxu3 }
  0xa5   : >> { %v289_v40 = vadd.f32 %v288_v39, %v244_v38  ;;  %1402 = vmatmul.msk.f32.gmra.mxu0 %vm201_vm1, %v1397_v35  ;;  %1413 = vmatmul.msk.f32.gmra.mxu1 %vm201_vm1, %v1408_v36 }
  0xaa   : >> { %v456_v41 = vpop.f32.mrf.mxu0  ;;  %v516_v42 = vpop.f32.mrf.mxu1 }
  0xac   : >> { %v335_v43 = vpop.f32.mrf.mxu2  ;;  %v396_v44 = vpop.f32.mrf.mxu3 }
  0xad   : >> { %v347_v45 = vadd.f32 %v335_v43, %v280_v28 }
  0xaf   : >> { %v408_v46 = vadd.f32 %v396_v44, %v347_v45 }
  0xb1   : >> { %v468_v47 = vadd.f32 %v456_v41, %v408_v46 }
  0xb2   : >> { %v459_v48 = vpop.f32.mrf.mxu0  ;;  %v519_v49 = vpop.f32.mrf.mxu1 }
  0xb3   : >> { %v528_v50 = vadd.f32 %v516_v42, %v468_v47 }
  0xb4   : >> { %v338_v51 = vpop.f32.mrf.mxu2  ;;  %v399_v52 = vpop.f32.mrf.mxu3 }
  0xb5   : >> { %v348_v53 = vadd.f32 %v338_v51, %v283_v37 }
  0xb7   : >> { %v409_v54 = vadd.f32 %v399_v52, %v348_v53 }
  0xb9   : >> { %v469_v55 = vadd.f32 %v459_v48, %v409_v54 }
  0xba   : >> { %v462_v56 = vpop.f32.mrf.mxu0  ;;  %v522_v57 = vpop.f32.mrf.mxu1 }
  0xbb   : >> { %v529_v58 = vadd.f32 %v519_v49, %v469_v55 }
  0xbc   : >> { %v341_v59 = vpop.f32.mrf.mxu2  ;;  %v402_v60 = vpop.f32.mrf.mxu3 }
  0xbd   : >> { %v349_v61 = vadd.f32 %v341_v59, %v286_v31 }
  0xbf   : >> { %v410_v62 = vadd.f32 %v402_v60, %v349_v61 }
  0xc1   : >> { %v470_v63 = vadd.f32 %v462_v56, %v410_v62 }
  0xc2   : >> { %v465_v0 = vpop.f32.mrf.mxu0  ;;  %v525_v1 = vpop.f32.mrf.mxu1 }
  0xc3   : >> { %v530_v2 = vadd.f32 %v522_v57, %v470_v63 }
  0xc4   : >> { %v344_v3 = vpop.f32.mrf.mxu2  ;;  %v405_v4 = vpop.f32.mrf.mxu3 }
  0xc5   : >> { %v350_v5 = vadd.f32 %v344_v3, %v289_v40 }
  0xc7   : >> { %v411_v6 = vadd.f32 %v405_v4, %v350_v5 }
  0xc9   : >> { %v471_v7 = vadd.f32 %v465_v0, %v411_v6 }
  0xca   : >> { %v697_v8 = vpop.f32.mrf.mxu0  ;;  %v730_v9 = vpop.f32.mrf.mxu1 }
  0xcb   : >> { %v531_v10 = vadd.f32 %v525_v1, %v471_v7 }
  0xcc   : >> { %v577_v11 = vpop.f32.mrf.mxu2  ;;  %v637_v12 = vpop.f32.mrf.mxu3 }
  0xcd   : >> { %v589_v13 = vadd.f32 %v577_v11, %v528_v50 }
  0xcf   : >> { %v649_v14 = vadd.f32 %v637_v12, %v589_v13 }
  0xd1   : >> { %v709_v15 = vadd.f32 %v697_v8, %v649_v14 }
  0xd2   : >> { %v700_v16 = vpop.f32.mrf.mxu0  ;;  %v733_v17 = vpop.f32.mrf.mxu1 }
  0xd4   : >> { %v580_v18 = vpop.f32.mrf.mxu2  ;;  %v640_v19 = vpop.f32.mrf.mxu3 }
  0xd5   : >> { %v590_v20 = vadd.f32 %v580_v18, %v529_v58 }
  0xd7   : >> { %v650_v21 = vadd.f32 %v640_v19, %v590_v20 }
  0xd9   : >> { %v2020_v22 = vadd.f32 %v700_v16, %v650_v21 }
  0xda   : >> { %v703_v23 = vpop.f32.mrf.mxu0  ;;  %v736_v24 = vpop.f32.mrf.mxu1 }
  0xdc   : >> { %v583_v25 = vpop.f32.mrf.mxu2  ;;  %v643_v26 = vpop.f32.mrf.mxu3 }
  0xdd   : >> { %v591_v27 = vadd.f32 %v583_v25, %v530_v2 }
  0xdf   : >> { %v651_v28 = vadd.f32 %v643_v26, %v591_v27 }
  0xe1   : >> { %v2022_v29 = vadd.f32 %v703_v23, %v651_v28 }
  0xe2   : >> { %v706_v30 = vpop.f32.mrf.mxu0  ;;  %v739_v31 = vpop.f32.mrf.mxu1 }
  0xe4   : >> { %v586_v32 = vpop.f32.mrf.mxu2  ;;  %v646_v33 = vpop.f32.mrf.mxu3 }
  0xe5   : >> { %v592_v34 = vadd.f32 %v586_v32, %v531_v10 }
  0xe7   : >> { %v652_v35 = vadd.f32 %v646_v33, %v592_v34 }
  0xe9   : >> { %v2024_v36 = vadd.f32 %v706_v30, %v652_v35 }
  0xea   : >> { %v821_v37 = vpop.f32.mrf.mxu0  ;;  %v854_v38 = vpop.f32.mrf.mxu1 }
  0xec   : >> { %v759_v39 = vpop.f32.mrf.mxu2  ;;  %v788_v40 = vpop.f32.mrf.mxu3 }
  0xed   : >> { %v760_v49 = vadd.f32 %v759_v39, %v730_v9 }
  0xef   : >> { %v800_v52 = vadd.f32 %v788_v40, %v760_v49 }
  0xf1   : >> { %v833_v55 = vadd.f32 %v821_v37, %v800_v52 }
  0xf2   : >> { %v824_v41 = vpop.f32.mrf.mxu0  ;;  %v857_v42 = vpop.f32.mrf.mxu1 }
  0xf3   : >> { %v866_v59 = vadd.f32 %v854_v38, %v833_v55 }
  0xf4   : >> { %v762_v43 = vpop.f32.mrf.mxu2  ;;  %v791_v44 = vpop.f32.mrf.mxu3 }
  0xf5   : >> { %v763_v56 = vadd.f32 %v762_v43, %v733_v17  ;;  %v1446_v43 = vld [vmem:[%s2046_s2] ss:$0 sm:$0xff] }
  0xf7   : >> { %v801_v60 = vadd.f32 %v791_v44, %v763_v56 }
  0xf9   : >> { %v834_v0 = vadd.f32 %v824_v41, %v801_v60 }
  0xfa   : >> { %v827_v45 = vpop.f32.mrf.mxu0  ;;  %v860_v46 = vpop.f32.mrf.mxu1 }
  0xfb   : >> { %v867_v5 = vadd.f32 %v857_v42, %v834_v0 }
  0xfc   : >> { %v765_v47 = vpop.f32.mrf.mxu2  ;;  %v794_v48 = vpop.f32.mrf.mxu3 }
  0xfd   : >> { %v766_v1 = vadd.f32 %v765_v47, %v736_v24 }
  0xff   : >> { %v802_v6 = vadd.f32 %v794_v48, %v766_v1 }
 0x101   : >> { %v835_v13 = vadd.f32 %v827_v45, %v802_v6 }
 0x102   : >> { %v830_v50 = vpop.f32.mrf.mxu0  ;;  %v863_v51 = vpop.f32.mrf.mxu1 }
 0x103   : >> { %v868_v18 = vadd.f32 %v860_v46, %v835_v13 }
 0x104   : >> { %v768_v53 = vpop.f32.mrf.mxu2  ;;  %v797_v54 = vpop.f32.mrf.mxu3 }
 0x105   : >> { %v769_v14 = vadd.f32 %v768_v53, %v739_v31 }
 0x107   : >> { %v803_v19 = vadd.f32 %v797_v54, %v769_v14 }
 0x109   : >> { %v836_v28 = vadd.f32 %v830_v50, %v803_v19 }
 0x10a   : >> { %v990_v57 = vpop.f32.mrf.mxu0  ;;  %v1041_v58 = vpop.f32.mrf.mxu1 }
 0x10b   : >> { %v869_v32 = vadd.f32 %v863_v51, %v836_v28 }
 0x10c   : >> { %v887_v61 = vpop.f32.mrf.mxu2  ;;  %v939_v62 = vpop.f32.mrf.mxu3 }
 0x10d   : >> { %v899_v63 = vadd.f32 %v887_v61, %v866_v59 }
 0x10f   : >> { %v951_v2 = vadd.f32 %v939_v62, %v899_v63 }
 0x111   : >> { %v1002_v3 = vadd.f32 %v990_v57, %v951_v2 }
 0x112   : >> { %v993_v4 = vpop.f32.mrf.mxu0  ;;  %v1044_v8 = vpop.f32.mrf.mxu1 }
 0x113   : >> { %v1053_v7 = vadd.f32 %v1041_v58, %v1002_v3 }
 0x114   : >> { %v890_v9 = vpop.f32.mrf.mxu2  ;;  %v942_v10 = vpop.f32.mrf.mxu3 }
 0x115   : >> { %v900_v11 = vadd.f32 %v890_v9, %v867_v5  ;;  %v1057_v12 = vmax.f32 %v709_v15, %v1053_v7 }
 0x117   : >> { %v952_v16 = vadd.f32 %v942_v10, %v900_v11  ;;  %1065 = vrot.lane.b32.xlu0 %v1057_v12, %s1463_s14 }
 0x119   : >> { %v1003_v17 = vadd.f32 %v993_v4, %v952_v16 }
 0x11a   : >> { %v996_v21 = vpop.f32.mrf.mxu0  ;;  %v1047_v27 = vpop.f32.mrf.mxu1 }
 0x11b   : >> { %v1054_v20 = vadd.f32 %v1044_v8, %v1003_v17 }
 0x11c   : >> { %v893_v23 = vpop.f32.mrf.mxu2  ;;  %v945_v24 = vpop.f32.mrf.mxu3 }
 0x11d   : >> { %v1058_v25 = vmax.f32 %v2020_v22, %v1054_v20  ;;  %v901_v26 = vadd.f32 %v893_v23, %v868_v18 }
 0x11f   : >> { %v953_v30 = vadd.f32 %v945_v24, %v901_v26  ;;  %1067 = vrot.lane.b32.xlu0 %v1058_v25, %s1463_s14 }
 0x121   : >> { %v1004_v15 = vadd.f32 %v996_v21, %v953_v30 }
 0x122   : >> { %v999_v38 = vpop.f32.mrf.mxu0  ;;  %v1050_v40 = vpop.f32.mrf.mxu1 }
 0x123   : >> { %v1055_v31 = vadd.f32 %v1047_v27, %v1004_v15 }
 0x124   : >> { %v896_v33 = vpop.f32.mrf.mxu2  ;;  %v948_v34 = vpop.f32.mrf.mxu3 }
 0x125   : >> { %v902_v35 = vadd.f32 %v896_v33, %v869_v32  ;;  %v1059_v37 = vmax.f32 %v2022_v29, %v1055_v31 }
 0x127   : >> { %v954_v39 = vadd.f32 %v948_v34, %v902_v35  ;;  %1069 = vrot.lane.b32.xlu1 %v1059_v37, %s1463_s14 }
 0x129   : >> { %v1005_v22 = vadd.f32 %v999_v38, %v954_v39 }
 0x12b   : >> { %v1056_v41 = vadd.f32 %v1050_v40, %v1005_v22 }
 0x12d   : >> { %v1060_v42 = vmax.f32 %v2024_v36, %v1056_v41 }
 0x12f   : >> { %1071 = vrot.lane.b32.xlu1 %v1060_v42, %s1463_s14 }
 0x189   : >> { %v1066_v44 = vpop.permute.xlu0 %1065 }
 0x18a   : >> { %v1077_v45 = vmax.f32 %v1057_v12, %v1066_v44 }
 0x18c   : >> { %v1085_v46 = vadd.f32 %v1446_v43, %v1077_v45 }
 0x18e   : >> { %vm1089_vm3 = vcmp.ge.f32.partialorder %v1085_v46, 0.0  ;;  %v1093_v29 = vmul.f32 0.2, %v1085_v46 }
 0x190   : >> { %v1097_v47 = vsel %vm1089_vm3, %v1085_v46, %v1093_v29 }
 0x191   : >> { %1104 = vst.msk [vmem:[%s1102_s29] sm:$0xff] %vm1103_vm2, %v1097_v47  ;;  %v1068_v48 = vpop.permute.xlu0 %1067 }
 0x192   : >> { %v1078_v49 = vmax.f32 %v1058_v25, %v1068_v48 }
 0x194   : >> { %v1086_v50 = vadd.f32 %v1446_v43, %v1078_v49 }
 0x196   : >> { %vm1090_vm4 = vcmp.ge.f32.partialorder %v1086_v50, 0.0  ;;  %v1094_v36 = vmul.f32 0.2, %v1086_v50 }
 0x198   : >> { %v1098_v51 = vsel %vm1090_vm4, %v1086_v50, %v1094_v36 }
 0x199   : >> { %1105 = vst.msk [vmem:[%s1102_s29 + $0x8] sm:$0xff] %vm1103_vm2, %v1098_v51  ;;  %v1070_v52 = vpop.permute.xlu1 %1069 }
 0x19a   : >> { %v1079_v53 = vmax.f32 %v1059_v37, %v1070_v52 }
 0x19c   : >> { %v1087_v54 = vadd.f32 %v1446_v43, %v1079_v53 }
 0x19e   : >> { %vm1091_vm5 = vcmp.ge.f32.partialorder %v1087_v54, 0.0  ;;  %v1095_v55 = vmul.f32 0.2, %v1087_v54 }
 0x1a0   : >> { %v1099_v56 = vsel %vm1091_vm5, %v1087_v54, %v1095_v55 }
 0x1a1   : >> { %1106 = vst.msk [vmem:[%s1102_s29 + $0x10] sm:$0xff] %vm1103_vm2, %v1099_v56  ;;  %v1072_v57 = vpop.permute.xlu1 %1071 }
 0x1a2   : >> { %v1080_v58 = vmax.f32 %v1060_v42, %v1072_v57 }
 0x1a4   : >> { %v1088_v59 = vadd.f32 %v1446_v43, %v1080_v58 }
 0x1a5   : > { %175 = sbr.rel (!%p173_p4) target bundleno = 15 (0xf), region = 90 }
 0x1a6   : >> { %vm1092_vm6 = vcmp.ge.f32.partialorder %v1088_v59, 0.0  ;;  %v1096_v60 = vmul.f32 0.2, %v1088_v59 }
 0x1a8   : >> { %v1100_v61 = vsel %vm1092_vm6, %v1088_v59, %v1096_v60 }
 0x1a9   : >> { %1107 = vst.msk [vmem:[%s1102_s29 + $0x18] sm:$0xff] %vm1103_vm2, %v1100_v61 }
 0x1aa PF: > { %s13_s12 = sadd.s32 1, %s1457_s12  }
 0x1ab   : > { %p10_p5 = scmp.ge.s32.totalorder %s13_s12, 4  }
 0x1ad   :  { %12 = sbr.rel (!%p10_p5) target bundleno = 1 (0x1), region = 101 }

// kernel: model_forward.6
= control target key start
LH: loop header
LB: loop body
LE: loop exit
PB: predicated region body
PF: predicated region fallthrough
CT: control target
= control target key end

     0   :  { %s1202_s12 = smov 0   ;;  %s1921_s0 = inlined_call_operand.vmem [shape: f32[2,324,72], index: 0, kind: input, shape index: {}]   ;;  %s1922_s1 = inlined_call_operand.vmem [shape: f32[9,72,128], index: 1, kind: input, shape index: {}]   ;;  %s1923_s2 = inlined_call_operand.vmem [shape: f32[1,64], index: 2, kind: input, shape index: {}]   ;;  %s1924_s3 = inlined_call_operand.vmem [shape: f32[2,128,64], index: 3, kind: output, shape index: {}]  }
   0x1 LB: > { %s968_s13 = sadd.s32 4294967295, %s1175_s12   ;;  %p972_p0 = scmp.ge.s32.totalorder %s1175_s12, 1  ;;  %s1175_s12 = sphi %s1202_s12, %s13_s12  }
   0x2   : > { %p137_p1 = scmp.lt.s32.totalorder %s1175_s12, 3 }
   0x4   : > { %p138_p2 = pnand %p972_p0, %p137_p1 }
   0x5   : > { %p161_p3 = scmp.lt.s32.totalorder (!%p138_p2), %s968_s13, 1  ;;  %s1220_s22 = smov (!%p138_p2), 0  }
   0x6   : > { %141 = sbr.rel (%p138_p2) target bundleno = 384 (0x180), region = 32 }
   0xb   : > { %s1986_s13 = smov (!%p161_p3, %s968_s13), 1 }
   0xc   : > { %s1146_s14 = smul.u32 328, %s1986_s13  ;;  %s1127_s15 = sshll.u32 %s1986_s13, 7 }
   0xd   : > { %s1213_s18 = scalar_lea.vmem %s1924_s3, %s1127_s15 }
   0xe   : > { %s1218_s21 = scalar_lea.vmem %s1921_s0, %s1146_s14 }
   0xf LB: >> { %v1228_v0 = vld [vmem:[%s1922_s1 + $0x88] sm:$0xff]  ;;  %v1233_v1 = vld [vmem:[%s1922_s1 + $0xd0] sm:$0xff]  ;;  %v1238_v2 = vld [vmem:[%s1922_s1 + $0x80] sm:$0xff]  ;;  %s178_s19 = smul.u32 36, %s1179_s22  ;;  %vm205_vm0 = vcmask 588800   ;;  %s1124_s5 = sshll.u32 %s1179_s22, 4  ;;  %s1179_s22 = sphi %s1220_s22, %s176_s22  }
  0x10   : >> { %219 = vmatpush.msra.mxu0 %v1228_v0  ;;  %291 = vmatpush.msra.mxu2 %v1233_v1  ;;  %v1245_v3 = vld [vmem:[%s1922_s1 + $0x40] sm:$0xff]  ;;  %v1250_v4 = vld [vmem:[%s1922_s1 + $0xc8] sm:$0xff]  ;;  %v1255_v5 = vld [vmem:[%s1922_s1 + $0x118] sm:$0xff]  ;;  %s858_s6 = scalar_lea.vmem %s1213_s18, %s1124_s5  ;;  %vm859_vm1 = vcmask 523264   ;;  %s176_s22 = sadd.s32 1, %s1179_s22  }
  0x11   : >> { %248 = vmatpush.msra.mxu1 %v1245_v3  ;;  %337 = vmatpush.msra.mxu3 %v1255_v5  ;;  %v1262_v6 = vld [vmem:[%s1922_s1 + $0x78] sm:$0xff]  ;;  %v1272_v8 = vld [vmem:[%s1922_s1 + $0xc0] sm:$0xff]  ;;  %v1279_v9 = vld [vmem:[%s1922_s1 + $0x110] sm:$0xff]  ;;  %s1401_s11 = scalar_lea.vmem %s1218_s21, %s178_s19  ;;  %p173_p4 = scmp.ge.s32.totalorder %s176_s22, 8  }
  0x12   : >> { %v1267_v7 = vld [vmem:[%s1922_s1 + $0x38] sm:$0xff]  ;;  %220 = vmatpush.msra.mxu0 %v1238_v2  ;;  %292 = vmatpush.msra.mxu2 %v1250_v4  ;;  %v1284_v10 = vld [vmem:[%s1922_s1 + $0x30] sm:$0xff]  ;;  %v1301_v13 = vld [vmem:[%s1922_s1 + $0x108] sm:$0xff] }
  0x13   : >> { %249 = vmatpush.msra.mxu1 %v1267_v7  ;;  %338 = vmatpush.msra.mxu3 %v1279_v9  ;;  %v1291_v11 = vld [vmem:[%s1922_s1 + $0x70] sm:$0xff]  ;;  %v1296_v12 = vld [vmem:[%s1922_s1 + $0xb8] sm:$0xff]  ;;  %v1308_v14 = vld [vmem:[%s1922_s1 + $0x28] sm:$0xff] }
  0x14   : >> { %221 = vmatpush.msra.mxu0 %v1262_v6  ;;  %293 = vmatpush.msra.mxu2 %v1272_v8  ;;  %v1313_v15 = vld [vmem:[%s1922_s1 + $0x100] sm:$0xff]  ;;  %v1320_v16 = vld [vmem:[%s1922_s1 + $0x68] sm:$0xff]  ;;  %v1325_v17 = vld [vmem:[%s1922_s1 + $0xb0] sm:$0xff] }
  0x15   : >> { %250 = vmatpush.msra.mxu1 %v1284_v10  ;;  %339 = vmatpush.msra.mxu3 %v1301_v13  ;;  %v1332_v18 = vld [vmem:[%s1922_s1 + $0x20] sm:$0xff]  ;;  %v1337_v19 = vld [vmem:[%s1922_s1 + $0xf8] sm:$0xff]  ;;  %v1349_v21 = vld [vmem:[%s1922_s1 + $0xa8] sm:$0xff] }
  0x16   : >> { %222 = vmatpush.msra.mxu0 %v1291_v11  ;;  %294 = vmatpush.msra.mxu2 %v1296_v12  ;;  %v1344_v20 = vld [vmem:[%s1922_s1 + $0x60] sm:$0xff]  ;;  %v1357_v22 = vld [vmem:[%s1922_s1 + $0x18] sm:$0xff]  ;;  %v1362_v23 = vld [vmem:[%s1922_s1 + $0xf0] sm:$0xff] }
  0x17   : >> { %251 = vmatpush.msra.mxu1 %v1308_v14  ;;  %340 = vmatpush.msra.mxu3 %v1313_v15  ;;  %v1369_v24 = vld [vmem:[%s1922_s1 + $0x58] sm:$0xff]  ;;  %v1374_v25 = vld [vmem:[%s1922_s1 + $0xa0] sm:$0xff]  ;;  %v1381_v26 = vld [vmem:[%s1922_s1 + $0x10] sm:$0xff] }
  0x18   : >> { %223 = vmatpush.msra.mxu0 %v1320_v16  ;;  %295 = vmatpush.msra.mxu2 %v1325_v17  ;;  %v1386_v27 = vld [vmem:[%s1922_s1 + $0xe8] sm:$0xff]  ;;  %v1393_v28 = vld [vmem:[%s1922_s1 + $0x50] sm:$0xff]  ;;  %v1398_v29 = vld [vmem:[%s1922_s1 + $0x98] sm:$0xff] }
  0x19   : >> { %252 = vmatpush.msra.mxu1 %v1332_v18  ;;  %341 = vmatpush.msra.mxu3 %v1337_v19  ;;  %v1408_v30 = vld [vmem:[%s1922_s1 + $0x8] sm:$0xff]  ;;  %v1413_v31 = vld [vmem:[%s1922_s1 + $0xe0] sm:$0xff]  ;;  %v1425_v33 = vld [vmem:[%s1922_s1 + $0x90] sm:$0xff] }
  0x1a   : >> { %224 = vmatpush.msra.mxu0 %v1344_v20  ;;  %296 = vmatpush.msra.mxu2 %v1349_v21  ;;  %1951 = vst [vmem:[#allocation2_spill] sm:$0xff] %v1413_v31  ;;  %v1420_v32 = vld [vmem:[%s1922_s1 + $0x48] sm:$0xff]  ;;  %v1433_v35 = vld [vmem:[%s1922_s1 + $0x160] sm:$0xff]  ;;  %v1440_v36 = vld [vmem:[%s1922_s1 + $0x1f0] sm:$0xff] }
  0x1b   : >> { %253 = vmatpush.msra.mxu1 %v1357_v22  ;;  %342 = vmatpush.msra.mxu3 %v1362_v23  ;;  %v991_v34 = vld [vmem:[%s1401_s11 + $0x2] sm:$0xff]  ;;  %v1453_v39 = vld [vmem:[%s1922_s1 + $0xd8] sm:$0xff]  ;;  %v1491_v46 = vld [vmem:[%s1922_s1 + $0x150] sm:$0xff] }
  0x1c   : >> { %225 = vmatpush.msra.mxu0 %v1369_v24  ;;  %297 = vmatpush.msra.mxu2 %v1374_v25  ;;  %v976_v37 = vld [vmem:[%s1401_s11 + $0x1] sm:$0xff]  ;;  %1952 = vst [vmem:[#allocation3_spill] sm:$0xff] %v1453_v39  ;;  %v1458_v40 = vld [vmem:[%s1401_s11 + $0x12] sm:$0xff]  ;;  %v992_v54 = vld [vmem:[%s1401_s11 + $0xa] sm:$0xff] }
  0x1d   : >> { %254 = vmatpush.msra.mxu1 %v1381_v26  ;;  %343 = vmatpush.msra.mxu3 %v1386_v27  ;;  %v1448_v38 = vld [vmem:[%s1922_s1] sm:$0xff]  ;;  %v1463_v41 = vld [vmem:[%s1922_s1 + $0x158] sm:$0xff]  ;;  %v1470_v42 = vld [vmem:[%s1922_s1 + $0x1a8] sm:$0xff] }
  0x1e   : >> { %226 = vmatpush.msra.mxu0 %v1393_v28  ;;  %298 = vmatpush.msra.mxu2 %v1398_v29  ;;  %v1475_v43 = vld [vmem:[%s1922_s1 + $0x1e8] sm:$0xff]  ;;  %v1482_v44 = vld [vmem:[%s1922_s1 + $0x238] sm:$0xff]  ;;  %v180_v45 = vld [vmem:[%s1401_s11] sm:$0xff] }
  0x1f   : >> { %255 = vmatpush.msra.mxu1 %v1408_v30  ;;  %344 = vmatpush.msra.mxu3 %v1413_v31  ;;  %1953 = vst [vmem:[#allocation4_spill] sm:$0xff] %v1482_v44  ;;  %v1496_v47 = vld [vmem:[%s1922_s1 + $0x1a0] sm:$0xff]  ;;  %v1508_v49 = vld [vmem:[%s1922_s1 + $0x230] sm:$0xff]  ;;  %v1515_v50 = vld [vmem:[%s1922_s1 + $0x148] sm:$0xff] }
  0x20   : >> { %227 = vmatpush.msra.mxu0 %v1420_v32  ;;  %299 = vmatpush.msra.mxu2 %v1425_v33  ;;  %v1503_v48 = vld [vmem:[%s1922_s1 + $0x1e0] sm:$0xff]  ;;  %1954 = vst [vmem:[#allocation5_spill] sm:$0xff] %v1508_v49  ;;  %v1520_v51 = vld [vmem:[%s1922_s1 + $0x198] sm:$0xff]  ;;  %v1532_v53 = vld [vmem:[%s1922_s1 + $0x228] sm:$0xff] }
  0x21   : >> { %1002 = vmatmul.msk.f32.vlgmr.msra.gmra.mxu2 %vm205_vm0, %v991_v34  ;;  %987 = vmatmul.msk.f32.vlgmr.msra.gmra.mxu0 %vm205_vm0, %v976_v37  ;;  %v1527_v52 = vld [vmem:[%s1922_s1 + $0x1d8] sm:$0xff]  ;;  %1955 = vst [vmem:[#allocation6_spill] sm:$0xff] %v1532_v53  ;;  %v1540_v55 = vld [vmem:[%s1922_s1 + $0x140] sm:$0xff]  ;;  %v1547_v56 = vld [vmem:[%s1922_s1 + $0x190] sm:$0xff] }
  0x22   : >> { %382 = vmatpush.msrb.mxu0 %v1433_v35  ;;  %473 = vmatpush.msrb.mxu2 %v1440_v36  ;;  %v1552_v57 = vld [vmem:[%s1922_s1 + $0x1d0] sm:$0xff]  ;;  %v1559_v58 = vld [vmem:[%s1922_s1 + $0x220] sm:$0xff]  ;;  %v1570_v61 = vld [vmem:[%s1922_s1 + $0x138] sm:$0xff] }
  0x23   : >> { %256 = vmatpush.msra.mxu1 %v1448_v38  ;;  %345 = vmatpush.msra.mxu3 %v1453_v39  ;;  %1956 = vst [vmem:[#allocation7_spill] sm:$0xff] %v1559_v58  ;;  %v977_v59 = vld [vmem:[%s1401_s11 + $0x9] sm:$0xff]  ;;  %v1565_v60 = vld [vmem:[%s1401_s11 + $0x1a] sm:$0xff] }
  0x24   : >> { %1017 = vmatmul.msk.f32.vlgmr.msra.gmra.mxu3 %vm205_vm0, %v1458_v40  ;;  %383 = vmatpush.msrb.mxu0 %v1463_v41  ;;  %v1577_v62 = vld [vmem:[%s1922_s1 + $0x188] sm:$0xff]  ;;  %v1589_v34 = vld [vmem:[%s1922_s1 + $0x218] sm:$0xff]  ;;  %v1651_v39 = vld [vmem:[%s1922_s1 + $0x170] sm:$0xff] }
  0x25   : >> { %427 = vmatpush.msrb.mxu1 %v1470_v42  ;;  %474 = vmatpush.msrb.mxu2 %v1475_v43  ;;  %v1582_v63 = vld [vmem:[%s1922_s1 + $0x1c8] sm:$0xff]  ;;  %1957 = vst [vmem:[#allocation8_spill] sm:$0xff] %v1589_v34  ;;  %v1678_v31 = vld [vmem:[%s1922_s1 + $0x280] sm:$0xff] }
  0x26   : >> { %518 = vmatpush.msrb.mxu3 %v1482_v44  ;;  %989 = vmatmul.msk.f32.vlgmr.msra.gmra.mxu1 %vm205_vm0, %v180_v45  ;;  %v181_v37 = vld [vmem:[%s1401_s11 + $0x8] sm:$0xff]  ;;  %v1598_v45 = vld [vmem:[%s1922_s1 + $0x130] sm:$0xff]  ;;  %v1646_v44 = vld [vmem:[%s1922_s1 + $0x120] sm:$0xff] }
  0x27   : >> { %384 = vmatpush.msrb.mxu0 %v1491_v46  ;;  %428 = vmatpush.msrb.mxu1 %v1496_v47  ;;  %1958 = vst [vmem:[#allocation9_spill] sm:$0xff] %v1598_v45 }
  0x28   : >> { %475 = vmatpush.msrb.mxu2 %v1503_v48  ;;  %519 = vmatpush.msrb.mxu3 %v1508_v49  ;;  %v1627_v49 = vld [vmem:[%s1922_s1 + $0x178] sm:$0xff]  ;;  %1964 = vst [vmem:[#allocation15_spill] sm:$0xff] %v1646_v44 }
  0x29   : >> { %385 = vmatpush.msrb.mxu0 %v1515_v50  ;;  %429 = vmatpush.msrb.mxu1 %v1520_v51 }
  0x2a   : >> { %476 = vmatpush.msrb.mxu2 %v1527_v52  ;;  %520 = vmatpush.msrb.mxu3 %v1532_v53  ;;  %v1622_v53 = vld [vmem:[%s1922_s1 + $0x128] sm:$0xff] }
  0x2b   : >> { %1003 = vmatmul.msk.f32.gmra.mxu2 %vm205_vm0, %v992_v54  ;;  %386 = vmatpush.msrb.mxu0 %v1540_v55  ;;  %v1603_v54 = vld [vmem:[%s1922_s1 + $0x180] sm:$0xff]  ;;  %1961 = vst [vmem:[#allocation12_spill] sm:$0xff] %v1622_v53 }
  0x2c   : >> { %430 = vmatpush.msrb.mxu1 %v1547_v56  ;;  %477 = vmatpush.msrb.mxu2 %v1552_v57 }
  0x2d   : >> { %521 = vmatpush.msrb.mxu3 %v1559_v58  ;;  %988 = vmatmul.msk.f32.gmra.mxu0 %vm205_vm0, %v977_v59  ;;  %v1610_v59 = vld [vmem:[%s1922_s1 + $0x1c0] sm:$0xff]  ;;  %v1615_v58 = vld [vmem:[%s1922_s1 + $0x210] sm:$0xff] }
  0x2e   : >> { %1018 = vmatmul.msk.f32.gmra.mxu3 %vm205_vm0, %v1565_v60  ;;  %387 = vmatpush.msrb.mxu0 %v1570_v61  ;;  %1959 = vst [vmem:[#allocation10_spill] sm:$0xff] %v1610_v59 }
  0x2f   : >> { %431 = vmatpush.msrb.mxu1 %v1577_v62  ;;  %478 = vmatpush.msrb.mxu2 %v1582_v63  ;;  %1960 = vst [vmem:[#allocation11_spill] sm:$0xff] %v1615_v58 }
  0x30   : >> { %522 = vmatpush.msrb.mxu3 %v1589_v34  ;;  %990 = vmatmul.msk.f32.gmra.mxu1 %vm205_vm0, %v181_v37  ;;  %v1634_v37 = vld [vmem:[%s1922_s1 + $0x1b8] sm:$0xff]  ;;  %v1639_v34 = vld [vmem:[%s1922_s1 + $0x208] sm:$0xff] }
  0x31   : >> { %388 = vmatpush.msrb.mxu0 %v1598_v45  ;;  %432 = vmatpush.msrb.mxu1 %v1603_v54  ;;  %1962 = vst [vmem:[#allocation13_spill] sm:$0xff] %v1634_v37  ;;  %v1668_v45 = vld [vmem:[%s1401_s11 + $0x13] sm:$0xff] }
  0x32   : >> { %1963 = vst [vmem:[#allocation14_spill] sm:$0xff] %v1639_v34  ;;  %479 = vmatpush.msrb.mxu2 %v1610_v59  ;;  %523 = vmatpush.msrb.mxu3 %v1615_v58  ;;  %v1658_v59 = vld [vmem:[%s1922_s1 + $0x1b0] sm:$0xff]  ;;  %v1663_v58 = vld [vmem:[%s1922_s1 + $0x200] sm:$0xff] }
  0x33   : >> { %389 = vmatpush.msrb.mxu0 %v1622_v53  ;;  %433 = vmatpush.msrb.mxu1 %v1627_v49  ;;  %1965 = vst [vmem:[#allocation16_spill] sm:$0xff] %v1658_v59  ;;  %v1671_v53 = vld [vmem:[%s1401_s11 + $0x24] sm:$0xff] }
  0x34   : >> { %1966 = vst [vmem:[#allocation17_spill] sm:$0xff] %v1663_v58  ;;  %480 = vmatpush.msrb.mxu2 %v1634_v37  ;;  %524 = vmatpush.msrb.mxu3 %v1639_v34  ;;  %v1685_v34 = vld [vmem:[%s1922_s1 + $0x168] sm:$0xff]  ;;  %v1697_v37 = vld [vmem:[%s1401_s11 + $0x14] sm:$0xff] }
  0x35   : >> { %390 = vmatpush.msrb.mxu0 %v1646_v44  ;;  %434 = vmatpush.msrb.mxu1 %v1651_v39  ;;  %v1690_v44 = vld [vmem:[%s1922_s1 + $0x1f8] sm:$0xff] }
  0x36   : >> { %481 = vmatpush.msrb.mxu2 %v1658_v59  ;;  %525 = vmatpush.msrb.mxu3 %v1663_v58  ;;  %1967 = vst [vmem:[#allocation18_spill] sm:$0xff] %v1690_v44  ;;  %v1700_v59 = vld [vmem:[%s1401_s11 + $0x25] sm:$0xff]  ;;  %v1707_v58 = vld [vmem:[%s1922_s1 + $0x278] sm:$0xff] }
  0x37   : >> { %1032 = vmatmul.msk.f32.vlgmr.msrb.gmra.mxu0 %vm205_vm0, %v1668_v45  ;;  %1062 = vmatmul.msk.f32.vlgmr.msrb.gmra.mxu2 %vm205_vm0, %v1671_v53 }
  0x38   : >> { %563 = vmatpush.msra.mxu0 %v1678_v31  ;;  %611 = vmatpush.msra.mxu2 %v1245_v3  ;;  %v1718_v3 = vld [vmem:[%s1922_s1 + $0x270] sm:$0xff] }
  0x39   : >> { %435 = vmatpush.msrb.mxu1 %v1685_v34  ;;  %526 = vmatpush.msrb.mxu3 %v1690_v44  ;;  %v1727_v44 = vld [vmem:[%s1922_s1 + $0x268] sm:$0xff] }
  0x3a   : >> { %1047 = vmatmul.msk.f32.vlgmr.msrb.gmra.mxu1 %vm205_vm0, %v1697_v37  ;;  %1077 = vmatmul.msk.f32.vlgmr.msrb.gmra.mxu3 %vm205_vm0, %v1700_v59 }
  0x3b   : >> { %564 = vmatpush.msra.mxu0 %v1707_v58  ;;  %588 = vmatpush.msra.mxu1 %v1228_v0  ;;  %v1734_v0 = vld [vmem:[%s1401_s11 + $0x1b] sm:$0xff] }
  0x3c   : >> { %612 = vmatpush.msra.mxu2 %v1267_v7  ;;  %634 = vmatpush.msra.mxu3 %v1233_v1  ;;  %v1737_v7 = vld [vmem:[%s1401_s11 + $0x2c] sm:$0xff]  ;;  %v1744_v1 = vld [vmem:[%s1922_s1 + $0x260] sm:$0xff] }
  0x3d   : >> { %565 = vmatpush.msra.mxu0 %v1718_v3  ;;  %589 = vmatpush.msra.mxu1 %v1238_v2  ;;  %v1037_v2 = vld [vmem:[%s1401_s11 + $0x1c] sm:$0xff] }
  0x3e   : >> { %613 = vmatpush.msra.mxu2 %v1284_v10  ;;  %635 = vmatpush.msra.mxu3 %v1250_v4  ;;  %v1754_v4 = vld [vmem:[%s1401_s11 + $0x2d] sm:$0xff] }
  0x3f   : >> { %566 = vmatpush.msra.mxu0 %v1727_v44  ;;  %590 = vmatpush.msra.mxu1 %v1262_v6  ;;  %v1761_v6 = vld [vmem:[%s1922_s1 + $0x258] sm:$0xff]  ;;  %v1780_v10 = vld [vmem:[%s1922_s1 + $0x248] sm:$0xff] }
  0x40   : >> { %614 = vmatpush.msra.mxu2 %v1308_v14  ;;  %636 = vmatpush.msra.mxu3 %v1272_v8  ;;  %v1771_v8 = vld [vmem:[%s1922_s1 + $0x250] sm:$0xff]  ;;  %v1970_v14 = vld [vmem:[#allocation10_spill] sm:$0xff] }
  0x41   : >> { %1033 = vmatmul.msk.f32.gmra.mxu0 %vm205_vm0, %v1734_v0  ;;  %1063 = vmatmul.msk.f32.gmra.mxu2 %vm205_vm0, %v1737_v7 }
  0x42   : >> { %567 = vmatpush.msra.mxu0 %v1744_v1  ;;  %591 = vmatpush.msra.mxu1 %v1291_v11  ;;  %v1789_v11 = vld [vmem:[%s1922_s1 + $0x240] sm:$0xff] }
  0x43   : >> { %615 = vmatpush.msra.mxu2 %v1332_v18  ;;  %637 = vmatpush.msra.mxu3 %v1296_v12  ;;  %v1081_v12 = vld [vmem:[%s1401_s11 + $0x26] sm:$0xff]  ;;  %v1108_v18 = vld [vmem:[%s1401_s11 + $0x36] sm:$0xff] }
  0x44   : >> { %1048 = vmatmul.msk.f32.gmra.mxu1 %vm205_vm0, %v1037_v2  ;;  %1078 = vmatmul.msk.f32.gmra.mxu3 %vm205_vm0, %v1754_v4 }
  0x45   : >> { %568 = vmatpush.msra.mxu0 %v1761_v6  ;;  %592 = vmatpush.msra.mxu1 %v1320_v16  ;;  %v1972_v16 = vld [vmem:[#allocation12_spill] sm:$0xff] }
  0x46   : >> { %616 = vmatpush.msra.mxu2 %v1357_v22  ;;  %638 = vmatpush.msra.mxu3 %v1325_v17  ;;  %v1973_v17 = vld [vmem:[#allocation13_spill] sm:$0xff] }
  0x47   : >> { %569 = vmatpush.msra.mxu0 %v1771_v8  ;;  %593 = vmatpush.msra.mxu1 %v1344_v20  ;;  %v1975_v20 = vld [vmem:[#allocation15_spill] sm:$0xff]  ;;  %v1977_v22 = vld [vmem:[#allocation5_spill] sm:$0xff] }
  0x48   : >> { %617 = vmatpush.msra.mxu2 %v1381_v26  ;;  %639 = vmatpush.msra.mxu3 %v1349_v21  ;;  %v1976_v21 = vld [vmem:[#allocation16_spill] sm:$0xff] }
  0x49   : >> { %570 = vmatpush.msra.mxu0 %v1780_v10  ;;  %594 = vmatpush.msra.mxu1 %v1369_v24  ;;  %v1979_v24 = vld [vmem:[#allocation7_spill] sm:$0xff]  ;;  %v1980_v26 = vld [vmem:[#allocation8_spill] sm:$0xff] }
  0x4a   : >> { %618 = vmatpush.msra.mxu2 %v1408_v30  ;;  %640 = vmatpush.msra.mxu3 %v1374_v25  ;;  %v1109_v25 = vld [vmem:[%s1401_s11 + $0x3e] sm:$0xff] }
  0x4b   : >> { %571 = vmatpush.msra.mxu0 %v1789_v11  ;;  %595 = vmatpush.msra.mxu1 %v1393_v28  ;;  %v1982_v28 = vld [vmem:[#allocation14_spill] sm:$0xff]  ;;  %v1114_v30 = vld [vmem:[%s1401_s11 + $0x37] sm:$0xff] }
  0x4c   : >> { %619 = vmatpush.msra.mxu2 %v1448_v38  ;;  %641 = vmatpush.msra.mxu3 %v1398_v29  ;;  %v1983_v29 = vld [vmem:[#allocation17_spill] sm:$0xff] }
  0x4d   : >> { %1092 = vmatmul.msk.f32.vlgmr.msra.gmra.mxu0 %vm205_vm0, %v1081_v12  ;;  %1096 = vmatmul.msk.f32.vlgmr.msra.gmra.mxu2 %vm205_vm0, %v1458_v40 }
  0x4e   : >> { %659 = vmatpush.msrb.mxu0 %v1255_v5  ;;  %709 = vmatpush.msrb.mxu2 %v1470_v42  ;;  %v1082_v5 = vld [vmem:[%s1401_s11 + $0x2e] sm:$0xff] }
  0x4f   : >> { %596 = vmatpush.msra.mxu1 %v1420_v32  ;;  %642 = vmatpush.msra.mxu3 %v1425_v33  ;;  %v1984_v32 = vld [vmem:[#allocation18_spill] sm:$0xff]  ;;  %v1120_v33 = vld [vmem:[%s1401_s11 + $0x38] sm:$0xff] }
  0x50   : >> { %1098 = vmatmul.msk.f32.vlgmr.msra.gmra.mxu3 %vm205_vm0, %v1697_v37  ;;  %660 = vmatpush.msrb.mxu0 %v1279_v9  ;;  %v1968_v9 = vld [vmem:[#allocation2_spill] sm:$0xff] }
  0x51   : >> { %684 = vmatpush.msrb.mxu1 %v1433_v35  ;;  %710 = vmatpush.msrb.mxu2 %v1496_v47  ;;  %v1121_v35 = vld [vmem:[%s1401_s11 + $0x40] sm:$0xff] }
  0x52   : >> { %745 = vmatpush.msrb.mxu3 %v1440_v36  ;;  %1094 = vmatmul.msk.f32.vlgmr.msra.gmra.mxu1 %vm205_vm0, %v1668_v45 }
  0x53   : >> { %661 = vmatpush.msrb.mxu0 %v1301_v13  ;;  %685 = vmatpush.msrb.mxu1 %v1463_v41  ;;  %v1969_v13 = vld [vmem:[#allocation9_spill] sm:$0xff] }
  0x54   : >> { %711 = vmatpush.msrb.mxu2 %v1520_v51  ;;  %746 = vmatpush.msrb.mxu3 %v1475_v43 }
  0x55   : >> { %662 = vmatpush.msrb.mxu0 %v1313_v15  ;;  %686 = vmatpush.msrb.mxu1 %v1491_v46  ;;  %v1971_v15 = vld [vmem:[#allocation3_spill] sm:$0xff] }
  0x56   : >> { %712 = vmatpush.msrb.mxu2 %v1547_v56  ;;  %747 = vmatpush.msrb.mxu3 %v1503_v48 }
  0x57   : >> { %1093 = vmatmul.msk.f32.gmra.mxu0 %vm205_vm0, %v1082_v5  ;;  %1097 = vmatmul.msk.f32.gmra.mxu2 %vm205_vm0, %v1565_v60 }
  0x58   : >> { %663 = vmatpush.msrb.mxu0 %v1337_v19  ;;  %687 = vmatpush.msrb.mxu1 %v1515_v50  ;;  %v1974_v19 = vld [vmem:[#allocation4_spill] sm:$0xff] }
  0x59   : >> { %713 = vmatpush.msrb.mxu2 %v1577_v62  ;;  %748 = vmatpush.msrb.mxu3 %v1527_v52 }
  0x5a   : >> { %1099 = vmatmul.msk.f32.gmra.mxu3 %vm205_vm0, %v1037_v2  ;;  %664 = vmatpush.msrb.mxu0 %v1362_v23  ;;  %v1978_v23 = vld [vmem:[#allocation6_spill] sm:$0xff] }
  0x5b   : >> { %688 = vmatpush.msrb.mxu1 %v1540_v55  ;;  %714 = vmatpush.msrb.mxu2 %v1603_v54 }
  0x5c   : >> { %749 = vmatpush.msrb.mxu3 %v1552_v57  ;;  %1095 = vmatmul.msk.f32.gmra.mxu1 %vm205_vm0, %v1734_v0 }
  0x5d   : >> { %665 = vmatpush.msrb.mxu0 %v1386_v27  ;;  %689 = vmatpush.msrb.mxu1 %v1570_v61  ;;  %v1981_v27 = vld [vmem:[#allocation11_spill] sm:$0xff] }
  0x5e   : >> { %715 = vmatpush.msrb.mxu2 %v1627_v49  ;;  %750 = vmatpush.msrb.mxu3 %v1582_v63 }
  0x5f   : >> { %666 = vmatpush.msrb.mxu0 %v1968_v9  ;;  %690 = vmatpush.msrb.mxu1 %v1969_v13 }
  0x60   : >> { %716 = vmatpush.msrb.mxu2 %v1651_v39  ;;  %751 = vmatpush.msrb.mxu3 %v1970_v14 }
  0x61   : >> { %667 = vmatpush.msrb.mxu0 %v1971_v15  ;;  %691 = vmatpush.msrb.mxu1 %v1972_v16 }
  0x62   : >> { %717 = vmatpush.msrb.mxu2 %v1685_v34  ;;  %752 = vmatpush.msrb.mxu3 %v1973_v17 }
  0x63   : >> { %1100 = vmatmul.msk.f32.vlgmr.msrb.gmra.mxu0 %vm205_vm0, %v1671_v53  ;;  %1104 = vmatmul.msk.f32.vlgmr.msrb.gmra.mxu2 %vm205_vm0, %v1081_v12 }
  0x64   : >> { %780 = vmatpush.msra.mxu0 %v1974_v19  ;;  %1128 = vmatpush.msra.mxu2 %v1974_v19 }
  0x65   : >> { %692 = vmatpush.msrb.mxu1 %v1975_v20  ;;  %753 = vmatpush.msrb.mxu3 %v1976_v21 }
  0x66   : >> { %1102 = vmatmul.msk.f32.vlgmr.msrb.gmra.mxu1 %vm205_vm0, %v1700_v59  ;;  %1110 = vmatmul.msk.f32.vlgmr.msrb.gmra.mxu3 %vm205_vm0, %v1108_v18 }
  0x67   : >> { %781 = vmatpush.msra.mxu0 %v1977_v22  ;;  %1129 = vmatpush.msra.mxu2 %v1977_v22 }
  0x68   : >> { %815 = vmatpush.msra.mxu1 %v1678_v31  ;;  %1137 = vmatpush.msra.mxu3 %v1678_v31  ;;  %v1115_v31 = vld [vmem:[%s1401_s11 + $0x3f] sm:$0xff]  ;;  %s1181_s11 = smov 64  }
  0x69   : >> { %782 = vmatpush.msra.mxu0 %v1978_v23  ;;  %1130 = vmatpush.msra.mxu2 %v1978_v23 }
  0x6a   : >> { %816 = vmatpush.msra.mxu1 %v1707_v58  ;;  %1138 = vmatpush.msra.mxu3 %v1707_v58 }
  0x6b   : >> { %783 = vmatpush.msra.mxu0 %v1979_v24  ;;  %1131 = vmatpush.msra.mxu2 %v1979_v24 }
  0x6c   : >> { %817 = vmatpush.msra.mxu1 %v1718_v3  ;;  %1139 = vmatpush.msra.mxu3 %v1718_v3 }
  0x6d   : >> { %1101 = vmatmul.msk.f32.gmra.mxu0 %vm205_vm0, %v1737_v7  ;;  %1105 = vmatmul.msk.f32.gmra.mxu2 %vm205_vm0, %v1082_v5 }
  0x6e   : >> { %784 = vmatpush.msra.mxu0 %v1980_v26  ;;  %1132 = vmatpush.msra.mxu2 %v1980_v26 }
  0x6f   : >> { %818 = vmatpush.msra.mxu1 %v1727_v44  ;;  %1140 = vmatpush.msra.mxu3 %v1727_v44 }
  0x70   : >> { %1103 = vmatmul.msk.f32.gmra.mxu1 %vm205_vm0, %v1754_v4  ;;  %1111 = vmatmul.msk.f32.gmra.mxu3 %vm205_vm0, %v1109_v25 }
  0x71   : >> { %785 = vmatpush.msra.mxu0 %v1981_v27  ;;  %1133 = vmatpush.msra.mxu2 %v1981_v27 }
  0x72   : >> { %819 = vmatpush.msra.mxu1 %v1744_v1  ;;  %1141 = vmatpush.msra.mxu3 %v1744_v1 }
  0x73   : >> { %786 = vmatpush.msra.mxu0 %v1982_v28  ;;  %1134 = vmatpush.msra.mxu2 %v1982_v28 }
  0x74   : >> { %820 = vmatpush.msra.mxu1 %v1761_v6  ;;  %1142 = vmatpush.msra.mxu3 %v1761_v6 }
  0x75   : >> { %787 = vmatpush.msra.mxu0 %v1983_v29  ;;  %1135 = vmatpush.msra.mxu2 %v1983_v29 }
  0x76   : >> { %821 = vmatpush.msra.mxu1 %v1771_v8  ;;  %1143 = vmatpush.msra.mxu3 %v1771_v8 }
  0x77   : >> { %788 = vmatpush.msra.mxu0 %v1984_v32  ;;  %1136 = vmatpush.msra.mxu2 %v1984_v32 }
  0x78   : >> { %822 = vmatpush.msra.mxu1 %v1780_v10  ;;  %1144 = vmatpush.msra.mxu3 %v1780_v10 }
  0x79   : >> { %1116 = vmatmul.msk.f32.vlgmr.msra.gmra.mxu0 %vm205_vm0, %v1114_v30  ;;  %1117 = vmatmul.msk.f32.vlgmr.msra.gmra.mxu2 %vm205_vm0, %v1115_v31 }
  0x7a   : >> { %823 = vmatpush.msra.mxu1 %v1789_v11  ;;  %1145 = vmatpush.msra.mxu3 %v1789_v11 }
  0x7b   : >> { %1122 = vmatmul.msk.f32.vlgmr.msra.gmra.mxu1 %vm205_vm0, %v1120_v33  ;;  %1123 = vmatmul.msk.f32.vlgmr.msra.gmra.mxu3 %vm205_vm0, %v1121_v35 }
  0x9e   : >> { %v229_v36 = vpop.f32.mrf.mxu0 }
  0xa3   : >> { %v258_v38 = vpop.f32.mrf.mxu1 }
  0xa4   : >> { %v301_v39 = vpop.f32.mrf.mxu2  ;;  %v259_v45 = vadd.f32 %v258_v38, %v229_v36 }
  0xa6   : >> { %v307_v37 = vadd.f32 %v301_v39, %v259_v45 }
  0xa7   : >> { %v347_v40 = vpop.f32.mrf.mxu3 }
  0xa8   : >> { %v353_v1 = vadd.f32 %v347_v40, %v307_v37 }
  0xaa   : >> { %v232_v41 = vpop.f32.mrf.mxu0 }
  0xad   : >> { %v261_v42 = vpop.f32.mrf.mxu1 }
  0xae   : >> { %v304_v43 = vpop.f32.mrf.mxu2  ;;  %v262_v2 = vadd.f32 %v261_v42, %v232_v41 }
  0xb0   : >> { %v308_v12 = vadd.f32 %v304_v43, %v262_v2  ;;  %v1164_v43 = vld [vmem:[%s1923_s2] ss:$0 sm:$0xff] }
  0xb1   : >> { %v350_v44 = vpop.f32.mrf.mxu3 }
  0xb2   : >> { %v354_v17 = vadd.f32 %v350_v44, %v308_v12 }
  0xb4   : >> { %v392_v46 = vpop.f32.mrf.mxu0 }
  0xb5   : >> { %v398_v10 = vadd.f32 %v392_v46, %v353_v1 }
  0xb7   : >> { %v437_v47 = vpop.f32.mrf.mxu1 }
  0xb8   : >> { %v443_v13 = vadd.f32 %v437_v47, %v398_v10 }
  0xba   : >> { %v483_v48 = vpop.f32.mrf.mxu2 }
  0xbb   : >> { %v489_v18 = vadd.f32 %v483_v48, %v443_v13 }
  0xbd   : >> { %v528_v49 = vpop.f32.mrf.mxu3 }
  0xbe   : >> { %v395_v50 = vpop.f32.mrf.mxu0  ;;  %v534_v24 = vadd.f32 %v528_v49, %v489_v18 }
  0xbf   : >> { %v399_v20 = vadd.f32 %v395_v50, %v354_v17 }
  0xc1   : >> { %v440_v51 = vpop.f32.mrf.mxu1 }
  0xc2   : >> { %v444_v28 = vadd.f32 %v440_v51, %v399_v20 }
  0xc4   : >> { %v486_v52 = vpop.f32.mrf.mxu2 }
  0xc5   : >> { %v490_v31 = vadd.f32 %v486_v52, %v444_v28 }
  0xc7   : >> { %v531_v53 = vpop.f32.mrf.mxu3 }
  0xc8   : >> { %v535_v39 = vadd.f32 %v531_v53, %v490_v31 }
  0xca   : >> { %v573_v55 = vpop.f32.mrf.mxu0 }
  0xcb   : >> { %v579_v29 = vadd.f32 %v573_v55, %v534_v24 }
  0xcf   : >> { %v598_v56 = vpop.f32.mrf.mxu1 }
  0xd0   : >> { %v621_v57 = vpop.f32.mrf.mxu2 }
  0xd1   : >> { %v622_v59 = vadd.f32 %v621_v57, %v598_v56 }
  0xd3   : >> { %v644_v58 = vpop.f32.mrf.mxu3 }
  0xd4   : >> { %v576_v60 = vpop.f32.mrf.mxu0  ;;  %v650_v0 = vadd.f32 %v644_v58, %v622_v59 }
  0xd5   : >> { %v580_v41 = vadd.f32 %v576_v60, %v535_v39 }
  0xd9   : >> { %v601_v61 = vpop.f32.mrf.mxu1 }
  0xda   : >> { %v624_v62 = vpop.f32.mrf.mxu2 }
  0xdb   : >> { %v625_v4 = vadd.f32 %v624_v62, %v601_v61 }
  0xdd   : >> { %v647_v63 = vpop.f32.mrf.mxu3 }
  0xde   : >> { %v651_v5 = vadd.f32 %v647_v63, %v625_v4 }
  0xe0   : >> { %v669_v34 = vpop.f32.mrf.mxu0 }
  0xe1   : >> { %v675_v6 = vadd.f32 %v669_v34, %v650_v0 }
  0xe3   : >> { %v694_v54 = vpop.f32.mrf.mxu1 }
  0xe4   : >> { %v700_v9 = vadd.f32 %v694_v54, %v675_v6 }
  0xe6   : >> { %v719_v3 = vpop.f32.mrf.mxu2 }
  0xe7   : >> { %v725_v14 = vadd.f32 %v719_v3, %v700_v9 }
  0xe9   : >> { %v755_v7 = vpop.f32.mrf.mxu3 }
  0xea   : >> { %v672_v8 = vpop.f32.mrf.mxu0  ;;  %v761_v21 = vadd.f32 %v755_v7, %v725_v14 }
  0xeb   : >> { %v676_v15 = vadd.f32 %v672_v8, %v651_v5 }
  0xed   : >> { %v697_v11 = vpop.f32.mrf.mxu1 }
  0xee   : >> { %v701_v22 = vadd.f32 %v697_v11, %v676_v15 }
  0xf0   : >> { %v722_v16 = vpop.f32.mrf.mxu2 }
  0xf1   : >> { %v726_v25 = vadd.f32 %v722_v16, %v701_v22 }
  0xf3   : >> { %v758_v19 = vpop.f32.mrf.mxu3 }
  0xf4   : >> { %v762_v32 = vadd.f32 %v758_v19, %v726_v25 }
  0xf6   : >> { %v790_v23 = vpop.f32.mrf.mxu0 }
  0xf7   : >> { %v796_v26 = vadd.f32 %v790_v23, %v761_v21 }
  0xf8   : >> { %v825_v27 = vpop.f32.mrf.mxu1 }
  0xf9   : >> { %v831_v30 = vadd.f32 %v825_v27, %v796_v26 }
  0xfb   : >> { %v833_v33 = vmax.f32 %v579_v29, %v831_v30 }
  0xfc   : >> { %v793_v35 = vpop.f32.mrf.mxu2 }
  0xfd   : >> { %v797_v36 = vadd.f32 %v793_v35, %v762_v32  ;;  %837 = vrot.lane.b32.xlu0 %v833_v33, %s1181_s11 }
  0xfe   : >> { %v828_v38 = vpop.f32.mrf.mxu3 }
  0xff   : >> { %v832_v40 = vadd.f32 %v828_v38, %v797_v36 }
 0x101   : >> { %v834_v42 = vmax.f32 %v580_v41, %v832_v40 }
 0x105   : >> { %839 = vrot.lane.b32.xlu0 %v834_v42, %s1181_s11 }
 0x16f   : >> { %v838_v44 = vpop.permute.xlu0 %837 }
 0x170   : >> { %v843_v46 = vmax.f32 %v833_v33, %v838_v44 }
 0x172   : >> { %v849_v47 = vadd.f32 %v1164_v43, %v843_v46 }
 0x174   : >> { %vm851_vm2 = vcmp.ge.f32.partialorder %v849_v47, 0.0  ;;  %v853_v48 = vmul.f32 0.2, %v849_v47 }
 0x176   : >> { %v855_v49 = vsel %vm851_vm2, %v849_v47, %v853_v48 }
 0x177   : >> { %860 = vst.msk [vmem:[%s858_s6] sm:$0xff] %vm859_vm1, %v855_v49  ;;  %v840_v50 = vpop.permute.xlu0 %839 }
 0x178   : >> { %v844_v51 = vmax.f32 %v834_v42, %v840_v50 }
 0x17a   : >> { %v850_v52 = vadd.f32 %v1164_v43, %v844_v51 }
 0x17b   : > { %175 = sbr.rel (!%p173_p4) target bundleno = 15 (0xf), region = 90 }
 0x17c   : >> { %vm852_vm3 = vcmp.ge.f32.partialorder %v850_v52, 0.0  ;;  %v854_v53 = vmul.f32 0.2, %v850_v52 }
 0x17e   : >> { %v856_v55 = vsel %vm852_vm3, %v850_v52, %v854_v53 }
 0x17f   : >> { %861 = vst.msk [vmem:[%s858_s6 + $0x8] sm:$0xff] %vm859_vm1, %v856_v55 }
 0x180 PF: > { %s13_s12 = sadd.s32 1, %s1175_s12  }
 0x181   : > { %p10_p5 = scmp.ge.s32.totalorder %s13_s12, 4  }
 0x183   :  { %12 = sbr.rel (!%p10_p5) target bundleno = 1 (0x1), region = 101 }

// kernel: model_forward.7
= control target key start
LH: loop header
LB: loop body
LE: loop exit
PB: predicated region body
PF: predicated region fallthrough
CT: control target
= control target key end

     0   :  { %s1045_s12 = smov 0   ;;  %s1763_s0 = inlined_call_operand.vmem [shape: f32[2,100,80], index: 0, kind: input, shape index: {}]   ;;  %s1764_s1 = inlined_call_operand.vmem [shape: f32[9,80,128], index: 1, kind: input, shape index: {}]   ;;  %s1765_s2 = inlined_call_operand.vmem [shape: f32[1,64], index: 2, kind: input, shape index: {}]   ;;  %s1766_s3 = inlined_call_operand.vmem [shape: f32[2,32,64], index: 3, kind: output, shape index: {}]  }
   0x1 LB: > { %s850_s13 = sadd.s32 4294967295, %s1018_s12   ;;  %p854_p0 = scmp.ge.s32.totalorder %s1018_s12, 1  ;;  %s1018_s12 = sphi %s1045_s12, %s13_s12  }
   0x2   : > { %p137_p1 = scmp.lt.s32.totalorder %s1018_s12, 3 }
   0x4   : > { %p138_p2 = pnand %p854_p0, %p137_p1 }
   0x5   : > { %p161_p3 = scmp.lt.s32.totalorder (!%p138_p2), %s850_s13, 1  ;;  %s1063_s22 = smov (!%p138_p2), 0  }
   0x6   : > { %141 = sbr.rel (%p138_p2) target bundleno = 375 (0x177), region = 32 }
   0xb   : > { %s1840_s13 = smov (!%p161_p3, %s850_s13), 1 }
   0xc   : > { %s989_s14 = smul.u32 104, %s1840_s13  ;;  %s988_s15 = sshll.u32 %s1840_s13, 5 }
   0xd   : > { %s1056_s18 = scalar_lea.vmem %s1766_s3, %s988_s15 }
   0xe   : > { %s1061_s21 = scalar_lea.vmem %s1763_s0, %s989_s14 }
   0xf LB: >> { %v1071_v0 = vld [vmem:[%s1764_s1 + $0x98] sm:$0xff]  ;;  %v1076_v1 = vld [vmem:[%s1764_s1 + $0x90] sm:$0xff]  ;;  %v1081_v2 = vld [vmem:[%s1764_s1 + $0x48] sm:$0xff]  ;;  %s178_s10 = smul.u32 20, %s1022_s22  ;;  %vm205_vm0 = vcmask 654336   ;;  %s985_s25 = sshll.u32 %s1022_s22, 3  ;;  %s1022_s22 = sphi %s1063_s22, %s176_s22  }
  0x10   : >> { %215 = vmatpush.msra.mxu0 %v1071_v0  ;;  %238 = vmatpush.msra.mxu1 %v1081_v2  ;;  %v1088_v3 = vld [vmem:[%s1764_s1 + $0x40] sm:$0xff]  ;;  %v1093_v4 = vld [vmem:[%s1764_s1 + $0xe8] sm:$0xff]  ;;  %v1104_v6 = vld [vmem:[%s1764_s1 + $0x38] sm:$0xff]  ;;  %s741_s26 = scalar_lea.vmem %s1056_s18, %s985_s25  ;;  %vm742_vm2 = vcmask 523264   ;;  %s176_s22 = sadd.s32 1, %s1022_s22  }
  0x11   : >> { %v1098_v5 = vld [vmem:[%s1764_s1 + $0x88] sm:$0xff]  ;;  %275 = vmatpush.msra.mxu2 %v1093_v4  ;;  %v1109_v7 = vld [vmem:[%s1764_s1 + $0xe0] sm:$0xff]  ;;  %v1121_v9 = vld [vmem:[%s1764_s1 + $0x138] sm:$0xff]  ;;  %s1430_s4 = scalar_lea.vmem %s1061_s21, %s178_s10  ;;  %p173_p4 = scmp.ge.s32.totalorder %s176_s22, 4  }
  0x12   : >> { %216 = vmatpush.msra.mxu0 %v1076_v1  ;;  %239 = vmatpush.msra.mxu1 %v1088_v3  ;;  %v1116_v8 = vld [vmem:[%s1764_s1 + $0x80] sm:$0xff]  ;;  %v1128_v10 = vld [vmem:[%s1764_s1 + $0x30] sm:$0xff]  ;;  %v1133_v11 = vld [vmem:[%s1764_s1 + $0xd8] sm:$0xff] }
  0x13   : >> { %276 = vmatpush.msra.mxu2 %v1109_v7  ;;  %314 = vmatpush.msra.mxu3 %v1121_v9  ;;  %v1138_v12 = vld [vmem:[%s1764_s1 + $0x130] sm:$0xff]  ;;  %v1150_v14 = vld [vmem:[%s1764_s1 + $0x128] sm:$0xff]  ;;  %v1155_v15 = vld [vmem:[%s1764_s1 + $0x78] sm:$0xff] }
  0x14   : >> { %217 = vmatpush.msra.mxu0 %v1098_v5  ;;  %240 = vmatpush.msra.mxu1 %v1104_v6  ;;  %v1145_v13 = vld [vmem:[%s1764_s1 + $0xd0] sm:$0xff]  ;;  %v1162_v16 = vld [vmem:[%s1764_s1 + $0x28] sm:$0xff]  ;;  %v1174_v18 = vld [vmem:[%s1764_s1 + $0x120] sm:$0xff] }
  0x15   : >> { %277 = vmatpush.msra.mxu2 %v1133_v11  ;;  %315 = vmatpush.msra.mxu3 %v1138_v12  ;;  %v1169_v17 = vld [vmem:[%s1764_s1 + $0xc8] sm:$0xff]  ;;  %v1179_v19 = vld [vmem:[%s1764_s1 + $0x70] sm:$0xff]  ;;  %v1186_v20 = vld [vmem:[%s1764_s1 + $0x20] sm:$0xff] }
  0x16   : >> { %218 = vmatpush.msra.mxu0 %v1116_v8  ;;  %241 = vmatpush.msra.mxu1 %v1128_v10  ;;  %v1193_v21 = vld [vmem:[%s1764_s1 + $0xc0] sm:$0xff]  ;;  %v1198_v22 = vld [vmem:[%s1764_s1 + $0x118] sm:$0xff]  ;;  %v1203_v23 = vld [vmem:[%s1764_s1 + $0x68] sm:$0xff] }
  0x17   : >> { %278 = vmatpush.msra.mxu2 %v1145_v13  ;;  %316 = vmatpush.msra.mxu3 %v1150_v14  ;;  %v1210_v24 = vld [vmem:[%s1764_s1 + $0x18] sm:$0xff]  ;;  %v1222_v26 = vld [vmem:[%s1764_s1 + $0x110] sm:$0xff]  ;;  %v1227_v27 = vld [vmem:[%s1764_s1 + $0x60] sm:$0xff] }
  0x18   : >> { %219 = vmatpush.msra.mxu0 %v1155_v15  ;;  %242 = vmatpush.msra.mxu1 %v1162_v16  ;;  %v1217_v25 = vld [vmem:[%s1764_s1 + $0xb8] sm:$0xff]  ;;  %v1234_v28 = vld [vmem:[%s1764_s1 + $0x10] sm:$0xff]  ;;  %v1246_v30 = vld [vmem:[%s1764_s1 + $0x108] sm:$0xff] }
  0x19   : >> { %279 = vmatpush.msra.mxu2 %v1169_v17  ;;  %317 = vmatpush.msra.mxu3 %v1174_v18  ;;  %v1241_v29 = vld [vmem:[%s1764_s1 + $0xb0] sm:$0xff]  ;;  %v1251_v31 = vld [vmem:[%s1764_s1 + $0x58] sm:$0xff]  ;;  %v1258_v32 = vld [vmem:[%s1764_s1 + $0x8] sm:$0xff] }
  0x1a   : >> { %220 = vmatpush.msra.mxu0 %v1179_v19  ;;  %243 = vmatpush.msra.mxu1 %v1186_v20  ;;  %v1265_v33 = vld [vmem:[%s1764_s1 + $0xa8] sm:$0xff]  ;;  %v1270_v34 = vld [vmem:[%s1764_s1 + $0x100] sm:$0xff]  ;;  %v1275_v35 = vld [vmem:[%s1764_s1 + $0x50] sm:$0xff] }
  0x1b   : >> { %280 = vmatpush.msra.mxu2 %v1193_v21  ;;  %318 = vmatpush.msra.mxu3 %v1198_v22  ;;  %v1282_v36 = vld [vmem:[%s1764_s1] sm:$0xff]  ;;  %v1289_v37 = vld [vmem:[%s1764_s1 + $0x188] sm:$0xff]  ;;  %v1294_v38 = vld [vmem:[%s1764_s1 + $0x1d8] sm:$0xff] }
  0x1c   : >> { %221 = vmatpush.msra.mxu0 %v1203_v23  ;;  %244 = vmatpush.msra.mxu1 %v1210_v24  ;;  %v1301_v39 = vld [vmem:[%s1764_s1 + $0xa0] sm:$0xff]  ;;  %v1306_v40 = vld [vmem:[%s1764_s1 + $0xf8] sm:$0xff]  ;;  %v1318_v42 = vld [vmem:[%s1764_s1 + $0x1d0] sm:$0xff] }
  0x1d   : >> { %281 = vmatpush.msra.mxu2 %v1217_v25  ;;  %319 = vmatpush.msra.mxu3 %v1222_v26  ;;  %1791 = vst [vmem:[#allocation2_spill] sm:$0xff] %v1306_v40  ;;  %v1313_v41 = vld [vmem:[%s1764_s1 + $0x180] sm:$0xff]  ;;  %v1325_v43 = vld [vmem:[%s1764_s1 + $0x228] sm:$0xff]  ;;  %v1330_v44 = vld [vmem:[%s1764_s1 + $0xf0] sm:$0xff] }
  0x1e   : >> { %222 = vmatpush.msra.mxu0 %v1227_v27  ;;  %245 = vmatpush.msra.mxu1 %v1234_v28  ;;  %1792 = vst [vmem:[#allocation3_spill] sm:$0xff] %v1330_v44  ;;  %v1337_v45 = vld [vmem:[%s1764_s1 + $0x178] sm:$0xff]  ;;  %v1342_v46 = vld [vmem:[%s1764_s1 + $0x1c8] sm:$0xff]  ;;  %v1349_v47 = vld [vmem:[%s1764_s1 + $0x220] sm:$0xff] }
  0x1f   : >> { %282 = vmatpush.msra.mxu2 %v1241_v29  ;;  %320 = vmatpush.msra.mxu3 %v1246_v30  ;;  %v1354_v48 = vld [vmem:[%s1764_s1 + $0x278] sm:$0xff]  ;;  %v1361_v49 = vld [vmem:[%s1764_s1 + $0x170] sm:$0xff]  ;;  %v1366_v50 = vld [vmem:[%s1764_s1 + $0x1c0] sm:$0xff] }
  0x20   : >> { %223 = vmatpush.msra.mxu0 %v1251_v31  ;;  %246 = vmatpush.msra.mxu1 %v1258_v32  ;;  %1793 = vst [vmem:[#allocation4_spill] sm:$0xff] %v1354_v48  ;;  %v1373_v51 = vld [vmem:[%s1764_s1 + $0x218] sm:$0xff]  ;;  %v1378_v52 = vld [vmem:[%s1764_s1 + $0x270] sm:$0xff]  ;;  %v1386_v53 = vld [vmem:[%s1764_s1 + $0x168] sm:$0xff] }
  0x21   : >> { %283 = vmatpush.msra.mxu2 %v1265_v33  ;;  %321 = vmatpush.msra.mxu3 %v1270_v34  ;;  %1794 = vst [vmem:[#allocation5_spill] sm:$0xff] %v1378_v52  ;;  %v1391_v54 = vld [vmem:[%s1764_s1 + $0x1b8] sm:$0xff]  ;;  %v1398_v55 = vld [vmem:[%s1764_s1 + $0x210] sm:$0xff]  ;;  %v1403_v56 = vld [vmem:[%s1764_s1 + $0x268] sm:$0xff] }
  0x22   : >> { %224 = vmatpush.msra.mxu0 %v1275_v35  ;;  %247 = vmatpush.msra.mxu1 %v1282_v36  ;;  %1795 = vst [vmem:[#allocation6_spill] sm:$0xff] %v1403_v56  ;;  %v1410_v57 = vld [vmem:[%s1764_s1 + $0x160] sm:$0xff]  ;;  %v1415_v58 = vld [vmem:[%s1764_s1 + $0x1b0] sm:$0xff]  ;;  %v1422_v59 = vld [vmem:[%s1764_s1 + $0x208] sm:$0xff] }
  0x23   : >> { %284 = vmatpush.msra.mxu2 %v1301_v39  ;;  %322 = vmatpush.msra.mxu3 %v1306_v40  ;;  %1796 = vst [vmem:[#allocation7_spill] sm:$0xff] %v1415_v58  ;;  %v1427_v60 = vld [vmem:[%s1764_s1 + $0x260] sm:$0xff]  ;;  %v1437_v61 = vld [vmem:[%s1764_s1 + $0x158] sm:$0xff]  ;;  %v1442_v62 = vld [vmem:[%s1764_s1 + $0x1a8] sm:$0xff] }
  0x24   : >> { %352 = vmatpush.msrb.mxu0 %v1289_v37  ;;  %390 = vmatpush.msrb.mxu1 %v1294_v38  ;;  %1797 = vst [vmem:[#allocation8_spill] sm:$0xff] %v1422_v59  ;;  %v1449_v63 = vld [vmem:[%s1764_s1 + $0x200] sm:$0xff]  ;;  %v1481_v40 = vld [vmem:[%s1764_s1 + $0x148] sm:$0xff] }
  0x25   : >> { %429 = vmatpush.msrb.mxu2 %v1325_v43  ;;  %323 = vmatpush.msra.mxu3 %v1330_v44  ;;  %1798 = vst [vmem:[#allocation9_spill] sm:$0xff] %v1427_v60  ;;  %v1469_v44 = vld [vmem:[%s1764_s1 + $0x1a0] sm:$0xff] }
  0x26   : >> { %353 = vmatpush.msrb.mxu0 %v1313_v41  ;;  %391 = vmatpush.msrb.mxu1 %v1318_v42  ;;  %1799 = vst [vmem:[#allocation10_spill] sm:$0xff] %v1442_v62 }
  0x27   : >> { %430 = vmatpush.msrb.mxu2 %v1349_v47  ;;  %467 = vmatpush.msrb.mxu3 %v1354_v48  ;;  %1800 = vst [vmem:[#allocation11_spill] sm:$0xff] %v1449_v63  ;;  %v871_v48 = vld [vmem:[%s1430_s4 + $0x2] sm:$0xff] }
  0x28   : >> { %354 = vmatpush.msrb.mxu0 %v1337_v45  ;;  %392 = vmatpush.msrb.mxu1 %v1342_v46  ;;  %1803 = vst [vmem:[#allocation14_spill] sm:$0xff] %v1469_v44 }
  0x29   : >> { %431 = vmatpush.msrb.mxu2 %v1373_v51  ;;  %468 = vmatpush.msrb.mxu3 %v1378_v52  ;;  %v1461_v52 = vld [vmem:[%s1764_s1 + $0x150] sm:$0xff]  ;;  %1805 = vst [vmem:[#allocation16_spill] sm:$0xff] %v1481_v40 }
  0x2a   : >> { %355 = vmatpush.msrb.mxu0 %v1361_v49  ;;  %393 = vmatpush.msrb.mxu1 %v1366_v50  ;;  %1802 = vst [vmem:[#allocation13_spill] sm:$0xff] %v1461_v52 }
  0x2b   : >> { %432 = vmatpush.msrb.mxu2 %v1398_v55  ;;  %469 = vmatpush.msrb.mxu3 %v1403_v56  ;;  %v1454_v56 = vld [vmem:[%s1764_s1 + $0x258] sm:$0xff] }
  0x2c   : >> { %356 = vmatpush.msrb.mxu0 %v1386_v53  ;;  %394 = vmatpush.msrb.mxu1 %v1391_v54  ;;  %1801 = vst [vmem:[#allocation12_spill] sm:$0xff] %v1454_v56 }
  0x2d   : >> { %433 = vmatpush.msrb.mxu2 %v1422_v59  ;;  %470 = vmatpush.msrb.mxu3 %v1427_v60  ;;  %v1474_v60 = vld [vmem:[%s1764_s1 + $0x1f8] sm:$0xff]  ;;  %v858_v59 = vld [vmem:[%s1430_s4 + $0x1] sm:$0xff] }
  0x2e   : >> { %357 = vmatpush.msrb.mxu0 %v1410_v57  ;;  %395 = vmatpush.msrb.mxu1 %v1415_v58  ;;  %1804 = vst [vmem:[#allocation15_spill] sm:$0xff] %v1474_v60  ;;  %v1492_v58 = vld [vmem:[%s1430_s4 + $0xa] sm:$0xff] }
  0x2f   : >> { %434 = vmatpush.msrb.mxu2 %v1449_v63  ;;  %471 = vmatpush.msrb.mxu3 %v1454_v56  ;;  %v1499_v56 = vld [vmem:[%s1764_s1 + $0x140] sm:$0xff]  ;;  %v1504_v63 = vld [vmem:[%s1764_s1 + $0x198] sm:$0xff] }
  0x30   : >> { %358 = vmatpush.msrb.mxu0 %v1437_v61  ;;  %396 = vmatpush.msrb.mxu1 %v1442_v62  ;;  %v1486_v62 = vld [vmem:[%s1764_s1 + $0x250] sm:$0xff]  ;;  %1807 = vst [vmem:[#allocation18_spill] sm:$0xff] %v1499_v56 }
  0x31   : >> { %1806 = vst [vmem:[#allocation17_spill] sm:$0xff] %v1486_v62  ;;  %882 = vmatmul.msk.f32.vlgmr.msra.gmra.mxu2 %vm205_vm0, %v871_v48  ;;  %472 = vmatpush.msrb.mxu3 %v1486_v62  ;;  %v1511_v48 = vld [vmem:[%s1764_s1 + $0x1f0] sm:$0xff]  ;;  %v1525_v62 = vld [vmem:[%s1764_s1 + $0x2c8] sm:$0xff] }
  0x32   : >> { %359 = vmatpush.msrb.mxu0 %v1461_v52  ;;  %397 = vmatpush.msrb.mxu1 %v1469_v44  ;;  %1808 = vst [vmem:[#allocation19_spill] sm:$0xff] %v1504_v63  ;;  %v180_v44 = vld [vmem:[%s1430_s4] sm:$0xff]  ;;  %v1566_v52 = vld [vmem:[%s1430_s4 + $0x14] sm:$0xff] }
  0x33   : >> { %435 = vmatpush.msrb.mxu2 %v1474_v60  ;;  %1809 = vst [vmem:[#allocation20_spill] sm:$0xff] %v1511_v48  ;;  %v1516_v60 = vld [vmem:[%s1764_s1 + $0x248] sm:$0xff]  ;;  %869 = vmatmul.msk.f32.vlgmr.msra.gmra.mxu0 %vm205_vm0, %v858_v59 }
  0x34   : >> { %360 = vmatpush.msrb.mxu0 %v1481_v40  ;;  %1810 = vst [vmem:[#allocation21_spill] sm:$0xff] %v1516_v60  ;;  %896 = vmatmul.msk.f32.vlgmr.msra.gmra.mxu3 %vm205_vm0, %v1492_v58  ;;  %v1532_v40 = vld [vmem:[%s1764_s1 + $0x190] sm:$0xff]  ;;  %v1537_v59 = vld [vmem:[%s1764_s1 + $0x1e8] sm:$0xff] }
  0x35   : >> { %398 = vmatpush.msrb.mxu1 %v1504_v63  ;;  %1811 = vst [vmem:[#allocation22_spill] sm:$0xff] %v1537_v59  ;;  %436 = vmatpush.msrb.mxu2 %v1511_v48  ;;  %v1549_v63 = vld [vmem:[%s1764_s1 + $0x2c0] sm:$0xff]  ;;  %v1563_v48 = vld [vmem:[%s1764_s1 + $0x238] sm:$0xff] }
  0x36   : >> { %361 = vmatpush.msrb.mxu0 %v1499_v56  ;;  %473 = vmatpush.msrb.mxu3 %v1516_v60  ;;  %v1544_v56 = vld [vmem:[%s1764_s1 + $0x240] sm:$0xff]  ;;  %1813 = vst [vmem:[#allocation24_spill] sm:$0xff] %v1549_v63 }
  0x37   : >> { %1812 = vst [vmem:[#allocation23_spill] sm:$0xff] %v1544_v56  ;;  %870 = vmatmul.msk.f32.vlgmr.msra.gmra.mxu1 %vm205_vm0, %v180_v44  ;;  %v1556_v60 = vld [vmem:[%s1764_s1 + $0x1e0] sm:$0xff]  ;;  %437 = vmatpush.msrb.mxu2 %v1537_v59  ;;  %v1573_v44 = vld [vmem:[%s1764_s1 + $0x2b8] sm:$0xff]  ;;  %v1580_v59 = vld [vmem:[%s1764_s1 + $0x230] sm:$0xff] }
  0x38   : >> { %505 = vmatpush.msra.mxu0 %v1525_v62  ;;  %399 = vmatpush.msrb.mxu1 %v1532_v40  ;;  %1814 = vst [vmem:[#allocation25_spill] sm:$0xff] %v1563_v48 }
  0x39   : >> { %474 = vmatpush.msrb.mxu3 %v1544_v56  ;;  %438 = vmatpush.msrb.mxu2 %v1556_v60  ;;  %v1586_v56 = vld [vmem:[%s1430_s4 + $0xb] sm:$0xff] }
  0x3a   : >> { %506 = vmatpush.msra.mxu0 %v1549_v63  ;;  %526 = vmatpush.msra.mxu1 %v1071_v0  ;;  %v1589_v63 = vld [vmem:[%s1430_s4 + $0x15] sm:$0xff] }
  0x3b   : >> { %475 = vmatpush.msrb.mxu3 %v1563_v48  ;;  %938 = vmatmul.msk.f32.vlgmr.msrb.gmra.mxu2 %vm205_vm0, %v1566_v52  ;;  %v1596_v0 = vld [vmem:[%s1764_s1 + $0x2b0] sm:$0xff] }
  0x3c   : >> { %507 = vmatpush.msra.mxu0 %v1573_v44  ;;  %527 = vmatpush.msra.mxu1 %v1076_v1  ;;  %v1605_v48 = vld [vmem:[%s1430_s4 + $0xc] sm:$0xff] }
  0x3d   : >> { %546 = vmatpush.msra.mxu2 %v1081_v2  ;;  %476 = vmatpush.msrb.mxu3 %v1580_v59  ;;  %v1610_v1 = vld [vmem:[%s1764_s1 + $0x2a8] sm:$0xff]  ;;  %v1619_v2 = vld [vmem:[%s1764_s1 + $0x2a0] sm:$0xff] }
  0x3e   : >> { %910 = vmatmul.msk.f32.vlgmr.msrb.gmra.mxu0 %vm205_vm0, %v1586_v56  ;;  %952 = vmatmul.msk.f32.vlgmr.msrb.gmra.mxu3 %vm205_vm0, %v1589_v63 }
  0x3f   : >> { %508 = vmatpush.msra.mxu0 %v1596_v0  ;;  %528 = vmatpush.msra.mxu1 %v1098_v5  ;;  %v1647_v5 = vld [vmem:[%s1764_s1 + $0x288] sm:$0xff] }
  0x40   : >> { %547 = vmatpush.msra.mxu2 %v1088_v3  ;;  %566 = vmatpush.msra.mxu3 %v1093_v4  ;;  %v1629_v3 = vld [vmem:[%s1764_s1 + $0x298] sm:$0xff]  ;;  %v1638_v4 = vld [vmem:[%s1764_s1 + $0x290] sm:$0xff] }
  0x41   : >> { %924 = vmatmul.msk.f32.vlgmr.msrb.gmra.mxu1 %vm205_vm0, %v1605_v48  ;;  %509 = vmatpush.msra.mxu0 %v1610_v1 }
  0x42   : >> { %529 = vmatpush.msra.mxu1 %v1116_v8  ;;  %548 = vmatpush.msra.mxu2 %v1104_v6  ;;  %v1656_v6 = vld [vmem:[%s1764_s1 + $0x280] sm:$0xff]  ;;  %v1815_v8 = vld [vmem:[#allocation7_spill] sm:$0xff] }
  0x43   : >> { %567 = vmatpush.msra.mxu3 %v1109_v7  ;;  %510 = vmatpush.msra.mxu0 %v1619_v2  ;;  %v955_v7 = vld [vmem:[%s1430_s4 + $0x16] sm:$0xff] }
  0x44   : >> { %530 = vmatpush.msra.mxu1 %v1155_v15  ;;  %549 = vmatpush.msra.mxu2 %v1128_v10  ;;  %v1817_v10 = vld [vmem:[#allocation2_spill] sm:$0xff]  ;;  %v1822_v15 = vld [vmem:[#allocation16_spill] sm:$0xff] }
  0x45   : >> { %568 = vmatpush.msra.mxu3 %v1133_v11  ;;  %511 = vmatpush.msra.mxu0 %v1629_v3  ;;  %v1818_v11 = vld [vmem:[#allocation13_spill] sm:$0xff] }
  0x46   : >> { %531 = vmatpush.msra.mxu1 %v1179_v19  ;;  %550 = vmatpush.msra.mxu2 %v1162_v16  ;;  %v1823_v16 = vld [vmem:[#allocation14_spill] sm:$0xff] }
  0x47   : >> { %569 = vmatpush.msra.mxu3 %v1145_v13  ;;  %512 = vmatpush.msra.mxu0 %v1638_v4  ;;  %v1820_v13 = vld [vmem:[#allocation11_spill] sm:$0xff]  ;;  %v1826_v19 = vld [vmem:[#allocation18_spill] sm:$0xff] }
  0x48   : >> { %532 = vmatpush.msra.mxu1 %v1203_v23  ;;  %551 = vmatpush.msra.mxu2 %v1186_v20  ;;  %v1827_v20 = vld [vmem:[#allocation19_spill] sm:$0xff]  ;;  %v1830_v23 = vld [vmem:[#allocation22_spill] sm:$0xff] }
  0x49   : >> { %570 = vmatpush.msra.mxu3 %v1169_v17  ;;  %513 = vmatpush.msra.mxu0 %v1647_v5  ;;  %v1824_v17 = vld [vmem:[#allocation15_spill] sm:$0xff] }
  0x4a   : >> { %533 = vmatpush.msra.mxu1 %v1227_v27  ;;  %552 = vmatpush.msra.mxu2 %v1210_v24  ;;  %v975_v24 = vld [vmem:[%s1430_s4 + $0x1e] sm:$0xff] }
  0x4b   : >> { %571 = vmatpush.msra.mxu3 %v1193_v21  ;;  %514 = vmatpush.msra.mxu0 %v1656_v6  ;;  %v1828_v21 = vld [vmem:[#allocation20_spill] sm:$0xff]  ;;  %v1833_v27 = vld [vmem:[#allocation9_spill] sm:$0xff] }
  0x4c   : >> { %534 = vmatpush.msra.mxu1 %v1251_v31  ;;  %553 = vmatpush.msra.mxu2 %v1234_v28  ;;  %v1834_v28 = vld [vmem:[#allocation12_spill] sm:$0xff]  ;;  %v1837_v31 = vld [vmem:[#allocation23_spill] sm:$0xff] }
  0x4d   : >> { %572 = vmatpush.msra.mxu3 %v1217_v25  ;;  %966 = vmatmul.msk.f32.vlgmr.msra.gmra.mxu0 %vm205_vm0, %v955_v7  ;;  %v1831_v25 = vld [vmem:[#allocation6_spill] sm:$0xff] }
  0x4e   : >> { %587 = vmatpush.msrb.mxu0 %v1121_v9  ;;  %535 = vmatpush.msra.mxu1 %v1275_v35  ;;  %v1816_v9 = vld [vmem:[#allocation8_spill] sm:$0xff] }
  0x4f   : >> { %554 = vmatpush.msra.mxu2 %v1258_v32  ;;  %573 = vmatpush.msra.mxu3 %v1241_v29  ;;  %v1835_v29 = vld [vmem:[#allocation17_spill] sm:$0xff] }
  0x50   : >> { %588 = vmatpush.msrb.mxu0 %v1138_v12  ;;  %608 = vmatpush.msrb.mxu1 %v1289_v37  ;;  %v1819_v12 = vld [vmem:[#allocation10_spill] sm:$0xff]  ;;  %v1838_v32 = vld [vmem:[#allocation25_spill] sm:$0xff] }
  0x51   : >> { %555 = vmatpush.msra.mxu2 %v1282_v36  ;;  %574 = vmatpush.msra.mxu3 %v1265_v33  ;;  %v979_v33 = vld [vmem:[%s1430_s4 + $0x1f] sm:$0xff] }
  0x52   : >> { %589 = vmatpush.msrb.mxu0 %v1150_v14  ;;  %609 = vmatpush.msrb.mxu1 %v1313_v41  ;;  %v1821_v14 = vld [vmem:[#allocation3_spill] sm:$0xff] }
  0x53   : >> { %629 = vmatpush.msrb.mxu2 %v1294_v38  ;;  %575 = vmatpush.msra.mxu3 %v1301_v39 }
  0x54   : >> { %590 = vmatpush.msrb.mxu0 %v1174_v18  ;;  %610 = vmatpush.msrb.mxu1 %v1337_v45  ;;  %v1825_v18 = vld [vmem:[#allocation4_spill] sm:$0xff] }
  0x55   : >> { %630 = vmatpush.msrb.mxu2 %v1318_v42  ;;  %657 = vmatpush.msrb.mxu3 %v1325_v43 }
  0x56   : >> { %591 = vmatpush.msrb.mxu0 %v1198_v22  ;;  %611 = vmatpush.msrb.mxu1 %v1361_v49  ;;  %v1829_v22 = vld [vmem:[#allocation5_spill] sm:$0xff] }
  0x57   : >> { %631 = vmatpush.msrb.mxu2 %v1342_v46  ;;  %658 = vmatpush.msrb.mxu3 %v1349_v47 }
  0x58   : >> { %592 = vmatpush.msrb.mxu0 %v1222_v26  ;;  %612 = vmatpush.msrb.mxu1 %v1386_v53  ;;  %v1832_v26 = vld [vmem:[#allocation24_spill] sm:$0xff] }
  0x59   : >> { %632 = vmatpush.msrb.mxu2 %v1366_v50  ;;  %659 = vmatpush.msrb.mxu3 %v1373_v51 }
  0x5a   : >> { %593 = vmatpush.msrb.mxu0 %v1246_v30  ;;  %613 = vmatpush.msrb.mxu1 %v1410_v57  ;;  %v1836_v30 = vld [vmem:[#allocation21_spill] sm:$0xff] }
  0x5b   : >> { %633 = vmatpush.msrb.mxu2 %v1391_v54  ;;  %660 = vmatpush.msrb.mxu3 %v1398_v55 }
  0x5c   : >> { %594 = vmatpush.msrb.mxu0 %v1270_v34  ;;  %614 = vmatpush.msrb.mxu1 %v1437_v61  ;;  %v983_v34 = vld [vmem:[%s1430_s4 + $0x20] sm:$0xff]  ;;  %s1024_s4 = smov 64  }
  0x5d   : >> { %634 = vmatpush.msrb.mxu2 %v1815_v8  ;;  %661 = vmatpush.msrb.mxu3 %v1816_v9 }
  0x5e   : >> { %968 = vmatmul.msk.f32.vlgmr.msra.gmra.mxu2 %vm205_vm0, %v1492_v58  ;;  %595 = vmatpush.msrb.mxu0 %v1817_v10 }
  0x5f   : >> { %615 = vmatpush.msrb.mxu1 %v1818_v11  ;;  %635 = vmatpush.msrb.mxu2 %v1819_v12 }
  0x60   : >> { %662 = vmatpush.msrb.mxu3 %v1820_v13  ;;  %596 = vmatpush.msrb.mxu0 %v1821_v14 }
  0x61   : >> { %969 = vmatmul.msk.f32.vlgmr.msra.gmra.mxu3 %vm205_vm0, %v1605_v48  ;;  %616 = vmatpush.msrb.mxu1 %v1822_v15 }
  0x62   : >> { %636 = vmatpush.msrb.mxu2 %v1823_v16  ;;  %663 = vmatpush.msrb.mxu3 %v1824_v17 }
  0x63   : >> { %967 = vmatmul.msk.f32.vlgmr.msra.gmra.mxu1 %vm205_vm0, %v1586_v56  ;;  %684 = vmatpush.msra.mxu0 %v1825_v18 }
  0x64   : >> { %617 = vmatpush.msrb.mxu1 %v1826_v19  ;;  %637 = vmatpush.msrb.mxu2 %v1827_v20 }
  0x65   : >> { %664 = vmatpush.msrb.mxu3 %v1828_v21  ;;  %685 = vmatpush.msra.mxu0 %v1829_v22 }
  0x66   : >> { %711 = vmatpush.msra.mxu1 %v1525_v62  ;;  %638 = vmatpush.msrb.mxu2 %v1532_v40 }
  0x67   : >> { %665 = vmatpush.msrb.mxu3 %v1830_v23  ;;  %972 = vmatmul.msk.f32.vlgmr.msrb.gmra.mxu2 %vm205_vm0, %v955_v7 }
  0x68   : >> { %686 = vmatpush.msra.mxu0 %v1831_v25  ;;  %712 = vmatpush.msra.mxu1 %v1832_v26 }
  0x69   : >> { %666 = vmatpush.msrb.mxu3 %v1556_v60  ;;  %970 = vmatmul.msk.f32.vlgmr.msrb.gmra.mxu0 %vm205_vm0, %v1566_v52 }
  0x6a   : >> { %976 = vmatmul.msk.f32.vlgmr.msrb.gmra.mxu3 %vm205_vm0, %v975_v24  ;;  %687 = vmatpush.msra.mxu0 %v1833_v27 }
  0x6b   : >> { %713 = vmatpush.msra.mxu1 %v1573_v44 }
  0x6c   : >> { %971 = vmatmul.msk.f32.vlgmr.msrb.gmra.mxu1 %vm205_vm0, %v1589_v63  ;;  %688 = vmatpush.msra.mxu0 %v1834_v28 }
  0x6d   : >> { %714 = vmatpush.msra.mxu1 %v1596_v0 }
  0x6e   : >> { %689 = vmatpush.msra.mxu0 %v1835_v29 }
  0x6f   : >> { %715 = vmatpush.msra.mxu1 %v1610_v1 }
  0x70   : >> { %690 = vmatpush.msra.mxu0 %v1836_v30 }
  0x71   : >> { %716 = vmatpush.msra.mxu1 %v1619_v2 }
  0x72   : >> { %691 = vmatpush.msra.mxu0 %v1837_v31 }
  0x73   : >> { %717 = vmatpush.msra.mxu1 %v1629_v3 }
  0x74   : >> { %692 = vmatpush.msra.mxu0 %v1838_v32 }
  0x75   : >> { %718 = vmatpush.msra.mxu1 %v1638_v4 }
  0x76   : >> { %693 = vmatpush.msra.mxu0 %v1580_v59 }
  0x77   : >> { %719 = vmatpush.msra.mxu1 %v1647_v5  ;;  %980 = vmatmul.msk.f32.vlgmr.msra.gmra.mxu0 %vm205_vm0, %v979_v33 }
  0x79   : >> { %720 = vmatpush.msra.mxu1 %v1656_v6  ;;  %v1007_v6 = vld [vmem:[%s1765_s2] ss:$0 sm:$0xff] }
  0x7a   : >> { %984 = vmatmul.msk.f32.vlgmr.msra.gmra.mxu1 %vm205_vm0, %v983_v34 }
  0xb0   : >> { %v226_v35 = vpop.f32.mrf.mxu0 }
  0xb4   : >> { %v249_v36 = vpop.f32.mrf.mxu1  ;;  %v286_v37 = vpop.f32.mrf.mxu2 }
  0xb5   : >> { %v250_v43 = vadd.f32 %v249_v36, %v226_v35 }
  0xb7   : >> { %v325_v38 = vpop.f32.mrf.mxu3  ;;  %v289_v49 = vadd.f32 %v286_v37, %v250_v43 }
  0xb9   : >> { %v328_v53 = vadd.f32 %v325_v38, %v289_v49 }
  0xbb   : >> { %v363_v39 = vpop.f32.mrf.mxu0 }
  0xbc   : >> { %v366_v57 = vadd.f32 %v363_v39, %v328_v53 }
  0xbe   : >> { %v401_v40 = vpop.f32.mrf.mxu1  ;;  %v440_v41 = vpop.f32.mrf.mxu2 }
  0xbf   : >> { %v404_v61 = vadd.f32 %v401_v40, %v366_v57 }
  0xc1   : >> { %v478_v42 = vpop.f32.mrf.mxu3  ;;  %v443_v48 = vadd.f32 %v440_v41, %v404_v61 }
  0xc3   : >> { %v481_v1 = vadd.f32 %v478_v42, %v443_v48 }
  0xca   : >> { %v516_v45 = vpop.f32.mrf.mxu0 }
  0xcb   : >> { %v519_v3 = vadd.f32 %v516_v45, %v481_v1 }
  0xe0   : >> { %v537_v46 = vpop.f32.mrf.mxu1 }
  0xe1   : >> { %v557_v47 = vpop.f32.mrf.mxu2 }
  0xe2   : >> { %v558_v50 = vadd.f32 %v557_v47, %v537_v46 }
  0xe4   : >> { %v577_v51 = vpop.f32.mrf.mxu3 }
  0xe5   : >> { %v580_v52 = vadd.f32 %v577_v51, %v558_v50 }
  0xe6   : >> { %v598_v54 = vpop.f32.mrf.mxu0 }
  0xe7   : >> { %v601_v55 = vadd.f32 %v598_v54, %v580_v52 }
  0xe9   : >> { %v619_v56 = vpop.f32.mrf.mxu1 }
  0xea   : >> { %v622_v58 = vadd.f32 %v619_v56, %v601_v55  ;;  %v640_v60 = vpop.f32.mrf.mxu2 }
  0xec   : >> { %v643_v62 = vadd.f32 %v640_v60, %v622_v58 }
  0xed   : >> { %v668_v63 = vpop.f32.mrf.mxu3 }
  0xee   : >> { %v671_v59 = vadd.f32 %v668_v63, %v643_v62 }
  0xf4   : >> { %v695_v44 = vpop.f32.mrf.mxu0 }
  0xf5   : >> { %v698_v0 = vadd.f32 %v695_v44, %v671_v59 }
  0xf7   : >> { %v722_v2 = vpop.f32.mrf.mxu1 }
  0xf8   : >> { %v725_v4 = vadd.f32 %v722_v2, %v698_v0 }
  0xfa   : >> { %v726_v5 = vmax.f32 %v519_v3, %v725_v4 }
  0xfc   : >> { %728 = vrot.lane.b32.xlu0 %v726_v5, %s1024_s4 }
 0x16e   : >> { %v729_v7 = vpop.permute.xlu0 %728 }
 0x16f   : >> { %v731_v8 = vmax.f32 %v726_v5, %v729_v7 }
 0x171   : >> { %v736_v9 = vadd.f32 %v1007_v6, %v731_v8 }
 0x172   : > { %175 = sbr.rel (!%p173_p4) target bundleno = 15 (0xf), region = 90 }
 0x173   : >> { %vm737_vm1 = vcmp.ge.f32.partialorder %v736_v9, 0.0  ;;  %v738_v10 = vmul.f32 0.2, %v736_v9 }
 0x175   : >> { %v739_v11 = vsel %vm737_vm1, %v736_v9, %v738_v10 }
 0x176   : >> { %743 = vst.msk [vmem:[%s741_s26] sm:$0xff] %vm742_vm2, %v739_v11 }
 0x177 PF: > { %s13_s12 = sadd.s32 1, %s1018_s12  }
 0x178   : > { %p10_p5 = scmp.ge.s32.totalorder %s13_s12, 4  }
 0x17a   :  { %12 = sbr.rel (!%p10_p5) target bundleno = 1 (0x1), region = 101 }

// kernel: model_forward.8
= control target key start
LH: loop header
LB: loop body
LE: loop exit
PB: predicated region body
PF: predicated region fallthrough
CT: control target
= control target key end

     0   :  { %s1073_s12 = smov 0   ;;  %s1921_s0 = inlined_call_operand.vmem [shape: f32[2,36,96], index: 0, kind: input, shape index: {}]   ;;  %s1922_s1 = inlined_call_operand.vmem [shape: f32[9,96,128], index: 1, kind: input, shape index: {}]   ;;  %s1923_s2 = inlined_call_operand.vmem [shape: f32[1,64], index: 2, kind: input, shape index: {}]   ;;  %s1924_s3 = inlined_call_operand.vmem [shape: f32[2,8,64], index: 3, kind: output, shape index: {}]  }
   0x1 LB: > { %s864_s13 = sadd.s32 4294967295, %s1046_s12   ;;  %p868_p0 = scmp.ge.s32.totalorder %s1046_s12, 1  ;;  %s1046_s12 = sphi %s1073_s12, %s13_s12  }
   0x2   : > { %p137_p1 = scmp.lt.s32.totalorder %s1046_s12, 3 }
   0x4   : > { %p138_p2 = pnand %p868_p0, %p137_p1 }
   0x5   : > { %p160_p3 = scmp.lt.s32.totalorder (!%p138_p2), %s864_s13, 1  ;;  %s1091_s22 = smov (!%p138_p2), 0  }
   0x6   : > { %141 = sbr.rel (%p138_p2) target bundleno = 395 (0x18b), region = 32 }
   0xb   : > { %s2046_s13 = smov (!%p160_p3, %s864_s13), 1 }
   0xc   : > { %s1017_s14 = smul.u32 40, %s2046_s13  ;;  %s870_s15 = sshll.u32 %s2046_s13, 3 }
   0xd   : > { %s1084_s18 = scalar_lea.vmem %s1924_s3, %s870_s15 }
   0xe   : > { %s1089_s21 = scalar_lea.vmem %s1921_s0, %s1017_s14 }
   0xf LB: >> { %v1099_v0 = vld [vmem:[%s1922_s1 + $0xb8] sm:$0xff]  ;;  %v1104_v1 = vld [vmem:[%s1922_s1 + $0xb0] sm:$0xff]  ;;  %v1126_v5 = vld [vmem:[%s1922_s1 + $0xa8] sm:$0xff]  ;;  %s176_s23 = smul.u32 12, %s1050_s22  ;;  %vm207_vm0 = vcmask 785408   ;;  %s1014_s11 = sshll.u32 %s1050_s22, 2  ;;  %s1050_s22 = sphi %s1091_s22, %s174_s22  }
  0x10   : >> { %v1109_v2 = vld [vmem:[%s1922_s1 + $0x58] sm:$0xff]  ;;  %215 = vmatpush.msra.mxu0 %v1099_v0  ;;  %v1116_v3 = vld [vmem:[%s1922_s1 + $0x50] sm:$0xff]  ;;  %v1132_v6 = vld [vmem:[%s1922_s1 + $0x48] sm:$0xff]  ;;  %s757_s13 = scalar_lea.vmem %s1084_s18, %s1014_s11  ;;  %vm758_vm2 = vcmask 519168   ;;  %s174_s22 = sadd.s32 1, %s1050_s22  }
  0x11   : >> { %238 = vmatpush.msra.mxu1 %v1109_v2  ;;  %v1121_v4 = vld [vmem:[%s1922_s1 + $0x118] sm:$0xff]  ;;  %v1137_v7 = vld [vmem:[%s1922_s1 + $0x110] sm:$0xff]  ;;  %v1144_v8 = vld [vmem:[%s1922_s1 + $0xa0] sm:$0xff]  ;;  %s1554_s14 = scalar_lea.vmem %s1089_s21, %s176_s23  ;;  %p171_p4 = scmp.ge.s32.totalorder %s174_s22, 2  }
  0x12   : >> { %277 = vmatpush.msra.mxu2 %v1121_v4  ;;  %216 = vmatpush.msra.mxu0 %v1104_v1  ;;  %v1149_v9 = vld [vmem:[%s1922_s1 + $0x178] sm:$0xff]  ;;  %v1156_v10 = vld [vmem:[%s1922_s1 + $0x40] sm:$0xff]  ;;  %v1161_v11 = vld [vmem:[%s1922_s1 + $0x108] sm:$0xff] }
  0x13   : >> { %239 = vmatpush.msra.mxu1 %v1116_v3  ;;  %318 = vmatpush.msra.mxu3 %v1149_v9  ;;  %v1166_v12 = vld [vmem:[%s1922_s1 + $0x170] sm:$0xff]  ;;  %v1173_v13 = vld [vmem:[%s1922_s1 + $0x100] sm:$0xff]  ;;  %v1178_v14 = vld [vmem:[%s1922_s1 + $0x168] sm:$0xff] }
  0x14   : >> { %278 = vmatpush.msra.mxu2 %v1137_v7  ;;  %217 = vmatpush.msra.mxu0 %v1126_v5  ;;  %v1183_v15 = vld [vmem:[%s1922_s1 + $0x98] sm:$0xff]  ;;  %v1202_v18 = vld [vmem:[%s1922_s1 + $0x160] sm:$0xff]  ;;  %v1207_v19 = vld [vmem:[%s1922_s1 + $0x90] sm:$0xff] }
  0x15   : >> { %240 = vmatpush.msra.mxu1 %v1132_v6  ;;  %319 = vmatpush.msra.mxu3 %v1166_v12  ;;  %v1190_v16 = vld [vmem:[%s1922_s1 + $0x38] sm:$0xff]  ;;  %v1214_v20 = vld [vmem:[%s1922_s1 + $0x30] sm:$0xff]  ;;  %v1231_v23 = vld [vmem:[%s1922_s1 + $0x88] sm:$0xff] }
  0x16   : >> { %279 = vmatpush.msra.mxu2 %v1161_v11  ;;  %218 = vmatpush.msra.mxu0 %v1144_v8  ;;  %v1197_v17 = vld [vmem:[%s1922_s1 + $0xf8] sm:$0xff]  ;;  %v1221_v21 = vld [vmem:[%s1922_s1 + $0xf0] sm:$0xff]  ;;  %v1238_v24 = vld [vmem:[%s1922_s1 + $0x28] sm:$0xff] }
  0x17   : >> { %241 = vmatpush.msra.mxu1 %v1156_v10  ;;  %320 = vmatpush.msra.mxu3 %v1178_v14  ;;  %v1226_v22 = vld [vmem:[%s1922_s1 + $0x158] sm:$0xff]  ;;  %v1245_v25 = vld [vmem:[%s1922_s1 + $0xe8] sm:$0xff]  ;;  %v1250_v26 = vld [vmem:[%s1922_s1 + $0x150] sm:$0xff] }
  0x18   : >> { %280 = vmatpush.msra.mxu2 %v1173_v13  ;;  %219 = vmatpush.msra.mxu0 %v1183_v15  ;;  %v1255_v27 = vld [vmem:[%s1922_s1 + $0x80] sm:$0xff]  ;;  %v1274_v30 = vld [vmem:[%s1922_s1 + $0x148] sm:$0xff]  ;;  %v1279_v31 = vld [vmem:[%s1922_s1 + $0x78] sm:$0xff] }
  0x19   : >> { %242 = vmatpush.msra.mxu1 %v1190_v16  ;;  %321 = vmatpush.msra.mxu3 %v1202_v18  ;;  %v1262_v28 = vld [vmem:[%s1922_s1 + $0x20] sm:$0xff]  ;;  %1965 = vst [vmem:[#allocation2_spill] sm:$0xff] %v1274_v30  ;;  %v1286_v32 = vld [vmem:[%s1922_s1 + $0x18] sm:$0xff]  ;;  %v1303_v35 = vld [vmem:[%s1922_s1 + $0x70] sm:$0xff] }
  0x1a   : >> { %281 = vmatpush.msra.mxu2 %v1197_v17  ;;  %220 = vmatpush.msra.mxu0 %v1207_v19  ;;  %v1269_v29 = vld [vmem:[%s1922_s1 + $0xe0] sm:$0xff]  ;;  %v1293_v33 = vld [vmem:[%s1922_s1 + $0xd8] sm:$0xff]  ;;  %v1310_v36 = vld [vmem:[%s1922_s1 + $0x10] sm:$0xff] }
  0x1b   : >> { %243 = vmatpush.msra.mxu1 %v1214_v20  ;;  %322 = vmatpush.msra.mxu3 %v1226_v22  ;;  %v1298_v34 = vld [vmem:[%s1922_s1 + $0x140] sm:$0xff]  ;;  %v1317_v37 = vld [vmem:[%s1922_s1 + $0xd0] sm:$0xff]  ;;  %v1322_v38 = vld [vmem:[%s1922_s1 + $0x138] sm:$0xff] }
  0x1c   : >> { %282 = vmatpush.msra.mxu2 %v1221_v21  ;;  %221 = vmatpush.msra.mxu0 %v1231_v23  ;;  %1966 = vst [vmem:[#allocation3_spill] sm:$0xff] %v1298_v34  ;;  %v1327_v39 = vld [vmem:[%s1922_s1 + $0x68] sm:$0xff]  ;;  %v1346_v42 = vld [vmem:[%s1922_s1 + $0x130] sm:$0xff]  ;;  %v1351_v43 = vld [vmem:[%s1922_s1 + $0x60] sm:$0xff] }
  0x1d   : >> { %244 = vmatpush.msra.mxu1 %v1238_v24  ;;  %323 = vmatpush.msra.mxu3 %v1250_v26  ;;  %1967 = vst [vmem:[#allocation4_spill] sm:$0xff] %v1322_v38  ;;  %v1334_v40 = vld [vmem:[%s1922_s1 + $0x8] sm:$0xff]  ;;  %v1358_v44 = vld [vmem:[%s1922_s1] sm:$0xff]  ;;  %v1365_v45 = vld [vmem:[%s1922_s1 + $0x1d8] sm:$0xff] }
  0x1e   : >> { %283 = vmatpush.msra.mxu2 %v1245_v25  ;;  %222 = vmatpush.msra.mxu0 %v1255_v27  ;;  %v1341_v41 = vld [vmem:[%s1922_s1 + $0xc8] sm:$0xff]  ;;  %1968 = vst [vmem:[#allocation5_spill] sm:$0xff] %v1346_v42  ;;  %v1370_v46 = vld [vmem:[%s1922_s1 + $0x238] sm:$0xff]  ;;  %v1377_v47 = vld [vmem:[%s1922_s1 + $0xc0] sm:$0xff] }
  0x1f   : >> { %245 = vmatpush.msra.mxu1 %v1262_v28  ;;  %324 = vmatpush.msra.mxu3 %v1274_v30  ;;  %v1382_v48 = vld [vmem:[%s1922_s1 + $0x128] sm:$0xff]  ;;  %v1389_v49 = vld [vmem:[%s1922_s1 + $0x1d0] sm:$0xff]  ;;  %v1401_v51 = vld [vmem:[%s1922_s1 + $0x298] sm:$0xff] }
  0x20   : >> { %284 = vmatpush.msra.mxu2 %v1269_v29  ;;  %223 = vmatpush.msra.mxu0 %v1279_v31  ;;  %1969 = vst [vmem:[#allocation6_spill] sm:$0xff] %v1382_v48  ;;  %v1394_v50 = vld [vmem:[%s1922_s1 + $0x230] sm:$0xff]  ;;  %v1406_v52 = vld [vmem:[%s1922_s1 + $0x120] sm:$0xff]  ;;  %v1413_v53 = vld [vmem:[%s1922_s1 + $0x1c8] sm:$0xff] }
  0x21   : >> { %246 = vmatpush.msra.mxu1 %v1286_v32  ;;  %325 = vmatpush.msra.mxu3 %v1298_v34  ;;  %1970 = vst [vmem:[#allocation7_spill] sm:$0xff] %v1406_v52  ;;  %v1418_v54 = vld [vmem:[%s1922_s1 + $0x228] sm:$0xff]  ;;  %v1425_v55 = vld [vmem:[%s1922_s1 + $0x290] sm:$0xff]  ;;  %v1430_v56 = vld [vmem:[%s1922_s1 + $0x2f8] sm:$0xff] }
  0x22   : >> { %285 = vmatpush.msra.mxu2 %v1293_v33  ;;  %224 = vmatpush.msra.mxu0 %v1303_v35  ;;  %1971 = vst [vmem:[#allocation8_spill] sm:$0xff] %v1430_v56  ;;  %v1437_v57 = vld [vmem:[%s1922_s1 + $0x1c0] sm:$0xff]  ;;  %v1449_v59 = vld [vmem:[%s1922_s1 + $0x288] sm:$0xff]  ;;  %v1454_v60 = vld [vmem:[%s1922_s1 + $0x2f0] sm:$0xff] }
  0x23   : >> { %247 = vmatpush.msra.mxu1 %v1310_v36  ;;  %326 = vmatpush.msra.mxu3 %v1322_v38  ;;  %v1442_v58 = vld [vmem:[%s1922_s1 + $0x220] sm:$0xff]  ;;  %1972 = vst [vmem:[#allocation9_spill] sm:$0xff] %v1454_v60  ;;  %v1461_v61 = vld [vmem:[%s1922_s1 + $0x1b8] sm:$0xff]  ;;  %v1510_v38 = vld [vmem:[%s1922_s1 + $0x1a8] sm:$0xff] }
  0x24   : >> { %286 = vmatpush.msra.mxu2 %v1317_v37  ;;  %225 = vmatpush.msra.mxu0 %v1327_v39  ;;  %v1466_v62 = vld [vmem:[%s1922_s1 + $0x218] sm:$0xff]  ;;  %v1473_v63 = vld [vmem:[%s1922_s1 + $0x280] sm:$0xff]  ;;  %1980 = vst [vmem:[#allocation17_spill] sm:$0xff] %v1510_v38  ;;  %v1515_v34 = vld [vmem:[%s1922_s1 + $0x208] sm:$0xff] }
  0x25   : >> { %248 = vmatpush.msra.mxu1 %v1334_v40  ;;  %327 = vmatpush.msra.mxu3 %v1346_v42  ;;  %1973 = vst [vmem:[#allocation10_spill] sm:$0xff] %v1466_v62  ;;  %v1497_v42 = vld [vmem:[%s1922_s1 + $0x278] sm:$0xff]  ;;  %v1616_v30 = vld [vmem:[%s1554_s14 + $0x6] sm:$0xf] }
  0x26   : >> { %287 = vmatpush.msra.mxu2 %v1341_v41  ;;  %226 = vmatpush.msra.mxu0 %v1351_v43  ;;  %1974 = vst [vmem:[#allocation11_spill] sm:$0xff] %v1473_v63 }
  0x27   : >> { %249 = vmatpush.msra.mxu1 %v1358_v44  ;;  %328 = vmatpush.msra.mxu3 %v1382_v48  ;;  %v1490_v48 = vld [vmem:[%s1922_s1 + $0x210] sm:$0xff]  ;;  %1978 = vst [vmem:[#allocation15_spill] sm:$0xff] %v1497_v42 }
  0x28   : >> { %358 = vmatpush.msrb.mxu0 %v1365_v45  ;;  %288 = vmatpush.msra.mxu2 %v1377_v47  ;;  %1977 = vst [vmem:[#allocation14_spill] sm:$0xff] %v1490_v48 }
  0x29   : >> { %398 = vmatpush.msrb.mxu1 %v1370_v46  ;;  %329 = vmatpush.msra.mxu3 %v1406_v52  ;;  %v1485_v52 = vld [vmem:[%s1922_s1 + $0x1b0] sm:$0xff]  ;;  %1981 = vst [vmem:[#allocation18_spill] sm:$0xff] %v1515_v34 }
  0x2a   : >> { %359 = vmatpush.msrb.mxu0 %v1389_v49  ;;  %439 = vmatpush.msrb.mxu2 %v1401_v51  ;;  %1976 = vst [vmem:[#allocation13_spill] sm:$0xff] %v1485_v52 }
  0x2b   : >> { %399 = vmatpush.msrb.mxu1 %v1394_v50  ;;  %479 = vmatpush.msrb.mxu3 %v1430_v56  ;;  %v1478_v56 = vld [vmem:[%s1922_s1 + $0x2e8] sm:$0xff] }
  0x2c   : >> { %360 = vmatpush.msrb.mxu0 %v1413_v53  ;;  %440 = vmatpush.msrb.mxu2 %v1425_v55  ;;  %1975 = vst [vmem:[#allocation12_spill] sm:$0xff] %v1478_v56 }
  0x2d   : >> { %400 = vmatpush.msrb.mxu1 %v1418_v54  ;;  %480 = vmatpush.msrb.mxu3 %v1454_v60  ;;  %v1502_v60 = vld [vmem:[%s1922_s1 + $0x2e0] sm:$0xff] }
  0x2e   : >> { %361 = vmatpush.msrb.mxu0 %v1437_v57  ;;  %441 = vmatpush.msrb.mxu2 %v1449_v59  ;;  %1979 = vst [vmem:[#allocation16_spill] sm:$0xff] %v1502_v60 }
  0x2f   : >> { %401 = vmatpush.msrb.mxu1 %v1442_v58  ;;  %481 = vmatpush.msrb.mxu3 %v1478_v56  ;;  %v1527_v56 = vld [vmem:[%s1922_s1 + $0x2d8] sm:$0xff] }
  0x30   : >> { %362 = vmatpush.msrb.mxu0 %v1461_v61  ;;  %442 = vmatpush.msrb.mxu2 %v1473_v63  ;;  %v1522_v63 = vld [vmem:[%s1922_s1 + $0x270] sm:$0xff]  ;;  %1983 = vst [vmem:[#allocation20_spill] sm:$0xff] %v1527_v56 }
  0x31   : >> { %402 = vmatpush.msrb.mxu1 %v1466_v62  ;;  %1982 = vst [vmem:[#allocation19_spill] sm:$0xff] %v1522_v63  ;;  %482 = vmatpush.msrb.mxu3 %v1502_v60  ;;  %v1534_v62 = vld [vmem:[%s1922_s1 + $0x1a0] sm:$0xff]  ;;  %v1551_v60 = vld [vmem:[%s1922_s1 + $0x2d0] sm:$0xff] }
  0x32   : >> { %363 = vmatpush.msrb.mxu0 %v1485_v52  ;;  %443 = vmatpush.msrb.mxu2 %v1497_v42  ;;  %1984 = vst [vmem:[#allocation21_spill] sm:$0xff] %v1534_v62  ;;  %v1546_v42 = vld [vmem:[%s1922_s1 + $0x268] sm:$0xff]  ;;  %v1593_v52 = vld [vmem:[%s1922_s1 + $0x1f0] sm:$0xff] }
  0x33   : >> { %403 = vmatpush.msrb.mxu1 %v1490_v48  ;;  %v1539_v48 = vld [vmem:[%s1922_s1 + $0x200] sm:$0xff]  ;;  %1986 = vst [vmem:[#allocation23_spill] sm:$0xff] %v1546_v42  ;;  %483 = vmatpush.msrb.mxu3 %v1527_v56  ;;  %v1578_v56 = vld [vmem:[%s1922_s1 + $0x2c8] sm:$0xff] }
  0x34   : >> { %1985 = vst [vmem:[#allocation22_spill] sm:$0xff] %v1539_v48  ;;  %364 = vmatpush.msrb.mxu0 %v1510_v38  ;;  %444 = vmatpush.msrb.mxu2 %v1522_v63  ;;  %v1566_v38 = vld [vmem:[%s1922_s1 + $0x1f8] sm:$0xff]  ;;  %v1573_v63 = vld [vmem:[%s1922_s1 + $0x260] sm:$0xff] }
  0x35   : >> { %404 = vmatpush.msrb.mxu1 %v1515_v34  ;;  %1987 = vst [vmem:[#allocation24_spill] sm:$0xff] %v1551_v60  ;;  %v1561_v34 = vld [vmem:[%s1922_s1 + $0x198] sm:$0xff]  ;;  %484 = vmatpush.msrb.mxu3 %v1551_v60 }
  0x36   : >> { %1988 = vst [vmem:[#allocation25_spill] sm:$0xff] %v1561_v34  ;;  %365 = vmatpush.msrb.mxu0 %v1534_v62  ;;  %445 = vmatpush.msrb.mxu2 %v1546_v42  ;;  %v886_v62 = vld [vmem:[%s1554_s14 + $0x2] sm:$0xf]  ;;  %v1598_v60 = vld [vmem:[%s1922_s1 + $0x258] sm:$0xff]  ;;  %v1605_v42 = vld [vmem:[%s1922_s1 + $0x188] sm:$0xff] }
  0x37   : >> { %1989 = vst [vmem:[#allocation26_spill] sm:$0xff] %v1566_v38  ;;  %405 = vmatpush.msrb.mxu1 %v1539_v48  ;;  %v1585_v48 = vld [vmem:[%s1922_s1 + $0x190] sm:$0xff]  ;;  %485 = vmatpush.msrb.mxu3 %v1578_v56 }
  0x38   : >> { %1990 = vst [vmem:[#allocation27_spill] sm:$0xff] %v1573_v63  ;;  %366 = vmatpush.msrb.mxu0 %v1561_v34  ;;  %446 = vmatpush.msrb.mxu2 %v1573_v63  ;;  %v871_v34 = vld [vmem:[%s1554_s14 + $0x1] sm:$0xf]  ;;  %v1628_v63 = vld [vmem:[%s1922_s1 + $0x1e8] sm:$0xff] }
  0x39   : >> { %1991 = vst [vmem:[#allocation28_spill] sm:$0xff] %v1578_v56  ;;  %406 = vmatpush.msrb.mxu1 %v1566_v38  ;;  %v1610_v38 = vld [vmem:[%s1922_s1 + $0x2c0] sm:$0xff]  ;;  %899 = vmatmul.msk.f32.vlgmr.msra.gmra.mxu2 %vm207_vm0, %v886_v62  ;;  %v1635_v62 = vld [vmem:[%s1922_s1 + $0x250] sm:$0xff] }
  0x3a   : >> { %1992 = vst [vmem:[#allocation29_spill] sm:$0xff] %v1585_v48  ;;  %367 = vmatpush.msrb.mxu0 %v1585_v48  ;;  %447 = vmatpush.msrb.mxu2 %v1598_v60  ;;  %v1623_v56 = vld [vmem:[%s1922_s1 + $0x180] sm:$0xff]  ;;  %v1690_v48 = vld [vmem:[%s1554_s14 + $0xc] sm:$0xf] }
  0x3b   : >> { %1993 = vst [vmem:[#allocation30_spill] sm:$0xff] %v1593_v52  ;;  %407 = vmatpush.msrb.mxu1 %v1593_v52  ;;  %486 = vmatpush.msrb.mxu3 %v1610_v38  ;;  %v178_v52 = vld [vmem:[%s1554_s14] sm:$0xf] }
  0x3c   : >> { %1994 = vst [vmem:[#allocation31_spill] sm:$0xff] %v1598_v60  ;;  %368 = vmatpush.msrb.mxu0 %v1605_v42  ;;  %v1640_v60 = vld [vmem:[%s1922_s1 + $0x2b8] sm:$0xff]  ;;  %915 = vmatmul.msk.f32.vlgmr.msra.gmra.mxu3 %vm207_vm0, %v1616_v30 }
  0x3d   : >> { %1995 = vst [vmem:[#allocation32_spill] sm:$0xff] %v1605_v42  ;;  %884 = vmatmul.msk.f32.vlgmr.msra.gmra.mxu0 %vm207_vm0, %v871_v34  ;;  %408 = vmatpush.msrb.mxu1 %v1628_v63  ;;  %v1656_v42 = vld [vmem:[%s1922_s1 + $0x1e0] sm:$0xff]  ;;  %v1661_v34 = vld [vmem:[%s1922_s1 + $0x248] sm:$0xff] }
  0x3e   : >> { %1996 = vst [vmem:[#allocation33_spill] sm:$0xff] %v1610_v38  ;;  %v1649_v38 = vld [vmem:[%s1922_s1 + $0x358] sm:$0xff]  ;;  %369 = vmatpush.msrb.mxu0 %v1623_v56  ;;  %448 = vmatpush.msrb.mxu2 %v1635_v62 }
  0x3f   : >> { %1997 = vst [vmem:[#allocation34_spill] sm:$0xff] %v1623_v56  ;;  %487 = vmatpush.msrb.mxu3 %v1640_v60  ;;  %v1668_v56 = vld [vmem:[%s1922_s1 + $0x2b0] sm:$0xff]  ;;  %885 = vmatmul.msk.f32.vlgmr.msra.gmra.mxu1 %vm207_vm0, %v178_v52  ;;  %v1697_v52 = vld [vmem:[%s1922_s1 + $0x348] sm:$0xff] }
  0x40   : >> { %1998 = vst [vmem:[#allocation35_spill] sm:$0xff] %v1628_v63  ;;  %v1673_v63 = vld [vmem:[%s1922_s1 + $0x350] sm:$0xff]  ;;  %519 = vmatpush.msra.mxu0 %v1649_v38  ;;  %409 = vmatpush.msrb.mxu1 %v1656_v42 }
  0x41   : >> { %1999 = vst [vmem:[#allocation36_spill] sm:$0xff] %v1635_v62  ;;  %449 = vmatpush.msrb.mxu2 %v1661_v34  ;;  %v1687_v62 = vld [vmem:[%s1922_s1 + $0x2a8] sm:$0xff]  ;;  %488 = vmatpush.msrb.mxu3 %v1668_v56 }
  0x42   : >> { %2000 = vst [vmem:[#allocation37_spill] sm:$0xff] %v1640_v60  ;;  %v1680_v60 = vld [vmem:[%s1922_s1 + $0x240] sm:$0xff]  ;;  %520 = vmatpush.msra.mxu0 %v1673_v63  ;;  %540 = vmatpush.msra.mxu1 %v1099_v0 }
  0x43   : >> { %2001 = vst [vmem:[#allocation38_spill] sm:$0xff] %v1661_v34  ;;  %450 = vmatpush.msrb.mxu2 %v1680_v60  ;;  %v1704_v34 = vld [vmem:[%s1922_s1 + $0x2a0] sm:$0xff]  ;;  %489 = vmatpush.msrb.mxu3 %v1687_v62 }
  0x44   : >> { %2002 = vst [vmem:[#allocation39_spill] sm:$0xff] %v1668_v56  ;;  %963 = vmatmul.msk.f32.vlgmr.msrb.gmra.mxu2 %vm207_vm0, %v1690_v48  ;;  %v1710_v56 = vld [vmem:[%s1554_s14 + $0x7] sm:$0xf]  ;;  %521 = vmatpush.msra.mxu0 %v1697_v52 }
  0x45   : >> { %2003 = vst [vmem:[#allocation40_spill] sm:$0xff] %v1673_v63  ;;  %v1713_v63 = vld [vmem:[%s1554_s14 + $0xd] sm:$0xf]  ;;  %541 = vmatpush.msra.mxu1 %v1104_v1  ;;  %v1720_v0 = vld [vmem:[%s1922_s1 + $0x340] sm:$0xff]  ;;  %560 = vmatpush.msra.mxu2 %v1109_v2  ;;  %v1734_v1 = vld [vmem:[%s1922_s1 + $0x338] sm:$0xff] }
  0x46   : >> { %2004 = vst [vmem:[#allocation41_spill] sm:$0xff] %v1687_v62  ;;  %490 = vmatpush.msrb.mxu3 %v1704_v34  ;;  %931 = vmatmul.msk.f32.vlgmr.msrb.gmra.mxu0 %vm207_vm0, %v1710_v56  ;;  %v1729_v62 = vld [vmem:[%s1554_s14 + $0x8] sm:$0xf]  ;;  %v1743_v2 = vld [vmem:[%s1922_s1 + $0x330] sm:$0xff] }
  0x47   : >> { %979 = vmatmul.msk.f32.vlgmr.msrb.gmra.mxu3 %vm207_vm0, %v1713_v63  ;;  %522 = vmatpush.msra.mxu0 %v1720_v0 }
  0x48   : >> { %542 = vmatpush.msra.mxu1 %v1126_v5  ;;  %561 = vmatpush.msra.mxu2 %v1116_v3  ;;  %v1753_v3 = vld [vmem:[%s1922_s1 + $0x328] sm:$0xff]  ;;  %v1771_v5 = vld [vmem:[%s1922_s1 + $0x318] sm:$0xff] }
  0x49   : >> { %580 = vmatpush.msra.mxu3 %v1121_v4  ;;  %947 = vmatmul.msk.f32.vlgmr.msrb.gmra.mxu1 %vm207_vm0, %v1729_v62  ;;  %v1762_v4 = vld [vmem:[%s1922_s1 + $0x320] sm:$0xff] }
  0x4a   : >> { %523 = vmatpush.msra.mxu0 %v1734_v1  ;;  %543 = vmatpush.msra.mxu1 %v1144_v8  ;;  %v1798_v8 = vld [vmem:[%s1922_s1 + $0x300] sm:$0xff] }
  0x4b   : >> { %562 = vmatpush.msra.mxu2 %v1132_v6  ;;  %581 = vmatpush.msra.mxu3 %v1137_v7  ;;  %v1780_v6 = vld [vmem:[%s1922_s1 + $0x310] sm:$0xff]  ;;  %v1789_v7 = vld [vmem:[%s1922_s1 + $0x308] sm:$0xff] }
  0x4c   : >> { %524 = vmatpush.msra.mxu0 %v1743_v2  ;;  %544 = vmatpush.msra.mxu1 %v1183_v15  ;;  %v2010_v15 = vld [vmem:[#allocation17_spill] sm:$0xff] }
  0x4d   : >> { %563 = vmatpush.msra.mxu2 %v1156_v10  ;;  %582 = vmatpush.msra.mxu3 %v1161_v11  ;;  %v1805_v10 = vld [vmem:[%s1554_s14 + $0xe] sm:$0xf]  ;;  %v2006_v11 = vld [vmem:[#allocation13_spill] sm:$0xff] }
  0x4e   : >> { %525 = vmatpush.msra.mxu0 %v1753_v3  ;;  %545 = vmatpush.msra.mxu1 %v1207_v19  ;;  %v2014_v19 = vld [vmem:[#allocation21_spill] sm:$0xff] }
  0x4f   : >> { %564 = vmatpush.msra.mxu2 %v1190_v16  ;;  %583 = vmatpush.msra.mxu3 %v1173_v13  ;;  %v2008_v13 = vld [vmem:[#allocation11_spill] sm:$0xff]  ;;  %v2011_v16 = vld [vmem:[#allocation14_spill] sm:$0xff] }
  0x50   : >> { %526 = vmatpush.msra.mxu0 %v1762_v4  ;;  %546 = vmatpush.msra.mxu1 %v1231_v23  ;;  %v2018_v23 = vld [vmem:[#allocation25_spill] sm:$0xff] }
  0x51   : >> { %565 = vmatpush.msra.mxu2 %v1214_v20  ;;  %584 = vmatpush.msra.mxu3 %v1197_v17  ;;  %v2012_v17 = vld [vmem:[#allocation15_spill] sm:$0xff]  ;;  %v2015_v20 = vld [vmem:[#allocation18_spill] sm:$0xff] }
  0x52   : >> { %527 = vmatpush.msra.mxu0 %v1771_v5  ;;  %547 = vmatpush.msra.mxu1 %v1255_v27  ;;  %v2022_v27 = vld [vmem:[#allocation29_spill] sm:$0xff] }
  0x53   : >> { %566 = vmatpush.msra.mxu2 %v1238_v24  ;;  %585 = vmatpush.msra.mxu3 %v1221_v21  ;;  %v2016_v21 = vld [vmem:[#allocation19_spill] sm:$0xff]  ;;  %v2019_v24 = vld [vmem:[#allocation22_spill] sm:$0xff] }
  0x54   : >> { %528 = vmatpush.msra.mxu0 %v1780_v6  ;;  %548 = vmatpush.msra.mxu1 %v1279_v31  ;;  %v2025_v31 = vld [vmem:[#allocation7_spill] sm:$0xff] }
  0x55   : >> { %567 = vmatpush.msra.mxu2 %v1262_v28  ;;  %586 = vmatpush.msra.mxu3 %v1245_v25  ;;  %v2020_v25 = vld [vmem:[#allocation23_spill] sm:$0xff]  ;;  %v2023_v28 = vld [vmem:[#allocation26_spill] sm:$0xff] }
  0x56   : >> { %529 = vmatpush.msra.mxu0 %v1789_v7  ;;  %549 = vmatpush.msra.mxu1 %v1303_v35  ;;  %v2028_v35 = vld [vmem:[#allocation31_spill] sm:$0xff] }
  0x57   : >> { %568 = vmatpush.msra.mxu2 %v1286_v32  ;;  %587 = vmatpush.msra.mxu3 %v1269_v29  ;;  %v2024_v29 = vld [vmem:[#allocation27_spill] sm:$0xff]  ;;  %v2026_v32 = vld [vmem:[#allocation32_spill] sm:$0xff] }
  0x58   : >> { %530 = vmatpush.msra.mxu0 %v1798_v8  ;;  %550 = vmatpush.msra.mxu1 %v1327_v39  ;;  %v2032_v39 = vld [vmem:[#allocation36_spill] sm:$0xff] }
  0x59   : >> { %569 = vmatpush.msra.mxu2 %v1310_v36  ;;  %588 = vmatpush.msra.mxu3 %v1293_v33  ;;  %v2027_v33 = vld [vmem:[#allocation30_spill] sm:$0xff] }
  0x5a   : >> { %995 = vmatmul.msk.f32.vlgmr.msra.gmra.mxu0 %vm207_vm0, %v1805_v10  ;;  %551 = vmatpush.msra.mxu1 %v1351_v43  ;;  %v2030_v36 = vld [vmem:[#allocation34_spill] sm:$0xff]  ;;  %v1004_v43 = vld [vmem:[%s1554_s14 + $0x12] sm:$0xf] }
  0x5b   : >> { %601 = vmatpush.msrb.mxu0 %v1149_v9  ;;  %570 = vmatpush.msra.mxu2 %v1334_v40  ;;  %v2005_v9 = vld [vmem:[#allocation2_spill] sm:$0xff]  ;;  %v2033_v40 = vld [vmem:[#allocation9_spill] sm:$0xff] }
  0x5c   : >> { %589 = vmatpush.msra.mxu3 %v1317_v37  ;;  %622 = vmatpush.msrb.mxu1 %v1365_v45  ;;  %v2031_v37 = vld [vmem:[#allocation35_spill] sm:$0xff]  ;;  %v2036_v45 = vld [vmem:[#allocation40_spill] sm:$0xff] }
  0x5d   : >> { %602 = vmatpush.msrb.mxu0 %v1166_v12  ;;  %571 = vmatpush.msra.mxu2 %v1358_v44  ;;  %v2007_v12 = vld [vmem:[#allocation10_spill] sm:$0xff]  ;;  %v2035_v44 = vld [vmem:[#allocation12_spill] sm:$0xff] }
  0x5e   : >> { %590 = vmatpush.msra.mxu3 %v1341_v41  ;;  %623 = vmatpush.msrb.mxu1 %v1389_v49  ;;  %v2034_v41 = vld [vmem:[#allocation38_spill] sm:$0xff]  ;;  %v2042_v49 = vld [vmem:[#allocation37_spill] sm:$0xff] }
  0x5f   : >> { %603 = vmatpush.msrb.mxu0 %v1178_v14  ;;  %643 = vmatpush.msrb.mxu2 %v1370_v46  ;;  %v2009_v14 = vld [vmem:[#allocation3_spill] sm:$0xff]  ;;  %v2039_v46 = vld [vmem:[#allocation24_spill] sm:$0xff] }
  0x60   : >> { %591 = vmatpush.msra.mxu3 %v1377_v47  ;;  %624 = vmatpush.msrb.mxu1 %v1413_v53  ;;  %v2040_v47 = vld [vmem:[#allocation28_spill] sm:$0xff] }
  0x61   : >> { %604 = vmatpush.msrb.mxu0 %v1202_v18  ;;  %644 = vmatpush.msrb.mxu2 %v1394_v50  ;;  %v2013_v18 = vld [vmem:[#allocation4_spill] sm:$0xff]  ;;  %v2043_v50 = vld [vmem:[#allocation39_spill] sm:$0xff] }
  0x62   : >> { %671 = vmatpush.msrb.mxu3 %v1401_v51  ;;  %625 = vmatpush.msrb.mxu1 %v1437_v57  ;;  %v2044_v51 = vld [vmem:[#allocation41_spill] sm:$0xff]  ;;  %v1008_v53 = vld [vmem:[%s1554_s14 + $0x13] sm:$0xf] }
  0x63   : >> { %605 = vmatpush.msrb.mxu0 %v1226_v22  ;;  %645 = vmatpush.msrb.mxu2 %v1418_v54  ;;  %v2017_v22 = vld [vmem:[#allocation5_spill] sm:$0xff]  ;;  %v1012_v54 = vld [vmem:[%s1554_s14 + $0x14] sm:$0xf]  ;;  %s1052_s14 = smov 64  }
  0x64   : >> { %672 = vmatpush.msrb.mxu3 %v1425_v55  ;;  %626 = vmatpush.msrb.mxu1 %v1461_v61 }
  0x65   : >> { %606 = vmatpush.msrb.mxu0 %v1250_v26  ;;  %646 = vmatpush.msrb.mxu2 %v1442_v58  ;;  %v2021_v26 = vld [vmem:[#allocation6_spill] sm:$0xff] }
  0x66   : >> { %673 = vmatpush.msrb.mxu3 %v1449_v59  ;;  %627 = vmatpush.msrb.mxu1 %v2006_v11 }
  0x67   : >> { %607 = vmatpush.msrb.mxu0 %v2005_v9  ;;  %647 = vmatpush.msrb.mxu2 %v2007_v12 }
  0x68   : >> { %674 = vmatpush.msrb.mxu3 %v2008_v13  ;;  %628 = vmatpush.msrb.mxu1 %v2010_v15 }
  0x69   : >> { %608 = vmatpush.msrb.mxu0 %v2009_v14  ;;  %648 = vmatpush.msrb.mxu2 %v2011_v16 }
  0x6a   : >> { %675 = vmatpush.msrb.mxu3 %v2012_v17  ;;  %629 = vmatpush.msrb.mxu1 %v2014_v19 }
  0x6b   : >> { %609 = vmatpush.msrb.mxu0 %v2013_v18  ;;  %649 = vmatpush.msrb.mxu2 %v2015_v20 }
  0x6c   : >> { %676 = vmatpush.msrb.mxu3 %v2016_v21  ;;  %630 = vmatpush.msrb.mxu1 %v2018_v23 }
  0x6d   : >> { %610 = vmatpush.msrb.mxu0 %v2017_v22  ;;  %650 = vmatpush.msrb.mxu2 %v2019_v24  ;;  %v1035_v24 = vld [vmem:[%s1923_s2] ss:$0 sm:$0xff] }
  0x6e   : >> { %677 = vmatpush.msrb.mxu3 %v2020_v25  ;;  %997 = vmatmul.msk.f32.vlgmr.msra.gmra.mxu2 %vm207_vm0, %v1616_v30  ;;  %v2029_v30 = vld [vmem:[#allocation8_spill] sm:$0xff] }
  0x6f   : >> { %611 = vmatpush.msrb.mxu0 %v2021_v26  ;;  %631 = vmatpush.msrb.mxu1 %v2022_v27 }
  0x70   : >> { %651 = vmatpush.msrb.mxu2 %v2023_v28  ;;  %678 = vmatpush.msrb.mxu3 %v2024_v29 }
  0x71   : >> { %612 = vmatpush.msrb.mxu0 %v2025_v31  ;;  %998 = vmatmul.msk.f32.vlgmr.msra.gmra.mxu3 %vm207_vm0, %v1729_v62 }
  0x72   : >> { %632 = vmatpush.msrb.mxu1 %v2026_v32  ;;  %652 = vmatpush.msrb.mxu2 %v2027_v33 }
  0x73   : >> { %679 = vmatpush.msrb.mxu3 %v2028_v35  ;;  %996 = vmatmul.msk.f32.vlgmr.msra.gmra.mxu1 %vm207_vm0, %v1710_v56 }
  0x74   : >> { %698 = vmatpush.msra.mxu0 %v2029_v30  ;;  %633 = vmatpush.msrb.mxu1 %v2030_v36 }
  0x75   : >> { %653 = vmatpush.msrb.mxu2 %v2031_v37  ;;  %680 = vmatpush.msrb.mxu3 %v2032_v39 }
  0x76   : >> { %699 = vmatpush.msra.mxu0 %v2033_v40  ;;  %725 = vmatpush.msra.mxu1 %v1649_v38  ;;  %v2037_v38 = vld [vmem:[#allocation16_spill] sm:$0xff] }
  0x77   : >> { %654 = vmatpush.msrb.mxu2 %v1656_v42  ;;  %681 = vmatpush.msrb.mxu3 %v2034_v41  ;;  %v2038_v42 = vld [vmem:[#allocation20_spill] sm:$0xff] }
  0x78   : >> { %1001 = vmatmul.msk.f32.vlgmr.msrb.gmra.mxu2 %vm207_vm0, %v1805_v10  ;;  %700 = vmatpush.msra.mxu0 %v2035_v44 }
  0x79   : >> { %726 = vmatpush.msra.mxu1 %v2036_v45  ;;  %682 = vmatpush.msrb.mxu3 %v1680_v60 }
  0x7a   : >> { %999 = vmatmul.msk.f32.vlgmr.msrb.gmra.mxu0 %vm207_vm0, %v1690_v48  ;;  %1005 = vmatmul.msk.f32.vlgmr.msrb.gmra.mxu3 %vm207_vm0, %v1004_v43  ;;  %v2041_v48 = vld [vmem:[#allocation33_spill] sm:$0xff] }
  0x7b   : >> { %701 = vmatpush.msra.mxu0 %v2037_v38  ;;  %727 = vmatpush.msra.mxu1 %v1697_v52 }
  0x7c   : >> { %1000 = vmatmul.msk.f32.vlgmr.msrb.gmra.mxu1 %vm207_vm0, %v1713_v63 }
  0x7d   : >> { %702 = vmatpush.msra.mxu0 %v2038_v42  ;;  %728 = vmatpush.msra.mxu1 %v1720_v0 }
  0x7f   : >> { %703 = vmatpush.msra.mxu0 %v2039_v46  ;;  %729 = vmatpush.msra.mxu1 %v1734_v1 }
  0x81   : >> { %704 = vmatpush.msra.mxu0 %v2040_v47  ;;  %730 = vmatpush.msra.mxu1 %v1743_v2 }
  0x83   : >> { %705 = vmatpush.msra.mxu0 %v2041_v48  ;;  %731 = vmatpush.msra.mxu1 %v1753_v3 }
  0x85   : >> { %706 = vmatpush.msra.mxu0 %v2042_v49  ;;  %732 = vmatpush.msra.mxu1 %v1762_v4 }
  0x87   : >> { %707 = vmatpush.msra.mxu0 %v2043_v50  ;;  %733 = vmatpush.msra.mxu1 %v1771_v5 }
  0x89   : >> { %708 = vmatpush.msra.mxu0 %v2044_v51  ;;  %734 = vmatpush.msra.mxu1 %v1780_v6 }
  0x8b   : >> { %709 = vmatpush.msra.mxu0 %v1704_v34  ;;  %735 = vmatpush.msra.mxu1 %v1789_v7 }
  0x8c   : >> { %1009 = vmatmul.msk.f32.vlgmr.msra.gmra.mxu0 %vm207_vm0, %v1008_v53 }
  0x8d   : >> { %736 = vmatpush.msra.mxu1 %v1798_v8 }
  0x8e   : >> { %1013 = vmatmul.msk.f32.vlgmr.msra.gmra.mxu1 %vm207_vm0, %v1012_v54 }
  0xba   : >> { %v228_v55 = vpop.f32.mrf.mxu0 }
  0xbc   : >> { %v290_v56 = vpop.f32.mrf.mxu2  ;;  %v251_v57 = vpop.f32.mrf.mxu1 }
  0xbd   : >> { %v252_v34 = vadd.f32 %v251_v57, %v228_v55 }
  0xbf   : >> { %v331_v58 = vpop.f32.mrf.mxu3  ;;  %v293_v3 = vadd.f32 %v290_v56, %v252_v34 }
  0xc1   : >> { %v334_v6 = vadd.f32 %v331_v58, %v293_v3 }
  0xc3   : >> { %v371_v59 = vpop.f32.mrf.mxu0 }
  0xc4   : >> { %v374_v10 = vadd.f32 %v371_v59, %v334_v6 }
  0xc6   : >> { %v411_v61 = vpop.f32.mrf.mxu1 }
  0xc7   : >> { %v452_v60 = vpop.f32.mrf.mxu2  ;;  %v414_v12 = vadd.f32 %v411_v61, %v374_v10 }
  0xc9   : >> { %v455_v15 = vadd.f32 %v452_v60, %v414_v12 }
  0xca   : >> { %v492_v63 = vpop.f32.mrf.mxu3 }
  0xcb   : >> { %v495_v19 = vadd.f32 %v492_v63, %v455_v15 }
  0xd7   : >> { %v532_v62 = vpop.f32.mrf.mxu0 }
  0xd8   : >> { %v535_v21 = vadd.f32 %v532_v62, %v495_v19 }
  0xf0   : >> { %v553_v0 = vpop.f32.mrf.mxu1 }
  0xf1   : >> { %v573_v52 = vpop.f32.mrf.mxu2 }
  0xf2   : >> { %v574_v1 = vadd.f32 %v573_v52, %v553_v0 }
  0xf4   : >> { %v593_v2 = vpop.f32.mrf.mxu3 }
  0xf5   : >> { %v596_v4 = vadd.f32 %v593_v2, %v574_v1 }
  0xf7   : >> { %v614_v5 = vpop.f32.mrf.mxu0 }
  0xf8   : >> { %v617_v7 = vadd.f32 %v614_v5, %v596_v4 }
  0xf9   : >> { %v635_v8 = vpop.f32.mrf.mxu1 }
  0xfa   : >> { %v638_v9 = vadd.f32 %v635_v8, %v617_v7 }
  0xfb   : >> { %v656_v11 = vpop.f32.mrf.mxu2 }
  0xfc   : >> { %v659_v13 = vadd.f32 %v656_v11, %v638_v9 }
  0xfd   : >> { %v684_v14 = vpop.f32.mrf.mxu3 }
  0xfe   : >> { %v687_v16 = vadd.f32 %v684_v14, %v659_v13 }
 0x109   : >> { %v711_v17 = vpop.f32.mrf.mxu0 }
 0x10a   : >> { %v714_v18 = vadd.f32 %v711_v17, %v687_v16 }
 0x10b   : >> { %v738_v20 = vpop.f32.mrf.mxu1 }
 0x10c   : >> { %v741_v22 = vadd.f32 %v738_v20, %v714_v18 }
 0x10e   : >> { %v742_v23 = vmax.f32 %v535_v21, %v741_v22 }
 0x110   : >> { %744 = vrot.lane.b32.xlu0 %v742_v23, %s1052_s14 }
 0x182   : >> { %v745_v25 = vpop.permute.xlu0 %744 }
 0x183   : >> { %v747_v26 = vmax.f32 %v742_v23, %v745_v25 }
 0x185   : >> { %v752_v27 = vadd.f32 %v1035_v24, %v747_v26 }
 0x186   : > { %173 = sbr.rel (!%p171_p4) target bundleno = 15 (0xf), region = 90 }
 0x187   : >> { %vm753_vm1 = vcmp.ge.f32.partialorder %v752_v27, 0.0  ;;  %v754_v28 = vmul.f32 0.2, %v752_v27 }
 0x189   : >> { %v755_v29 = vsel %vm753_vm1, %v752_v27, %v754_v28 }
 0x18a   : >> { %759 = vst.msk [vmem:[%s757_s13] sm:$0xf] %vm758_vm2, %v755_v29 }
 0x18b PF: > { %s13_s12 = sadd.s32 1, %s1046_s12  }
 0x18c   : > { %p10_p5 = scmp.ge.s32.totalorder %s13_s12, 4  }
 0x18e   :  { %12 = sbr.rel (!%p10_p5) target bundleno = 1 (0x1), region = 101 }

// kernel: model_forward.9
= control target key start
LH: loop header
LB: loop body
LE: loop exit
PB: predicated region body
PF: predicated region fallthrough
CT: control target
= control target key end

     0   :  { %s1588_s30 = smov 0   ;;  %s2848_s0 = inlined_call_operand.vmem [shape: f32[2,16,128], index: 0, kind: input, shape index: {}]   ;;  %s2849_s1 = inlined_call_operand.vmem [shape: f32[9,128,128], index: 1, kind: input, shape index: {}]   ;;  %s2850_s2 = inlined_call_operand.vmem [shape: f32[1,64], index: 2, kind: input, shape index: {}]   ;;  %s2851_s3 = inlined_call_operand.vmem [shape: f32[3,64,32], index: 3, kind: input, shape index: {}]   ;;  %s2852_s4 = inlined_call_operand.vmem [shape: f32[3,1,32], index: 4, kind: input, shape index: {}]   ;;  %s2853_s5 = inlined_call_operand.vmem [shape: f32[3,32,16], index: 5, kind: input, shape index: {}]   ;;  %s2854_s6 = inlined_call_operand.vmem [shape: f32[3,1,16], index: 6, kind: input, shape index: {}]   ;;  %s2855_s7 = inlined_call_operand.vmem [shape: f32[3,16,4], index: 7, kind: input, shape index: {}]   ;;  %s2856_s8 = inlined_call_operand.vmem [shape: f32[3,1,4], index: 8, kind: input, shape index: {}]   ;;  %s2857_s9 = inlined_call_operand.vmem [shape: f32[2,3,4], index: 9, kind: output, shape index: {}]  }
   0x1 LB: > { %s1326_s10 = sadd.s32 4294967295, %s1535_s30   ;;  %p1330_p0 = scmp.ge.s32.totalorder %s1535_s30, 1  ;;  %s1535_s30 = sphi %s1588_s30, %s19_s30  }
   0x2   : > { %p287_p1 = scmp.lt.s32.totalorder %s1535_s30, 3 }
   0x4   : > { %p288_p2 = pnand %p1330_p0, %p287_p1 }
   0x6   : > { %291 = sbr.rel (%p288_p2) target bundleno = 1180 (0x49c), region = 56 }
   0xb   : > { %v1599_v0 = vld [vmem:[%s2849_s1 + $0xf8] sm:$0xff]  ;;  %v1604_v1 = vld [vmem:[%s2849_s1 + $0xf0] sm:$0xff]  ;;  %v1626_v5 = vld [vmem:[%s2849_s1 + $0xe8] sm:$0xff]  ;;  %p2114_p3 = scmp.lt.s32.totalorder %s1326_s10, 1  ;;  %vm875_vm0 = vcmask 517120   ;;  %vm897_vm2 = vcmask 523264  }
   0xc   : > { %v1609_v2 = vld [vmem:[%s2849_s1 + $0x78] sm:$0xff]  ;;  %366 = vmatpush.msra.mxu0 %v1599_v0  ;;  %v1616_v3 = vld [vmem:[%s2849_s1 + $0x70] sm:$0xff]  ;;  %v1632_v6 = vld [vmem:[%s2849_s1 + $0x68] sm:$0xff]  ;;  %vm929_vm4 = vcmask 261120   ;;  %vm959_vm7 = vcmask 130048   ;;  %vm984_vm10 = vcmask 24576  }
   0xd   : > { %386 = vmatpush.msra.mxu1 %v1609_v2  ;;  %v1621_v4 = vld [vmem:[%s2849_s1 + $0x178] sm:$0xff]  ;;  %v1637_v7 = vld [vmem:[%s2849_s1 + $0x170] sm:$0xff]  ;;  %v1644_v8 = vld [vmem:[%s2849_s1 + $0xe0] sm:$0xff]  ;;  %s3079_s10 = smov (!%p2114_p3, %s1326_s10), 1 }
   0xe   : > { %424 = vmatpush.msra.mxu2 %v1621_v4  ;;  %367 = vmatpush.msra.mxu0 %v1604_v1  ;;  %v1649_v9 = vld [vmem:[%s2849_s1 + $0x1f8] sm:$0xff]  ;;  %v1656_v10 = vld [vmem:[%s2849_s1 + $0x60] sm:$0xff]  ;;  %v1661_v11 = vld [vmem:[%s2849_s1 + $0x168] sm:$0xff]  ;;  %s1507_s28 = sshll.u32 %s3079_s10, 4  ;;  %s1333_s13 = sshll.u32 %s3079_s10, 2 }
   0xf   : > { %387 = vmatpush.msra.mxu1 %v1616_v3  ;;  %463 = vmatpush.msra.mxu3 %v1649_v9  ;;  %v1666_v12 = vld [vmem:[%s2849_s1 + $0x1f0] sm:$0xff]  ;;  %v1673_v13 = vld [vmem:[%s2849_s1 + $0x160] sm:$0xff]  ;;  %v1678_v14 = vld [vmem:[%s2849_s1 + $0x1e8] sm:$0xff]  ;;  %s2260_s24 = scalar_lea.vmem %s2848_s0, %s1507_s28  ;;  %s2835_s14 = scalar_lea.vmem %s2857_s9, %s1333_s13 }
  0x10   : > { %425 = vmatpush.msra.mxu2 %v1637_v7  ;;  %368 = vmatpush.msra.mxu0 %v1626_v5  ;;  %v1683_v15 = vld [vmem:[%s2849_s1 + $0xd8] sm:$0xff]  ;;  %v1702_v18 = vld [vmem:[%s2849_s1 + $0x1e0] sm:$0xff]  ;;  %v1707_v19 = vld [vmem:[%s2849_s1 + $0xd0] sm:$0xff] }
  0x11   : > { %388 = vmatpush.msra.mxu1 %v1632_v6  ;;  %464 = vmatpush.msra.mxu3 %v1666_v12  ;;  %v1690_v16 = vld [vmem:[%s2849_s1 + $0x58] sm:$0xff]  ;;  %2931 = vst [vmem:[#allocation2_spill] sm:$0xff] %v1702_v18  ;;  %v1714_v20 = vld [vmem:[%s2849_s1 + $0x50] sm:$0xff]  ;;  %v1731_v23 = vld [vmem:[%s2849_s1 + $0xc8] sm:$0xff] }
  0x12   : > { %426 = vmatpush.msra.mxu2 %v1661_v11  ;;  %369 = vmatpush.msra.mxu0 %v1644_v8  ;;  %v1697_v17 = vld [vmem:[%s2849_s1 + $0x158] sm:$0xff]  ;;  %v1721_v21 = vld [vmem:[%s2849_s1 + $0x150] sm:$0xff]  ;;  %v1738_v24 = vld [vmem:[%s2849_s1 + $0x48] sm:$0xff] }
  0x13   : > { %389 = vmatpush.msra.mxu1 %v1656_v10  ;;  %465 = vmatpush.msra.mxu3 %v1678_v14  ;;  %v1726_v22 = vld [vmem:[%s2849_s1 + $0x1d8] sm:$0xff]  ;;  %v1745_v25 = vld [vmem:[%s2849_s1 + $0x148] sm:$0xff]  ;;  %v1750_v26 = vld [vmem:[%s2849_s1 + $0x1d0] sm:$0xff] }
  0x14   : > { %427 = vmatpush.msra.mxu2 %v1673_v13  ;;  %370 = vmatpush.msra.mxu0 %v1683_v15  ;;  %2932 = vst [vmem:[#allocation3_spill] sm:$0xff] %v1726_v22  ;;  %v1755_v27 = vld [vmem:[%s2849_s1 + $0xc0] sm:$0xff]  ;;  %v1774_v30 = vld [vmem:[%s2849_s1 + $0x1c8] sm:$0xff]  ;;  %v1779_v31 = vld [vmem:[%s2849_s1 + $0xb8] sm:$0xff] }
  0x15   : > { %390 = vmatpush.msra.mxu1 %v1690_v16  ;;  %466 = vmatpush.msra.mxu3 %v1702_v18  ;;  %2933 = vst [vmem:[#allocation4_spill] sm:$0xff] %v1750_v26  ;;  %v1762_v28 = vld [vmem:[%s2849_s1 + $0x40] sm:$0xff]  ;;  %v1786_v32 = vld [vmem:[%s2849_s1 + $0x38] sm:$0xff]  ;;  %v1803_v35 = vld [vmem:[%s2849_s1 + $0xb0] sm:$0xff] }
  0x16   : > { %428 = vmatpush.msra.mxu2 %v1697_v17  ;;  %371 = vmatpush.msra.mxu0 %v1707_v19  ;;  %v1769_v29 = vld [vmem:[%s2849_s1 + $0x140] sm:$0xff]  ;;  %2934 = vst [vmem:[#allocation5_spill] sm:$0xff] %v1774_v30  ;;  %v1793_v33 = vld [vmem:[%s2849_s1 + $0x138] sm:$0xff]  ;;  %v1810_v36 = vld [vmem:[%s2849_s1 + $0x30] sm:$0xff] }
  0x17   : > { %391 = vmatpush.msra.mxu1 %v1714_v20  ;;  %467 = vmatpush.msra.mxu3 %v1726_v22  ;;  %v1798_v34 = vld [vmem:[%s2849_s1 + $0x1c0] sm:$0xff]  ;;  %v1817_v37 = vld [vmem:[%s2849_s1 + $0x130] sm:$0xff]  ;;  %v1822_v38 = vld [vmem:[%s2849_s1 + $0x1b8] sm:$0xff] }
  0x18   : > { %429 = vmatpush.msra.mxu2 %v1721_v21  ;;  %372 = vmatpush.msra.mxu0 %v1731_v23  ;;  %2935 = vst [vmem:[#allocation6_spill] sm:$0xff] %v1798_v34  ;;  %v1827_v39 = vld [vmem:[%s2849_s1 + $0xa8] sm:$0xff]  ;;  %v1846_v42 = vld [vmem:[%s2849_s1 + $0x1b0] sm:$0xff]  ;;  %v1851_v43 = vld [vmem:[%s2849_s1 + $0xa0] sm:$0xff] }
  0x19   : > { %392 = vmatpush.msra.mxu1 %v1738_v24  ;;  %468 = vmatpush.msra.mxu3 %v1750_v26  ;;  %2936 = vst [vmem:[#allocation7_spill] sm:$0xff] %v1822_v38  ;;  %v1834_v40 = vld [vmem:[%s2849_s1 + $0x28] sm:$0xff]  ;;  %v1858_v44 = vld [vmem:[%s2849_s1 + $0x20] sm:$0xff]  ;;  %v1875_v47 = vld [vmem:[%s2849_s1 + $0x98] sm:$0xff] }
  0x1a   : > { %430 = vmatpush.msra.mxu2 %v1745_v25  ;;  %373 = vmatpush.msra.mxu0 %v1755_v27  ;;  %v1841_v41 = vld [vmem:[%s2849_s1 + $0x128] sm:$0xff]  ;;  %2937 = vst [vmem:[#allocation8_spill] sm:$0xff] %v1846_v42  ;;  %v1865_v45 = vld [vmem:[%s2849_s1 + $0x120] sm:$0xff]  ;;  %v1882_v48 = vld [vmem:[%s2849_s1 + $0x18] sm:$0xff] }
  0x1b   : > { %393 = vmatpush.msra.mxu1 %v1762_v28  ;;  %469 = vmatpush.msra.mxu3 %v1774_v30  ;;  %v1870_v46 = vld [vmem:[%s2849_s1 + $0x1a8] sm:$0xff]  ;;  %v1889_v49 = vld [vmem:[%s2849_s1 + $0x118] sm:$0xff]  ;;  %v1894_v50 = vld [vmem:[%s2849_s1 + $0x1a0] sm:$0xff] }
  0x1c   : > { %431 = vmatpush.msra.mxu2 %v1769_v29  ;;  %374 = vmatpush.msra.mxu0 %v1779_v31  ;;  %2938 = vst [vmem:[#allocation9_spill] sm:$0xff] %v1870_v46  ;;  %v1899_v51 = vld [vmem:[%s2849_s1 + $0x90] sm:$0xff]  ;;  %v1918_v54 = vld [vmem:[%s2849_s1 + $0x198] sm:$0xff]  ;;  %v1923_v55 = vld [vmem:[%s2849_s1 + $0x88] sm:$0xff] }
  0x1d   : > { %394 = vmatpush.msra.mxu1 %v1786_v32  ;;  %470 = vmatpush.msra.mxu3 %v1798_v34  ;;  %2939 = vst [vmem:[#allocation10_spill] sm:$0xff] %v1894_v50  ;;  %v1906_v52 = vld [vmem:[%s2849_s1 + $0x10] sm:$0xff]  ;;  %v1930_v56 = vld [vmem:[%s2849_s1 + $0x8] sm:$0xff]  ;;  %v1947_v59 = vld [vmem:[%s2849_s1 + $0x80] sm:$0xff] }
  0x1e   : > { %432 = vmatpush.msra.mxu2 %v1793_v33  ;;  %375 = vmatpush.msra.mxu0 %v1803_v35  ;;  %v1913_v53 = vld [vmem:[%s2849_s1 + $0x110] sm:$0xff]  ;;  %2940 = vst [vmem:[#allocation11_spill] sm:$0xff] %v1918_v54  ;;  %v1937_v57 = vld [vmem:[%s2849_s1 + $0x108] sm:$0xff]  ;;  %v1954_v60 = vld [vmem:[%s2849_s1] sm:$0xff] }
  0x1f   : > { %395 = vmatpush.msra.mxu1 %v1810_v36  ;;  %471 = vmatpush.msra.mxu3 %v1822_v38  ;;  %v1942_v58 = vld [vmem:[%s2849_s1 + $0x190] sm:$0xff]  ;;  %v1961_v61 = vld [vmem:[%s2849_s1 + $0x278] sm:$0xff]  ;;  %v1973_v63 = vld [vmem:[%s2849_s1 + $0x100] sm:$0xff] }
  0x20   : > { %433 = vmatpush.msra.mxu2 %v1817_v37  ;;  %376 = vmatpush.msra.mxu0 %v1827_v39  ;;  %2941 = vst [vmem:[#allocation12_spill] sm:$0xff] %v1942_v58  ;;  %v1966_v62 = vld [vmem:[%s2849_s1 + $0x2f8] sm:$0xff]  ;;  %v2009_v38 = vld [vmem:[%s2849_s1 + $0x268] sm:$0xff]  ;;  %v2021_v30 = vld [vmem:[%s2849_s1 + $0x370] sm:$0xff] }
  0x21   : > { %396 = vmatpush.msra.mxu1 %v1834_v40  ;;  %472 = vmatpush.msra.mxu3 %v1846_v42  ;;  %v2002_v42 = vld [vmem:[%s2849_s1 + $0x180] sm:$0xff]  ;;  %2946 = vst [vmem:[#allocation17_spill] sm:$0xff] %v2009_v38  ;;  %v2014_v34 = vld [vmem:[%s2849_s1 + $0x2e8] sm:$0xff] }
  0x22   : > { %434 = vmatpush.msra.mxu2 %v1841_v41  ;;  %377 = vmatpush.msra.mxu0 %v1851_v43  ;;  %2945 = vst [vmem:[#allocation16_spill] sm:$0xff] %v2002_v42  ;;  %v2033_v26 = vld [vmem:[%s2849_s1 + $0x260] sm:$0xff] }
  0x23   : > { %397 = vmatpush.msra.mxu1 %v1858_v44  ;;  %473 = vmatpush.msra.mxu3 %v1870_v46  ;;  %v1997_v46 = vld [vmem:[%s2849_s1 + $0x378] sm:$0xff]  ;;  %2947 = vst [vmem:[#allocation18_spill] sm:$0xff] %v2014_v34  ;;  %v2038_v22 = vld [vmem:[%s2849_s1 + $0x2e0] sm:$0xff] }
  0x24   : > { %435 = vmatpush.msra.mxu2 %v1865_v45  ;;  %378 = vmatpush.msra.mxu0 %v1875_v47  ;;  %2944 = vst [vmem:[#allocation15_spill] sm:$0xff] %v1997_v46  ;;  %v2321_v18 = vld [vmem:[%s2260_s24 + $0x4] sm:$0x3] }
  0x25   : > { %398 = vmatpush.msra.mxu1 %v1882_v48  ;;  %474 = vmatpush.msra.mxu3 %v1894_v50  ;;  %v1985_v50 = vld [vmem:[%s2849_s1 + $0x270] sm:$0xff]  ;;  %2948 = vst [vmem:[#allocation19_spill] sm:$0xff] %v2021_v30 }
  0x26   : > { %436 = vmatpush.msra.mxu2 %v1889_v49  ;;  %379 = vmatpush.msra.mxu0 %v1899_v51  ;;  %2950 = vst [vmem:[#allocation21_spill] sm:$0xff] %v2033_v26 }
  0x27   : > { %399 = vmatpush.msra.mxu1 %v1906_v52  ;;  %475 = vmatpush.msra.mxu3 %v1918_v54  ;;  %v1978_v54 = vld [vmem:[%s2849_s1 + $0x188] sm:$0xff]  ;;  %2951 = vst [vmem:[#allocation22_spill] sm:$0xff] %v2038_v22 }
  0x28   : > { %437 = vmatpush.msra.mxu2 %v1913_v53  ;;  %380 = vmatpush.msra.mxu0 %v1923_v55  ;;  %2942 = vst [vmem:[#allocation13_spill] sm:$0xff] %v1978_v54 }
  0x29   : > { %400 = vmatpush.msra.mxu1 %v1930_v56  ;;  %476 = vmatpush.msra.mxu3 %v1942_v58  ;;  %v1990_v58 = vld [vmem:[%s2849_s1 + $0x2f0] sm:$0xff] }
  0x2a   : > { %438 = vmatpush.msra.mxu2 %v1937_v57  ;;  %381 = vmatpush.msra.mxu0 %v1947_v59  ;;  %2943 = vst [vmem:[#allocation14_spill] sm:$0xff] %v1990_v58 }
  0x2b   : > { %401 = vmatpush.msra.mxu1 %v1954_v60  ;;  %477 = vmatpush.msra.mxu3 %v1978_v54  ;;  %v2026_v54 = vld [vmem:[%s2849_s1 + $0x3f8] sm:$0xff] }
  0x2c   : > { %502 = vmatpush.msrb.mxu0 %v1961_v61  ;;  %439 = vmatpush.msra.mxu2 %v1973_v63  ;;  %2949 = vst [vmem:[#allocation20_spill] sm:$0xff] %v2026_v54 }
  0x2d   : > { %541 = vmatpush.msrb.mxu1 %v1966_v62  ;;  %478 = vmatpush.msra.mxu3 %v2002_v42  ;;  %v2050_v42 = vld [vmem:[%s2849_s1 + $0x3f0] sm:$0xff] }
  0x2e   : > { %503 = vmatpush.msrb.mxu0 %v1985_v50  ;;  %580 = vmatpush.msrb.mxu2 %v1997_v46  ;;  %v2045_v46 = vld [vmem:[%s2849_s1 + $0x368] sm:$0xff]  ;;  %2953 = vst [vmem:[#allocation24_spill] sm:$0xff] %v2050_v42 }
  0x2f   : > { %542 = vmatpush.msrb.mxu1 %v1990_v58  ;;  %2952 = vst [vmem:[#allocation23_spill] sm:$0xff] %v2045_v46  ;;  %619 = vmatpush.msrb.mxu3 %v2026_v54  ;;  %v2057_v58 = vld [vmem:[%s2849_s1 + $0x258] sm:$0xff]  ;;  %v2074_v54 = vld [vmem:[%s2849_s1 + $0x3e8] sm:$0xff] }
  0x30   : > { %504 = vmatpush.msrb.mxu0 %v2009_v38  ;;  %581 = vmatpush.msrb.mxu2 %v2021_v30  ;;  %2954 = vst [vmem:[#allocation25_spill] sm:$0xff] %v2057_v58  ;;  %v2069_v30 = vld [vmem:[%s2849_s1 + $0x360] sm:$0xff]  ;;  %v2299_v38 = vld [vmem:[%s2849_s1 + $0x290] sm:$0xff] }
  0x31   : > { %543 = vmatpush.msrb.mxu1 %v2014_v34  ;;  %v2062_v34 = vld [vmem:[%s2849_s1 + $0x2d8] sm:$0xff]  ;;  %2956 = vst [vmem:[#allocation27_spill] sm:$0xff] %v2069_v30  ;;  %620 = vmatpush.msrb.mxu3 %v2050_v42  ;;  %v2098_v42 = vld [vmem:[%s2849_s1 + $0x3e0] sm:$0xff] }
  0x32   : > { %2955 = vst [vmem:[#allocation26_spill] sm:$0xff] %v2062_v34  ;;  %505 = vmatpush.msrb.mxu0 %v2033_v26  ;;  %582 = vmatpush.msrb.mxu2 %v2045_v46  ;;  %v2081_v26 = vld [vmem:[%s2849_s1 + $0x250] sm:$0xff]  ;;  %v2093_v46 = vld [vmem:[%s2849_s1 + $0x358] sm:$0xff] }
  0x33   : > { %544 = vmatpush.msrb.mxu1 %v2038_v22  ;;  %2957 = vst [vmem:[#allocation28_spill] sm:$0xff] %v2074_v54  ;;  %v2086_v22 = vld [vmem:[%s2849_s1 + $0x2d0] sm:$0xff]  ;;  %621 = vmatpush.msrb.mxu3 %v2074_v54 }
  0x34   : > { %2958 = vst [vmem:[#allocation29_spill] sm:$0xff] %v2081_v26  ;;  %506 = vmatpush.msrb.mxu0 %v2057_v58  ;;  %583 = vmatpush.msrb.mxu2 %v2069_v30  ;;  %v2105_v58 = vld [vmem:[%s2849_s1 + $0x248] sm:$0xff]  ;;  %v2123_v54 = vld [vmem:[%s2849_s1 + $0x350] sm:$0xff]  ;;  %v2128_v30 = vld [vmem:[%s2849_s1 + $0x3d8] sm:$0xff] }
  0x35   : > { %2959 = vst [vmem:[#allocation30_spill] sm:$0xff] %v2086_v22  ;;  %545 = vmatpush.msrb.mxu1 %v2062_v34  ;;  %v2110_v34 = vld [vmem:[%s2849_s1 + $0x2c8] sm:$0xff]  ;;  %622 = vmatpush.msrb.mxu3 %v2098_v42 }
  0x36   : > { %2960 = vst [vmem:[#allocation31_spill] sm:$0xff] %v2093_v46  ;;  %507 = vmatpush.msrb.mxu0 %v2081_v26  ;;  %584 = vmatpush.msrb.mxu2 %v2093_v46  ;;  %v2135_v26 = vld [vmem:[%s2849_s1 + $0x240] sm:$0xff]  ;;  %v2147_v46 = vld [vmem:[%s2849_s1 + $0x348] sm:$0xff] }
  0x37   : > { %2961 = vst [vmem:[#allocation32_spill] sm:$0xff] %v2098_v42  ;;  %546 = vmatpush.msrb.mxu1 %v2086_v22  ;;  %v2140_v22 = vld [vmem:[%s2849_s1 + $0x2c0] sm:$0xff]  ;;  %v2152_v42 = vld [vmem:[%s2849_s1 + $0x3d0] sm:$0xff]  ;;  %623 = vmatpush.msrb.mxu3 %v2128_v30 }
  0x38   : > { %2962 = vst [vmem:[#allocation33_spill] sm:$0xff] %v2105_v58  ;;  %508 = vmatpush.msrb.mxu0 %v2105_v58  ;;  %585 = vmatpush.msrb.mxu2 %v2123_v54  ;;  %v2159_v58 = vld [vmem:[%s2849_s1 + $0x238] sm:$0xff] }
  0x39   : > { %2963 = vst [vmem:[#allocation34_spill] sm:$0xff] %v2110_v34  ;;  %547 = vmatpush.msrb.mxu1 %v2110_v34  ;;  %v2164_v34 = vld [vmem:[%s2849_s1 + $0x2b8] sm:$0xff]  ;;  %624 = vmatpush.msrb.mxu3 %v2152_v42 }
  0x3a   : > { %2965 = vst [vmem:[#allocation35_spill] sm:$0xff] %v2123_v54  ;;  %509 = vmatpush.msrb.mxu0 %v2135_v26  ;;  %v2182_v54 = vld [vmem:[%s2849_s1 + $0x3c8] sm:$0xff]  ;;  %586 = vmatpush.msrb.mxu2 %v2147_v46 }
  0x3b   : > { %2966 = vst [vmem:[#allocation36_spill] sm:$0xff] %v2128_v30  ;;  %548 = vmatpush.msrb.mxu1 %v2140_v22  ;;  %v2177_v30 = vld [vmem:[%s2849_s1 + $0x340] sm:$0xff]  ;;  %625 = vmatpush.msrb.mxu3 %v2182_v54 }
  0x3c   : > { %2967 = vst [vmem:[#allocation37_spill] sm:$0xff] %v2135_v26  ;;  %v2189_v26 = vld [vmem:[%s2849_s1 + $0x230] sm:$0xff]  ;;  %510 = vmatpush.msrb.mxu0 %v2159_v58  ;;  %587 = vmatpush.msrb.mxu2 %v2177_v30 }
  0x3d   : > { %2968 = vst [vmem:[#allocation38_spill] sm:$0xff] %v2140_v22  ;;  %v2194_v22 = vld [vmem:[%s2849_s1 + $0x2b0] sm:$0xff]  ;;  %549 = vmatpush.msrb.mxu1 %v2164_v34  ;;  %479 = vmatmul.f32.vlgmr.msra.gmra.mxu3 %v2321_v18 }
  0x3e   : > { %2969 = vst [vmem:[#allocation39_spill] sm:$0xff] %v2147_v46  ;;  %v2201_v46 = vld [vmem:[%s2849_s1 + $0x338] sm:$0xff]  ;;  %511 = vmatpush.msrb.mxu0 %v2189_v26 }
  0x3f   : > { %2970 = vst [vmem:[#allocation40_spill] sm:$0xff] %v2152_v42  ;;  %v2206_v42 = vld [vmem:[%s2849_s1 + $0x3c0] sm:$0xff]  ;;  %550 = vmatpush.msrb.mxu1 %v2194_v22  ;;  %588 = vmatpush.msrb.mxu2 %v2201_v46 }
  0x40   : > { %2971 = vst [vmem:[#allocation41_spill] sm:$0xff] %v2159_v58  ;;  %v2213_v58 = vld [vmem:[%s2849_s1 + $0x228] sm:$0xff]  ;;  %626 = vmatpush.msrb.mxu3 %v2206_v42 }
  0x41   : > { %2972 = vst [vmem:[#allocation42_spill] sm:$0xff] %v2164_v34  ;;  %v2218_v34 = vld [vmem:[%s2849_s1 + $0x2a8] sm:$0xff]  ;;  %512 = vmatpush.msrb.mxu0 %v2213_v58 }
  0x42   : > { %2973 = vst [vmem:[#allocation43_spill] sm:$0xff] %v2177_v30  ;;  %v2226_v30 = vld [vmem:[%s2849_s1 + $0x330] sm:$0xff]  ;;  %551 = vmatpush.msrb.mxu1 %v2218_v34 }
  0x43   : > { %2974 = vst [vmem:[#allocation44_spill] sm:$0xff] %v2182_v54  ;;  %v2231_v54 = vld [vmem:[%s2849_s1 + $0x3b8] sm:$0xff]  ;;  %589 = vmatpush.msrb.mxu2 %v2226_v30 }
  0x44   : > { %2975 = vst [vmem:[#allocation45_spill] sm:$0xff] %v2189_v26  ;;  %v2238_v26 = vld [vmem:[%s2849_s1 + $0x220] sm:$0xff]  ;;  %627 = vmatpush.msrb.mxu3 %v2231_v54 }
  0x45   : > { %2976 = vst [vmem:[#allocation46_spill] sm:$0xff] %v2194_v22  ;;  %v2243_v22 = vld [vmem:[%s2849_s1 + $0x2a0] sm:$0xff]  ;;  %513 = vmatpush.msrb.mxu0 %v2238_v26 }
  0x46   : > { %2977 = vst [vmem:[#allocation47_spill] sm:$0xff] %v2201_v46  ;;  %v2250_v46 = vld [vmem:[%s2849_s1 + $0x328] sm:$0xff]  ;;  %552 = vmatpush.msrb.mxu1 %v2243_v22 }
  0x47   : > { %2978 = vst [vmem:[#allocation48_spill] sm:$0xff] %v2206_v42  ;;  %v2255_v42 = vld [vmem:[%s2849_s1 + $0x3b0] sm:$0xff]  ;;  %590 = vmatpush.msrb.mxu2 %v2250_v46 }
  0x48   : > { %2979 = vst [vmem:[#allocation49_spill] sm:$0xff] %v2213_v58  ;;  %v2272_v58 = vld [vmem:[%s2849_s1 + $0x298] sm:$0xff]  ;;  %628 = vmatpush.msrb.mxu3 %v2255_v42 }
  0x49   : > { %2980 = vst [vmem:[#allocation50_spill] sm:$0xff] %v2218_v34  ;;  %v2267_v34 = vld [vmem:[%s2849_s1 + $0x218] sm:$0xff]  ;;  %553 = vmatpush.msrb.mxu1 %v2272_v58 }
  0x4a   : > { %2981 = vst [vmem:[#allocation51_spill] sm:$0xff] %v2226_v30  ;;  %v2279_v30 = vld [vmem:[%s2849_s1 + $0x320] sm:$0xff]  ;;  %514 = vmatpush.msrb.mxu0 %v2267_v34 }
  0x4b   : > { %2982 = vst [vmem:[#allocation52_spill] sm:$0xff] %v2231_v54  ;;  %v2284_v54 = vld [vmem:[%s2849_s1 + $0x3a8] sm:$0xff]  ;;  %591 = vmatpush.msrb.mxu2 %v2279_v30  ;;  %554 = vmatpush.msrb.mxu1 %v2299_v38 }
  0x4c   : > { %2983 = vst [vmem:[#allocation53_spill] sm:$0xff] %v2238_v26  ;;  %v406_v26 = vld [vmem:[%s2260_s24 + $0x2] sm:$0x3]  ;;  %629 = vmatpush.msrb.mxu3 %v2284_v54 }
  0x4d   : > { %2984 = vst [vmem:[#allocation54_spill] sm:$0xff] %v2243_v22  ;;  %v2291_v22 = vld [vmem:[%s2849_s1 + $0x210] sm:$0xff]  ;;  %440 = vmatmul.f32.vlgmr.msra.gmra.mxu2 %v406_v26 }
  0x4e   : > { %2985 = vst [vmem:[#allocation55_spill] sm:$0xff] %v2250_v46  ;;  %v2304_v46 = vld [vmem:[%s2849_s1 + $0x318] sm:$0xff]  ;;  %515 = vmatpush.msrb.mxu0 %v2291_v22  ;;  %v2340_v26 = vld [vmem:[%s2849_s1 + $0x310] sm:$0xff] }
  0x4f   : > { %2986 = vst [vmem:[#allocation56_spill] sm:$0xff] %v2255_v42  ;;  %v2311_v42 = vld [vmem:[%s2849_s1 + $0x208] sm:$0xff]  ;;  %592 = vmatpush.msrb.mxu2 %v2304_v46 }
  0x50   : > { %2987 = vst [vmem:[#allocation57_spill] sm:$0xff] %v2267_v34  ;;  %v348_v34 = vld [vmem:[%s2260_s24 + $0x1] sm:$0x3]  ;;  %516 = vmatpush.msrb.mxu0 %v2311_v42 }
  0x51   : > { %2988 = vst [vmem:[#allocation58_spill] sm:$0xff] %v2272_v58  ;;  %v2316_v58 = vld [vmem:[%s2849_s1 + $0x3a0] sm:$0xff]  ;;  %382 = vmatmul.f32.vlgmr.msra.gmra.mxu0 %v348_v34  ;;  %v2364_v34 = vld [vmem:[%s2849_s1 + $0x308] sm:$0xff]  ;;  %593 = vmatpush.msrb.mxu2 %v2340_v26 }
  0x52   : > { %2989 = vst [vmem:[#allocation59_spill] sm:$0xff] %v2279_v30  ;;  %v2333_v30 = vld [vmem:[%s2849_s1 + $0x288] sm:$0xff]  ;;  %630 = vmatpush.msrb.mxu3 %v2316_v58 }
  0x53   : > { %2990 = vst [vmem:[#allocation60_spill] sm:$0xff] %v2284_v54  ;;  %v2328_v54 = vld [vmem:[%s2849_s1 + $0x200] sm:$0xff]  ;;  %555 = vmatpush.msrb.mxu1 %v2333_v30  ;;  %594 = vmatpush.msrb.mxu2 %v2364_v34 }
  0x54   : > { %2991 = vst [vmem:[#allocation61_spill] sm:$0xff] %v2291_v22  ;;  %517 = vmatpush.msrb.mxu0 %v2328_v54  ;;  %v2392_v22 = vld [vmem:[%s2260_s24 + $0x8] sm:$0x3] }
  0x55   : > { %2992 = vst [vmem:[#allocation62_spill] sm:$0xff] %v2299_v38  ;;  %v331_v38 = vld [vmem:[%s2260_s24] sm:$0x3] }
  0x56   : > { %2993 = vst [vmem:[#allocation63_spill] sm:$0xff] %v2304_v46  ;;  %v2345_v46 = vld [vmem:[%s2849_s1 + $0x398] sm:$0xff]  ;;  %402 = vmatmul.f32.vlgmr.msra.gmra.mxu1 %v331_v38  ;;  %v2399_v38 = vld [vmem:[%s2849_s1 + $0x468] sm:$0xff] }
  0x57   : > { %2994 = vst [vmem:[#allocation64_spill] sm:$0xff] %v2311_v42  ;;  %v2352_v42 = vld [vmem:[%s2849_s1 + $0x478] sm:$0xff]  ;;  %631 = vmatpush.msrb.mxu3 %v2345_v46 }
  0x58   : > { %2995 = vst [vmem:[#allocation65_spill] sm:$0xff] %v2316_v58  ;;  %v2359_v58 = vld [vmem:[%s2849_s1 + $0x280] sm:$0xff]  ;;  %658 = vmatpush.msra.mxu0 %v2352_v42 }
  0x59   : > { %2996 = vst [vmem:[#allocation66_spill] sm:$0xff] %v2328_v54  ;;  %v2371_v54 = vld [vmem:[%s2849_s1 + $0x390] sm:$0xff]  ;;  %556 = vmatpush.msrb.mxu1 %v2359_v58 }
  0x5a   : > { %2997 = vst [vmem:[#allocation67_spill] sm:$0xff] %v2333_v30  ;;  %v2376_v30 = vld [vmem:[%s2849_s1 + $0x470] sm:$0xff]  ;;  %632 = vmatpush.msrb.mxu3 %v2371_v54 }
  0x5b   : > { %2998 = vst [vmem:[#allocation68_spill] sm:$0xff] %v2340_v26  ;;  %v2382_v26 = vld [vmem:[%s2849_s1 + $0x300] sm:$0xff]  ;;  %659 = vmatpush.msra.mxu0 %v2376_v30  ;;  %679 = vmatpush.msra.mxu1 %v1599_v0 }
  0x5c   : > { %2999 = vst [vmem:[#allocation69_spill] sm:$0xff] %v2345_v46  ;;  %v2389_v46 = vld [vmem:[%s2849_s1 + $0x388] sm:$0xff]  ;;  %595 = vmatpush.msrb.mxu2 %v2382_v26  ;;  %v2421_v0 = vld [vmem:[%s2849_s1 + $0x460] sm:$0xff] }
  0x5d   : > { %3000 = vst [vmem:[#allocation70_spill] sm:$0xff] %v2364_v34  ;;  %v2406_v34 = vld [vmem:[%s2849_s1 + $0x380] sm:$0xff]  ;;  %633 = vmatpush.msrb.mxu3 %v2389_v46  ;;  %596 = vmatmul.f32.vlgmr.msrb.gmra.mxu2 %v2392_v22 }
  0x5e   : > { %3001 = vst [vmem:[#allocation71_spill] sm:$0xff] %v2371_v54  ;;  %v2411_v54 = vld [vmem:[%s2260_s24 + $0x5] sm:$0x3]  ;;  %660 = vmatpush.msra.mxu0 %v2399_v38  ;;  %680 = vmatpush.msra.mxu1 %v1604_v1  ;;  %v2442_v1 = vld [vmem:[%s2849_s1 + $0x450] sm:$0xff] }
  0x5f   : > { %3002 = vst [vmem:[#allocation72_spill] sm:$0xff] %v2376_v30  ;;  %v2414_v30 = vld [vmem:[%s2260_s24 + $0x9] sm:$0x3]  ;;  %699 = vmatpush.msra.mxu2 %v1609_v2  ;;  %634 = vmatpush.msrb.mxu3 %v2406_v34 }
  0x60   : > { %3003 = vst [vmem:[#allocation73_spill] sm:$0xff] %v2389_v46  ;;  %518 = vmatmul.f32.vlgmr.msrb.gmra.mxu0 %v2411_v54  ;;  %635 = vmatmul.f32.vlgmr.msrb.gmra.mxu3 %v2414_v30  ;;  %v2428_v46 = vld [vmem:[%s2260_s24 + $0x6] sm:$0x3]  ;;  %v2451_v2 = vld [vmem:[%s2849_s1 + $0x448] sm:$0xff] }
  0x61   : > { %3004 = vst [vmem:[#allocation74_spill] sm:$0xff] %v2399_v38  ;;  %v2433_v38 = vld [vmem:[%s2849_s1 + $0x458] sm:$0xff]  ;;  %661 = vmatpush.msra.mxu0 %v2421_v0  ;;  %681 = vmatpush.msra.mxu1 %v1626_v5  ;;  %v2478_v5 = vld [vmem:[%s2849_s1 + $0x430] sm:$0xff] }
  0x62   : > { %700 = vmatpush.msra.mxu2 %v1616_v3  ;;  %719 = vmatpush.msra.mxu3 %v1621_v4  ;;  %v2460_v3 = vld [vmem:[%s2849_s1 + $0x440] sm:$0xff]  ;;  %v2469_v4 = vld [vmem:[%s2849_s1 + $0x438] sm:$0xff] }
  0x63   : > { %557 = vmatmul.f32.vlgmr.msrb.gmra.mxu1 %v2428_v46  ;;  %662 = vmatpush.msra.mxu0 %v2433_v38 }
  0x64   : > { %682 = vmatpush.msra.mxu1 %v1644_v8  ;;  %701 = vmatpush.msra.mxu2 %v1632_v6  ;;  %v2487_v6 = vld [vmem:[%s2849_s1 + $0x428] sm:$0xff]  ;;  %v2505_v8 = vld [vmem:[%s2849_s1 + $0x418] sm:$0xff] }
  0x65   : > { %720 = vmatpush.msra.mxu3 %v1637_v7  ;;  %663 = vmatpush.msra.mxu0 %v2442_v1  ;;  %v2496_v7 = vld [vmem:[%s2849_s1 + $0x420] sm:$0xff] }
  0x66   : > { %683 = vmatpush.msra.mxu1 %v1683_v15  ;;  %702 = vmatpush.msra.mxu2 %v1656_v10  ;;  %v2514_v10 = vld [vmem:[%s2849_s1 + $0x410] sm:$0xff]  ;;  %v2539_v15 = vld [vmem:[%s2260_s24 + $0xa] sm:$0x3] }
  0x67   : > { %721 = vmatpush.msra.mxu3 %v1661_v11  ;;  %664 = vmatpush.msra.mxu0 %v2451_v2  ;;  %v2523_v11 = vld [vmem:[%s2849_s1 + $0x408] sm:$0xff] }
  0x68   : > { %684 = vmatpush.msra.mxu1 %v1707_v19  ;;  %703 = vmatpush.msra.mxu2 %v1690_v16  ;;  %v3006_v16 = vld [vmem:[#allocation17_spill] sm:$0xff]  ;;  %v3009_v19 = vld [vmem:[#allocation3_spill] sm:$0xff] }
  0x69   : > { %722 = vmatpush.msra.mxu3 %v1673_v13  ;;  %665 = vmatpush.msra.mxu0 %v2460_v3  ;;  %v2532_v13 = vld [vmem:[%s2849_s1 + $0x400] sm:$0xff] }
  0x6a   : > { %685 = vmatpush.msra.mxu1 %v1731_v23  ;;  %704 = vmatpush.msra.mxu2 %v1714_v20  ;;  %v3010_v20 = vld [vmem:[#allocation21_spill] sm:$0xff]  ;;  %v3013_v23 = vld [vmem:[#allocation4_spill] sm:$0xff] }
  0x6b   : > { %723 = vmatpush.msra.mxu3 %v1697_v17  ;;  %666 = vmatpush.msra.mxu0 %v2469_v4  ;;  %v3007_v17 = vld [vmem:[#allocation14_spill] sm:$0xff] }
  0x6c   : > { %686 = vmatpush.msra.mxu1 %v1755_v27  ;;  %705 = vmatpush.msra.mxu2 %v1738_v24  ;;  %v3014_v24 = vld [vmem:[#allocation25_spill] sm:$0xff]  ;;  %v3016_v27 = vld [vmem:[#allocation23_spill] sm:$0xff] }
  0x6d   : > { %724 = vmatpush.msra.mxu3 %v1721_v21  ;;  %667 = vmatpush.msra.mxu0 %v2478_v5  ;;  %v3011_v21 = vld [vmem:[#allocation18_spill] sm:$0xff] }
  0x6e   : > { %687 = vmatpush.msra.mxu1 %v1779_v31  ;;  %706 = vmatpush.msra.mxu2 %v1762_v28  ;;  %v3017_v28 = vld [vmem:[#allocation5_spill] sm:$0xff]  ;;  %v3019_v31 = vld [vmem:[#allocation26_spill] sm:$0xff] }
  0x6f   : > { %725 = vmatpush.msra.mxu3 %v1745_v25  ;;  %668 = vmatpush.msra.mxu0 %v2487_v6  ;;  %v3015_v25 = vld [vmem:[#allocation22_spill] sm:$0xff] }
  0x70   : > { %688 = vmatpush.msra.mxu1 %v1803_v35  ;;  %707 = vmatpush.msra.mxu2 %v1786_v32  ;;  %v3020_v32 = vld [vmem:[#allocation27_spill] sm:$0xff]  ;;  %v3022_v35 = vld [vmem:[#allocation33_spill] sm:$0xff] }
  0x71   : > { %726 = vmatpush.msra.mxu3 %v1769_v29  ;;  %669 = vmatpush.msra.mxu0 %v2496_v7  ;;  %v3018_v29 = vld [vmem:[#allocation29_spill] sm:$0xff] }
  0x72   : > { %689 = vmatpush.msra.mxu1 %v1827_v39  ;;  %708 = vmatpush.msra.mxu2 %v1810_v36  ;;  %v3023_v36 = vld [vmem:[#allocation30_spill] sm:$0xff]  ;;  %v3025_v39 = vld [vmem:[#allocation7_spill] sm:$0xff] }
  0x73   : > { %727 = vmatpush.msra.mxu3 %v1793_v33  ;;  %670 = vmatpush.msra.mxu0 %v2505_v8  ;;  %v3021_v33 = vld [vmem:[#allocation6_spill] sm:$0xff] }
  0x74   : > { %690 = vmatpush.msra.mxu1 %v1851_v43  ;;  %709 = vmatpush.msra.mxu2 %v1834_v40  ;;  %v3026_v40 = vld [vmem:[#allocation37_spill] sm:$0xff]  ;;  %v3028_v43 = vld [vmem:[#allocation35_spill] sm:$0xff] }
  0x75   : > { %728 = vmatpush.msra.mxu3 %v1817_v37  ;;  %671 = vmatpush.msra.mxu0 %v2514_v10  ;;  %v3024_v37 = vld [vmem:[#allocation31_spill] sm:$0xff] }
  0x76   : > { %691 = vmatpush.msra.mxu1 %v1875_v47  ;;  %710 = vmatpush.msra.mxu2 %v1858_v44  ;;  %v3029_v44 = vld [vmem:[#allocation8_spill] sm:$0xff]  ;;  %v3031_v47 = vld [vmem:[#allocation38_spill] sm:$0xff] }
  0x77   : > { %729 = vmatpush.msra.mxu3 %v1841_v41  ;;  %672 = vmatpush.msra.mxu0 %v2523_v11  ;;  %v3027_v41 = vld [vmem:[#allocation34_spill] sm:$0xff] }
  0x78   : > { %692 = vmatpush.msra.mxu1 %v1899_v51  ;;  %711 = vmatpush.msra.mxu2 %v1882_v48  ;;  %v3032_v48 = vld [vmem:[#allocation39_spill] sm:$0xff]  ;;  %v3035_v51 = vld [vmem:[#allocation42_spill] sm:$0xff] }
  0x79   : > { %730 = vmatpush.msra.mxu3 %v1865_v45  ;;  %673 = vmatpush.msra.mxu0 %v2532_v13  ;;  %v3030_v45 = vld [vmem:[#allocation41_spill] sm:$0xff] }
  0x7a   : > { %693 = vmatpush.msra.mxu1 %v1923_v55  ;;  %712 = vmatpush.msra.mxu2 %v1906_v52  ;;  %v3036_v52 = vld [vmem:[#allocation43_spill] sm:$0xff]  ;;  %v3038_v55 = vld [vmem:[#allocation49_spill] sm:$0xff] }
  0x7b   : > { %731 = vmatpush.msra.mxu3 %v1889_v49  ;;  %674 = vmatmul.f32.vlgmr.msra.gmra.mxu0 %v2539_v15  ;;  %v3033_v49 = vld [vmem:[#allocation9_spill] sm:$0xff] }
  0x7c   : > { %740 = vmatpush.msrb.mxu0 %v1649_v9  ;;  %694 = vmatpush.msra.mxu1 %v1947_v59  ;;  %v3005_v9 = vld [vmem:[#allocation2_spill] sm:$0xff]  ;;  %v3041_v59 = vld [vmem:[#allocation11_spill] sm:$0xff] }
  0x7d   : > { %713 = vmatpush.msra.mxu2 %v1930_v56  ;;  %732 = vmatpush.msra.mxu3 %v1913_v53  ;;  %v3037_v53 = vld [vmem:[#allocation10_spill] sm:$0xff] }
  0x7e   : > { %741 = vmatpush.msrb.mxu0 %v1666_v12  ;;  %761 = vmatpush.msrb.mxu1 %v1961_v61  ;;  %v3008_v12 = vld [vmem:[#allocation15_spill] sm:$0xff]  ;;  %v3039_v56 = vld [vmem:[#allocation46_spill] sm:$0xff] }
  0x7f   : > { %714 = vmatpush.msra.mxu2 %v1954_v60  ;;  %733 = vmatpush.msra.mxu3 %v1937_v57  ;;  %v3040_v57 = vld [vmem:[#allocation47_spill] sm:$0xff]  ;;  %v3042_v60 = vld [vmem:[#allocation53_spill] sm:$0xff]  ;;  %v3043_v61 = vld [vmem:[#allocation50_spill] sm:$0xff] }
  0x80   : > { %742 = vmatpush.msrb.mxu0 %v1678_v14  ;;  %762 = vmatpush.msrb.mxu1 %v1985_v50  ;;  %v3012_v14 = vld [vmem:[#allocation19_spill] sm:$0xff]  ;;  %v3034_v50 = vld [vmem:[#allocation45_spill] sm:$0xff] }
  0x81   : > { %782 = vmatpush.msrb.mxu2 %v1966_v62  ;;  %734 = vmatpush.msra.mxu3 %v1973_v63  ;;  %v3044_v62 = vld [vmem:[#allocation51_spill] sm:$0xff]  ;;  %v3045_v63 = vld [vmem:[#allocation12_spill] sm:$0xff] }
  0x82   : > { %743 = vmatpush.msrb.mxu0 %v3005_v9  ;;  %763 = vmatpush.msrb.mxu1 %v3006_v16  ;;  %v3046_v9 = vld [vmem:[#allocation57_spill] sm:$0xff]  ;;  %v3047_v16 = vld [vmem:[#allocation54_spill] sm:$0xff] }
  0x83   : > { %783 = vmatpush.msrb.mxu2 %v3007_v17  ;;  %804 = vmatpush.msrb.mxu3 %v3008_v12  ;;  %v3048_v17 = vld [vmem:[#allocation55_spill] sm:$0xff]  ;;  %v3049_v12 = vld [vmem:[#allocation13_spill] sm:$0xff] }
  0x84   : > { %744 = vmatpush.msrb.mxu0 %v3009_v19  ;;  %764 = vmatpush.msrb.mxu1 %v3010_v20  ;;  %v3050_v19 = vld [vmem:[#allocation61_spill] sm:$0xff]  ;;  %v3051_v20 = vld [vmem:[#allocation58_spill] sm:$0xff] }
  0x85   : > { %784 = vmatpush.msrb.mxu2 %v3011_v21  ;;  %805 = vmatpush.msrb.mxu3 %v3012_v14  ;;  %v3052_v21 = vld [vmem:[#allocation59_spill] sm:$0xff]  ;;  %v3053_v14 = vld [vmem:[#allocation16_spill] sm:$0xff] }
  0x86   : > { %745 = vmatpush.msrb.mxu0 %v3013_v23  ;;  %765 = vmatpush.msrb.mxu1 %v3014_v24  ;;  %v3054_v23 = vld [vmem:[#allocation64_spill] sm:$0xff]  ;;  %v3055_v24 = vld [vmem:[#allocation62_spill] sm:$0xff] }
  0x87   : > { %785 = vmatpush.msrb.mxu2 %v3015_v25  ;;  %806 = vmatpush.msrb.mxu3 %v3016_v27  ;;  %v3056_v25 = vld [vmem:[#allocation63_spill] sm:$0xff]  ;;  %v3058_v27 = vld [vmem:[#allocation66_spill] sm:$0xff] }
  0x88   : > { %746 = vmatpush.msrb.mxu0 %v3017_v28  ;;  %766 = vmatpush.msrb.mxu1 %v3018_v29  ;;  %v3059_v28 = vld [vmem:[#allocation67_spill] sm:$0xff]  ;;  %v3060_v29 = vld [vmem:[#allocation68_spill] sm:$0xff] }
  0x89   : > { %786 = vmatpush.msrb.mxu2 %v3019_v31  ;;  %807 = vmatpush.msrb.mxu3 %v3020_v32  ;;  %v3061_v31 = vld [vmem:[#allocation24_spill] sm:$0xff]  ;;  %v803_v32 = vld [vmem:[%s2260_s24 + $0xc] sm:$0x3] }
  0x8a   : > { %747 = vmatpush.msrb.mxu0 %v3021_v33  ;;  %767 = vmatpush.msrb.mxu1 %v3022_v35  ;;  %v3064_v33 = vld [vmem:[#allocation72_spill] sm:$0xff] }
  0x8b   : > { %787 = vmatpush.msrb.mxu2 %v3023_v36  ;;  %808 = vmatpush.msrb.mxu3 %v3024_v37  ;;  %v3065_v35 = vld [vmem:[#allocation32_spill] sm:$0xff]  ;;  %v3066_v36 = vld [vmem:[#allocation74_spill] sm:$0xff]  ;;  %v825_v37 = vld [vmem:[%s2260_s24 + $0xd] sm:$0x3] }
  0x8c   : > { %748 = vmatpush.msrb.mxu0 %v3025_v39  ;;  %768 = vmatpush.msrb.mxu1 %v3026_v40 }
  0x8d   : > { %788 = vmatpush.msrb.mxu2 %v3027_v41  ;;  %809 = vmatpush.msrb.mxu3 %v3028_v43 }
  0x8e   : > { %749 = vmatpush.msrb.mxu0 %v3029_v44  ;;  %769 = vmatpush.msrb.mxu1 %v3030_v45 }
  0x8f   : > { %789 = vmatpush.msrb.mxu2 %v3031_v47  ;;  %810 = vmatpush.msrb.mxu3 %v3032_v48 }
  0x90   : > { %750 = vmatpush.msrb.mxu0 %v3033_v49  ;;  %770 = vmatpush.msrb.mxu1 %v3034_v50 }
  0x91   : > { %790 = vmatpush.msrb.mxu2 %v3035_v51  ;;  %811 = vmatpush.msrb.mxu3 %v3036_v52 }
  0x92   : > { %751 = vmatpush.msrb.mxu0 %v3037_v53  ;;  %771 = vmatpush.msrb.mxu1 %v3038_v55 }
  0x93   : > { %791 = vmatpush.msrb.mxu2 %v3039_v56  ;;  %812 = vmatpush.msrb.mxu3 %v3040_v57 }
  0x94   : > { %752 = vmatpush.msrb.mxu0 %v3041_v59  ;;  %772 = vmatpush.msrb.mxu1 %v3042_v60 }
  0x95   : > { %792 = vmatpush.msrb.mxu2 %v3043_v61  ;;  %813 = vmatpush.msrb.mxu3 %v3044_v62 }
  0x96   : > { %753 = vmatpush.msrb.mxu0 %v3045_v63  ;;  %773 = vmatpush.msrb.mxu1 %v3046_v9 }
  0x97   : > { %793 = vmatpush.msrb.mxu2 %v3047_v16  ;;  %814 = vmatpush.msrb.mxu3 %v3048_v17 }
  0x98   : > { %715 = vmatmul.f32.vlgmr.msra.gmra.mxu2 %v2321_v18  ;;  %754 = vmatpush.msrb.mxu0 %v3049_v12  ;;  %v3057_v18 = vld [vmem:[#allocation20_spill] sm:$0xff] }
  0x99   : > { %774 = vmatpush.msrb.mxu1 %v3050_v19  ;;  %794 = vmatpush.msrb.mxu2 %v3051_v20 }
  0x9a   : > { %815 = vmatpush.msrb.mxu3 %v3052_v21  ;;  %755 = vmatpush.msrb.mxu0 %v3053_v14  ;;  %v894_v14 = vld [vmem:[%s2851_s3 + $0x30] sm:$0xff] }
  0x9b   : > { %735 = vmatmul.f32.vlgmr.msra.gmra.mxu3 %v2428_v46  ;;  %775 = vmatpush.msrb.mxu1 %v3054_v23  ;;  %v3062_v46 = vld [vmem:[#allocation70_spill] sm:$0xff]  ;;  %v893_v23 = vld [vmem:[%s2851_s3 + $0x28] sm:$0xff] }
  0x9c   : > { %795 = vmatpush.msrb.mxu2 %v3055_v24  ;;  %816 = vmatpush.msrb.mxu3 %v3056_v25  ;;  %v892_v24 = vld [vmem:[%s2851_s3 + $0x20] sm:$0xff]  ;;  %v1492_v25 = vld [vmem:[%s2851_s3 + $0xb8] sm:$0xff] }
  0x9d   : > { %695 = vmatmul.f32.vlgmr.msra.gmra.mxu1 %v2411_v54  ;;  %826 = vmatpush.msra.mxu0 %v3057_v18  ;;  %v3063_v54 = vld [vmem:[#allocation28_spill] sm:$0xff]  ;;  %v891_v18 = vld [vmem:[%s2851_s3 + $0x18] sm:$0xff] }
  0x9e   : > { %776 = vmatpush.msrb.mxu1 %v3058_v27  ;;  %796 = vmatpush.msrb.mxu2 %v3059_v28  ;;  %v1491_v27 = vld [vmem:[%s2851_s3 + $0xb0] sm:$0xff] }
  0x9f   : > { %817 = vmatpush.msrb.mxu3 %v3060_v29  ;;  %827 = vmatpush.msra.mxu0 %v3061_v31  ;;  %v890_v28 = vld [vmem:[%s2851_s3 + $0x10] sm:$0xff]  ;;  %v1490_v29 = vld [vmem:[%s2851_s3 + $0xa8] sm:$0xff] }
  0xa0   : > { %848 = vmatpush.msra.mxu1 %v2352_v42  ;;  %797 = vmatpush.msrb.mxu2 %v2359_v58  ;;  %v3067_v42 = vld [vmem:[#allocation36_spill] sm:$0xff]  ;;  %v889_v31 = vld [vmem:[%s2851_s3 + $0x8] sm:$0xff] }
  0xa1   : > { %818 = vmatpush.msrb.mxu3 %v3062_v46  ;;  %798 = vmatmul.f32.vlgmr.msrb.gmra.mxu2 %v2539_v15  ;;  %v3068_v58 = vld [vmem:[#allocation40_spill] sm:$0xff]  ;;  %v1489_v46 = vld [vmem:[%s2851_s3 + $0xa0] sm:$0xff] }
  0xa2   : > { %828 = vmatpush.msra.mxu0 %v3063_v54  ;;  %849 = vmatpush.msra.mxu1 %v3064_v33  ;;  %v3069_v15 = vld [vmem:[#allocation44_spill] sm:$0xff]  ;;  %v1472_v54 = vld [vmem:[%s2851_s3 + $0x78] sm:$0xff] }
  0xa3   : > { %819 = vmatpush.msrb.mxu3 %v2382_v26  ;;  %756 = vmatmul.f32.vlgmr.msrb.gmra.mxu0 %v2392_v22  ;;  %v3070_v22 = vld [vmem:[#allocation48_spill] sm:$0xff]  ;;  %v1488_v33 = vld [vmem:[%s2851_s3 + $0x98] sm:$0xff] }
  0xa4   : > { %820 = vmatmul.f32.vlgmr.msrb.gmra.mxu3 %v803_v32  ;;  %829 = vmatpush.msra.mxu0 %v3065_v35  ;;  %v3071_v26 = vld [vmem:[#allocation52_spill] sm:$0xff]  ;;  %v888_v32 = vld [vmem:[%s2851_s3] sm:$0xff] }
  0xa5   : > { %850 = vmatpush.msra.mxu1 %v3066_v36  ;;  %v1471_v35 = vld [vmem:[%s2851_s3 + $0x70] sm:$0xff] }
  0xa6   : > { %777 = vmatmul.f32.vlgmr.msrb.gmra.mxu1 %v2414_v30  ;;  %830 = vmatpush.msra.mxu0 %v3067_v42  ;;  %v3072_v30 = vld [vmem:[#allocation56_spill] sm:$0xff]  ;;  %v1470_v42 = vld [vmem:[%s2851_s3 + $0x68] sm:$0xff] }
  0xa7   : > { %851 = vmatpush.msra.mxu1 %v2421_v0  ;;  %v3073_v0 = vld [vmem:[#allocation60_spill] sm:$0xff] }
  0xa8   : > { %831 = vmatpush.msra.mxu0 %v3068_v58  ;;  %v1487_v36 = vld [vmem:[%s2851_s3 + $0x90] sm:$0xff]  ;;  %v1486_v58 = vld [vmem:[%s2851_s3 + $0x88] sm:$0xff] }
  0xa9   : > { %852 = vmatpush.msra.mxu1 %v2433_v38  ;;  %v3074_v38 = vld [vmem:[#allocation65_spill] sm:$0xff] }
  0xaa   : > { %832 = vmatpush.msra.mxu0 %v3069_v15  ;;  %v1469_v15 = vld [vmem:[%s2851_s3 + $0x60] sm:$0xff] }
  0xab   : > { %853 = vmatpush.msra.mxu1 %v2442_v1  ;;  %v3075_v1 = vld [vmem:[#allocation69_spill] sm:$0xff] }
  0xac   : > { %833 = vmatpush.msra.mxu0 %v3070_v22  ;;  %v1485_v22 = vld [vmem:[%s2851_s3 + $0x80] sm:$0xff] }
  0xad   : > { %854 = vmatpush.msra.mxu1 %v2451_v2  ;;  %v3076_v2 = vld [vmem:[#allocation71_spill] sm:$0xff] }
  0xae   : > { %834 = vmatpush.msra.mxu0 %v3071_v26  ;;  %v1468_v26 = vld [vmem:[%s2851_s3 + $0x58] sm:$0xff] }
  0xaf   : > { %855 = vmatpush.msra.mxu1 %v2460_v3  ;;  %v3077_v3 = vld [vmem:[#allocation73_spill] sm:$0xff] }
  0xb0   : > { %835 = vmatpush.msra.mxu0 %v3072_v30  ;;  %v1467_v30 = vld [vmem:[%s2851_s3 + $0x50] sm:$0xff] }
  0xb1   : > { %856 = vmatpush.msra.mxu1 %v2469_v4  ;;  %v847_v4 = vld [vmem:[%s2260_s24 + $0xe] sm:$0x3]  ;;  %s1537_s24 = smov 64  }
  0xb2   : > { %836 = vmatpush.msra.mxu0 %v3073_v0  ;;  %v1466_v0 = vld [vmem:[%s2851_s3 + $0x48] sm:$0xff] }
  0xb3   : > { %857 = vmatpush.msra.mxu1 %v2478_v5 }
  0xb4   : > { %837 = vmatpush.msra.mxu0 %v3074_v38  ;;  %v1465_v38 = vld [vmem:[%s2851_s3 + $0x40] sm:$0xff] }
  0xb5   : > { %858 = vmatpush.msra.mxu1 %v2487_v6 }
  0xb6   : > { %838 = vmatpush.msra.mxu0 %v3075_v1  ;;  %v1498_v1 = vld [vmem:[%s2853_s5 + $0x58] sm:$0xff] }
  0xb7   : > { %859 = vmatpush.msra.mxu1 %v2496_v7 }
  0xb8   : > { %839 = vmatpush.msra.mxu0 %v3076_v2 }
  0xb9   : > { %860 = vmatpush.msra.mxu1 %v2505_v8 }
  0xba   : > { %840 = vmatpush.msra.mxu0 %v3077_v3 }
  0xbb   : > { %861 = vmatpush.msra.mxu1 %v2514_v10 }
  0xbc   : > { %841 = vmatpush.msra.mxu0 %v2406_v34  ;;  %v895_v34 = vld [vmem:[%s2851_s3 + $0x38] sm:$0xff] }
  0xbd   : > { %862 = vmatpush.msra.mxu1 %v2523_v11  ;;  %842 = vmatmul.f32.vlgmr.msra.gmra.mxu0 %v825_v37 }
  0xbe   : > { %909 = vmatpush.msra.mxu2 %v895_v34  ;;  %1164 = vmatpush.msrb.mxu0 %v1492_v25  ;;  %v1496_v34 = vld [vmem:[%s2853_s5 + $0x48] sm:$0xff]  ;;  %v928_v25 = vld [vmem:[%s2854_s6] sm:$0x1] }
  0xbf   : > { %863 = vmatpush.msra.mxu1 %v2532_v13 }
  0xc0   : > { %864 = vmatmul.f32.vlgmr.msra.gmra.mxu1 %v847_v4  ;;  %v480_v39 = vpop.f32.mrf.mxu3  ;;  %910 = vmatpush.msra.mxu2 %v894_v14 }
  0xc1   : > { %1165 = vmatpush.msrb.mxu0 %v1491_v27  ;;  %1201 = vmatpush.msrb.mxu1 %v1498_v1 }
  0xc2   : > { %911 = vmatpush.msra.mxu2 %v893_v23 }
  0xc3   : > { %1166 = vmatpush.msrb.mxu0 %v1490_v29 }
  0xc4   : > { %912 = vmatpush.msra.mxu2 %v892_v24 }
  0xc5   : > { %1167 = vmatpush.msrb.mxu0 %v1489_v46 }
  0xc6   : > { %913 = vmatpush.msra.mxu2 %v891_v18 }
  0xc7   : > { %1168 = vmatpush.msrb.mxu0 %v1488_v33 }
  0xc8   : > { %914 = vmatpush.msra.mxu2 %v890_v28  ;;  %v1473_v28 = vld [vmem:[%s2852_s4 + $0x1] sm:$0x1] }
  0xc9   : > { %1169 = vmatpush.msrb.mxu0 %v1487_v36  ;;  %v1481_v36 = vld [vmem:[%s2855_s7 + $0x10] sm:$0xff] }
  0xca   : > { %915 = vmatpush.msra.mxu2 %v889_v31 }
  0xcb   : > { %1170 = vmatpush.msrb.mxu0 %v1486_v58 }
  0xcc   : > { %916 = vmatpush.msra.mxu2 %v888_v32 }
  0xcd   : > { %1171 = vmatpush.msrb.mxu0 %v1485_v22 }
  0xce   : > { %v383_v5 = vpop.f32.mrf.mxu0  ;;  %1036 = vmatpush.msrb.mxu2 %v1472_v54 }
  0xd0   : > { %v441_v6 = vpop.f32.mrf.mxu2  ;;  %1037 = vmatpush.msrb.mxu2 %v1471_v35  ;;  %v1482_v35 = vld [vmem:[%s2855_s7 + $0x18] sm:$0xff] }
  0xd2   : > { %1038 = vmatpush.msrb.mxu2 %v1470_v42  ;;  %v958_v42 = vld [vmem:[%s2856_s8] sm:$0x1] }
  0xd3   : > { %v403_v7 = vpop.f32.mrf.mxu1 }
  0xd4   : > { %v404_v10 = vadd.f32 %v403_v7, %v383_v5  ;;  %1039 = vmatpush.msrb.mxu2 %v1469_v15 }
  0xd6   : > { %v444_v48 = vadd.f32 %v441_v6, %v404_v10  ;;  %1040 = vmatpush.msrb.mxu2 %v1468_v26  ;;  %v927_v10 = vld [vmem:[%s2853_s5 + $0x18] sm:$0xff] }
  0xd7   : > { %945 = vmatpush.msra.mxu3 %v927_v10 }
  0xd8   : > { %v483_v51 = vadd.f32 %v480_v39, %v444_v48  ;;  %1041 = vmatpush.msrb.mxu2 %v1467_v30  ;;  %v924_v48 = vld [vmem:[%s2853_s5] sm:$0xff] }
  0xd9   : > { %v1479_v30 = vld [vmem:[%s2854_s6 + $0x1] sm:$0x1] }
  0xda   : > { %1042 = vmatpush.msrb.mxu2 %v1466_v0 }
  0xdc   : > { %1043 = vmatpush.msrb.mxu2 %v1465_v38 }
  0xdd   : > { %v519_v40 = vpop.f32.mrf.mxu0 }
  0xde   : > { %v522_v55 = vadd.f32 %v519_v40, %v483_v51  ;;  %v883_v40 = vld [vmem:[%s2850_s2] sm:$0x1] }
  0xe0   : > { %v597_v8 = vpop.f32.mrf.mxu2  ;;  %v558_v41 = vpop.f32.mrf.mxu1 }
  0xe1   : > { %v561_v59 = vadd.f32 %v558_v41, %v522_v55 }
  0xe3   : > { %v636_v43 = vpop.f32.mrf.mxu3  ;;  %v600_v62 = vadd.f32 %v597_v8, %v561_v59 }
  0xe5   : > { %v639_v17 = vadd.f32 %v636_v43, %v600_v62  ;;  %v1501_v62 = vld [vmem:[%s2855_s7 + $0x20] sm:$0xff] }
  0xf8   : > { %v675_v44 = vpop.f32.mrf.mxu0 }
  0xf9   : > { %v678_v19 = vadd.f32 %v675_v44, %v639_v17  ;;  %v1477_v17 = vld [vmem:[%s2853_s5 + $0x30] sm:$0xff] }
 0x11a   : > { %v696_v11 = vpop.f32.mrf.mxu1 }
 0x11b   : > { %v716_v45 = vpop.f32.mrf.mxu2 }
 0x11c   : > { %v717_v47 = vadd.f32 %v716_v45, %v696_v11  ;;  %v1497_v45 = vld [vmem:[%s2853_s5 + $0x50] sm:$0xff]  ;;  %v1495_v11 = vld [vmem:[%s2853_s5 + $0x40] sm:$0xff] }
 0x11d   : > { %1202 = vmatpush.msrb.mxu1 %v1497_v45  ;;  %v1483_v45 = vld [vmem:[%s2856_s8 + $0x1] sm:$0x1] }
 0x11e   : > { %v736_v13 = vpop.f32.mrf.mxu3 }
 0x11f   : > { %v739_v49 = vadd.f32 %v736_v13, %v717_v47  ;;  %1203 = vmatpush.msrb.mxu1 %v1496_v34  ;;  %v926_v47 = vld [vmem:[%s2853_s5 + $0x10] sm:$0xff]  ;;  %v925_v13 = vld [vmem:[%s2853_s5 + $0x8] sm:$0xff] }
 0x120   : > { %v757_v50 = vpop.f32.mrf.mxu0  ;;  %946 = vmatpush.msra.mxu3 %v926_v47 }
 0x121   : > { %v760_v52 = vadd.f32 %v757_v50, %v739_v49  ;;  %1204 = vmatpush.msrb.mxu1 %v1495_v11  ;;  %v1493_v49 = vld [vmem:[%s2852_s4 + $0x2] sm:$0x1] }
 0x122   : > { %947 = vmatpush.msra.mxu3 %v925_v13  ;;  %v1503_v11 = vld [vmem:[%s2856_s8 + $0x2] sm:$0x1] }
 0x123   : > { %v778_v53 = vpop.f32.mrf.mxu1 }
 0x124   : > { %v781_v56 = vadd.f32 %v778_v53, %v760_v52  ;;  %v799_v57 = vpop.f32.mrf.mxu2  ;;  %948 = vmatpush.msra.mxu3 %v924_v48  ;;  %v896_v53 = vld [vmem:[%s2852_s4] sm:$0x1] }
 0x126   : > { %v802_v60 = vadd.f32 %v799_v57, %v781_v56 }
 0x127   : > { %v821_v61 = vpop.f32.mrf.mxu3 }
 0x128   : > { %v824_v63 = vadd.f32 %v821_v61, %v802_v60  ;;  %v1502_v61 = vld [vmem:[%s2855_s7 + $0x28] sm:$0xff] }
 0x13a   : > { %v843_v9 = vpop.f32.mrf.mxu0 }
 0x13b   : > { %v846_v16 = vadd.f32 %v843_v9, %v824_v63  ;;  %v957_v63 = vld [vmem:[%s2855_s7 + $0x8] sm:$0xff]  ;;  %v956_v9 = vld [vmem:[%s2855_s7] sm:$0xff] }
 0x13c   : > { %977 = vmatpush.msrb.mxu3 %v957_v63 }
 0x13d   : > { %v865_v12 = vpop.f32.mrf.mxu1 }
 0x13e   : > { %v868_v20 = vadd.f32 %v865_v12, %v846_v16  ;;  %978 = vmatpush.msrb.mxu3 %v956_v9  ;;  %v1478_v16 = vld [vmem:[%s2853_s5 + $0x38] sm:$0xff]  ;;  %v1476_v12 = vld [vmem:[%s2853_s5 + $0x28] sm:$0xff] }
 0x140   : > { %v869_v21 = vmax.f32 %v678_v19, %v868_v20  ;;  %v1475_v19 = vld [vmem:[%s2853_s5 + $0x20] sm:$0xff] }
 0x141   : > { %v1499_v20 = vld [vmem:[%s2854_s6 + $0x2] sm:$0x1] }
 0x142   : > { %871 = vrot.lane.b32.xlu0 %v869_v21, %s1537_s24 }
 0x1b4   : > { %v872_v2 = vpop.permute.xlu0 %871 }
 0x1b5   : > { %v874_v3 = vmax.f32 %v869_v21, %v872_v2 }
 0x1b7   : > { %v876_v37 = vsel %vm875_vm0, %v874_v3, -inf }
 0x1b8   : > { %v877_v4 = vrot.slane %v876_v37, 4 }
 0x1ba   : > { %v878_v5 = vmax.f32 %v876_v37, %v877_v4 }
 0x1bc   : > { %v879_v6 = vrot.slane %v878_v5, 2 }
 0x1be   : > { %v880_v7 = vmax.f32 %v878_v5, %v879_v6 }
 0x1c0   : > { %v881_v39 = vrot.slane %v880_v7, 1 }
 0x1c2   : > { %v882_v8 = vmax.f32 %v880_v7, %v881_v39 }
 0x1c4   : > { %v884_v41 = vadd.f32 %v883_v40, %v882_v8 }
 0x1c6   : > { %vm885_vm1 = vcmp.ge.f32.partialorder %v884_v41, 0.0  ;;  %v886_v43 = vmul.f32 0.2, %v884_v41 }
 0x1c8   : > { %v887_v44 = vsel %vm885_vm1, %v884_v41, %v886_v43 }
 0x1c9   : > { %1462 = vmatmul.msk.f32.vlgmr.msra.gmra.mxu2 %vm897_vm2, %v887_v44  ;;  %1494 = vmatmul.msk.f32.vlgmr.msrb.gmra.mxu0 %vm897_vm2, %v887_v44 }
 0x1ca   : > { %1234 = vmatpush.msra.mxu2 %v1502_v61 }
 0x1cc   : > { %1235 = vmatpush.msra.mxu2 %v1501_v62 }
 0x1d1   : > { %1474 = vmatmul.msk.f32.vlgmr.msrb.gmra.mxu2 %vm897_vm2, %v887_v44 }
 0x246   : > { %v1173_v50 = vpop.f32.mrf.mxu0 }
 0x247   : > { %v1174_v51 = vadd.f32 %v1493_v49, %v1173_v50 }
 0x249   : > { %vm1176_vm3 = vcmp.ge.f32.partialorder %v1174_v51, 0.0  ;;  %v1177_v52 = vmul.f32 0.2, %v1174_v51 }
 0x24b   : > { %v1178_v55 = vsel %vm1176_vm3, %v1174_v51, %v1177_v52 }
 0x24c   : > { %v918_v56 = vpop.f32.mrf.mxu2  ;;  %1500 = vmatmul.msk.f32.vlgmr.msrb.gmra.mxu1 %vm929_vm4, %v1178_v55 }
 0x24d   : > { %v919_v57 = vadd.f32 %v918_v56, %v896_v53 }
 0x24f   : > { %vm921_vm5 = vcmp.ge.f32.partialorder %v919_v57, 0.0  ;;  %v922_v59 = vmul.f32 0.2, %v919_v57 }
 0x251   : > { %v923_v60 = vsel %vm921_vm5, %v919_v57, %v922_v59 }
 0x252   : > { %1463 = vmatmul.msk.f32.vlgmr.msra.gmra.mxu3 %vm929_vm4, %v923_v60 }
 0x253   : > { %1073 = vmatpush.msra.mxu3 %v1478_v16 }
 0x254   : > { %v1045_v29 = vpop.f32.mrf.mxu2 }
 0x255   : > { %1074 = vmatpush.msra.mxu3 %v1477_v17  ;;  %v1046_v46 = vadd.f32 %v1473_v28, %v1045_v29 }
 0x257   : > { %1075 = vmatpush.msra.mxu3 %v1476_v12  ;;  %v1049_v54 = vmul.f32 0.2, %v1046_v46  ;;  %vm1048_vm9 = vcmp.ge.f32.partialorder %v1046_v46, 0.0 }
 0x259   : > { %1076 = vmatpush.msra.mxu3 %v1475_v19  ;;  %v1050_v33 = vsel %vm1048_vm9, %v1046_v46, %v1049_v54 }
 0x2c9   : > { %v1206_v21 = vpop.f32.mrf.mxu1 }
 0x2ca   : > { %v1207_v14 = vadd.f32 %v1499_v20, %v1206_v21 }
 0x2cc   : > { %vm1209_vm6 = vcmp.ge.f32.partialorder %v1207_v14, 0.0  ;;  %v1210_v23 = vmul.f32 0.2, %v1207_v14 }
 0x2ce   : > { %v1211_v24 = vsel %vm1209_vm6, %v1207_v14, %v1210_v23 }
 0x2cf   : > { %1504 = vmatmul.msk.f32.vlgmr.msra.gmra.mxu2 %vm959_vm7, %v1211_v24 }
 0x2d5   : > { %v950_v18 = vpop.f32.mrf.mxu3 }
 0x2d6   : > { %v951_v27 = vadd.f32 %v950_v18, %v928_v25 }
 0x2d8   : > { %vm953_vm8 = vcmp.ge.f32.partialorder %v951_v27, 0.0  ;;  %v954_v31 = vmul.f32 0.2, %v951_v27 }
 0x2da   : > { %v955_v32 = vsel %vm953_vm8, %v951_v27, %v954_v31 }
 0x2db   : > { %1464 = vmatmul.msk.f32.vlgmr.msrb.gmra.mxu3 %vm959_vm7, %v955_v32 }
 0x2dc   : > { %1106 = vmatpush.msrb.mxu3 %v1482_v35 }
 0x2de   : > { %1107 = vmatpush.msrb.mxu3 %v1481_v36 }
 0x2e3   : > { %1480 = vmatmul.msk.f32.vlgmr.msra.gmra.mxu3 %vm929_vm4, %v1050_v33 }
 0x352   : > { %v1237_v47 = vpop.f32.mrf.mxu2 }
 0x353   : > { %v2825_v48 = vadd.f32 %v1503_v11, %v1237_v47 }
 0x355   : > { %v1240_v53 = vmul.f32 %v2825_v48, %v2825_v48 }
 0x357   : > { %v1241_v60 = vsel %vm984_vm10, %v1240_v53, 0.0 }
 0x35e   : > { %v980_v58 = vpop.f32.mrf.mxu3 }
 0x35f   : > { %v981_v15 = vadd.f32 %v980_v58, %v958_v42 }
 0x361   : > { %v983_v22 = vmul.f32 %v981_v15, %v981_v15 }
 0x363   : > { %v985_v26 = vsel %vm984_vm10, %v983_v22, 0.0 }
 0x364   : > { %986 = vadd.xlane.f32.xlu0 %v985_v26 }
 0x366   : > { %v1078_v0 = vpop.f32.mrf.mxu3 }
 0x367   : > { %v1079_v38 = vadd.f32 %v1479_v30, %v1078_v0 }
 0x369   : > { %vm1081_vm11 = vcmp.ge.f32.partialorder %v1079_v38, 0.0  ;;  %v1082_v1 = vmul.f32 0.2, %v1079_v38 }
 0x36b   : > { %v1083_v2 = vsel %vm1081_vm11, %v1079_v38, %v1082_v1 }
 0x36c   : > { %1484 = vmatmul.msk.f32.vlgmr.msrb.gmra.mxu3 %vm959_vm7, %v1083_v2 }
 0x3d7   : > { %v987_v3 = vpop.xlane.xlu0 %986 }
 0x3d8   : > { %1517 = vrsqrt.f32 %v987_v3  ;;  %vm995_vm12 = vcmp.eq.f32.partialorder %v987_v3, inf  ;;  %v998_v8 = vand.u32 2147483648, %v987_v3  ;;  %vm997_vm13 = vcmp.eq.f32.partialorder %v987_v3, 0.0 }
 0x3de   : > { %v1518_v37 = vpop.eup %1517 }
 0x3df   : > { %v989_v4 = vmul.f32 %v1518_v37, %v987_v3 }
 0x3e1   : > { %v990_v5 = vmul.f32 %v1518_v37, %v989_v4 }
 0x3e3   : > { %v991_v6 = vmul.f32 0.5, %v990_v5 }
 0x3e5   : > { %v992_v7 = vsub.f32 1.5, %v991_v6 }
 0x3e7   : > { %v993_v39 = vmul.f32 %v1518_v37, %v992_v7 }
 0x3e9   : > { %v994_v40 = vmul.f32 %v993_v39, %v987_v3 }
 0x3eb   : > { %v996_v41 = vsel %vm995_vm12, %v987_v3, %v994_v40 }
 0x3ec   : > { %v999_v43 = vsel %vm997_vm13, %v998_v8, %v996_v41 }
 0x3ed   : > { %v1000_v44 = vmax.f32 %v999_v43, 1e-12 }
 0x3ef   : > { %1519 = vrcp.f32 %v1000_v44  ;;  %v1109_v34 = vpop.f32.mrf.mxu3  ;;  %v1012_v55 = vand.u32 2147483648, %v1000_v44  ;;  %v1010_v57 = vand.u32 2147483647, %v1000_v44  ;;  %vm1006_vm15 = vweird.f32 %v1000_v44 }
 0x3f0   : > { %v2818_v10 = vadd.f32 %v1483_v45, %v1109_v34 }
 0x3f1   : > { %v1013_v61 = vor.u32 1.1754944e-38, %v1012_v55  ;;  %vm1011_vm1 = vcmp.eq.f32.partialorder %v1010_v57, 8.507059e+37 }
 0x3f2   : > { %v1112_v13 = vmul.f32 %v2818_v10, %v2818_v10 }
 0x3f4   : > { %v1113_v49 = vsel %vm984_vm10, %v1112_v13, 0.0 }
 0x3f5   : > { %v1520_v50 = vpop.eup %1519  ;;  %1114 = vadd.xlane.f32.xlu1 %v1113_v49 }
 0x3f6   : > { %v1002_v51 = vmul.f32 %v1520_v50, %v1000_v44  ;;  %vm1007_vm14 = vweird.f32 %v1520_v50 }
 0x3f7   : > { %vm1008_vm0 = vmor %vm1006_vm15, %vm1007_vm14 }
 0x3f8   : > { %v1003_v52 = vsub.f32 1.0, %v1002_v51 }
 0x3fa   : > { %v1004_v56 = vmul.f32 %v1520_v50, %v1003_v52 }
 0x3fc   : > { %v1005_v59 = vadd.f32 %v1520_v50, %v1004_v56 }
 0x3fd   : > { %1242 = vadd.xlane.f32.xlu1 %v1241_v60 }
 0x3fe   : > { %v1009_v62 = vsel %vm1008_vm0, %v1520_v50, %v1005_v59 }
 0x3ff   : > { %v1014_v63 = vsel %vm1011_vm1, %v1013_v61, %v1009_v62 }
 0x400   : > { %v1015_v9 = vmul.f32 %v1014_v63, %v981_v15 }
 0x402   : > { %1016 = vst.msk [vmem:[%s2835_s14] sm:$0x1] %vm984_vm10, %v1015_v9 }
 0x468   : > { %v1115_v16 = vpop.xlane.xlu1 %1114 }
 0x469   : > { %1521 = vrsqrt.f32 %v1115_v16  ;;  %vm1123_vm2 = vcmp.eq.f32.partialorder %v1115_v16, inf  ;;  %v1126_v28 = vand.u32 2147483648, %v1115_v16  ;;  %vm1125_vm3 = vcmp.eq.f32.partialorder %v1115_v16, 0.0 }
 0x46f   : > { %v1522_v17 = vpop.eup %1521 }
 0x470   : > { %v1117_v12 = vmul.f32 %v1522_v17, %v1115_v16  ;;  %v1243_v19 = vpop.xlane.xlu1 %1242 }
 0x471   : > { %1523 = vrsqrt.f32 %v1243_v19  ;;  %vm1251_vm4 = vcmp.eq.f32.partialorder %v1243_v19, inf  ;;  %v1254_v36 = vand.u32 2147483648, %v1243_v19  ;;  %vm1253_vm5 = vcmp.eq.f32.partialorder %v1243_v19, 0.0 }
 0x472   : > { %v1118_v20 = vmul.f32 %v1522_v17, %v1117_v12 }
 0x474   : > { %v1119_v21 = vmul.f32 0.5, %v1118_v20 }
 0x476   : > { %v1120_v14 = vsub.f32 1.5, %v1119_v21 }
 0x477   : > { %v1524_v23 = vpop.eup %1523 }
 0x478   : > { %v1121_v24 = vmul.f32 %v1522_v17, %v1120_v14  ;;  %v1245_v25 = vmul.f32 %v1524_v23, %v1243_v19 }
 0x47a   : > { %v1122_v18 = vmul.f32 %v1121_v24, %v1115_v16  ;;  %v1246_v27 = vmul.f32 %v1524_v23, %v1245_v25 }
 0x47c   : > { %v1124_v29 = vsel %vm1123_vm2, %v1115_v16, %v1122_v18  ;;  %v1247_v31 = vmul.f32 0.5, %v1246_v27 }
 0x47d   : > { %v1127_v46 = vsel %vm1125_vm3, %v1126_v28, %v1124_v29 }
 0x47e   : > { %v1128_v32 = vmax.f32 %v1127_v46, 1e-12  ;;  %v1248_v54 = vsub.f32 1.5, %v1247_v31 }
 0x480   : > { %1525 = vrcp.f32 %v1128_v32  ;;  %v1249_v33 = vmul.f32 %v1524_v23, %v1248_v54  ;;  %v1140_v0 = vand.u32 2147483648, %v1128_v32  ;;  %v1138_v1 = vand.u32 2147483647, %v1128_v32 }
 0x481   : > { %vm1134_vm7 = vweird.f32 %v1128_v32 }
 0x482   : > { %v1250_v35 = vmul.f32 %v1249_v33, %v1243_v19  ;;  %v1141_v3 = vor.u32 1.1754944e-38, %v1140_v0  ;;  %vm1139_vm9 = vcmp.eq.f32.partialorder %v1138_v1, 8.507059e+37 }
 0x484   : > { %v1252_v42 = vsel %vm1251_vm4, %v1243_v19, %v1250_v35 }
 0x485   : > { %v1255_v15 = vsel %vm1253_vm5, %v1254_v36, %v1252_v42 }
 0x486   : > { %v1526_v58 = vpop.eup %1525  ;;  %v1256_v26 = vmax.f32 %v1255_v15, 1e-12 }
 0x487   : > { %v1130_v22 = vmul.f32 %v1526_v58, %v1128_v32  ;;  %vm1135_vm6 = vweird.f32 %v1526_v58 }
 0x488   : > { %1527 = vrcp.f32 %v1256_v26  ;;  %vm1136_vm8 = vmor %vm1134_vm7, %vm1135_vm6  ;;  %v1268_v40 = vand.u32 2147483648, %v1256_v26  ;;  %v1266_v41 = vand.u32 2147483647, %v1256_v26  ;;  %vm1262_vm12 = vweird.f32 %v1256_v26 }
 0x489   : > { %v1131_v30 = vsub.f32 1.0, %v1130_v22 }
 0x48a   : > { %v1269_v44 = vor.u32 1.1754944e-38, %v1268_v40  ;;  %vm1267_vm14 = vcmp.eq.f32.partialorder %v1266_v41, 8.507059e+37 }
 0x48b   : > { %v1132_v38 = vmul.f32 %v1526_v58, %v1131_v30 }
 0x48d   : > { %v1133_v2 = vadd.f32 %v1526_v58, %v1132_v38 }
 0x48e   : > { %v1528_v37 = vpop.eup %1527 }
 0x48f   : > { %v1137_v4 = vsel %vm1136_vm8, %v1526_v58, %v1133_v2  ;;  %v1258_v6 = vmul.f32 %v1528_v37, %v1256_v26  ;;  %vm1263_vm11 = vweird.f32 %v1528_v37 }
 0x490   : > { %v1142_v5 = vsel %vm1139_vm9, %v1141_v3, %v1137_v4  ;;  %vm1264_vm13 = vmor %vm1262_vm12, %vm1263_vm11 }
 0x491   : > { %v1143_v7 = vmul.f32 %v1142_v5, %v2818_v10  ;;  %v1259_v39 = vsub.f32 1.0, %v1258_v6 }
 0x493   : > { %1144 = vst.msk [vmem:[%s2835_s14 + $0x1] sm:$0x1] %vm984_vm10, %v1143_v7  ;;  %v1260_v8 = vmul.f32 %v1528_v37, %v1259_v39 }
 0x495   : > { %v1261_v43 = vadd.f32 %v1528_v37, %v1260_v8 }
 0x497   : > { %v1265_v45 = vsel %vm1264_vm13, %v1528_v37, %v1261_v43 }
 0x498   : > { %v1270_v34 = vsel %vm1267_vm14, %v1269_v44, %v1265_v45 }
 0x499   : > { %v1271_v11 = vmul.f32 %v1270_v34, %v2825_v48 }
 0x49b   : > { %1272 = vst.msk [vmem:[%s2835_s14 + $0x2] sm:$0x1] %vm984_vm10, %v1271_v11 }
 0x49c PF: > { %s19_s30 = sadd.s32 1, %s1535_s30  }
 0x49d   : > { %p16_p4 = scmp.ge.s32.totalorder %s19_s30, 4  }
 0x49f   :  { %18 = sbr.rel (!%p16_p4) target bundleno = 1 (0x1), region = 106 }

</bundles_post_ra>
